<compile_context>
chip_gen: v7x
topology: tpu7x:2x2x1
jax: 0.10.0
libtpu: 0.0.40
codegen_flags: <defaults>
</compile_context>

<pallas_src>
import jax
import jax.numpy as jnp
from jax.experimental import pallas as pl
from jax.experimental.pallas import tpu as pltpu

IN_FEATURES = 1 * 28 * 28      # 784
IN_PAD = 896                   # 7 * 128 (lane-aligned contraction dim)
HIDDEN = 1024
NUM_CLASSES = 10
CLS_PAD = 128                  # lane-dense output width
BN_EPS = 1e-5
NEG_INF = -1.0e30              # mask value for padded class lanes


def _bnn_mlp_kernel(x_ref,
                    w1, s1, t1,
                    w2, s2, t2,
                    w3, s3, t3,
                    w4, s4, t4,
                    w5, b5,
                    out_ref):
    """One batch tile of the fused forward pass (weights resident in VMEM)."""

    def layer(h, w_ref, s_ref, t_ref):
        # Pre-binarized bf16 (+/-1) weights; upcast to f32 for an exact matmul.
        wb = w_ref[...].astype(jnp.float32)
        h = jnp.dot(h, wb, preferred_element_type=jnp.float32)
        # Folded (bias + BatchNorm1d inference) affine, then ReLU.
        return jnp.maximum(h * s_ref[...] + t_ref[...], 0.0)

    h = x_ref[...]                              # (tb, 896), already zero-padded
    h = layer(h, w1, s1, t1)                    # 896  -> 1024
    h = layer(h, w2, s2, t2)                    # 1024 -> 1024
    h = layer(h, w3, s3, t3)                    # 1024 -> 1024
    h = layer(h, w4, s4, t4)                    # 1024 -> 1024

    # Final BinaryLinear 1024 -> 128 (only the first 10 lanes are real classes;
    # padded lanes carry a -1e30 bias so they vanish in the softmax sums).
    logits = jnp.dot(h, w5[...].astype(jnp.float32),
                     preferred_element_type=jnp.float32) + b5[...]

    # LogSoftmax over the class dimension.
    m = jnp.max(logits, axis=-1, keepdims=True)
    z = logits - m
    lse = jnp.log(jnp.sum(jnp.exp(z), axis=-1, keepdims=True))
    out_ref[...] = z - lse


def bnn_mlp_forward(x, params, *, batch_tile=256):
    """x: (B, 1, 28, 28) or (B, 784) f32.  params: 14 arrays from build_params."""
    B = x.shape[0]
    x_flat = jnp.reshape(x, (B, -1)).astype(jnp.float32)      # nn.Flatten()
    x_flat = jnp.pad(x_flat, ((0, 0), (0, IN_PAD - IN_FEATURES)))

    # Batch tiling: tile rows must be a multiple of 8 (sublane granularity).
    b8 = ((B + 7) // 8) * 8
    tb = min(batch_tile, b8)
    bp = ((B + tb - 1) // tb) * tb
    if bp != B:
        x_flat = jnp.pad(x_flat, ((0, bp - B), (0, 0)))
    grid = (bp // tb,)

    def const_spec(a):
        # Full-array block whose index never changes -> stays resident in VMEM
        # across all batch-tile grid steps (weights DMA'd once).
        return pl.BlockSpec(a.shape, lambda i, n=a.ndim: (0,) * n)

    in_specs = [pl.BlockSpec((tb, IN_PAD), lambda i: (i, 0))]
    in_specs += [const_spec(p) for p in params]

    out = pl.pallas_call(
        _bnn_mlp_kernel,
        out_shape=jax.ShapeDtypeStruct((bp, CLS_PAD), jnp.float32),
        grid=grid,
        in_specs=in_specs,
        out_specs=pl.BlockSpec((tb, CLS_PAD), lambda i: (i, 0)),
        compiler_params=pltpu.CompilerParams(
            dimension_semantics=("parallel",),
            vmem_limit_bytes=48 << 20,        # fits v7x 64 MiB physical VMEM
        ),
    )(x_flat, *params)

    return out[:B, :NUM_CLASSES]


def build_params(key):
    """Deterministic init mirroring the module; returns kernel-ready params.

    Each layer's weight is binarized (sign) offline and stored as bf16.
    Layers 1-4: BatchNorm1d default inference stats (mean=0, var=1, gamma=1,
    beta=0) folded with the linear bias into per-feature (scale, shift).
    Layer 5: weight/bias padded to 128 output lanes (-1e30 bias on pad lanes).
    """
    dims = [(IN_FEATURES, HIDDEN), (HIDDEN, HIDDEN), (HIDDEN, HIDDEN),
            (HIDDEN, HIDDEN), (HIDDEN, NUM_CLASSES)]
    params = []
    for li, (fan_in, fan_out) in enumerate(dims):
        key, kw, kb = jax.random.split(key, 3)
        bound = 1.0 / jnp.sqrt(float(fan_in))
        w = jax.random.uniform(kw, (fan_in, fan_out), jnp.float32, -bound, bound)
        b = jax.random.uniform(kb, (fan_out,), jnp.float32, -bound, bound)

        wb = jnp.sign(w).astype(jnp.bfloat16)          # pre-binarized weights
        if li == 0:
            wb = jnp.pad(wb, ((0, IN_PAD - IN_FEATURES), (0, 0)))

        if li < 4:
            # BatchNorm1d(fan_out), inference with default-init running stats.
            gamma = jnp.ones((fan_out,), jnp.float32)
            beta = jnp.zeros((fan_out,), jnp.float32)
            r_mean = jnp.zeros((fan_out,), jnp.float32)
            r_var = jnp.ones((fan_out,), jnp.float32)
            scale = gamma / jnp.sqrt(r_var + BN_EPS)
            shift = beta - r_mean * scale
            shift = shift + b * scale                  # fold linear bias in
            params.extend([wb,
                           scale.reshape(1, fan_out),
                           shift.reshape(1, fan_out)])
        else:
            wb = jnp.pad(wb, ((0, 0), (0, CLS_PAD - NUM_CLASSES)))
            b_pad = jnp.full((1, CLS_PAD), NEG_INF, jnp.float32)
            b_pad = b_pad.at[0, :NUM_CLASSES].set(b)
            params.extend([wb, b_pad])
    return params


def reference_forward(x, params):
    """Pure-JAX reference using the same (mathematically equivalent) params."""
    (w1, s1, t1, w2, s2, t2, w3, s3, t3, w4, s4, t4, w5, b5) = params
    B = x.shape[0]
    h = jnp.reshape(x, (B, -1)).astype(jnp.float32)
    h = jnp.pad(h, ((0, 0), (0, IN_PAD - IN_FEATURES)))
    for (w, s, t) in [(w1, s1, t1), (w2, s2, t2), (w3, s3, t3), (w4, s4, t4)]:
        h = jnp.dot(h, w.astype(jnp.float32), preferred_element_type=jnp.float32)
        h = jnp.maximum(h * s + t, 0.0)
    logits = jnp.dot(h, w5.astype(jnp.float32),
                     preferred_element_type=jnp.float32) + b5
    logits = logits[:, :NUM_CLASSES]
    return jax.nn.log_softmax(logits, axis=-1)


if __name__ == "__main__":
    key = jax.random.PRNGKey(0)
    key, kx = jax.random.split(key)

    # NCHW input like the PyTorch module expects: (B, 1, 28, 28).
    B = 8
    x = jax.random.normal(kx, (B, 1, 28, 28), jnp.float32)

    params = build_params(key)

    out = bnn_mlp_forward(x, params)
    out = jax.block_until_ready(out)

    ref = reference_forward(x, params)
    assert out.shape == (B, NUM_CLASSES)
    assert jnp.allclose(out, ref, atol=1e-3, rtol=1e-3), "mismatch vs reference"
    # Rows of log-softmax should exp-sum to 1.
    assert jnp.allclose(jnp.exp(out).sum(-1), 1.0, atol=1e-4)

    print("KERNEL_OK")
</pallas_src>

<mosaic_0001>
module attributes {stable_mosaic.version = 11 : i64} {
  func.func @_bnn_mlp_kernel(%arg0: i32, %arg1: memref<8x896xf32, #tpu.memory_space<vmem>>, %arg2: memref<896x1024xbf16, #tpu.memory_space<vmem>>, %arg3: memref<1x1024xf32, #tpu.memory_space<vmem>>, %arg4: memref<1x1024xf32, #tpu.memory_space<vmem>>, %arg5: memref<1024x1024xbf16, #tpu.memory_space<vmem>>, %arg6: memref<1x1024xf32, #tpu.memory_space<vmem>>, %arg7: memref<1x1024xf32, #tpu.memory_space<vmem>>, %arg8: memref<1024x1024xbf16, #tpu.memory_space<vmem>>, %arg9: memref<1x1024xf32, #tpu.memory_space<vmem>>, %arg10: memref<1x1024xf32, #tpu.memory_space<vmem>>, %arg11: memref<1024x1024xbf16, #tpu.memory_space<vmem>>, %arg12: memref<1x1024xf32, #tpu.memory_space<vmem>>, %arg13: memref<1x1024xf32, #tpu.memory_space<vmem>>, %arg14: memref<1024x128xbf16, #tpu.memory_space<vmem>>, %arg15: memref<1x128xf32, #tpu.memory_space<vmem>>, %arg16: memref<8x128xf32, #tpu.memory_space<vmem>>) attributes {dimension_semantics = [#tpu.dimension_semantics<parallel>], iteration_bounds = array<i64: 1>, scalar_prefetch = 0 : i64, scratch_operands = 0 : i64, tpu.core_type = #tpu.core_type<tc>, window_params = [{transform_indices = @transform_0, window_bounds = array<i64: 8, 896>}, {pipeline_mode = #tpu.pipeline_mode<synchronous>, transform_indices = @transform_1, window_bounds = array<i64: 896, 1024>}, {pipeline_mode = #tpu.pipeline_mode<synchronous>, transform_indices = @transform_2, window_bounds = array<i64: 1, 1024>}, {pipeline_mode = #tpu.pipeline_mode<synchronous>, transform_indices = @transform_3, window_bounds = array<i64: 1, 1024>}, {pipeline_mode = #tpu.pipeline_mode<synchronous>, transform_indices = @transform_4, window_bounds = array<i64: 1024, 1024>}, {pipeline_mode = #tpu.pipeline_mode<synchronous>, transform_indices = @transform_5, window_bounds = array<i64: 1, 1024>}, {pipeline_mode = #tpu.pipeline_mode<synchronous>, transform_indices = @transform_6, window_bounds = array<i64: 1, 1024>}, {pipeline_mode = #tpu.pipeline_mode<synchronous>, transform_indices = @transform_7, window_bounds = array<i64: 1024, 1024>}, {pipeline_mode = #tpu.pipeline_mode<synchronous>, transform_indices = @transform_8, window_bounds = array<i64: 1, 1024>}, {pipeline_mode = #tpu.pipeline_mode<synchronous>, transform_indices = @transform_9, window_bounds = array<i64: 1, 1024>}, {pipeline_mode = #tpu.pipeline_mode<synchronous>, transform_indices = @transform_10, window_bounds = array<i64: 1024, 1024>}, {pipeline_mode = #tpu.pipeline_mode<synchronous>, transform_indices = @transform_11, window_bounds = array<i64: 1, 1024>}, {pipeline_mode = #tpu.pipeline_mode<synchronous>, transform_indices = @transform_12, window_bounds = array<i64: 1, 1024>}, {pipeline_mode = #tpu.pipeline_mode<synchronous>, transform_indices = @transform_13, window_bounds = array<i64: 1024, 128>}, {pipeline_mode = #tpu.pipeline_mode<synchronous>, transform_indices = @transform_14, window_bounds = array<i64: 1, 128>}, {transform_indices = @transform_15, window_bounds = array<i64: 8, 128>}]} {
    %c0 = arith.constant 0 : index
    %c0_0 = arith.constant 0 : index
    %0 = vector.load %arg1[%c0, %c0_0] : memref<8x896xf32, #tpu.memory_space<vmem>>, vector<8x896xf32>
    %c0_1 = arith.constant 0 : index
    %c0_2 = arith.constant 0 : index
    %1 = vector.load %arg2[%c0_1, %c0_2] : memref<896x1024xbf16, #tpu.memory_space<vmem>>, vector<896x1024xbf16>
    %2 = arith.extf %1 : vector<896x1024xbf16> to vector<896x1024xf32>
    %cst = arith.constant dense<0.000000e+00> : vector<8x1024xf32>
    %3 = tpu.matmul %0, %2, %cst {dimension_numbers = #tpu.dot_dimension_numbers<[1], [0], [0], [1], [0, 0, 1, 1], [], []>} : vector<8x896xf32>, vector<896x1024xf32>, vector<8x1024xf32> -> vector<8x1024xf32>
    %c0_3 = arith.constant 0 : index
    %c0_4 = arith.constant 0 : index
    %4 = vector.load %arg3[%c0_3, %c0_4] : memref<1x1024xf32, #tpu.memory_space<vmem>>, vector<1x1024xf32>
    %5 = vector.broadcast %4 : vector<1x1024xf32> to vector<8x1024xf32>
    %6 = arith.mulf %3, %5 : vector<8x1024xf32>
    %c0_5 = arith.constant 0 : index
    %c0_6 = arith.constant 0 : index
    %7 = vector.load %arg4[%c0_5, %c0_6] : memref<1x1024xf32, #tpu.memory_space<vmem>>, vector<1x1024xf32>
    %8 = vector.broadcast %7 : vector<1x1024xf32> to vector<8x1024xf32>
    %9 = arith.addf %6, %8 : vector<8x1024xf32>
    %cst_7 = arith.constant 0.000000e+00 : f32
    %10 = vector.broadcast %cst_7 : f32 to vector<8x1024xf32>
    %11 = arith.maximumf %9, %10 : vector<8x1024xf32>
    %c0_8 = arith.constant 0 : index
    %c0_9 = arith.constant 0 : index
    %12 = vector.load %arg5[%c0_8, %c0_9] : memref<1024x1024xbf16, #tpu.memory_space<vmem>>, vector<1024x1024xbf16>
    %13 = arith.extf %12 : vector<1024x1024xbf16> to vector<1024x1024xf32>
    %cst_10 = arith.constant dense<0.000000e+00> : vector<8x1024xf32>
    %14 = tpu.matmul %11, %13, %cst_10 {dimension_numbers = #tpu.dot_dimension_numbers<[1], [0], [0], [1], [0, 0, 1, 1], [], []>} : vector<8x1024xf32>, vector<1024x1024xf32>, vector<8x1024xf32> -> vector<8x1024xf32>
    %c0_11 = arith.constant 0 : index
    %c0_12 = arith.constant 0 : index
    %15 = vector.load %arg6[%c0_11, %c0_12] : memref<1x1024xf32, #tpu.memory_space<vmem>>, vector<1x1024xf32>
    %16 = vector.broadcast %15 : vector<1x1024xf32> to vector<8x1024xf32>
    %17 = arith.mulf %14, %16 : vector<8x1024xf32>
    %c0_13 = arith.constant 0 : index
    %c0_14 = arith.constant 0 : index
    %18 = vector.load %arg7[%c0_13, %c0_14] : memref<1x1024xf32, #tpu.memory_space<vmem>>, vector<1x1024xf32>
    %19 = vector.broadcast %18 : vector<1x1024xf32> to vector<8x1024xf32>
    %20 = arith.addf %17, %19 : vector<8x1024xf32>
    %cst_15 = arith.constant 0.000000e+00 : f32
    %21 = vector.broadcast %cst_15 : f32 to vector<8x1024xf32>
    %22 = arith.maximumf %20, %21 : vector<8x1024xf32>
    %c0_16 = arith.constant 0 : index
    %c0_17 = arith.constant 0 : index
    %23 = vector.load %arg8[%c0_16, %c0_17] : memref<1024x1024xbf16, #tpu.memory_space<vmem>>, vector<1024x1024xbf16>
    %24 = arith.extf %23 : vector<1024x1024xbf16> to vector<1024x1024xf32>
    %cst_18 = arith.constant dense<0.000000e+00> : vector<8x1024xf32>
    %25 = tpu.matmul %22, %24, %cst_18 {dimension_numbers = #tpu.dot_dimension_numbers<[1], [0], [0], [1], [0, 0, 1, 1], [], []>} : vector<8x1024xf32>, vector<1024x1024xf32>, vector<8x1024xf32> -> vector<8x1024xf32>
    %c0_19 = arith.constant 0 : index
    %c0_20 = arith.constant 0 : index
    %26 = vector.load %arg9[%c0_19, %c0_20] : memref<1x1024xf32, #tpu.memory_space<vmem>>, vector<1x1024xf32>
    %27 = vector.broadcast %26 : vector<1x1024xf32> to vector<8x1024xf32>
    %28 = arith.mulf %25, %27 : vector<8x1024xf32>
    %c0_21 = arith.constant 0 : index
    %c0_22 = arith.constant 0 : index
    %29 = vector.load %arg10[%c0_21, %c0_22] : memref<1x1024xf32, #tpu.memory_space<vmem>>, vector<1x1024xf32>
    %30 = vector.broadcast %29 : vector<1x1024xf32> to vector<8x1024xf32>
    %31 = arith.addf %28, %30 : vector<8x1024xf32>
    %cst_23 = arith.constant 0.000000e+00 : f32
    %32 = vector.broadcast %cst_23 : f32 to vector<8x1024xf32>
    %33 = arith.maximumf %31, %32 : vector<8x1024xf32>
    %c0_24 = arith.constant 0 : index
    %c0_25 = arith.constant 0 : index
    %34 = vector.load %arg11[%c0_24, %c0_25] : memref<1024x1024xbf16, #tpu.memory_space<vmem>>, vector<1024x1024xbf16>
    %35 = arith.extf %34 : vector<1024x1024xbf16> to vector<1024x1024xf32>
    %cst_26 = arith.constant dense<0.000000e+00> : vector<8x1024xf32>
    %36 = tpu.matmul %33, %35, %cst_26 {dimension_numbers = #tpu.dot_dimension_numbers<[1], [0], [0], [1], [0, 0, 1, 1], [], []>} : vector<8x1024xf32>, vector<1024x1024xf32>, vector<8x1024xf32> -> vector<8x1024xf32>
    %c0_27 = arith.constant 0 : index
    %c0_28 = arith.constant 0 : index
    %37 = vector.load %arg12[%c0_27, %c0_28] : memref<1x1024xf32, #tpu.memory_space<vmem>>, vector<1x1024xf32>
    %38 = vector.broadcast %37 : vector<1x1024xf32> to vector<8x1024xf32>
    %39 = arith.mulf %36, %38 : vector<8x1024xf32>
    %c0_29 = arith.constant 0 : index
    %c0_30 = arith.constant 0 : index
    %40 = vector.load %arg13[%c0_29, %c0_30] : memref<1x1024xf32, #tpu.memory_space<vmem>>, vector<1x1024xf32>
    %41 = vector.broadcast %40 : vector<1x1024xf32> to vector<8x1024xf32>
    %42 = arith.addf %39, %41 : vector<8x1024xf32>
    %cst_31 = arith.constant 0.000000e+00 : f32
    %43 = vector.broadcast %cst_31 : f32 to vector<8x1024xf32>
    %44 = arith.maximumf %42, %43 : vector<8x1024xf32>
    %c0_32 = arith.constant 0 : index
    %c0_33 = arith.constant 0 : index
    %45 = vector.load %arg14[%c0_32, %c0_33] : memref<1024x128xbf16, #tpu.memory_space<vmem>>, vector<1024x128xbf16>
    %46 = arith.extf %45 : vector<1024x128xbf16> to vector<1024x128xf32>
    %cst_34 = arith.constant dense<0.000000e+00> : vector<8x128xf32>
    %47 = tpu.matmul %44, %46, %cst_34 {dimension_numbers = #tpu.dot_dimension_numbers<[1], [0], [0], [1], [0, 0, 1, 1], [], []>} : vector<8x1024xf32>, vector<1024x128xf32>, vector<8x128xf32> -> vector<8x128xf32>
    %c0_35 = arith.constant 0 : index
    %c0_36 = arith.constant 0 : index
    %48 = vector.load %arg15[%c0_35, %c0_36] : memref<1x128xf32, #tpu.memory_space<vmem>>, vector<1x128xf32>
    %49 = vector.broadcast %48 : vector<1x128xf32> to vector<8x128xf32>
    %50 = arith.addf %47, %49 : vector<8x128xf32>
    %cst_37 = arith.constant dense<0xFF800000> : vector<8xf32>
    %51 = vector.multi_reduction <maximumf>, %50, %cst_37 [1] : vector<8x128xf32> to vector<8xf32>
    %52 = vector.shape_cast %51 : vector<8xf32> to vector<8x1xf32>
    %53 = vector.broadcast %52 : vector<8x1xf32> to vector<8x128xf32>
    %54 = arith.subf %50, %53 : vector<8x128xf32>
    %55 = math.exp %54 : vector<8x128xf32>
    %cst_38 = arith.constant dense<0.000000e+00> : vector<8xf32>
    %56 = vector.multi_reduction <add>, %55, %cst_38 [1] : vector<8x128xf32> to vector<8xf32>
    %57 = vector.shape_cast %56 : vector<8xf32> to vector<8x1xf32>
    %58 = math.log %57 : vector<8x1xf32>
    %59 = vector.broadcast %58 : vector<8x1xf32> to vector<8x128xf32>
    %60 = arith.subf %54, %59 : vector<8x128xf32>
    %c0_39 = arith.constant 0 : index
    %c0_40 = arith.constant 0 : index
    %61 = vector.load %arg16[%c0_39, %c0_40] : memref<8x128xf32, #tpu.memory_space<vmem>>, vector<8x128xf32>
    tpu.vector_store %arg16[%c0_39, %c0_40], %60 {strides = array<i32>} : memref<8x128xf32, #tpu.memory_space<vmem>>, vector<8x128xf32>,
    return
  }
  func.func @transform_0(%arg0: i32) -> (i32, i32) {
    %c0_i32 = arith.constant 0 : i32
    %c0_i32_0 = arith.constant 0 : i32
    return %arg0, %c0_i32 : i32, i32
  }
  func.func @transform_1(%arg0: i32) -> (i32, i32) {
    %c0_i32 = arith.constant 0 : i32
    %c0_i32_0 = arith.constant 0 : i32
    %c0_i32_1 = arith.constant 0 : i32
    return %c0_i32, %c0_i32_0 : i32, i32
  }
  func.func @transform_2(%arg0: i32) -> (i32, i32) {
    %c0_i32 = arith.constant 0 : i32
    %c0_i32_0 = arith.constant 0 : i32
    %c0_i32_1 = arith.constant 0 : i32
    return %c0_i32, %c0_i32_0 : i32, i32
  }
  func.func @transform_3(%arg0: i32) -> (i32, i32) {
    %c0_i32 = arith.constant 0 : i32
    %c0_i32_0 = arith.constant 0 : i32
    %c0_i32_1 = arith.constant 0 : i32
    return %c0_i32, %c0_i32_0 : i32, i32
  }
  func.func @transform_4(%arg0: i32) -> (i32, i32) {
    %c0_i32 = arith.constant 0 : i32
    %c0_i32_0 = arith.constant 0 : i32
    %c0_i32_1 = arith.constant 0 : i32
    return %c0_i32, %c0_i32_0 : i32, i32
  }
  func.func @transform_5(%arg0: i32) -> (i32, i32) {
    %c0_i32 = arith.constant 0 : i32
    %c0_i32_0 = arith.constant 0 : i32
    %c0_i32_1 = arith.constant 0 : i32
    return %c0_i32, %c0_i32_0 : i32, i32
  }
  func.func @transform_6(%arg0: i32) -> (i32, i32) {
    %c0_i32 = arith.constant 0 : i32
    %c0_i32_0 = arith.constant 0 : i32
    %c0_i32_1 = arith.constant 0 : i32
    return %c0_i32, %c0_i32_0 : i32, i32
  }
  func.func @transform_7(%arg0: i32) -> (i32, i32) {
    %c0_i32 = arith.constant 0 : i32
    %c0_i32_0 = arith.constant 0 : i32
    %c0_i32_1 = arith.constant 0 : i32
    return %c0_i32, %c0_i32_0 : i32, i32
  }
  func.func @transform_8(%arg0: i32) -> (i32, i32) {
    %c0_i32 = arith.constant 0 : i32
    %c0_i32_0 = arith.constant 0 : i32
    %c0_i32_1 = arith.constant 0 : i32
    return %c0_i32, %c0_i32_0 : i32, i32
  }
  func.func @transform_9(%arg0: i32) -> (i32, i32) {
    %c0_i32 = arith.constant 0 : i32
    %c0_i32_0 = arith.constant 0 : i32
    %c0_i32_1 = arith.constant 0 : i32
    return %c0_i32, %c0_i32_0 : i32, i32
  }
  func.func @transform_10(%arg0: i32) -> (i32, i32) {
    %c0_i32 = arith.constant 0 : i32
    %c0_i32_0 = arith.constant 0 : i32
    %c0_i32_1 = arith.constant 0 : i32
    return %c0_i32, %c0_i32_0 : i32, i32
  }
  func.func @transform_11(%arg0: i32) -> (i32, i32) {
    %c0_i32 = arith.constant 0 : i32
    %c0_i32_0 = arith.constant 0 : i32
    %c0_i32_1 = arith.constant 0 : i32
    return %c0_i32, %c0_i32_0 : i32, i32
  }
  func.func @transform_12(%arg0: i32) -> (i32, i32) {
    %c0_i32 = arith.constant 0 : i32
    %c0_i32_0 = arith.constant 0 : i32
    %c0_i32_1 = arith.constant 0 : i32
    return %c0_i32, %c0_i32_0 : i32, i32
  }
  func.func @transform_13(%arg0: i32) -> (i32, i32) {
    %c0_i32 = arith.constant 0 : i32
    %c0_i32_0 = arith.constant 0 : i32
    %c0_i32_1 = arith.constant 0 : i32
    return %c0_i32, %c0_i32_0 : i32, i32
  }
  func.func @transform_14(%arg0: i32) -> (i32, i32) {
    %c0_i32 = arith.constant 0 : i32
    %c0_i32_0 = arith.constant 0 : i32
    %c0_i32_1 = arith.constant 0 : i32
    return %c0_i32, %c0_i32_0 : i32, i32
  }
  func.func @transform_15(%arg0: i32) -> (i32, i32) {
    %c0_i32 = arith.constant 0 : i32
    %c0_i32_0 = arith.constant 0 : i32
    return %arg0, %c0_i32 : i32, i32
  }
}

</mosaic_0001>

<bundles_post_ra>
// kernel: tpu_custom_call.1
= control target key start
LH: loop header
LB: loop body
LE: loop exit
PB: predicated region body
PF: predicated region fallthrough
CT: control target
= control target key end

     0   :  { %s19478_s0 = inlined_call_operand.hbm [shape: f32[8,896], index: 0, kind: input, shape index: {}]   ;;  %s19479_s1 = inlined_call_operand.hbm [shape: bf16[896,1024], index: 1, kind: input, shape index: {}]   ;;  %s19480_s2 = inlined_call_operand.hbm [shape: f32[1,1024], index: 2, kind: input, shape index: {}]   ;;  %s19481_s3 = inlined_call_operand.hbm [shape: f32[1,1024], index: 3, kind: input, shape index: {}]   ;;  %s19482_s4 = inlined_call_operand.hbm [shape: bf16[1024,1024], index: 4, kind: input, shape index: {}]   ;;  %s19483_s5 = inlined_call_operand.hbm [shape: f32[1,1024], index: 5, kind: input, shape index: {}]   ;;  %s19484_s6 = inlined_call_operand.hbm [shape: f32[1,1024], index: 6, kind: input, shape index: {}]   ;;  %s19485_s7 = inlined_call_operand.hbm [shape: bf16[1024,1024], index: 7, kind: input, shape index: {}]   ;;  %s19486_s8 = inlined_call_operand.hbm [shape: f32[1,1024], index: 8, kind: input, shape index: {}]   ;;  %s19487_s9 = inlined_call_operand.hbm [shape: f32[1,1024], index: 9, kind: input, shape index: {}]   ;;  %s19488_s10 = inlined_call_operand.hbm [shape: bf16[1024,1024], index: 10, kind: input, shape index: {}]   ;;  %s19489_s11 = inlined_call_operand.hbm [shape: f32[1,1024], index: 11, kind: input, shape index: {}]   ;;  %s19490_s12 = inlined_call_operand.hbm [shape: f32[1,1024], index: 12, kind: input, shape index: {}]   ;;  %s19491_s13 = inlined_call_operand.hbm [shape: bf16[1024,128], index: 13, kind: input, shape index: {}]   ;;  %s19492_s14 = inlined_call_operand.hbm [shape: f32[1,128], index: 14, kind: input, shape index: {}]   ;;  %s19493_s15 = inlined_call_operand.hbm [shape: f32[8,128], index: 15, kind: output, shape index: {}]  }
   0x1   :  { %19495 = sst [smem:[#allocation36_spill]] %s19493_s15 }
   0x2   :  { %20 = vsyncpa [#allocation3], 0 }
   0x3   :  { %21 = vsyncpa [#allocation6], 0 }
   0x4   :  { %22 = vsyncpa [#allocation9], 0 }
   0x5   :  { %23 = vsyncpa [#allocation12], 0 }
   0x6   :  { %24 = vsyncpa [#allocation15], 0 }
   0x7   :  { %25 = vsyncpa [#allocation18], 0 }
   0x8   :  { %26 = vsyncpa [#allocation21], 0 }
   0x9   :  { %27 = vsyncpa [#allocation24], 0 }
   0xa   :  { %28 = vsyncpa [#allocation4], 0  ;;  %s18789_s18 = smov [#allocation5]   ;;  %s18419_s22 = scalar_lea.hbm %s19479_s1, 57344 }
   0xb   :  { %s44_s19 = sshll.u32 %s18789_s18, 4  ;;  %p18420_p0 = scmp.ne.s32.totalorder %s19479_s1, %s18419_s22  ;;  %s45_s19 = int_to_ptr.vmem [resolvable:$true] %s44_s19 }
   0xc   :  { %p18423_p1 = scmp.lt.u32.totalorder %s18419_s22, %s19479_s1 }
   0xe   :  { %p18425_p2 = pnand %p18423_p1, %p18420_p0 }
  0x10   :  { %18428 = shalt.err (!%p18425_p2)
}
  0x11   :  { %s18429_s27 = scalar_lea.vmem %s45_s19, 57344  ;;  %p18434_p4 = scmp.lt.s32.totalorder %s45_s19, %s45_s19 }
  0x12   :  { %p18430_p3 = scmp.ne.s32.totalorder %s45_s19, %s18429_s27  ;;  %p18435_p5 = scmp.lt.s32.totalorder %s18429_s27, %s18429_s27 }
  0x14   :  { %p18436_p6 = por %p18435_p5, %p18434_p4 }
  0x16   :  { %p18437_p7 = pnand %p18436_p6, %p18430_p3 }
  0x18   :  { %18440 = shalt.err (!%p18437_p7)
}
  0x19   :  { %s18790_s28 = smov 512   ;;  %s18791_s29 = smov 32  }
  0x1a   :  { %50 = dma.hbm_to_vmem [thread:$0]  %s19479_s1, 57344, %s45_s19, [#allocation6], %s18790_s28, %s18790_s28, %s18791_s29  }
  0x1b   :  { %s18792_s17 = smov [#allocation8]   ;;  %s18793_s20 = smov [#allocation11]  }
  0x1c   :  { %s67_s18 = sshll.u32 %s18792_s17, 4  ;;  %s89_s21 = sshll.u32 %s18793_s20, 4  ;;  %s68_s18 = int_to_ptr.vmem [resolvable:$true] %s67_s18  ;;  %s90_s21 = int_to_ptr.vmem [resolvable:$true] %s89_s21 }
  0x1d   :  { %s18441_s24 = scalar_lea.hbm %s19481_s3, 128 }
  0x1e   :  { %p18442_p8 = scmp.ne.s32.totalorder %s19481_s3, %s18441_s24  ;;  %p18445_p9 = scmp.lt.u32.totalorder %s18441_s24, %s19481_s3 }
  0x20   :  { %p18447_p10 = pnand %p18445_p9, %p18442_p8 }
  0x22   :  { %18450 = shalt.err (!%p18447_p10)
}
  0x23   :  { %s18451_s1 = scalar_lea.vmem %s68_s18, 128  ;;  %p18456_p12 = scmp.lt.s32.totalorder %s68_s18, %s68_s18 }
  0x24   :  { %p18452_p11 = scmp.ne.s32.totalorder %s68_s18, %s18451_s1  ;;  %p18457_p13 = scmp.lt.s32.totalorder %s18451_s1, %s18451_s1 }
  0x26   :  { %p18458_p0 = por %p18457_p13, %p18456_p12 }
  0x28   :  { %p18459_p1 = pnand %p18458_p0, %p18452_p11 }
  0x2a   :  { %18462 = shalt.err (!%p18459_p1)
}
  0x2b   :  { %70 = dma.hbm_to_vmem [thread:$0]  %s19481_s3, 128, %s68_s18, [#allocation9]  }
  0x2c   :  { %s18463_s20 = scalar_lea.hbm %s19483_s5, 128 }
  0x2d   :  { %p18464_p2 = scmp.ne.s32.totalorder %s19483_s5, %s18463_s20  ;;  %p18467_p3 = scmp.lt.u32.totalorder %s18463_s20, %s19483_s5 }
  0x2f   :  { %p18469_p4 = pnand %p18467_p3, %p18464_p2 }
  0x31   :  { %18472 = shalt.err (!%p18469_p4)
}
  0x32   :  { %s18473_s25 = scalar_lea.vmem %s90_s21, 128  ;;  %p18478_p6 = scmp.lt.s32.totalorder %s90_s21, %s90_s21 }
  0x33   :  { %p18474_p5 = scmp.ne.s32.totalorder %s90_s21, %s18473_s25  ;;  %p18479_p7 = scmp.lt.s32.totalorder %s18473_s25, %s18473_s25 }
  0x35   :  { %p18480_p8 = por %p18479_p7, %p18478_p6 }
  0x37   :  { %p18481_p9 = pnand %p18480_p8, %p18474_p5 }
  0x39   :  { %18484 = shalt.err (!%p18481_p9)
}
  0x3a   :  { %92 = dma.hbm_to_vmem [thread:$0]  %s19483_s5, 128, %s90_s21, [#allocation12]  }
  0x3b   :  { %s18794_s26 = smov [#allocation14]   ;;  %s18795_s1 = smov [#allocation17]  }
  0x3c   :  { %s108_s27 = sshll.u32 %s18794_s26, 4  ;;  %s131_s19 = sshll.u32 %s18795_s1, 4  ;;  %s109_s27 = int_to_ptr.vmem [resolvable:$true] %s108_s27  ;;  %s132_s19 = int_to_ptr.vmem [resolvable:$true] %s131_s19 }
  0x3d   :  { %s18485_s17 = scalar_lea.hbm %s19485_s7, 65536 }
  0x3e   :  { %p18486_p10 = scmp.ne.s32.totalorder %s19485_s7, %s18485_s17  ;;  %p18489_p11 = scmp.lt.u32.totalorder %s18485_s17, %s19485_s7 }
  0x40   :  { %p18491_p12 = pnand %p18489_p11, %p18486_p10 }
  0x42   :  { %18494 = shalt.err (!%p18491_p12)
}
  0x43   :  { %s18495_s5 = scalar_lea.vmem %s109_s27, 65536  ;;  %p18500_p0 = scmp.lt.s32.totalorder %s109_s27, %s109_s27 }
  0x44   :  { %p18496_p13 = scmp.ne.s32.totalorder %s109_s27, %s18495_s5  ;;  %p18501_p1 = scmp.lt.s32.totalorder %s18495_s5, %s18495_s5 }
  0x46   :  { %p18502_p2 = por %p18501_p1, %p18500_p0 }
  0x48   :  { %p18503_p3 = pnand %p18502_p2, %p18496_p13 }
  0x4a   :  { %18506 = shalt.err (!%p18503_p3)
}
  0x4b   :  { %114 = dma.hbm_to_vmem [thread:$0]  %s19485_s7, 65536, %s109_s27, [#allocation15], %s18790_s28, %s18790_s28, %s18791_s29  }
  0x4c   :  { %s18507_s18 = scalar_lea.hbm %s19487_s9, 128 }
  0x4d   :  { %p18508_p4 = scmp.ne.s32.totalorder %s19487_s9, %s18507_s18  ;;  %p18511_p5 = scmp.lt.u32.totalorder %s18507_s18, %s19487_s9 }
  0x4f   :  { %p18513_p6 = pnand %p18511_p5, %p18508_p4 }
  0x51   :  { %18516 = shalt.err (!%p18513_p6)
}
  0x52   :  { %s18517_s17 = scalar_lea.vmem %s132_s19, 128  ;;  %p18522_p8 = scmp.lt.s32.totalorder %s132_s19, %s132_s19 }
  0x53   :  { %p18518_p7 = scmp.ne.s32.totalorder %s132_s19, %s18517_s17  ;;  %p18523_p9 = scmp.lt.s32.totalorder %s18517_s17, %s18517_s17 }
  0x55   :  { %p18524_p10 = por %p18523_p9, %p18522_p8 }
  0x57   :  { %p18525_p11 = pnand %p18524_p10, %p18518_p7 }
  0x59   :  { %18528 = shalt.err (!%p18525_p11)
}
  0x5a   :  { %134 = dma.hbm_to_vmem [thread:$0]  %s19487_s9, 128, %s132_s19, [#allocation18]  }
  0x5b   :  { %s18796_s20 = smov [#allocation20]   ;;  %s18797_s22 = smov [#allocation23]  }
  0x5c   :  { %s153_s15 = sshll.u32 %s18796_s20, 4  ;;  %s172_s23 = sshll.u32 %s18797_s22, 4  ;;  %s154_s15 = int_to_ptr.vmem [resolvable:$true] %s153_s15  ;;  %s173_s23 = int_to_ptr.vmem [resolvable:$true] %s172_s23 }
  0x5d   :  { %s18529_s24 = scalar_lea.hbm %s19489_s11, 128 }
  0x5e   :  { %p18530_p12 = scmp.ne.s32.totalorder %s19489_s11, %s18529_s24  ;;  %p18533_p13 = scmp.lt.u32.totalorder %s18529_s24, %s19489_s11 }
  0x60   :  { %p18535_p0 = pnand %p18533_p13, %p18530_p12 }
  0x62   :  { %18538 = shalt.err (!%p18535_p0)
}
  0x63   :  { %s18539_s9 = scalar_lea.vmem %s154_s15, 128  ;;  %p18544_p2 = scmp.lt.s32.totalorder %s154_s15, %s154_s15 }
  0x64   :  { %p18540_p1 = scmp.ne.s32.totalorder %s154_s15, %s18539_s9  ;;  %p18545_p3 = scmp.lt.s32.totalorder %s18539_s9, %s18539_s9 }
  0x66   :  { %p18546_p4 = por %p18545_p3, %p18544_p2 }
  0x68   :  { %p18547_p5 = pnand %p18546_p4, %p18540_p1 }
  0x6a   :  { %18550 = shalt.err (!%p18547_p5)
}
  0x6b   :  { %156 = dma.hbm_to_vmem [thread:$0]  %s19489_s11, 128, %s154_s15, [#allocation21]  }
  0x6c   :  { %s18551_s17 = scalar_lea.hbm %s19491_s13, 8192 }
  0x6d   :  { %p18552_p6 = scmp.ne.s32.totalorder %s19491_s13, %s18551_s17  ;;  %p18555_p7 = scmp.lt.u32.totalorder %s18551_s17, %s19491_s13 }
  0x6f   :  { %p18557_p8 = pnand %p18555_p7, %p18552_p6 }
  0x71   :  { %18560 = shalt.err (!%p18557_p8)
}
  0x72   :  { %s18561_s5 = scalar_lea.vmem %s173_s23, 8192  ;;  %p18566_p10 = scmp.lt.s32.totalorder %s173_s23, %s173_s23 }
  0x73   :  { %p18562_p9 = scmp.ne.s32.totalorder %s173_s23, %s18561_s5  ;;  %p18567_p11 = scmp.lt.s32.totalorder %s18561_s5, %s18561_s5 }
  0x75   :  { %p18568_p12 = por %p18567_p11, %p18566_p10 }
  0x77   :  { %p18569_p13 = pnand %p18568_p12, %p18562_p9 }
  0x79   :  { %18572 = shalt.err (!%p18569_p13)
}
  0x7a   :  { %s18798_s11 = smov 64   ;;  %s18799_s15 = smov 4  }
  0x7b   :  { %178 = dma.hbm_to_vmem [thread:$0]  %s19491_s13, 8192, %s173_s23, [#allocation24], %s18798_s11, %s18798_s11, %s18799_s15  }
  0x7c   :  { %s18800_s25 = smov [#allocation2]   ;;  %s18801_s18 = smov [#allocation7]  }
  0x7d   :  { %s35_s3 = sshll.u32 %s18800_s25, 4  ;;  %s57_s26 = sshll.u32 %s18801_s18, 4  ;;  %s36_s3 = int_to_ptr.vmem [resolvable:$true] %s35_s3  ;;  %s58_s26 = int_to_ptr.vmem [resolvable:$true] %s57_s26 }
  0x7e   :  { %s18573_s1 = scalar_lea.hbm %s19478_s0, 896 }
  0x7f   :  { %p18574_p0 = scmp.ne.s32.totalorder %s19478_s0, %s18573_s1  ;;  %p18577_p1 = scmp.lt.u32.totalorder %s18573_s1, %s19478_s0 }
  0x81   :  { %p18579_p2 = pnand %p18577_p1, %p18574_p0 }
  0x83   :  { %18582 = shalt.err (!%p18579_p2)
}
  0x84   :  { %s18583_s13 = scalar_lea.vmem %s36_s3, 896  ;;  %p18588_p4 = scmp.lt.s32.totalorder %s36_s3, %s36_s3 }
  0x85   :  { %p18584_p3 = scmp.ne.s32.totalorder %s36_s3, %s18583_s13  ;;  %p18589_p5 = scmp.lt.s32.totalorder %s18583_s13, %s18583_s13 }
  0x87   :  { %p18590_p6 = por %p18589_p5, %p18588_p4 }
  0x89   :  { %p18591_p7 = pnand %p18590_p6, %p18584_p3 }
  0x8b   :  { %18594 = shalt.err (!%p18591_p7)
}
  0x8c   :  { %38 = dma.hbm_to_vmem [thread:$0]  %s19478_s0, 896, %s36_s3, [#allocation3]  }
  0x8d   :  { %s18595_s5 = scalar_lea.hbm %s19480_s2, 128 }
  0x8e   :  { %p18596_p8 = scmp.ne.s32.totalorder %s19480_s2, %s18595_s5  ;;  %p18599_p9 = scmp.lt.u32.totalorder %s18595_s5, %s19480_s2 }
  0x90   :  { %p18601_p10 = pnand %p18599_p9, %p18596_p8 }
  0x92   :  { %18604 = shalt.err (!%p18601_p10)
}
  0x93   :  { %s18605_s25 = scalar_lea.vmem %s58_s26, 128  ;;  %p18610_p12 = scmp.lt.s32.totalorder %s58_s26, %s58_s26 }
  0x94   :  { %p18606_p11 = scmp.ne.s32.totalorder %s58_s26, %s18605_s25  ;;  %p18611_p13 = scmp.lt.s32.totalorder %s18605_s25, %s18605_s25 }
  0x96   :  { %p18612_p0 = por %p18611_p13, %p18610_p12 }
  0x98   :  { %p18613_p1 = pnand %p18612_p0, %p18606_p11 }
  0x9a   :  { %18616 = shalt.err (!%p18613_p1)
}
  0x9b   :  { %60 = dma.hbm_to_vmem [thread:$0]  %s19480_s2, 128, %s58_s26, [#allocation6]  }
  0x9c   :  { %s18802_s18 = smov [#allocation10]   ;;  %s18803_s19 = smov [#allocation13]  }
  0x9d   :  { %s76_s9 = sshll.u32 %s18802_s18, 4  ;;  %s99_s1 = sshll.u32 %s18803_s19, 4  ;;  %s77_s9 = int_to_ptr.vmem [resolvable:$true] %s76_s9  ;;  %s100_s1 = int_to_ptr.vmem [resolvable:$true] %s99_s1 }
  0x9e   :  { %s18617_s17 = scalar_lea.hbm %s19482_s4, 65536 }
  0x9f   :  { %p18618_p2 = scmp.ne.s32.totalorder %s19482_s4, %s18617_s17  ;;  %p18621_p3 = scmp.lt.u32.totalorder %s18617_s17, %s19482_s4 }
  0xa1   :  { %p18623_p4 = pnand %p18621_p3, %p18618_p2 }
  0xa3   :  { %18626 = shalt.err (!%p18623_p4)
}
  0xa4   :  { %s18627_s2 = scalar_lea.vmem %s77_s9, 65536  ;;  %p18632_p6 = scmp.lt.s32.totalorder %s77_s9, %s77_s9 }
  0xa5   :  { %p18628_p5 = scmp.ne.s32.totalorder %s77_s9, %s18627_s2  ;;  %p18633_p7 = scmp.lt.s32.totalorder %s18627_s2, %s18627_s2 }
  0xa7   :  { %p18634_p8 = por %p18633_p7, %p18632_p6 }
  0xa9   :  { %p18635_p9 = pnand %p18634_p8, %p18628_p5 }
  0xab   :  { %18638 = shalt.err (!%p18635_p9)
}
  0xac   :  { %82 = dma.hbm_to_vmem [thread:$0]  %s19482_s4, 65536, %s77_s9, [#allocation9], %s18790_s28, %s18790_s28, %s18791_s29  }
  0xad   :  { %s18639_s11 = scalar_lea.hbm %s19484_s6, 128 }
  0xae   :  { %p18640_p10 = scmp.ne.s32.totalorder %s19484_s6, %s18639_s11  ;;  %p18643_p11 = scmp.lt.u32.totalorder %s18639_s11, %s19484_s6 }
  0xb0   :  { %p18645_p12 = pnand %p18643_p11, %p18640_p10 }
  0xb2   :  { %18648 = shalt.err (!%p18645_p12)
}
  0xb3   :  { %s18649_s0 = scalar_lea.vmem %s100_s1, 128  ;;  %p18654_p0 = scmp.lt.s32.totalorder %s100_s1, %s100_s1 }
  0xb4   :  { %p18650_p13 = scmp.ne.s32.totalorder %s100_s1, %s18649_s0  ;;  %p18655_p1 = scmp.lt.s32.totalorder %s18649_s0, %s18649_s0 }
  0xb6   :  { %p18656_p2 = por %p18655_p1, %p18654_p0 }
  0xb8   :  { %p18657_p3 = pnand %p18656_p2, %p18650_p13 }
  0xba   :  { %18660 = shalt.err (!%p18657_p3)
}
  0xbb   :  { %102 = dma.hbm_to_vmem [thread:$0]  %s19484_s6, 128, %s100_s1, [#allocation12]  }
  0xbc   :  { %s18804_s18 = smov [#allocation16]   ;;  %s18805_s19 = smov [#allocation19]  }
  0xbd   :  { %s121_s9 = sshll.u32 %s18804_s18, 4  ;;  %s140_s30 = sshll.u32 %s18805_s19, 4  ;;  %s122_s9 = int_to_ptr.vmem [resolvable:$true] %s121_s9  ;;  %s141_s30 = int_to_ptr.vmem [resolvable:$true] %s140_s30 }
  0xbe   :  { %s18661_s7 = scalar_lea.hbm %s19486_s8, 128 }
  0xbf   :  { %p18662_p4 = scmp.ne.s32.totalorder %s19486_s8, %s18661_s7  ;;  %p18665_p5 = scmp.lt.u32.totalorder %s18661_s7, %s19486_s8 }
  0xc1   :  { %p18667_p6 = pnand %p18665_p5, %p18662_p4 }
  0xc3   :  { %18670 = shalt.err (!%p18667_p6)
}
  0xc4   :  { %s18671_s6 = scalar_lea.vmem %s122_s9, 128  ;;  %p18676_p8 = scmp.lt.s32.totalorder %s122_s9, %s122_s9 }
  0xc5   :  { %p18672_p7 = scmp.ne.s32.totalorder %s122_s9, %s18671_s6  ;;  %p18677_p9 = scmp.lt.s32.totalorder %s18671_s6, %s18671_s6 }
  0xc7   :  { %p18678_p10 = por %p18677_p9, %p18676_p8 }
  0xc9   :  { %p18679_p11 = pnand %p18678_p10, %p18672_p7 }
  0xcb   :  { %18682 = shalt.err (!%p18679_p11)
}
  0xcc   :  { %124 = dma.hbm_to_vmem [thread:$0]  %s19486_s8, 128, %s122_s9, [#allocation15]  }
  0xcd   :  { %s18683_s5 = scalar_lea.hbm %s19488_s10, 65536 }
  0xce   :  { %p18684_p12 = scmp.ne.s32.totalorder %s19488_s10, %s18683_s5  ;;  %p18687_p13 = scmp.lt.u32.totalorder %s18683_s5, %s19488_s10 }
  0xd0   :  { %p18689_p0 = pnand %p18687_p13, %p18684_p12 }
  0xd2   :  { %18692 = shalt.err (!%p18689_p0)
}
  0xd3   :  { %s18693_s25 = scalar_lea.vmem %s141_s30, 65536  ;;  %p18698_p2 = scmp.lt.s32.totalorder %s141_s30, %s141_s30 }
  0xd4   :  { %p18694_p1 = scmp.ne.s32.totalorder %s141_s30, %s18693_s25  ;;  %p18699_p3 = scmp.lt.s32.totalorder %s18693_s25, %s18693_s25 }
  0xd6   :  { %p18700_p4 = por %p18699_p3, %p18698_p2 }
  0xd8   :  { %p18701_p5 = pnand %p18700_p4, %p18694_p1 }
  0xda   :  { %18704 = shalt.err (!%p18701_p5)
}
  0xdb   :  { %146 = dma.hbm_to_vmem [thread:$0]  %s19488_s10, 65536, %s141_s30, [#allocation18], %s18790_s28, %s18790_s28, %s18791_s29  }
  0xdc   :  { %s18806_s4 = smov [#allocation22]   ;;  %s18807_s18 = smov [#allocation25]  }
  0xdd   :  { %s163_s3 = sshll.u32 %s18806_s4, 4  ;;  %s185_s9 = sshll.u32 %s18807_s18, 4  ;;  %s164_s3 = int_to_ptr.vmem [resolvable:$true] %s163_s3  ;;  %s186_s9 = int_to_ptr.vmem [resolvable:$true] %s185_s9 }
  0xde   :  { %s18705_s17 = scalar_lea.hbm %s19490_s12, 128 }
  0xdf   :  { %p18706_p6 = scmp.ne.s32.totalorder %s19490_s12, %s18705_s17  ;;  %p18709_p7 = scmp.lt.u32.totalorder %s18705_s17, %s19490_s12 }
  0xe1   :  { %p18711_p8 = pnand %p18709_p7, %p18706_p6 }
  0xe3   :  { %18714 = shalt.err (!%p18711_p8)
}
  0xe4   :  { %s18715_s10 = scalar_lea.vmem %s164_s3, 128  ;;  %p18720_p10 = scmp.lt.s32.totalorder %s164_s3, %s164_s3 }
  0xe5   :  { %p18716_p9 = scmp.ne.s32.totalorder %s164_s3, %s18715_s10  ;;  %p18721_p11 = scmp.lt.s32.totalorder %s18715_s10, %s18715_s10 }
  0xe7   :  { %p18722_p12 = por %p18721_p11, %p18720_p10 }
  0xe9   :  { %p18723_p13 = pnand %p18722_p12, %p18716_p9 }
  0xeb   :  { %18726 = shalt.err (!%p18723_p13)
}
  0xec   :  { %166 = dma.hbm_to_vmem [thread:$0]  %s19490_s12, 128, %s164_s3, [#allocation21]  }
  0xed   :  { %s18727_s6 = scalar_lea.hbm %s19492_s14, 16 }
  0xee   :  { %p18728_p0 = scmp.ne.s32.totalorder %s19492_s14, %s18727_s6  ;;  %p18731_p1 = scmp.lt.u32.totalorder %s18727_s6, %s19492_s14 }
  0xf0   :  { %p18733_p2 = pnand %p18731_p1, %p18728_p0 }
  0xf2   :  { %18736 = shalt.err (!%p18733_p2)
}
  0xf3   :  { %s18737_s5 = scalar_lea.vmem %s186_s9, 16  ;;  %s18741_s11 = scalar_lea.vmem %s186_s9, 32 }
  0xf4   :  { %p18738_p3 = scmp.ne.s32.totalorder %s186_s9, %s18737_s5  ;;  %p18742_p4 = scmp.lt.s32.totalorder %s186_s9, %s186_s9 }
  0xf5   :  { %p18743_p5 = scmp.lt.s32.totalorder %s18741_s11, %s18737_s5 }
  0xf7   :  { %p18744_p6 = por %p18743_p5, %p18742_p4 }
  0xf9   :  { %p18745_p7 = pnand %p18744_p6, %p18738_p3 }
  0xfb   :  { %18748 = shalt.err (!%p18745_p7)
}
  0xfc   :  { %188 = dma.hbm_to_vmem [thread:$0]  %s19492_s14, 16, %s186_s9, [#allocation24]  }
  0xfd   :  { %18771 = dma.done.wait [#allocation3], 896  }
  0xfe   :  { %18772 = vsyncadd [#allocation3], 4294966400 }
  0xff   :  { %18773 = dma.done.wait [#allocation6], 57472  }
 0x100   :  { %18774 = vsyncadd [#allocation6], 4294909824 }
 0x101   :  { %18775 = dma.done.wait [#allocation9], 65664  }
 0x102   :  { %18776 = vsyncadd [#allocation9], 4294901632 }
 0x103   :  { %18777 = dma.done.wait [#allocation12], 256  }
 0x104   :  { %18778 = vsyncadd [#allocation12], 4294967040 }
 0x105   :  { %18779 = dma.done.wait [#allocation15], 65664  }
 0x106   :  { %18780 = vsyncadd [#allocation15], 4294901632 }
 0x107   :  { %18781 = dma.done.wait [#allocation18], 65664  }
 0x108   :  { %18782 = vsyncadd [#allocation18], 4294901632 }
 0x109   :  { %18783 = dma.done.wait [#allocation21], 256  }
 0x10a   :  { %18784 = vsyncadd [#allocation21], 4294967040 }
 0x10b   :  { %18785 = dma.done.wait [#allocation24], 8208  }
 0x10c   :  { %18786 = vsyncadd [#allocation24], 4294959088  ;;  %v241_v0 = vld [vmem:[#allocation5] sm:$0xff]  ;;  %v242_v2 = vld [vmem:[#allocation5 + $0x8] sm:$0xff]  ;;  %s18809_s14 = smov [#allocation26]  }
 0x10d   :  { %v245_v1 = vld [vmem:[#allocation5 + $0x20] sm:$0xff]  ;;  %v246_v4 = vld [vmem:[#allocation5 + $0x28] sm:$0xff]  ;;  %v235_v53 = vld [vmem:[#allocation2 + $0x8] sm:$0xff]  ;;  %s11729_s21 = sshll.u32 %s18809_s14, 4  ;;  %s11730_s21 = int_to_ptr.vmem [resolvable:$true] %s11729_s21 }
 0x10e   :  { %v16397_v3 = vcombine.high %v241_v0, %v245_v1  ;;  %v16398_v5 = vcombine.low %v241_v0, %v245_v1  ;;  %v249_v6 = vld [vmem:[#allocation5 + $0x40] sm:$0xff]  ;;  %v16509_v8 = vcombine.high %v242_v2, %v246_v4  ;;  %v16510_v9 = vcombine.low %v242_v2, %v246_v4  ;;  %v250_v11 = vld [vmem:[#allocation5 + $0x48] sm:$0xff]  ;;  %1649 = vmatprep.mubr.f32.mxu0 %v235_v53  ;;  %s18749_s24 = scalar_lea.vmem %s11730_s21, 128  ;;  %p18754_p9 = scmp.lt.s32.totalorder %s11730_s21, %s11730_s21 }
 0x10f   :  { %v253_v7 = vld [vmem:[#allocation5 + $0x60] sm:$0xff]  ;;  %v254_v12 = vld [vmem:[#allocation5 + $0x68] sm:$0xff]  ;;  %1933 = vmatprep.mubr.f32.mxu1 %v235_v53  ;;  %p18750_p8 = scmp.ne.s32.totalorder %s11730_s21, %s18749_s24  ;;  %p18755_p10 = scmp.lt.s32.totalorder %s18749_s24, %s18749_s24 }
 0x110   :  { %v16399_v10 = vcombine.high %v249_v6, %v253_v7  ;;  %v257_v13 = vld [vmem:[#allocation5 + $0x80] sm:$0xff]  ;;  %12206 = vmatprep.subr.bf16.mxu0 %v16397_v3  ;;  %v16511_v14 = vcombine.high %v250_v11, %v254_v12  ;;  %v258_v16 = vld [vmem:[#allocation5 + $0x88] sm:$0xff]  ;;  %12430 = vmatprep.subr.bf16.mxu1 %v16509_v8  ;;  %v16400_v18 = vcombine.low %v249_v6, %v253_v7 }
 0x111   :  { %v261_v15 = vld [vmem:[#allocation5 + $0xa0] sm:$0xff]  ;;  %v262_v17 = vld [vmem:[#allocation5 + $0xa8] sm:$0xff]  ;;  %12208 = vmatpush1.bf16.msra.mxu0 %v16398_v5  ;;  %12432 = vmatpush1.bf16.msra.mxu1 %v16510_v9  ;;  %v16512_v19 = vcombine.low %v250_v11, %v254_v12  ;;  %p18756_p11 = por %p18755_p10, %p18754_p9 }
 0x112   :  { %12210 = vmatprep.subr.bf16.mxu0 %v16399_v10  ;;  %v16401_v20 = vcombine.high %v257_v13, %v261_v15  ;;  %12434 = vmatprep.subr.bf16.mxu1 %v16511_v14  ;;  %v16513_v21 = vcombine.high %v258_v16, %v262_v17  ;;  %v265_v22 = vld [vmem:[#allocation5 + $0xc0] sm:$0xff]  ;;  %v266_v24 = vld [vmem:[#allocation5 + $0xc8] sm:$0xff]  ;;  %v16402_v26 = vcombine.low %v257_v13, %v261_v15 }
 0x113   :  { %v269_v23 = vld [vmem:[#allocation5 + $0xe0] sm:$0xff]  ;;  %v270_v25 = vld [vmem:[#allocation5 + $0xe8] sm:$0xff]  ;;  %v16514_v27 = vcombine.low %v258_v16, %v262_v17  ;;  %p18757_p12 = pnand %p18756_p11, %p18750_p8 }
 0x114   :  { %v16403_v28 = vcombine.high %v265_v22, %v269_v23  ;;  %v16515_v29 = vcombine.high %v266_v24, %v270_v25  ;;  %v273_v30 = vld [vmem:[#allocation5 + $0x100] sm:$0xff]  ;;  %v274_v32 = vld [vmem:[#allocation5 + $0x108] sm:$0xff]  ;;  %v16404_v34 = vcombine.low %v265_v22, %v269_v23  ;;  %v16516_v35 = vcombine.low %v266_v24, %v270_v25 }
 0x115   :  { %12212 = vmatpush1.bf16.msra.mxu0 %v16400_v18  ;;  %12436 = vmatpush1.bf16.msra.mxu1 %v16512_v19  ;;  %v277_v31 = vld [vmem:[#allocation5 + $0x120] sm:$0xff]  ;;  %v278_v33 = vld [vmem:[#allocation5 + $0x128] sm:$0xff] }
 0x116   :  { %12214 = vmatprep.subr.bf16.mxu0 %v16401_v20  ;;  %12438 = vmatprep.subr.bf16.mxu1 %v16513_v21  ;;  %v16405_v36 = vcombine.high %v273_v30, %v277_v31  ;;  %v16517_v37 = vcombine.high %v274_v32, %v278_v33  ;;  %v281_v38 = vld [vmem:[#allocation5 + $0x140] sm:$0xff]  ;;  %v282_v40 = vld [vmem:[#allocation5 + $0x148] sm:$0xff]  ;;  %v16406_v42 = vcombine.low %v273_v30, %v277_v31 }
 0x117   :  { %v285_v39 = vld [vmem:[#allocation5 + $0x160] sm:$0xff]  ;;  %v286_v41 = vld [vmem:[#allocation5 + $0x168] sm:$0xff]  ;;  %v16518_v43 = vcombine.low %v274_v32, %v278_v33 }
 0x118   :  { %v16407_v44 = vcombine.high %v281_v38, %v285_v39  ;;  %v16519_v45 = vcombine.high %v282_v40, %v286_v41  ;;  %v289_v46 = vld [vmem:[#allocation5 + $0x180] sm:$0xff]  ;;  %v290_v48 = vld [vmem:[#allocation5 + $0x188] sm:$0xff]  ;;  %v16408_v50 = vcombine.low %v281_v38, %v285_v39  ;;  %v16520_v51 = vcombine.low %v282_v40, %v286_v41 }
 0x119   :  { %12216 = vmatpush1.bf16.msra.mxu0 %v16402_v26  ;;  %12440 = vmatpush1.bf16.msra.mxu1 %v16514_v27  ;;  %v293_v47 = vld [vmem:[#allocation5 + $0x1a0] sm:$0xff]  ;;  %v294_v49 = vld [vmem:[#allocation5 + $0x1a8] sm:$0xff] }
 0x11a   :  { %12218 = vmatprep.subr.bf16.mxu0 %v16403_v28  ;;  %12442 = vmatprep.subr.bf16.mxu1 %v16515_v29  ;;  %v16409_v52 = vcombine.high %v289_v46, %v293_v47  ;;  %v16521_v54 = vcombine.high %v290_v48, %v294_v49  ;;  %v297_v55 = vld [vmem:[#allocation5 + $0x1c0] sm:$0xff]  ;;  %v298_v57 = vld [vmem:[#allocation5 + $0x1c8] sm:$0xff]  ;;  %v16410_v59 = vcombine.low %v289_v46, %v293_v47 }
 0x11b   :  { %v301_v56 = vld [vmem:[#allocation5 + $0x1e0] sm:$0xff]  ;;  %v302_v58 = vld [vmem:[#allocation5 + $0x1e8] sm:$0xff]  ;;  %v16522_v60 = vcombine.low %v290_v48, %v294_v49 }
 0x11c   :  { %v16411_v61 = vcombine.high %v297_v55, %v301_v56  ;;  %v16523_v62 = vcombine.high %v298_v57, %v302_v58  ;;  %v305_v63 = vld [vmem:[#allocation5 + $0x200] sm:$0xff]  ;;  %v306_v1 = vld [vmem:[#allocation5 + $0x208] sm:$0xff]  ;;  %v16412_v3 = vcombine.low %v297_v55, %v301_v56  ;;  %v16524_v4 = vcombine.low %v298_v57, %v302_v58 }
 0x11d   :  { %12220 = vmatpush1.bf16.msra.mxu0 %v16404_v34  ;;  %12444 = vmatpush1.bf16.msra.mxu1 %v16516_v35  ;;  %v309_v0 = vld [vmem:[#allocation5 + $0x220] sm:$0xff]  ;;  %v310_v2 = vld [vmem:[#allocation5 + $0x228] sm:$0xff] }
 0x11e   :  { %12222 = vmatprep.subr.bf16.mxu0 %v16405_v36  ;;  %12446 = vmatprep.subr.bf16.mxu1 %v16517_v37  ;;  %v16413_v5 = vcombine.high %v305_v63, %v309_v0  ;;  %v16525_v6 = vcombine.high %v306_v1, %v310_v2  ;;  %v313_v7 = vld [vmem:[#allocation5 + $0x240] sm:$0xff]  ;;  %v314_v9 = vld [vmem:[#allocation5 + $0x248] sm:$0xff]  ;;  %v16414_v11 = vcombine.low %v305_v63, %v309_v0 }
 0x11f   :  { %v317_v8 = vld [vmem:[#allocation5 + $0x260] sm:$0xff]  ;;  %v318_v10 = vld [vmem:[#allocation5 + $0x268] sm:$0xff]  ;;  %v16526_v12 = vcombine.low %v306_v1, %v310_v2 }
 0x120   :  { %v16415_v13 = vcombine.high %v313_v7, %v317_v8  ;;  %v16527_v14 = vcombine.high %v314_v9, %v318_v10  ;;  %v321_v15 = vld [vmem:[#allocation5 + $0x280] sm:$0xff]  ;;  %v322_v17 = vld [vmem:[#allocation5 + $0x288] sm:$0xff]  ;;  %v16416_v19 = vcombine.low %v313_v7, %v317_v8  ;;  %v16528_v20 = vcombine.low %v314_v9, %v318_v10 }
 0x121   :  { %12224 = vmatpush1.bf16.msra.mxu0 %v16406_v42  ;;  %12448 = vmatpush1.bf16.msra.mxu1 %v16518_v43  ;;  %v325_v16 = vld [vmem:[#allocation5 + $0x2a0] sm:$0xff]  ;;  %v326_v18 = vld [vmem:[#allocation5 + $0x2a8] sm:$0xff] }
 0x122   :  { %12226 = vmatprep.subr.bf16.mxu0 %v16407_v44  ;;  %12450 = vmatprep.subr.bf16.mxu1 %v16519_v45  ;;  %v16417_v21 = vcombine.high %v321_v15, %v325_v16  ;;  %v16529_v22 = vcombine.high %v322_v17, %v326_v18  ;;  %v329_v23 = vld [vmem:[#allocation5 + $0x2c0] sm:$0xff]  ;;  %v330_v25 = vld [vmem:[#allocation5 + $0x2c8] sm:$0xff]  ;;  %v16418_v27 = vcombine.low %v321_v15, %v325_v16 }
 0x123   :  { %v333_v24 = vld [vmem:[#allocation5 + $0x2e0] sm:$0xff]  ;;  %v334_v26 = vld [vmem:[#allocation5 + $0x2e8] sm:$0xff]  ;;  %v16530_v28 = vcombine.low %v322_v17, %v326_v18 }
 0x124   :  { %v16419_v29 = vcombine.high %v329_v23, %v333_v24  ;;  %v16531_v30 = vcombine.high %v330_v25, %v334_v26  ;;  %v337_v31 = vld [vmem:[#allocation5 + $0x300] sm:$0xff]  ;;  %v338_v33 = vld [vmem:[#allocation5 + $0x308] sm:$0xff]  ;;  %v16420_v35 = vcombine.low %v329_v23, %v333_v24  ;;  %v16532_v36 = vcombine.low %v330_v25, %v334_v26 }
 0x125   :  { %12228 = vmatpush1.bf16.msra.mxu0 %v16408_v50  ;;  %12452 = vmatpush1.bf16.msra.mxu1 %v16520_v51  ;;  %v341_v32 = vld [vmem:[#allocation5 + $0x320] sm:$0xff]  ;;  %v342_v34 = vld [vmem:[#allocation5 + $0x328] sm:$0xff] }
 0x126   :  { %12230 = vmatprep.subr.bf16.mxu0 %v16409_v52  ;;  %12454 = vmatprep.subr.bf16.mxu1 %v16521_v54  ;;  %v16421_v37 = vcombine.high %v337_v31, %v341_v32  ;;  %v16533_v38 = vcombine.high %v338_v33, %v342_v34  ;;  %v345_v39 = vld [vmem:[#allocation5 + $0x340] sm:$0xff]  ;;  %v346_v41 = vld [vmem:[#allocation5 + $0x348] sm:$0xff]  ;;  %v16422_v43 = vcombine.low %v337_v31, %v341_v32 }
 0x127   :  { %v349_v40 = vld [vmem:[#allocation5 + $0x360] sm:$0xff]  ;;  %v350_v42 = vld [vmem:[#allocation5 + $0x368] sm:$0xff]  ;;  %v16534_v44 = vcombine.low %v338_v33, %v342_v34 }
 0x128   :  { %v16423_v45 = vcombine.high %v345_v39, %v349_v40  ;;  %v16535_v46 = vcombine.high %v346_v41, %v350_v42  ;;  %v353_v47 = vld [vmem:[#allocation5 + $0x380] sm:$0xff]  ;;  %v354_v49 = vld [vmem:[#allocation5 + $0x388] sm:$0xff]  ;;  %v16424_v51 = vcombine.low %v345_v39, %v349_v40  ;;  %v16536_v52 = vcombine.low %v346_v41, %v350_v42 }
 0x129   :  { %12232 = vmatpush1.bf16.msra.mxu0 %v16410_v59  ;;  %12456 = vmatpush1.bf16.msra.mxu1 %v16522_v60  ;;  %v357_v48 = vld [vmem:[#allocation5 + $0x3a0] sm:$0xff]  ;;  %v358_v50 = vld [vmem:[#allocation5 + $0x3a8] sm:$0xff] }
 0x12a   :  { %12234 = vmatprep.subr.bf16.mxu0 %v16411_v61  ;;  %12458 = vmatprep.subr.bf16.mxu1 %v16523_v62  ;;  %v16425_v53 = vcombine.high %v353_v47, %v357_v48  ;;  %v16537_v54 = vcombine.high %v354_v49, %v358_v50  ;;  %v361_v55 = vld [vmem:[#allocation5 + $0x3c0] sm:$0xff]  ;;  %v362_v57 = vld [vmem:[#allocation5 + $0x3c8] sm:$0xff]  ;;  %v16426_v59 = vcombine.low %v353_v47, %v357_v48 }
 0x12b   :  { %v365_v56 = vld [vmem:[#allocation5 + $0x3e0] sm:$0xff]  ;;  %v366_v58 = vld [vmem:[#allocation5 + $0x3e8] sm:$0xff]  ;;  %v16538_v60 = vcombine.low %v354_v49, %v358_v50 }
 0x12c   :  { %v16427_v61 = vcombine.high %v361_v55, %v365_v56  ;;  %v16539_v62 = vcombine.high %v362_v57, %v366_v58  ;;  %v369_v63 = vld [vmem:[#allocation5 + $0x400] sm:$0xff]  ;;  %v370_v1 = vld [vmem:[#allocation5 + $0x408] sm:$0xff] }
 0x12d   :  { %12236 = vmatpush1.bf16.msra.mxu0 %v16412_v3  ;;  %12460 = vmatpush1.bf16.msra.mxu1 %v16524_v4  ;;  %v373_v0 = vld [vmem:[#allocation5 + $0x420] sm:$0xff]  ;;  %v374_v2 = vld [vmem:[#allocation5 + $0x428] sm:$0xff]  ;;  %v16428_v3 = vcombine.low %v361_v55, %v365_v56  ;;  %v16540_v4 = vcombine.low %v362_v57, %v366_v58 }
 0x12e   :  { %12238 = vmatprep.subr.bf16.mxu0 %v16413_v5  ;;  %12462 = vmatprep.subr.bf16.mxu1 %v16525_v6  ;;  %v16429_v5 = vcombine.high %v369_v63, %v373_v0  ;;  %v16541_v6 = vcombine.high %v370_v1, %v374_v2  ;;  %v377_v7 = vld [vmem:[#allocation5 + $0x440] sm:$0xff]  ;;  %v378_v9 = vld [vmem:[#allocation5 + $0x448] sm:$0xff] }
 0x12f   :  { %v381_v8 = vld [vmem:[#allocation5 + $0x460] sm:$0xff]  ;;  %v382_v10 = vld [vmem:[#allocation5 + $0x468] sm:$0xff] }
 0x130   :  { %v16543_v15 = vcombine.high %v378_v9, %v382_v10  ;;  %v385_v16 = vld [vmem:[#allocation5 + $0x480] sm:$0xff]  ;;  %v386_v18 = vld [vmem:[#allocation5 + $0x488] sm:$0xff] }
 0x131   :  { %12240 = vmatpush1.bf16.msra.mxu0 %v16414_v11  ;;  %12464 = vmatpush1.bf16.msra.mxu1 %v16526_v12  ;;  %v16430_v11 = vcombine.low %v369_v63, %v373_v0  ;;  %v234_v12 = vld [vmem:[#allocation2] sm:$0xff]  ;;  %v389_v17 = vld [vmem:[#allocation5 + $0x4a0] sm:$0xff] }
 0x132   :  { %12242 = vmatprep.subr.bf16.mxu0 %v16415_v13  ;;  %12466 = vmatprep.subr.bf16.mxu1 %v16527_v14  ;;  %v16542_v13 = vcombine.low %v370_v1, %v374_v2  ;;  %v16431_v14 = vcombine.high %v377_v7, %v381_v8  ;;  %v16433_v23 = vcombine.high %v385_v16, %v389_v17  ;;  %v393_v25 = vld [vmem:[#allocation5 + $0x4c0] sm:$0xff] }
 0x133   :  { %v397_v26 = vld [vmem:[#allocation5 + $0x4e0] sm:$0xff] }
 0x134   :  { %v16435_v31 = vcombine.high %v393_v25, %v397_v26  ;;  %v401_v33 = vld [vmem:[#allocation5 + $0x500] sm:$0xff] }
 0x135   :  { %12244 = vmatpush1.bf16.msra.mxu0 %v16416_v19  ;;  %12468 = vmatpush1.bf16.msra.mxu1 %v16528_v20  ;;  %v390_v19 = vld [vmem:[#allocation5 + $0x4a8] sm:$0xff]  ;;  %v237_v20 = vld [vmem:[#allocation2 + $0x18] sm:$0xff] }
 0x136   :  { %12246 = vmatprep.subr.bf16.mxu0 %v16417_v21  ;;  %12470 = vmatprep.subr.bf16.mxu1 %v16529_v22  ;;  %v16432_v21 = vcombine.low %v377_v7, %v381_v8  ;;  %v16544_v22 = vcombine.low %v378_v9, %v382_v10  ;;  %v16545_v24 = vcombine.high %v386_v18, %v390_v19  ;;  %v405_v34 = vld [vmem:[#allocation5 + $0x520] sm:$0xff] }
 0x137   :  { %v16437_v39 = vcombine.high %v401_v33, %v405_v34  ;;  %v409_v41 = vld [vmem:[#allocation5 + $0x540] sm:$0xff] }
 0x138   :  { %v413_v42 = vld [vmem:[#allocation5 + $0x560] sm:$0xff] }
 0x139   :  { %12248 = vmatpush1.bf16.msra.mxu0 %v16418_v27  ;;  %12472 = vmatpush1.bf16.msra.mxu1 %v16530_v28  ;;  %v394_v27 = vld [vmem:[#allocation5 + $0x4c8] sm:$0xff]  ;;  %v16439_v47 = vcombine.high %v409_v41, %v413_v42  ;;  %v417_v49 = vld [vmem:[#allocation5 + $0x580] sm:$0xff] }
 0x13a   :  { %12250 = vmatprep.subr.bf16.mxu0 %v16419_v29  ;;  %12474 = vmatprep.subr.bf16.mxu1 %v16531_v30  ;;  %v398_v28 = vld [vmem:[#allocation5 + $0x4e8] sm:$0xff]  ;;  %v16434_v29 = vcombine.low %v385_v16, %v389_v17  ;;  %v16546_v30 = vcombine.low %v386_v18, %v390_v19  ;;  %v421_v50 = vld [vmem:[#allocation5 + $0x5a0] sm:$0xff] }
 0x13b   :  { %v16547_v32 = vcombine.high %v394_v27, %v398_v28  ;;  %v16441_v55 = vcombine.high %v417_v49, %v421_v50  ;;  %v425_v57 = vld [vmem:[#allocation5 + $0x5c0] sm:$0xff]  ;;  %v450_v19 = vld [vmem:[#allocation5 + $0x688] sm:$0xff] }
 0x13c   :  { %v429_v58 = vld [vmem:[#allocation5 + $0x5e0] sm:$0xff] }
 0x13d   :  { %12252 = vmatpush1.bf16.msra.mxu0 %v16420_v35  ;;  %12476 = vmatpush1.bf16.msra.mxu1 %v16532_v36  ;;  %v402_v35 = vld [vmem:[#allocation5 + $0x508] sm:$0xff]  ;;  %v16443_v63 = vcombine.high %v425_v57, %v429_v58  ;;  %v433_v1 = vld [vmem:[#allocation5 + $0x600] sm:$0xff] }
 0x13e   :  { %12254 = vmatprep.subr.bf16.mxu0 %v16421_v37  ;;  %12478 = vmatprep.subr.bf16.mxu1 %v16533_v38  ;;  %v406_v36 = vld [vmem:[#allocation5 + $0x528] sm:$0xff]  ;;  %v16436_v37 = vcombine.low %v393_v25, %v397_v26  ;;  %v16548_v38 = vcombine.low %v394_v27, %v398_v28  ;;  %v437_v2 = vld [vmem:[#allocation5 + $0x620] sm:$0xff] }
 0x13f   :  { %v16549_v40 = vcombine.high %v402_v35, %v406_v36  ;;  %v16445_v7 = vcombine.high %v433_v1, %v437_v2  ;;  %v441_v9 = vld [vmem:[#allocation5 + $0x640] sm:$0xff]  ;;  %v458_v27 = vld [vmem:[#allocation5 + $0x6c8] sm:$0xff] }
 0x140   :  { %v445_v10 = vld [vmem:[#allocation5 + $0x660] sm:$0xff]  ;;  %v462_v28 = vld [vmem:[#allocation5 + $0x6e8] sm:$0xff] }
 0x141   :  { %12256 = vmatpush1.bf16.msra.mxu0 %v16422_v43  ;;  %12480 = vmatpush1.bf16.msra.mxu1 %v16534_v44  ;;  %v410_v43 = vld [vmem:[#allocation5 + $0x548] sm:$0xff]  ;;  %v449_v17 = vld [vmem:[#allocation5 + $0x680] sm:$0xff] }
 0x142   :  { %12258 = vmatprep.subr.bf16.mxu0 %v16423_v45  ;;  %12482 = vmatprep.subr.bf16.mxu1 %v16535_v46  ;;  %v414_v44 = vld [vmem:[#allocation5 + $0x568] sm:$0xff]  ;;  %v16438_v45 = vcombine.low %v401_v33, %v405_v34  ;;  %v16550_v46 = vcombine.low %v402_v35, %v406_v36  ;;  %v453_v18 = vld [vmem:[#allocation5 + $0x6a0] sm:$0xff] }
 0x143   :  { %v16551_v48 = vcombine.high %v410_v43, %v414_v44  ;;  %v457_v25 = vld [vmem:[#allocation5 + $0x6c0] sm:$0xff]  ;;  %v466_v35 = vld [vmem:[#allocation5 + $0x708] sm:$0xff] }
 0x144   :  { %v461_v26 = vld [vmem:[#allocation5 + $0x6e0] sm:$0xff]  ;;  %v470_v36 = vld [vmem:[#allocation5 + $0x728] sm:$0xff] }
 0x145   :  { %12260 = vmatpush1.bf16.msra.mxu0 %v16424_v51  ;;  %12484 = vmatpush1.bf16.msra.mxu1 %v16536_v52  ;;  %v418_v51 = vld [vmem:[#allocation5 + $0x588] sm:$0xff]  ;;  %v465_v33 = vld [vmem:[#allocation5 + $0x700] sm:$0xff] }
 0x146   :  { %12262 = vmatprep.subr.bf16.mxu0 %v16425_v53  ;;  %12486 = vmatprep.subr.bf16.mxu1 %v16537_v54  ;;  %v422_v52 = vld [vmem:[#allocation5 + $0x5a8] sm:$0xff]  ;;  %v16440_v53 = vcombine.low %v409_v41, %v413_v42  ;;  %v16552_v54 = vcombine.low %v410_v43, %v414_v44  ;;  %v469_v34 = vld [vmem:[#allocation5 + $0x720] sm:$0xff] }
 0x147   :  { %v16553_v56 = vcombine.high %v418_v51, %v422_v52  ;;  %v473_v41 = vld [vmem:[#allocation5 + $0x740] sm:$0xff]  ;;  %v474_v43 = vld [vmem:[#allocation5 + $0x748] sm:$0xff] }
 0x148   :  { %v477_v42 = vld [vmem:[#allocation5 + $0x760] sm:$0xff]  ;;  %v478_v44 = vld [vmem:[#allocation5 + $0x768] sm:$0xff] }
 0x149   :  { %12264 = vmatpush1.bf16.msra.mxu0 %v16426_v59  ;;  %12488 = vmatpush1.bf16.msra.mxu1 %v16538_v60  ;;  %v426_v59 = vld [vmem:[#allocation5 + $0x5c8] sm:$0xff] }
 0x14a   :  { %12266 = vmatprep.subr.bf16.mxu0 %v16427_v61  ;;  %12490 = vmatprep.subr.bf16.mxu1 %v16539_v62  ;;  %v430_v60 = vld [vmem:[#allocation5 + $0x5e8] sm:$0xff]  ;;  %v16442_v61 = vcombine.low %v417_v49, %v421_v50  ;;  %v16554_v62 = vcombine.low %v418_v51, %v422_v52  ;;  %v481_v49 = vld [vmem:[#allocation5 + $0x780] sm:$0xff] }
 0x14b   :  { %v16555_v0 = vcombine.high %v426_v59, %v430_v60  ;;  %v485_v50 = vld [vmem:[#allocation5 + $0x7a0] sm:$0xff]  ;;  %v482_v51 = vld [vmem:[#allocation5 + $0x788] sm:$0xff] }
 0x14c   :  { %v486_v52 = vld [vmem:[#allocation5 + $0x7a8] sm:$0xff] }
 0x14d   :  { %12268 = vmatpush1.bf16.msra.mxu0 %v16428_v3  ;;  %12492 = vmatpush1.bf16.msra.mxu1 %v16540_v4  ;;  %v434_v3 = vld [vmem:[#allocation5 + $0x608] sm:$0xff] }
 0x14e   :  { %12270 = vmatprep.subr.bf16.mxu0 %v16429_v5  ;;  %12494 = vmatprep.subr.bf16.mxu1 %v16541_v6  ;;  %v438_v4 = vld [vmem:[#allocation5 + $0x628] sm:$0xff]  ;;  %v16444_v5 = vcombine.low %v425_v57, %v429_v58  ;;  %v16556_v6 = vcombine.low %v426_v59, %v430_v60  ;;  %v489_v57 = vld [vmem:[#allocation5 + $0x7c0] sm:$0xff] }
 0x14f   :  { %v16557_v8 = vcombine.high %v434_v3, %v438_v4  ;;  %v493_v58 = vld [vmem:[#allocation5 + $0x7e0] sm:$0xff]  ;;  %v490_v59 = vld [vmem:[#allocation5 + $0x7c8] sm:$0xff] }
 0x150   :  { %1650 = vmatmul.mubr.f32.vlgmr.msra.gmra.mrb[0].mxu0 %v234_v12  ;;  %1934 = vmatmul.mubr.f32.vlgmr.msra.gmra.mrb[0].mxu1 %v234_v12  ;;  %v446_v12 = vld [vmem:[#allocation5 + $0x668] sm:$0xff] }
 0x151   :  { %12272 = vmatpush1.bf16.msra.mxu0 %v16430_v11  ;;  %12496 = vmatpush1.bf16.msra.mxu1 %v16542_v13  ;;  %v442_v11 = vld [vmem:[#allocation5 + $0x648] sm:$0xff]  ;;  %v16446_v13 = vcombine.low %v433_v1, %v437_v2  ;;  %v497_v1 = vld [vmem:[#allocation5 + $0x800] sm:$0xff] }
 0x152   :  { %12274 = vmatprep.subr.bf16.mxu0 %v16431_v14  ;;  %12498 = vmatprep.subr.bf16.mxu1 %v16543_v15  ;;  %v16558_v14 = vcombine.low %v434_v3, %v438_v4  ;;  %v16447_v15 = vcombine.high %v441_v9, %v445_v10  ;;  %v16559_v16 = vcombine.high %v442_v11, %v446_v12  ;;  %v494_v60 = vld [vmem:[#allocation5 + $0x7e8] sm:$0xff]  ;;  %v501_v2 = vld [vmem:[#allocation5 + $0x820] sm:$0xff] }
 0x153   :  { %1720 = vmatprep.mubr.f32.mxu0 %v237_v20  ;;  %2004 = vmatprep.mubr.f32.mxu1 %v237_v20  ;;  %v454_v20 = vld [vmem:[#allocation5 + $0x6a8] sm:$0xff] }
 0x154   :  { %v498_v3 = vld [vmem:[#allocation5 + $0x808] sm:$0xff] }
 0x155   :  { %12276 = vmatpush1.bf16.msra.mxu0 %v16432_v21  ;;  %12500 = vmatpush1.bf16.msra.mxu1 %v16544_v22  ;;  %v16448_v21 = vcombine.low %v441_v9, %v445_v10  ;;  %v16560_v22 = vcombine.low %v442_v11, %v446_v12  ;;  %v502_v4 = vld [vmem:[#allocation5 + $0x828] sm:$0xff]  ;;  %v505_v9 = vld [vmem:[#allocation5 + $0x840] sm:$0xff] }
 0x156   :  { %12278 = vmatprep.subr.bf16.mxu0 %v16433_v23  ;;  %12502 = vmatprep.subr.bf16.mxu1 %v16545_v24  ;;  %v16449_v23 = vcombine.high %v449_v17, %v453_v18  ;;  %v16561_v24 = vcombine.high %v450_v19, %v454_v20  ;;  %v509_v10 = vld [vmem:[#allocation5 + $0x860] sm:$0xff]  ;;  %v506_v11 = vld [vmem:[#allocation5 + $0x848] sm:$0xff] }
 0x157   :  { %v510_v12 = vld [vmem:[#allocation5 + $0x868] sm:$0xff] }
 0x159   :  { %12280 = vmatpush1.bf16.msra.mxu0 %v16434_v29  ;;  %12504 = vmatpush1.bf16.msra.mxu1 %v16546_v30  ;;  %v16450_v29 = vcombine.low %v449_v17, %v453_v18  ;;  %v16562_v30 = vcombine.low %v450_v19, %v454_v20  ;;  %v16575_v17 = vcombine.high %v506_v11, %v510_v12  ;;  %v513_v18 = vld [vmem:[#allocation5 + $0x880] sm:$0xff]  ;;  %v514_v20 = vld [vmem:[#allocation5 + $0x888] sm:$0xff] }
 0x15a   :  { %12282 = vmatprep.subr.bf16.mxu0 %v16435_v31  ;;  %12506 = vmatprep.subr.bf16.mxu1 %v16547_v32  ;;  %v16451_v31 = vcombine.high %v457_v25, %v461_v26  ;;  %v16563_v32 = vcombine.high %v458_v27, %v462_v28  ;;  %v517_v19 = vld [vmem:[#allocation5 + $0x8a0] sm:$0xff] }
 0x15d   :  { %12284 = vmatpush1.bf16.msra.mxu0 %v16436_v37  ;;  %12508 = vmatpush1.bf16.msra.mxu1 %v16548_v38  ;;  %v16452_v37 = vcombine.low %v457_v25, %v461_v26  ;;  %v16564_v38 = vcombine.low %v458_v27, %v462_v28  ;;  %v16465_v25 = vcombine.high %v513_v18, %v517_v19  ;;  %v521_v27 = vld [vmem:[#allocation5 + $0x8c0] sm:$0xff] }
 0x15e   :  { %12286 = vmatprep.subr.bf16.mxu0 %v16437_v39  ;;  %12510 = vmatprep.subr.bf16.mxu1 %v16549_v40  ;;  %v16453_v39 = vcombine.high %v465_v33, %v469_v34  ;;  %v16565_v40 = vcombine.high %v466_v35, %v470_v36  ;;  %v525_v28 = vld [vmem:[#allocation5 + $0x8e0] sm:$0xff] }
 0x161   :  { %12288 = vmatpush1.bf16.msra.mxu0 %v16438_v45  ;;  %12512 = vmatpush1.bf16.msra.mxu1 %v16550_v46  ;;  %v16454_v45 = vcombine.low %v465_v33, %v469_v34  ;;  %v16566_v46 = vcombine.low %v466_v35, %v470_v36  ;;  %v16467_v33 = vcombine.high %v521_v27, %v525_v28  ;;  %v529_v35 = vld [vmem:[#allocation5 + $0x900] sm:$0xff] }
 0x162   :  { %12290 = vmatprep.subr.bf16.mxu0 %v16439_v47  ;;  %12514 = vmatprep.subr.bf16.mxu1 %v16551_v48  ;;  %v16455_v47 = vcombine.high %v473_v41, %v477_v42  ;;  %v16567_v48 = vcombine.high %v474_v43, %v478_v44  ;;  %v533_v36 = vld [vmem:[#allocation5 + $0x920] sm:$0xff] }
 0x165   :  { %12292 = vmatpush1.bf16.msra.mxu0 %v16440_v53  ;;  %12516 = vmatpush1.bf16.msra.mxu1 %v16552_v54  ;;  %v16456_v53 = vcombine.low %v473_v41, %v477_v42  ;;  %v16568_v54 = vcombine.low %v474_v43, %v478_v44  ;;  %v16469_v41 = vcombine.high %v529_v35, %v533_v36  ;;  %v537_v43 = vld [vmem:[#allocation5 + $0x940] sm:$0xff] }
 0x166   :  { %12294 = vmatprep.subr.bf16.mxu0 %v16441_v55  ;;  %12518 = vmatprep.subr.bf16.mxu1 %v16553_v56  ;;  %v16457_v55 = vcombine.high %v481_v49, %v485_v50  ;;  %v16569_v56 = vcombine.high %v482_v51, %v486_v52  ;;  %v541_v44 = vld [vmem:[#allocation5 + $0x960] sm:$0xff] }
 0x169   :  { %12296 = vmatpush1.bf16.msra.mxu0 %v16442_v61  ;;  %12520 = vmatpush1.bf16.msra.mxu1 %v16554_v62  ;;  %v16458_v61 = vcombine.low %v481_v49, %v485_v50  ;;  %v16570_v62 = vcombine.low %v482_v51, %v486_v52  ;;  %v16471_v49 = vcombine.high %v537_v43, %v541_v44  ;;  %v545_v51 = vld [vmem:[#allocation5 + $0x980] sm:$0xff] }
 0x16a   :  { %12298 = vmatprep.subr.bf16.mxu0 %v16443_v63  ;;  %12522 = vmatprep.subr.bf16.mxu1 %v16555_v0  ;;  %v16459_v63 = vcombine.high %v489_v57, %v493_v58  ;;  %v16571_v0 = vcombine.high %v490_v59, %v494_v60  ;;  %v549_v52 = vld [vmem:[#allocation5 + $0x9a0] sm:$0xff] }
 0x16d   :  { %12300 = vmatpush1.bf16.msra.mxu0 %v16444_v5  ;;  %12524 = vmatpush1.bf16.msra.mxu1 %v16556_v6  ;;  %v16460_v5 = vcombine.low %v489_v57, %v493_v58  ;;  %v16572_v6 = vcombine.low %v490_v59, %v494_v60  ;;  %v16473_v57 = vcombine.high %v545_v51, %v549_v52  ;;  %v553_v59 = vld [vmem:[#allocation5 + $0x9c0] sm:$0xff] }
 0x16e   :  { %12302 = vmatprep.subr.bf16.mxu0 %v16445_v7  ;;  %12526 = vmatprep.subr.bf16.mxu1 %v16557_v8  ;;  %v16461_v7 = vcombine.high %v497_v1, %v501_v2  ;;  %v16573_v8 = vcombine.high %v498_v3, %v502_v4  ;;  %v557_v60 = vld [vmem:[#allocation5 + $0x9e0] sm:$0xff] }
 0x171   :  { %12304 = vmatpush1.bf16.msra.mxu0 %v16446_v13  ;;  %12528 = vmatpush1.bf16.msra.mxu1 %v16558_v14  ;;  %v16462_v13 = vcombine.low %v497_v1, %v501_v2  ;;  %v236_v14 = vld [vmem:[#allocation2 + $0x10] sm:$0xff]  ;;  %v16475_v1 = vcombine.high %v553_v59, %v557_v60 }
 0x172   :  { %12306 = vmatprep.subr.bf16.mxu0 %v16447_v15  ;;  %12530 = vmatprep.subr.bf16.mxu1 %v16559_v16  ;;  %v16574_v15 = vcombine.low %v498_v3, %v502_v4  ;;  %v16463_v16 = vcombine.high %v505_v9, %v509_v10  ;;  %v561_v3 = vld [vmem:[#allocation5 + $0xa00] sm:$0xff] }
 0x173   :  { %v565_v4 = vld [vmem:[#allocation5 + $0xa20] sm:$0xff] }
 0x175   :  { %12308 = vmatpush1.bf16.msra.mxu0 %v16448_v21  ;;  %12532 = vmatpush1.bf16.msra.mxu1 %v16560_v22  ;;  %v518_v21 = vld [vmem:[#allocation5 + $0x8a8] sm:$0xff]  ;;  %v239_v22 = vld [vmem:[#allocation2 + $0x28] sm:$0xff] }
 0x176   :  { %12310 = vmatprep.subr.bf16.mxu0 %v16449_v23  ;;  %12534 = vmatprep.subr.bf16.mxu1 %v16561_v24  ;;  %v16464_v23 = vcombine.low %v505_v9, %v509_v10  ;;  %v16576_v24 = vcombine.low %v506_v11, %v510_v12  ;;  %v16577_v26 = vcombine.high %v514_v20, %v518_v21  ;;  %v569_v11 = vld [vmem:[#allocation5 + $0xa40] sm:$0xff] }
 0x177   :  { %v16477_v9 = vcombine.high %v561_v3, %v565_v4  ;;  %v573_v12 = vld [vmem:[#allocation5 + $0xa60] sm:$0xff] }
 0x179   :  { %12312 = vmatpush1.bf16.msra.mxu0 %v16450_v29  ;;  %12536 = vmatpush1.bf16.msra.mxu1 %v16562_v30  ;;  %v522_v29 = vld [vmem:[#allocation5 + $0x8c8] sm:$0xff] }
 0x17a   :  { %12314 = vmatprep.subr.bf16.mxu0 %v16451_v31  ;;  %12538 = vmatprep.subr.bf16.mxu1 %v16563_v32  ;;  %v526_v30 = vld [vmem:[#allocation5 + $0x8e8] sm:$0xff]  ;;  %v16466_v31 = vcombine.low %v513_v18, %v517_v19  ;;  %v16578_v32 = vcombine.low %v514_v20, %v518_v21  ;;  %v577_v19 = vld [vmem:[#allocation5 + $0xa80] sm:$0xff] }
 0x17b   :  { %v16579_v34 = vcombine.high %v522_v29, %v526_v30  ;;  %v581_v20 = vld [vmem:[#allocation5 + $0xaa0] sm:$0xff]  ;;  %v578_v21 = vld [vmem:[#allocation5 + $0xa88] sm:$0xff] }
 0x17d   :  { %12316 = vmatpush1.bf16.msra.mxu0 %v16452_v37  ;;  %12540 = vmatpush1.bf16.msra.mxu1 %v16564_v38  ;;  %v530_v37 = vld [vmem:[#allocation5 + $0x908] sm:$0xff] }
 0x17e   :  { %12318 = vmatprep.subr.bf16.mxu0 %v16453_v39  ;;  %12542 = vmatprep.subr.bf16.mxu1 %v16565_v40  ;;  %v534_v38 = vld [vmem:[#allocation5 + $0x928] sm:$0xff]  ;;  %v16468_v39 = vcombine.low %v521_v27, %v525_v28  ;;  %v16580_v40 = vcombine.low %v522_v29, %v526_v30  ;;  %v585_v27 = vld [vmem:[#allocation5 + $0xac0] sm:$0xff] }
 0x17f   :  { %v16581_v42 = vcombine.high %v530_v37, %v534_v38  ;;  %v589_v28 = vld [vmem:[#allocation5 + $0xae0] sm:$0xff]  ;;  %v586_v29 = vld [vmem:[#allocation5 + $0xac8] sm:$0xff] }
 0x180   :  { %v590_v30 = vld [vmem:[#allocation5 + $0xae8] sm:$0xff] }
 0x181   :  { %12320 = vmatpush1.bf16.msra.mxu0 %v16454_v45  ;;  %12544 = vmatpush1.bf16.msra.mxu1 %v16566_v46  ;;  %v538_v45 = vld [vmem:[#allocation5 + $0x948] sm:$0xff] }
 0x182   :  { %12322 = vmatprep.subr.bf16.mxu0 %v16455_v47  ;;  %12546 = vmatprep.subr.bf16.mxu1 %v16567_v48  ;;  %v542_v46 = vld [vmem:[#allocation5 + $0x968] sm:$0xff]  ;;  %v16470_v47 = vcombine.low %v529_v35, %v533_v36  ;;  %v16582_v48 = vcombine.low %v530_v37, %v534_v38  ;;  %v593_v35 = vld [vmem:[#allocation5 + $0xb00] sm:$0xff] }
 0x183   :  { %v16583_v50 = vcombine.high %v538_v45, %v542_v46  ;;  %v597_v36 = vld [vmem:[#allocation5 + $0xb20] sm:$0xff]  ;;  %v594_v37 = vld [vmem:[#allocation5 + $0xb08] sm:$0xff] }
 0x184   :  { %v598_v38 = vld [vmem:[#allocation5 + $0xb28] sm:$0xff] }
 0x185   :  { %12324 = vmatpush1.bf16.msra.mxu0 %v16456_v53  ;;  %12548 = vmatpush1.bf16.msra.mxu1 %v16568_v54  ;;  %v546_v53 = vld [vmem:[#allocation5 + $0x988] sm:$0xff] }
 0x186   :  { %12326 = vmatprep.subr.bf16.mxu0 %v16457_v55  ;;  %12550 = vmatprep.subr.bf16.mxu1 %v16569_v56  ;;  %v550_v54 = vld [vmem:[#allocation5 + $0x9a8] sm:$0xff]  ;;  %v16472_v55 = vcombine.low %v537_v43, %v541_v44  ;;  %v16584_v56 = vcombine.low %v538_v45, %v542_v46  ;;  %v601_v43 = vld [vmem:[#allocation5 + $0xb40] sm:$0xff] }
 0x187   :  { %v16585_v58 = vcombine.high %v546_v53, %v550_v54  ;;  %v605_v44 = vld [vmem:[#allocation5 + $0xb60] sm:$0xff]  ;;  %v602_v45 = vld [vmem:[#allocation5 + $0xb48] sm:$0xff] }
 0x188   :  { %v606_v46 = vld [vmem:[#allocation5 + $0xb68] sm:$0xff] }
 0x189   :  { %12328 = vmatpush1.bf16.msra.mxu0 %v16458_v61  ;;  %12552 = vmatpush1.bf16.msra.mxu1 %v16570_v62  ;;  %v554_v61 = vld [vmem:[#allocation5 + $0x9c8] sm:$0xff] }
 0x18a   :  { %12330 = vmatprep.subr.bf16.mxu0 %v16459_v63  ;;  %12554 = vmatprep.subr.bf16.mxu1 %v16571_v0  ;;  %v558_v62 = vld [vmem:[#allocation5 + $0x9e8] sm:$0xff]  ;;  %v16474_v63 = vcombine.low %v545_v51, %v549_v52  ;;  %v16586_v0 = vcombine.low %v546_v53, %v550_v54  ;;  %v609_v51 = vld [vmem:[#allocation5 + $0xb80] sm:$0xff] }
 0x18b   :  { %v16587_v2 = vcombine.high %v554_v61, %v558_v62  ;;  %v613_v52 = vld [vmem:[#allocation5 + $0xba0] sm:$0xff]  ;;  %v610_v53 = vld [vmem:[#allocation5 + $0xb88] sm:$0xff] }
 0x18c   :  { %v614_v54 = vld [vmem:[#allocation5 + $0xba8] sm:$0xff] }
 0x18d   :  { %12332 = vmatpush1.bf16.msra.mxu0 %v16460_v5  ;;  %12556 = vmatpush1.bf16.msra.mxu1 %v16572_v6  ;;  %v562_v5 = vld [vmem:[#allocation5 + $0xa08] sm:$0xff] }
 0x18e   :  { %12334 = vmatprep.subr.bf16.mxu0 %v16461_v7  ;;  %12558 = vmatprep.subr.bf16.mxu1 %v16573_v8  ;;  %v566_v6 = vld [vmem:[#allocation5 + $0xa28] sm:$0xff]  ;;  %v16476_v7 = vcombine.low %v553_v59, %v557_v60  ;;  %v16588_v8 = vcombine.low %v554_v61, %v558_v62  ;;  %v617_v59 = vld [vmem:[#allocation5 + $0xbc0] sm:$0xff] }
 0x18f   :  { %v16589_v10 = vcombine.high %v562_v5, %v566_v6  ;;  %v621_v60 = vld [vmem:[#allocation5 + $0xbe0] sm:$0xff]  ;;  %v618_v61 = vld [vmem:[#allocation5 + $0xbc8] sm:$0xff] }
 0x190   :  { %1721 = vmatmul.mubr.f32.vlgmr.msra.gmra.mrb[0].mxu0 %v236_v14  ;;  %2005 = vmatmul.mubr.f32.vlgmr.msra.gmra.mrb[0].mxu1 %v236_v14  ;;  %v574_v14 = vld [vmem:[#allocation5 + $0xa68] sm:$0xff] }
 0x191   :  { %12336 = vmatpush1.bf16.msra.mxu0 %v16462_v13  ;;  %12560 = vmatpush1.bf16.msra.mxu1 %v16574_v15  ;;  %v570_v13 = vld [vmem:[#allocation5 + $0xa48] sm:$0xff]  ;;  %v16478_v15 = vcombine.low %v561_v3, %v565_v4  ;;  %v625_v3 = vld [vmem:[#allocation5 + $0xc00] sm:$0xff] }
 0x192   :  { %12338 = vmatprep.subr.bf16.mxu0 %v16463_v16  ;;  %12562 = vmatprep.subr.bf16.mxu1 %v16575_v17  ;;  %v16590_v16 = vcombine.low %v562_v5, %v566_v6  ;;  %v16479_v17 = vcombine.high %v569_v11, %v573_v12  ;;  %v16591_v18 = vcombine.high %v570_v13, %v574_v14  ;;  %v622_v62 = vld [vmem:[#allocation5 + $0xbe8] sm:$0xff]  ;;  %v629_v4 = vld [vmem:[#allocation5 + $0xc20] sm:$0xff] }
 0x193   :  { %1791 = vmatprep.mubr.f32.mxu0 %v239_v22  ;;  %2075 = vmatprep.mubr.f32.mxu1 %v239_v22  ;;  %v582_v22 = vld [vmem:[#allocation5 + $0xaa8] sm:$0xff] }
 0x194   :  { %v626_v5 = vld [vmem:[#allocation5 + $0xc08] sm:$0xff] }
 0x195   :  { %12340 = vmatpush1.bf16.msra.mxu0 %v16464_v23  ;;  %12564 = vmatpush1.bf16.msra.mxu1 %v16576_v24  ;;  %v16480_v23 = vcombine.low %v569_v11, %v573_v12  ;;  %v16592_v24 = vcombine.low %v570_v13, %v574_v14  ;;  %v630_v6 = vld [vmem:[#allocation5 + $0xc28] sm:$0xff]  ;;  %v633_v11 = vld [vmem:[#allocation5 + $0xc40] sm:$0xff] }
 0x196   :  { %12342 = vmatprep.subr.bf16.mxu0 %v16465_v25  ;;  %12566 = vmatprep.subr.bf16.mxu1 %v16577_v26  ;;  %v16481_v25 = vcombine.high %v577_v19, %v581_v20  ;;  %v16593_v26 = vcombine.high %v578_v21, %v582_v22  ;;  %v637_v12 = vld [vmem:[#allocation5 + $0xc60] sm:$0xff]  ;;  %v634_v13 = vld [vmem:[#allocation5 + $0xc48] sm:$0xff] }
 0x197   :  { %v638_v14 = vld [vmem:[#allocation5 + $0xc68] sm:$0xff] }
 0x199   :  { %12344 = vmatpush1.bf16.msra.mxu0 %v16466_v31  ;;  %12568 = vmatpush1.bf16.msra.mxu1 %v16578_v32  ;;  %v16482_v31 = vcombine.low %v577_v19, %v581_v20  ;;  %v16594_v32 = vcombine.low %v578_v21, %v582_v22  ;;  %v16607_v19 = vcombine.high %v634_v13, %v638_v14  ;;  %v641_v20 = vld [vmem:[#allocation5 + $0xc80] sm:$0xff]  ;;  %v642_v22 = vld [vmem:[#allocation5 + $0xc88] sm:$0xff] }
 0x19a   :  { %12346 = vmatprep.subr.bf16.mxu0 %v16467_v33  ;;  %12570 = vmatprep.subr.bf16.mxu1 %v16579_v34  ;;  %v16483_v33 = vcombine.high %v585_v27, %v589_v28  ;;  %v16595_v34 = vcombine.high %v586_v29, %v590_v30  ;;  %v645_v21 = vld [vmem:[#allocation5 + $0xca0] sm:$0xff] }
 0x19d   :  { %12348 = vmatpush1.bf16.msra.mxu0 %v16468_v39  ;;  %12572 = vmatpush1.bf16.msra.mxu1 %v16580_v40  ;;  %v16484_v39 = vcombine.low %v585_v27, %v589_v28  ;;  %v16596_v40 = vcombine.low %v586_v29, %v590_v30  ;;  %v649_v28 = vld [vmem:[#allocation5 + $0xcc0] sm:$0xff]  ;;  %v18808_v30 = vmov 0.0  }
 0x19e   :  { %12350 = vmatprep.subr.bf16.mxu0 %v16469_v41  ;;  %12574 = vmatprep.subr.bf16.mxu1 %v16581_v42  ;;  %v16485_v41 = vcombine.high %v593_v35, %v597_v36  ;;  %v16597_v42 = vcombine.high %v594_v37, %v598_v38  ;;  %v653_v29 = vld [vmem:[#allocation5 + $0xce0] sm:$0xff] }
 0x1a1   :  { %12352 = vmatpush1.bf16.msra.mxu0 %v16470_v47  ;;  %12576 = vmatpush1.bf16.msra.mxu1 %v16582_v48  ;;  %v16486_v47 = vcombine.low %v593_v35, %v597_v36  ;;  %v16598_v48 = vcombine.low %v594_v37, %v598_v38  ;;  %v16499_v35 = vcombine.high %v649_v28, %v653_v29  ;;  %v657_v37 = vld [vmem:[#allocation5 + $0xd00] sm:$0xff] }
 0x1a2   :  { %12354 = vmatprep.subr.bf16.mxu0 %v16471_v49  ;;  %12578 = vmatprep.subr.bf16.mxu1 %v16583_v50  ;;  %v16487_v49 = vcombine.high %v601_v43, %v605_v44  ;;  %v16599_v50 = vcombine.high %v602_v45, %v606_v46  ;;  %v661_v38 = vld [vmem:[#allocation5 + $0xd20] sm:$0xff] }
 0x1a5   :  { %12356 = vmatpush1.bf16.msra.mxu0 %v16472_v55  ;;  %12580 = vmatpush1.bf16.msra.mxu1 %v16584_v56  ;;  %v16488_v55 = vcombine.low %v601_v43, %v605_v44  ;;  %v16600_v56 = vcombine.low %v602_v45, %v606_v46  ;;  %v16501_v43 = vcombine.high %v657_v37, %v661_v38  ;;  %v665_v45 = vld [vmem:[#allocation5 + $0xd40] sm:$0xff] }
 0x1a6   :  { %12358 = vmatprep.subr.bf16.mxu0 %v16473_v57  ;;  %12582 = vmatprep.subr.bf16.mxu1 %v16585_v58  ;;  %v16489_v57 = vcombine.high %v609_v51, %v613_v52  ;;  %v16601_v58 = vcombine.high %v610_v53, %v614_v54  ;;  %v669_v46 = vld [vmem:[#allocation5 + $0xd60] sm:$0xff] }
 0x1a9   :  { %12360 = vmatpush1.bf16.msra.mxu0 %v16474_v63  ;;  %12584 = vmatpush1.bf16.msra.mxu1 %v16586_v0  ;;  %v16490_v63 = vcombine.low %v609_v51, %v613_v52  ;;  %v16602_v0 = vcombine.low %v610_v53, %v614_v54  ;;  %v16503_v51 = vcombine.high %v665_v45, %v669_v46  ;;  %v673_v53 = vld [vmem:[#allocation5 + $0xd80] sm:$0xff] }
 0x1aa   :  { %12362 = vmatprep.subr.bf16.mxu0 %v16475_v1  ;;  %12586 = vmatprep.subr.bf16.mxu1 %v16587_v2  ;;  %v16491_v1 = vcombine.high %v617_v59, %v621_v60  ;;  %v16603_v2 = vcombine.high %v618_v61, %v622_v62  ;;  %v677_v54 = vld [vmem:[#allocation5 + $0xda0] sm:$0xff] }
 0x1ad   :  { %12364 = vmatpush1.bf16.msra.mxu0 %v16476_v7  ;;  %12588 = vmatpush1.bf16.msra.mxu1 %v16588_v8  ;;  %v16492_v7 = vcombine.low %v617_v59, %v621_v60  ;;  %v16604_v8 = vcombine.low %v618_v61, %v622_v62  ;;  %v16505_v59 = vcombine.high %v673_v53, %v677_v54  ;;  %v681_v61 = vld [vmem:[#allocation5 + $0xdc0] sm:$0xff] }
 0x1ae   :  { %12366 = vmatprep.subr.bf16.mxu0 %v16477_v9  ;;  %12590 = vmatprep.subr.bf16.mxu1 %v16589_v10  ;;  %v16493_v9 = vcombine.high %v625_v3, %v629_v4  ;;  %v16605_v10 = vcombine.high %v626_v5, %v630_v6  ;;  %v685_v62 = vld [vmem:[#allocation5 + $0xde0] sm:$0xff] }
 0x1b1   :  { %12368 = vmatpush1.bf16.msra.mxu0 %v16478_v15  ;;  %12592 = vmatpush1.bf16.msra.mxu1 %v16590_v16  ;;  %v16494_v15 = vcombine.low %v625_v3, %v629_v4  ;;  %v238_v16 = vld [vmem:[#allocation2 + $0x20] sm:$0xff]  ;;  %v16507_v3 = vcombine.high %v681_v61, %v685_v62 }
 0x1b2   :  { %12370 = vmatprep.subr.bf16.mxu0 %v16479_v17  ;;  %12594 = vmatprep.subr.bf16.mxu1 %v16591_v18  ;;  %v16606_v17 = vcombine.low %v626_v5, %v630_v6  ;;  %v16495_v18 = vcombine.high %v633_v11, %v637_v12  ;;  %v243_v5 = vld [vmem:[#allocation5 + $0x10] sm:$0xff] }
 0x1b3   :  { %v247_v6 = vld [vmem:[#allocation5 + $0x30] sm:$0xff] }
 0x1b5   :  { %12372 = vmatpush1.bf16.msra.mxu0 %v16480_v23  ;;  %12596 = vmatpush1.bf16.msra.mxu1 %v16592_v24  ;;  %v646_v23 = vld [vmem:[#allocation5 + $0xca8] sm:$0xff]  ;;  %v16496_v24 = vcombine.low %v633_v11, %v637_v12  ;;  %v16621_v11 = vcombine.high %v243_v5, %v247_v6 }
 0x1b6   :  { %12374 = vmatprep.subr.bf16.mxu0 %v16481_v25  ;;  %12598 = vmatprep.subr.bf16.mxu1 %v16593_v26  ;;  %v16608_v25 = vcombine.low %v634_v13, %v638_v14  ;;  %v16497_v26 = vcombine.high %v641_v20, %v645_v21  ;;  %v16609_v27 = vcombine.high %v642_v22, %v646_v23  ;;  %v251_v13 = vld [vmem:[#allocation5 + $0x50] sm:$0xff] }
 0x1b7   :  { %v255_v14 = vld [vmem:[#allocation5 + $0x70] sm:$0xff] }
 0x1b9   :  { %12376 = vmatpush1.bf16.msra.mxu0 %v16482_v31  ;;  %12600 = vmatpush1.bf16.msra.mxu1 %v16594_v32  ;;  %v650_v31 = vld [vmem:[#allocation5 + $0xcc8] sm:$0xff] }
 0x1ba   :  { %12378 = vmatprep.subr.bf16.mxu0 %v16483_v33  ;;  %12602 = vmatprep.subr.bf16.mxu1 %v16595_v34  ;;  %v654_v32 = vld [vmem:[#allocation5 + $0xce8] sm:$0xff]  ;;  %v16498_v33 = vcombine.low %v641_v20, %v645_v21  ;;  %v16610_v34 = vcombine.low %v642_v22, %v646_v23  ;;  %v16623_v20 = vcombine.high %v251_v13, %v255_v14  ;;  %v259_v22 = vld [vmem:[#allocation5 + $0x90] sm:$0xff] }
 0x1bb   :  { %v16611_v36 = vcombine.high %v650_v31, %v654_v32  ;;  %v263_v23 = vld [vmem:[#allocation5 + $0xb0] sm:$0xff] }
 0x1bd   :  { %12380 = vmatpush1.bf16.msra.mxu0 %v16484_v39  ;;  %12604 = vmatpush1.bf16.msra.mxu1 %v16596_v40  ;;  %v658_v39 = vld [vmem:[#allocation5 + $0xd08] sm:$0xff] }
 0x1be   :  { %12382 = vmatprep.subr.bf16.mxu0 %v16485_v41  ;;  %12606 = vmatprep.subr.bf16.mxu1 %v16597_v42  ;;  %v662_v40 = vld [vmem:[#allocation5 + $0xd28] sm:$0xff]  ;;  %v16500_v41 = vcombine.low %v649_v28, %v653_v29  ;;  %v16612_v42 = vcombine.low %v650_v31, %v654_v32  ;;  %v16625_v28 = vcombine.high %v259_v22, %v263_v23  ;;  %v267_v31 = vld [vmem:[#allocation5 + $0xd0] sm:$0xff] }
 0x1bf   :  { %v16613_v44 = vcombine.high %v658_v39, %v662_v40  ;;  %v271_v32 = vld [vmem:[#allocation5 + $0xf0] sm:$0xff] }
 0x1c1   :  { %12384 = vmatpush1.bf16.msra.mxu0 %v16486_v47  ;;  %12608 = vmatpush1.bf16.msra.mxu1 %v16598_v48  ;;  %v666_v47 = vld [vmem:[#allocation5 + $0xd48] sm:$0xff] }
 0x1c2   :  { %12386 = vmatprep.subr.bf16.mxu0 %v16487_v49  ;;  %12610 = vmatprep.subr.bf16.mxu1 %v16599_v50  ;;  %v670_v48 = vld [vmem:[#allocation5 + $0xd68] sm:$0xff]  ;;  %v16502_v49 = vcombine.low %v657_v37, %v661_v38  ;;  %v16614_v50 = vcombine.low %v658_v39, %v662_v40  ;;  %v16627_v38 = vcombine.high %v267_v31, %v271_v32  ;;  %v275_v40 = vld [vmem:[#allocation5 + $0x110] sm:$0xff] }
 0x1c3   :  { %v16615_v52 = vcombine.high %v666_v47, %v670_v48 }
 0x1c5   :  { %12388 = vmatpush1.bf16.msra.mxu0 %v16488_v55  ;;  %12612 = vmatpush1.bf16.msra.mxu1 %v16600_v56  ;;  %v674_v55 = vld [vmem:[#allocation5 + $0xd88] sm:$0xff] }
 0x1c6   :  { %12390 = vmatprep.subr.bf16.mxu0 %v16489_v57  ;;  %12614 = vmatprep.subr.bf16.mxu1 %v16601_v58  ;;  %v678_v56 = vld [vmem:[#allocation5 + $0xda8] sm:$0xff]  ;;  %v16504_v57 = vcombine.low %v665_v45, %v669_v46  ;;  %v16616_v58 = vcombine.low %v666_v47, %v670_v48  ;;  %v283_v48 = vld [vmem:[#allocation5 + $0x150] sm:$0xff] }
 0x1c7   :  { %v16617_v60 = vcombine.high %v674_v55, %v678_v56 }
 0x1c9   :  { %12392 = vmatpush1.bf16.msra.mxu0 %v16490_v63  ;;  %12616 = vmatpush1.bf16.msra.mxu1 %v16602_v0  ;;  %v682_v63 = vld [vmem:[#allocation5 + $0xdc8] sm:$0xff] }
 0x1ca   :  { %12394 = vmatprep.subr.bf16.mxu0 %v16491_v1  ;;  %12618 = vmatprep.subr.bf16.mxu1 %v16603_v2  ;;  %v686_v0 = vld [vmem:[#allocation5 + $0xde8] sm:$0xff]  ;;  %v16506_v1 = vcombine.low %v673_v53, %v677_v54  ;;  %v16618_v2 = vcombine.low %v674_v55, %v678_v56  ;;  %v291_v56 = vld [vmem:[#allocation5 + $0x190] sm:$0xff] }
 0x1cb   :  { %v16619_v4 = vcombine.high %v682_v63, %v686_v0 }
 0x1cd   :  { %12396 = vmatpush1.bf16.msra.mxu0 %v16492_v7  ;;  %12620 = vmatpush1.bf16.msra.mxu1 %v16604_v8  ;;  %v244_v7 = vld [vmem:[#allocation5 + $0x18] sm:$0xff] }
 0x1ce   :  { %12398 = vmatprep.subr.bf16.mxu0 %v16493_v9  ;;  %12622 = vmatprep.subr.bf16.mxu1 %v16605_v10  ;;  %v248_v8 = vld [vmem:[#allocation5 + $0x38] sm:$0xff]  ;;  %v16508_v9 = vcombine.low %v681_v61, %v685_v62  ;;  %v16620_v10 = vcombine.low %v682_v63, %v686_v0  ;;  %v299_v0 = vld [vmem:[#allocation5 + $0x1d0] sm:$0xff] }
 0x1cf   :  { %v16733_v12 = vcombine.high %v244_v7, %v248_v8 }
 0x1d0   :  { %1792 = vmatmul.mubr.f32.vlgmr.msra.gmra.mrb[0].mxu0 %v238_v16  ;;  %2076 = vmatmul.mubr.f32.vlgmr.msra.gmra.mrb[0].mxu1 %v238_v16  ;;  %v256_v16 = vld [vmem:[#allocation5 + $0x78] sm:$0xff] }
 0x1d1   :  { %12400 = vmatpush1.bf16.msra.mxu0 %v16494_v15  ;;  %12624 = vmatpush1.bf16.msra.mxu1 %v16606_v17  ;;  %v252_v15 = vld [vmem:[#allocation5 + $0x58] sm:$0xff] }
 0x1d2   :  { %12402 = vmatprep.subr.bf16.mxu0 %v16495_v18  ;;  %12626 = vmatprep.subr.bf16.mxu1 %v16607_v19  ;;  %v240_v17 = vld [vmem:[#allocation2 + $0x30] sm:$0xff]  ;;  %v16622_v18 = vcombine.low %v243_v5, %v247_v6  ;;  %v16734_v19 = vcombine.low %v244_v7, %v248_v8  ;;  %v16735_v21 = vcombine.high %v252_v15, %v256_v16  ;;  %v307_v8 = vld [vmem:[#allocation5 + $0x210] sm:$0xff] }
 0x1d3   :  { %1862 = vmatprep.mubr.f32.mxu0 %v18808_v30  ;;  %2146 = vmatprep.mubr.f32.mxu1 %v18808_v30 }
 0x1d5   :  { %12404 = vmatpush1.bf16.msra.mxu0 %v16496_v24  ;;  %12628 = vmatpush1.bf16.msra.mxu1 %v16608_v25  ;;  %v260_v24 = vld [vmem:[#allocation5 + $0x98] sm:$0xff] }
 0x1d6   :  { %12406 = vmatprep.subr.bf16.mxu0 %v16497_v26  ;;  %12630 = vmatprep.subr.bf16.mxu1 %v16609_v27  ;;  %v264_v25 = vld [vmem:[#allocation5 + $0xb8] sm:$0xff]  ;;  %v16624_v26 = vcombine.low %v251_v13, %v255_v14  ;;  %v16736_v27 = vcombine.low %v252_v15, %v256_v16  ;;  %v315_v16 = vld [vmem:[#allocation5 + $0x250] sm:$0xff] }
 0x1d7   :  { %v16737_v29 = vcombine.high %v260_v24, %v264_v25  ;;  %v16738_v37 = vcombine.low %v260_v24, %v264_v25  ;;  %v323_v24 = vld [vmem:[#allocation5 + $0x290] sm:$0xff] }
 0x1d8   :  { %v327_v25 = vld [vmem:[#allocation5 + $0x2b0] sm:$0xff] }
 0x1d9   :  { %12408 = vmatpush1.bf16.msra.mxu0 %v16498_v33  ;;  %12632 = vmatpush1.bf16.msra.mxu1 %v16610_v34  ;;  %v18406_v33 = vld [vmem:[#allocation2 + $0x8] sm:$0xff]  ;;  %v268_v34 = vld [vmem:[#allocation5 + $0xd8] sm:$0xff] }
 0x1da   :  { %12410 = vmatprep.subr.bf16.mxu0 %v16499_v35  ;;  %12634 = vmatprep.subr.bf16.mxu1 %v16611_v36  ;;  %v272_v35 = vld [vmem:[#allocation5 + $0xf8] sm:$0xff]  ;;  %v16626_v36 = vcombine.low %v259_v22, %v263_v23 }
 0x1db   :  { %v16739_v39 = vcombine.high %v268_v34, %v272_v35  ;;  %v16740_v45 = vcombine.low %v268_v34, %v272_v35  ;;  %v335_v34 = vld [vmem:[#allocation5 + $0x2f0] sm:$0xff]  ;;  %v332_v35 = vld [vmem:[#allocation5 + $0x2d8] sm:$0xff] }
 0x1dd   :  { %12412 = vmatpush1.bf16.msra.mxu0 %v16500_v41  ;;  %12636 = vmatpush1.bf16.msra.mxu1 %v16612_v42  ;;  %v279_v41 = vld [vmem:[#allocation5 + $0x130] sm:$0xff]  ;;  %v276_v42 = vld [vmem:[#allocation5 + $0x118] sm:$0xff] }
 0x1de   :  { %12414 = vmatprep.subr.bf16.mxu0 %v16501_v43  ;;  %12638 = vmatprep.subr.bf16.mxu1 %v16613_v44  ;;  %v280_v43 = vld [vmem:[#allocation5 + $0x138] sm:$0xff]  ;;  %v16628_v44 = vcombine.low %v267_v31, %v271_v32  ;;  %v16629_v46 = vcombine.high %v275_v40, %v279_v41  ;;  %v16641_v31 = vcombine.high %v323_v24, %v327_v25 }
 0x1df   :  { %v16741_v47 = vcombine.high %v276_v42, %v280_v43  ;;  %v16742_v53 = vcombine.low %v276_v42, %v280_v43  ;;  %v343_v42 = vld [vmem:[#allocation5 + $0x330] sm:$0xff]  ;;  %v340_v43 = vld [vmem:[#allocation5 + $0x318] sm:$0xff] }
 0x1e1   :  { %12416 = vmatpush1.bf16.msra.mxu0 %v16502_v49  ;;  %12640 = vmatpush1.bf16.msra.mxu1 %v16614_v50  ;;  %v287_v49 = vld [vmem:[#allocation5 + $0x170] sm:$0xff]  ;;  %v284_v50 = vld [vmem:[#allocation5 + $0x158] sm:$0xff] }
 0x1e2   :  { %12418 = vmatprep.subr.bf16.mxu0 %v16503_v51  ;;  %12642 = vmatprep.subr.bf16.mxu1 %v16615_v52  ;;  %v288_v51 = vld [vmem:[#allocation5 + $0x178] sm:$0xff]  ;;  %v16630_v52 = vcombine.low %v275_v40, %v279_v41  ;;  %v16631_v54 = vcombine.high %v283_v48, %v287_v49  ;;  %v339_v41 = vld [vmem:[#allocation5 + $0x310] sm:$0xff] }
 0x1e3   :  { %v16743_v55 = vcombine.high %v284_v50, %v288_v51  ;;  %v16744_v61 = vcombine.low %v284_v50, %v288_v51  ;;  %v351_v50 = vld [vmem:[#allocation5 + $0x370] sm:$0xff]  ;;  %v348_v51 = vld [vmem:[#allocation5 + $0x358] sm:$0xff] }
 0x1e5   :  { %12420 = vmatpush1.bf16.msra.mxu0 %v16504_v57  ;;  %12644 = vmatpush1.bf16.msra.mxu1 %v16616_v58  ;;  %v295_v57 = vld [vmem:[#allocation5 + $0x1b0] sm:$0xff]  ;;  %v292_v58 = vld [vmem:[#allocation5 + $0x198] sm:$0xff] }
 0x1e6   :  { %12422 = vmatprep.subr.bf16.mxu0 %v16505_v59  ;;  %12646 = vmatprep.subr.bf16.mxu1 %v16617_v60  ;;  %v296_v59 = vld [vmem:[#allocation5 + $0x1b8] sm:$0xff]  ;;  %v16632_v60 = vcombine.low %v283_v48, %v287_v49  ;;  %v16633_v62 = vcombine.high %v291_v56, %v295_v57  ;;  %v347_v49 = vld [vmem:[#allocation5 + $0x350] sm:$0xff] }
 0x1e7   :  { %v16745_v63 = vcombine.high %v292_v58, %v296_v59  ;;  %v16746_v5 = vcombine.low %v292_v58, %v296_v59  ;;  %v359_v58 = vld [vmem:[#allocation5 + $0x3b0] sm:$0xff]  ;;  %v356_v59 = vld [vmem:[#allocation5 + $0x398] sm:$0xff] }
 0x1e9   :  { %12424 = vmatpush1.bf16.msra.mxu0 %v16506_v1  ;;  %12648 = vmatpush1.bf16.msra.mxu1 %v16618_v2  ;;  %v303_v1 = vld [vmem:[#allocation5 + $0x1f0] sm:$0xff]  ;;  %v300_v2 = vld [vmem:[#allocation5 + $0x1d8] sm:$0xff] }
 0x1ea   :  { %12426 = vmatprep.subr.bf16.mxu0 %v16507_v3  ;;  %12650 = vmatprep.subr.bf16.mxu1 %v16619_v4  ;;  %v304_v3 = vld [vmem:[#allocation5 + $0x1f8] sm:$0xff]  ;;  %v16634_v4 = vcombine.low %v291_v56, %v295_v57  ;;  %v16635_v6 = vcombine.high %v299_v0, %v303_v1  ;;  %v355_v57 = vld [vmem:[#allocation5 + $0x390] sm:$0xff] }
 0x1eb   :  { %v16747_v7 = vcombine.high %v300_v2, %v304_v3  ;;  %v16748_v13 = vcombine.low %v300_v2, %v304_v3  ;;  %v367_v2 = vld [vmem:[#allocation5 + $0x3f0] sm:$0xff]  ;;  %v364_v3 = vld [vmem:[#allocation5 + $0x3d8] sm:$0xff] }
 0x1ed   :  { %12428 = vmatpush1.bf16.msra.mxu0 %v16508_v9  ;;  %12652 = vmatpush1.bf16.msra.mxu1 %v16620_v10  ;;  %v311_v9 = vld [vmem:[#allocation5 + $0x230] sm:$0xff]  ;;  %v308_v10 = vld [vmem:[#allocation5 + $0x218] sm:$0xff] }
 0x1ee   :  { %12654 = vmatprep.subr.bf16.mxu0 %v16621_v11  ;;  %12878 = vmatprep.subr.bf16.mxu1 %v16733_v12  ;;  %v312_v11 = vld [vmem:[#allocation5 + $0x238] sm:$0xff]  ;;  %v16636_v12 = vcombine.low %v299_v0, %v303_v1  ;;  %v16637_v14 = vcombine.high %v307_v8, %v311_v9  ;;  %v363_v1 = vld [vmem:[#allocation5 + $0x3d0] sm:$0xff] }
 0x1ef   :  { %v16749_v15 = vcombine.high %v308_v10, %v312_v11 }
 0x1f0   :  { %1863 = vmatmul.mubr.f32.vlgmr.msra.gmra.mrb[0].mxu0 %v240_v17  ;;  %2147 = vmatmul.mubr.f32.vlgmr.msra.gmra.mrb[0].mxu1 %v240_v17  ;;  %v319_v17 = vld [vmem:[#allocation5 + $0x270] sm:$0xff] }
 0x1f1   :  { %12656 = vmatpush1.bf16.msra.mxu0 %v16622_v18  ;;  %12880 = vmatpush1.bf16.msra.mxu1 %v16734_v19  ;;  %v316_v18 = vld [vmem:[#allocation5 + $0x258] sm:$0xff]  ;;  %v16639_v22 = vcombine.high %v315_v16, %v319_v17 }
 0x1f2   :  { %12658 = vmatprep.subr.bf16.mxu0 %v16623_v20  ;;  %12882 = vmatprep.subr.bf16.mxu1 %v16735_v21  ;;  %v320_v19 = vld [vmem:[#allocation5 + $0x278] sm:$0xff]  ;;  %v16638_v20 = vcombine.low %v307_v8, %v311_v9  ;;  %v16750_v21 = vcombine.low %v308_v10, %v312_v11  ;;  %v371_v9 = vld [vmem:[#allocation5 + $0x410] sm:$0xff] }
 0x1f3   :  { %2217 = vmatprep.mubr.f32.mxu0 %v18406_v33  ;;  %2501 = vmatprep.mubr.f32.mxu1 %v18406_v33  ;;  %v16751_v23 = vcombine.high %v316_v18, %v320_v19  ;;  %v331_v33 = vld [vmem:[#allocation5 + $0x2d0] sm:$0xff]  ;;  %v372_v11 = vld [vmem:[#allocation5 + $0x418] sm:$0xff] }
 0x1f4   :  { %v375_v10 = vld [vmem:[#allocation5 + $0x430] sm:$0xff] }
 0x1f5   :  { %12660 = vmatpush1.bf16.msra.mxu0 %v16624_v26  ;;  %12884 = vmatpush1.bf16.msra.mxu1 %v16736_v27  ;;  %v324_v26 = vld [vmem:[#allocation5 + $0x298] sm:$0xff] }
 0x1f6   :  { %12662 = vmatprep.subr.bf16.mxu0 %v16625_v28  ;;  %12886 = vmatprep.subr.bf16.mxu1 %v16737_v29  ;;  %v328_v27 = vld [vmem:[#allocation5 + $0x2b8] sm:$0xff]  ;;  %v16640_v28 = vcombine.low %v315_v16, %v319_v17  ;;  %v16752_v29 = vcombine.low %v316_v18, %v320_v19  ;;  %v379_v17 = vld [vmem:[#allocation5 + $0x450] sm:$0xff] }
 0x1f7   :  { %v16753_v32 = vcombine.high %v324_v26, %v328_v27  ;;  %v383_v18 = vld [vmem:[#allocation5 + $0x470] sm:$0xff]  ;;  %v380_v19 = vld [vmem:[#allocation5 + $0x458] sm:$0xff] }
 0x1f9   :  { %12664 = vmatpush1.bf16.msra.mxu0 %v16626_v36  ;;  %12888 = vmatpush1.bf16.msra.mxu1 %v16738_v37  ;;  %v336_v36 = vld [vmem:[#allocation5 + $0x2f8] sm:$0xff]  ;;  %v16642_v37 = vcombine.low %v323_v24, %v327_v25  ;;  %v387_v25 = vld [vmem:[#allocation5 + $0x490] sm:$0xff] }
 0x1fa   :  { %12666 = vmatprep.subr.bf16.mxu0 %v16627_v38  ;;  %12890 = vmatprep.subr.bf16.mxu1 %v16739_v39  ;;  %v16754_v38 = vcombine.low %v324_v26, %v328_v27  ;;  %v16643_v39 = vcombine.high %v331_v33, %v335_v34  ;;  %v16755_v40 = vcombine.high %v332_v35, %v336_v36  ;;  %v391_v26 = vld [vmem:[#allocation5 + $0x4b0] sm:$0xff]  ;;  %v18407_v27 = vld [vmem:[#allocation2] sm:$0xff] }
 0x1fd   :  { %12668 = vmatpush1.bf16.msra.mxu0 %v16628_v44  ;;  %12892 = vmatpush1.bf16.msra.mxu1 %v16740_v45  ;;  %v344_v44 = vld [vmem:[#allocation5 + $0x338] sm:$0xff]  ;;  %v16644_v45 = vcombine.low %v331_v33, %v335_v34  ;;  %v16657_v33 = vcombine.high %v387_v25, %v391_v26 }
 0x1fe   :  { %12670 = vmatprep.subr.bf16.mxu0 %v16629_v46  ;;  %12894 = vmatprep.subr.bf16.mxu1 %v16741_v47  ;;  %v16756_v46 = vcombine.low %v332_v35, %v336_v36  ;;  %v16645_v47 = vcombine.high %v339_v41, %v343_v42  ;;  %v16757_v48 = vcombine.high %v340_v43, %v344_v44  ;;  %v395_v35 = vld [vmem:[#allocation5 + $0x4d0] sm:$0xff] }
 0x1ff   :  { %v399_v36 = vld [vmem:[#allocation5 + $0x4f0] sm:$0xff] }
 0x201   :  { %12672 = vmatpush1.bf16.msra.mxu0 %v16630_v52  ;;  %12896 = vmatpush1.bf16.msra.mxu1 %v16742_v53  ;;  %v352_v52 = vld [vmem:[#allocation5 + $0x378] sm:$0xff]  ;;  %v16646_v53 = vcombine.low %v339_v41, %v343_v42  ;;  %v16659_v42 = vcombine.high %v395_v35, %v399_v36 }
 0x202   :  { %12674 = vmatprep.subr.bf16.mxu0 %v16631_v54  ;;  %12898 = vmatprep.subr.bf16.mxu1 %v16743_v55  ;;  %v16758_v54 = vcombine.low %v340_v43, %v344_v44  ;;  %v16647_v55 = vcombine.high %v347_v49, %v351_v50  ;;  %v16759_v56 = vcombine.high %v348_v51, %v352_v52  ;;  %v403_v44 = vld [vmem:[#allocation5 + $0x510] sm:$0xff] }
 0x205   :  { %12676 = vmatpush1.bf16.msra.mxu0 %v16632_v60  ;;  %12900 = vmatpush1.bf16.msra.mxu1 %v16744_v61  ;;  %v360_v60 = vld [vmem:[#allocation5 + $0x3b8] sm:$0xff]  ;;  %v16648_v61 = vcombine.low %v347_v49, %v351_v50 }
 0x206   :  { %12678 = vmatprep.subr.bf16.mxu0 %v16633_v62  ;;  %12902 = vmatprep.subr.bf16.mxu1 %v16745_v63  ;;  %v16760_v62 = vcombine.low %v348_v51, %v352_v52  ;;  %v16649_v63 = vcombine.high %v355_v57, %v359_v58  ;;  %v16761_v0 = vcombine.high %v356_v59, %v360_v60  ;;  %v411_v52 = vld [vmem:[#allocation5 + $0x550] sm:$0xff] }
 0x209   :  { %12680 = vmatpush1.bf16.msra.mxu0 %v16634_v4  ;;  %12904 = vmatpush1.bf16.msra.mxu1 %v16746_v5  ;;  %v368_v4 = vld [vmem:[#allocation5 + $0x3f8] sm:$0xff]  ;;  %v16650_v5 = vcombine.low %v355_v57, %v359_v58 }
 0x20a   :  { %12682 = vmatprep.subr.bf16.mxu0 %v16635_v6  ;;  %12906 = vmatprep.subr.bf16.mxu1 %v16747_v7  ;;  %v16762_v6 = vcombine.low %v356_v59, %v360_v60  ;;  %v16651_v7 = vcombine.high %v363_v1, %v367_v2  ;;  %v16763_v8 = vcombine.high %v364_v3, %v368_v4  ;;  %v419_v60 = vld [vmem:[#allocation5 + $0x590] sm:$0xff] }
 0x20d   :  { %12684 = vmatpush1.bf16.msra.mxu0 %v16636_v12  ;;  %12908 = vmatpush1.bf16.msra.mxu1 %v16748_v13  ;;  %v376_v12 = vld [vmem:[#allocation5 + $0x438] sm:$0xff]  ;;  %v16652_v13 = vcombine.low %v363_v1, %v367_v2 }
 0x20e   :  { %12686 = vmatprep.subr.bf16.mxu0 %v16637_v14  ;;  %12910 = vmatprep.subr.bf16.mxu1 %v16749_v15  ;;  %v16764_v14 = vcombine.low %v364_v3, %v368_v4  ;;  %v16653_v15 = vcombine.high %v371_v9, %v375_v10  ;;  %v16765_v16 = vcombine.high %v372_v11, %v376_v12  ;;  %v427_v4 = vld [vmem:[#allocation5 + $0x5d0] sm:$0xff] }
 0x211   :  { %12688 = vmatpush1.bf16.msra.mxu0 %v16638_v20  ;;  %12912 = vmatpush1.bf16.msra.mxu1 %v16750_v21  ;;  %v384_v20 = vld [vmem:[#allocation5 + $0x478] sm:$0xff]  ;;  %v16654_v21 = vcombine.low %v371_v9, %v375_v10 }
 0x212   :  { %12690 = vmatprep.subr.bf16.mxu0 %v16639_v22  ;;  %12914 = vmatprep.subr.bf16.mxu1 %v16751_v23  ;;  %v16766_v22 = vcombine.low %v372_v11, %v376_v12  ;;  %v16655_v23 = vcombine.high %v379_v17, %v383_v18  ;;  %v16767_v24 = vcombine.high %v380_v19, %v384_v20  ;;  %v435_v12 = vld [vmem:[#allocation5 + $0x610] sm:$0xff] }
 0x215   :  { %12692 = vmatpush1.bf16.msra.mxu0 %v16640_v28  ;;  %12916 = vmatpush1.bf16.msra.mxu1 %v16752_v29  ;;  %v388_v28 = vld [vmem:[#allocation5 + $0x498] sm:$0xff] }
 0x216   :  { %12694 = vmatprep.subr.bf16.mxu0 %v16641_v31  ;;  %12918 = vmatprep.subr.bf16.mxu1 %v16753_v32  ;;  %v392_v29 = vld [vmem:[#allocation5 + $0x4b8] sm:$0xff]  ;;  %v16656_v31 = vcombine.low %v379_v17, %v383_v18  ;;  %v16768_v32 = vcombine.low %v380_v19, %v384_v20  ;;  %v443_v20 = vld [vmem:[#allocation5 + $0x650] sm:$0xff] }
 0x217   :  { %v16769_v34 = vcombine.high %v388_v28, %v392_v29  ;;  %v16770_v41 = vcombine.low %v388_v28, %v392_v29  ;;  %v451_v28 = vld [vmem:[#allocation5 + $0x690] sm:$0xff] }
 0x218   :  { %v455_v29 = vld [vmem:[#allocation5 + $0x6b0] sm:$0xff] }
 0x219   :  { %12696 = vmatpush1.bf16.msra.mxu0 %v16642_v37  ;;  %12920 = vmatpush1.bf16.msra.mxu1 %v16754_v38  ;;  %v18408_v37 = vld [vmem:[#allocation2 + $0x18] sm:$0xff]  ;;  %v396_v38 = vld [vmem:[#allocation5 + $0x4d8] sm:$0xff] }
 0x21a   :  { %12698 = vmatprep.subr.bf16.mxu0 %v16643_v39  ;;  %12922 = vmatprep.subr.bf16.mxu1 %v16755_v40  ;;  %v400_v39 = vld [vmem:[#allocation5 + $0x4f8] sm:$0xff]  ;;  %v16658_v40 = vcombine.low %v387_v25, %v391_v26 }
 0x21b   :  { %v16771_v43 = vcombine.high %v396_v38, %v400_v39  ;;  %v16772_v49 = vcombine.low %v396_v38, %v400_v39  ;;  %v463_v38 = vld [vmem:[#allocation5 + $0x6f0] sm:$0xff]  ;;  %v460_v39 = vld [vmem:[#allocation5 + $0x6d8] sm:$0xff] }
 0x21d   :  { %12700 = vmatpush1.bf16.msra.mxu0 %v16644_v45  ;;  %12924 = vmatpush1.bf16.msra.mxu1 %v16756_v46  ;;  %v407_v45 = vld [vmem:[#allocation5 + $0x530] sm:$0xff]  ;;  %v404_v46 = vld [vmem:[#allocation5 + $0x518] sm:$0xff] }
 0x21e   :  { %12702 = vmatprep.subr.bf16.mxu0 %v16645_v47  ;;  %12926 = vmatprep.subr.bf16.mxu1 %v16757_v48  ;;  %v408_v47 = vld [vmem:[#allocation5 + $0x538] sm:$0xff]  ;;  %v16660_v48 = vcombine.low %v395_v35, %v399_v36  ;;  %v16661_v50 = vcombine.high %v403_v44, %v407_v45  ;;  %v16673_v35 = vcombine.high %v451_v28, %v455_v29 }
 0x21f   :  { %v16773_v51 = vcombine.high %v404_v46, %v408_v47  ;;  %v16774_v57 = vcombine.low %v404_v46, %v408_v47  ;;  %v471_v46 = vld [vmem:[#allocation5 + $0x730] sm:$0xff]  ;;  %v468_v47 = vld [vmem:[#allocation5 + $0x718] sm:$0xff] }
 0x221   :  { %12704 = vmatpush1.bf16.msra.mxu0 %v16646_v53  ;;  %12928 = vmatpush1.bf16.msra.mxu1 %v16758_v54  ;;  %v415_v53 = vld [vmem:[#allocation5 + $0x570] sm:$0xff]  ;;  %v412_v54 = vld [vmem:[#allocation5 + $0x558] sm:$0xff] }
 0x222   :  { %12706 = vmatprep.subr.bf16.mxu0 %v16647_v55  ;;  %12930 = vmatprep.subr.bf16.mxu1 %v16759_v56  ;;  %v416_v55 = vld [vmem:[#allocation5 + $0x578] sm:$0xff]  ;;  %v16662_v56 = vcombine.low %v403_v44, %v407_v45  ;;  %v16663_v58 = vcombine.high %v411_v52, %v415_v53  ;;  %v467_v45 = vld [vmem:[#allocation5 + $0x710] sm:$0xff] }
 0x223   :  { %v16775_v59 = vcombine.high %v412_v54, %v416_v55  ;;  %v16776_v1 = vcombine.low %v412_v54, %v416_v55  ;;  %v479_v54 = vld [vmem:[#allocation5 + $0x770] sm:$0xff]  ;;  %v476_v55 = vld [vmem:[#allocation5 + $0x758] sm:$0xff] }
 0x225   :  { %12708 = vmatpush1.bf16.msra.mxu0 %v16648_v61  ;;  %12932 = vmatpush1.bf16.msra.mxu1 %v16760_v62  ;;  %v423_v61 = vld [vmem:[#allocation5 + $0x5b0] sm:$0xff]  ;;  %v420_v62 = vld [vmem:[#allocation5 + $0x598] sm:$0xff] }
 0x226   :  { %12710 = vmatprep.subr.bf16.mxu0 %v16649_v63  ;;  %12934 = vmatprep.subr.bf16.mxu1 %v16761_v0  ;;  %v424_v63 = vld [vmem:[#allocation5 + $0x5b8] sm:$0xff]  ;;  %v16664_v0 = vcombine.low %v411_v52, %v415_v53  ;;  %v16665_v2 = vcombine.high %v419_v60, %v423_v61  ;;  %v475_v53 = vld [vmem:[#allocation5 + $0x750] sm:$0xff] }
 0x227   :  { %v16777_v3 = vcombine.high %v420_v62, %v424_v63  ;;  %v16778_v9 = vcombine.low %v420_v62, %v424_v63  ;;  %v487_v62 = vld [vmem:[#allocation5 + $0x7b0] sm:$0xff]  ;;  %v484_v63 = vld [vmem:[#allocation5 + $0x798] sm:$0xff] }
 0x229   :  { %12712 = vmatpush1.bf16.msra.mxu0 %v16650_v5  ;;  %12936 = vmatpush1.bf16.msra.mxu1 %v16762_v6  ;;  %v431_v5 = vld [vmem:[#allocation5 + $0x5f0] sm:$0xff]  ;;  %v428_v6 = vld [vmem:[#allocation5 + $0x5d8] sm:$0xff] }
 0x22a   :  { %12714 = vmatprep.subr.bf16.mxu0 %v16651_v7  ;;  %12938 = vmatprep.subr.bf16.mxu1 %v16763_v8  ;;  %v432_v7 = vld [vmem:[#allocation5 + $0x5f8] sm:$0xff]  ;;  %v16666_v8 = vcombine.low %v419_v60, %v423_v61  ;;  %v16667_v10 = vcombine.high %v427_v4, %v431_v5  ;;  %v483_v61 = vld [vmem:[#allocation5 + $0x790] sm:$0xff] }
 0x22b   :  { %v16779_v11 = vcombine.high %v428_v6, %v432_v7  ;;  %v16780_v17 = vcombine.low %v428_v6, %v432_v7  ;;  %v495_v6 = vld [vmem:[#allocation5 + $0x7f0] sm:$0xff]  ;;  %v492_v7 = vld [vmem:[#allocation5 + $0x7d8] sm:$0xff] }
 0x22d   :  { %12716 = vmatpush1.bf16.msra.mxu0 %v16652_v13  ;;  %12940 = vmatpush1.bf16.msra.mxu1 %v16764_v14  ;;  %v439_v13 = vld [vmem:[#allocation5 + $0x630] sm:$0xff]  ;;  %v436_v14 = vld [vmem:[#allocation5 + $0x618] sm:$0xff] }
 0x22e   :  { %12718 = vmatprep.subr.bf16.mxu0 %v16653_v15  ;;  %12942 = vmatprep.subr.bf16.mxu1 %v16765_v16  ;;  %v440_v15 = vld [vmem:[#allocation5 + $0x638] sm:$0xff]  ;;  %v16668_v16 = vcombine.low %v427_v4, %v431_v5  ;;  %v16669_v18 = vcombine.high %v435_v12, %v439_v13  ;;  %v491_v5 = vld [vmem:[#allocation5 + $0x7d0] sm:$0xff] }
 0x22f   :  { %v16781_v19 = vcombine.high %v436_v14, %v440_v15  ;;  %v16782_v25 = vcombine.low %v436_v14, %v440_v15  ;;  %v503_v14 = vld [vmem:[#allocation5 + $0x830] sm:$0xff]  ;;  %v500_v15 = vld [vmem:[#allocation5 + $0x818] sm:$0xff] }
 0x230   :  { %2218 = vmatmul.mubr.f32.vlgmr.msra.gmra.mrb[2].mxu0 %v18407_v27  ;;  %2502 = vmatmul.mubr.f32.vlgmr.msra.gmra.mrb[2].mxu1 %v18407_v27 }
 0x231   :  { %12720 = vmatpush1.bf16.msra.mxu0 %v16654_v21  ;;  %12944 = vmatpush1.bf16.msra.mxu1 %v16766_v22  ;;  %v447_v21 = vld [vmem:[#allocation5 + $0x670] sm:$0xff]  ;;  %v444_v22 = vld [vmem:[#allocation5 + $0x658] sm:$0xff] }
 0x232   :  { %12722 = vmatprep.subr.bf16.mxu0 %v16655_v23  ;;  %12946 = vmatprep.subr.bf16.mxu1 %v16767_v24  ;;  %v448_v23 = vld [vmem:[#allocation5 + $0x678] sm:$0xff]  ;;  %v16670_v24 = vcombine.low %v435_v12, %v439_v13  ;;  %v16671_v26 = vcombine.high %v443_v20, %v447_v21  ;;  %v499_v13 = vld [vmem:[#allocation5 + $0x810] sm:$0xff] }
 0x233   :  { %2288 = vmatprep.mubr.f32.mxu0 %v18408_v37  ;;  %2572 = vmatprep.mubr.f32.mxu1 %v18408_v37  ;;  %v16783_v27 = vcombine.high %v444_v22, %v448_v23  ;;  %v459_v37 = vld [vmem:[#allocation5 + $0x6d0] sm:$0xff] }
 0x235   :  { %12724 = vmatpush1.bf16.msra.mxu0 %v16656_v31  ;;  %12948 = vmatpush1.bf16.msra.mxu1 %v16768_v32  ;;  %v452_v31 = vld [vmem:[#allocation5 + $0x698] sm:$0xff] }
 0x236   :  { %12726 = vmatprep.subr.bf16.mxu0 %v16657_v33  ;;  %12950 = vmatprep.subr.bf16.mxu1 %v16769_v34  ;;  %v456_v32 = vld [vmem:[#allocation5 + $0x6b8] sm:$0xff]  ;;  %v16672_v33 = vcombine.low %v443_v20, %v447_v21  ;;  %v16784_v34 = vcombine.low %v444_v22, %v448_v23  ;;  %v507_v21 = vld [vmem:[#allocation5 + $0x850] sm:$0xff] }
 0x237   :  { %v16785_v36 = vcombine.high %v452_v31, %v456_v32  ;;  %v511_v22 = vld [vmem:[#allocation5 + $0x870] sm:$0xff]  ;;  %v508_v23 = vld [vmem:[#allocation5 + $0x858] sm:$0xff] }
 0x239   :  { %12728 = vmatpush1.bf16.msra.mxu0 %v16658_v40  ;;  %12952 = vmatpush1.bf16.msra.mxu1 %v16770_v41  ;;  %v464_v40 = vld [vmem:[#allocation5 + $0x6f8] sm:$0xff]  ;;  %v16674_v41 = vcombine.low %v451_v28, %v455_v29  ;;  %v515_v29 = vld [vmem:[#allocation5 + $0x890] sm:$0xff] }
 0x23a   :  { %12730 = vmatprep.subr.bf16.mxu0 %v16659_v42  ;;  %12954 = vmatprep.subr.bf16.mxu1 %v16771_v43  ;;  %v16786_v42 = vcombine.low %v452_v31, %v456_v32  ;;  %v16675_v43 = vcombine.high %v459_v37, %v463_v38  ;;  %v16787_v44 = vcombine.high %v460_v39, %v464_v40  ;;  %v519_v31 = vld [vmem:[#allocation5 + $0x8b0] sm:$0xff]  ;;  %v18409_v32 = vld [vmem:[#allocation2 + $0x10] sm:$0xff] }
 0x23d   :  { %12732 = vmatpush1.bf16.msra.mxu0 %v16660_v48  ;;  %12956 = vmatpush1.bf16.msra.mxu1 %v16772_v49  ;;  %v472_v48 = vld [vmem:[#allocation5 + $0x738] sm:$0xff]  ;;  %v16676_v49 = vcombine.low %v459_v37, %v463_v38  ;;  %v16689_v37 = vcombine.high %v515_v29, %v519_v31 }
 0x23e   :  { %12734 = vmatprep.subr.bf16.mxu0 %v16661_v50  ;;  %12958 = vmatprep.subr.bf16.mxu1 %v16773_v51  ;;  %v16788_v50 = vcombine.low %v460_v39, %v464_v40  ;;  %v16677_v51 = vcombine.high %v467_v45, %v471_v46  ;;  %v16789_v52 = vcombine.high %v468_v47, %v472_v48  ;;  %v523_v39 = vld [vmem:[#allocation5 + $0x8d0] sm:$0xff] }
 0x23f   :  { %v527_v40 = vld [vmem:[#allocation5 + $0x8f0] sm:$0xff] }
 0x241   :  { %12736 = vmatpush1.bf16.msra.mxu0 %v16662_v56  ;;  %12960 = vmatpush1.bf16.msra.mxu1 %v16774_v57  ;;  %v480_v56 = vld [vmem:[#allocation5 + $0x778] sm:$0xff]  ;;  %v16678_v57 = vcombine.low %v467_v45, %v471_v46  ;;  %v16691_v46 = vcombine.high %v523_v39, %v527_v40 }
 0x242   :  { %12738 = vmatprep.subr.bf16.mxu0 %v16663_v58  ;;  %12962 = vmatprep.subr.bf16.mxu1 %v16775_v59  ;;  %v16790_v58 = vcombine.low %v468_v47, %v472_v48  ;;  %v16679_v59 = vcombine.high %v475_v53, %v479_v54  ;;  %v16791_v60 = vcombine.high %v476_v55, %v480_v56  ;;  %v531_v48 = vld [vmem:[#allocation5 + $0x910] sm:$0xff] }
 0x245   :  { %12740 = vmatpush1.bf16.msra.mxu0 %v16664_v0  ;;  %12964 = vmatpush1.bf16.msra.mxu1 %v16776_v1  ;;  %v488_v0 = vld [vmem:[#allocation5 + $0x7b8] sm:$0xff]  ;;  %v16680_v1 = vcombine.low %v475_v53, %v479_v54 }
 0x246   :  { %12742 = vmatprep.subr.bf16.mxu0 %v16665_v2  ;;  %12966 = vmatprep.subr.bf16.mxu1 %v16777_v3  ;;  %v16792_v2 = vcombine.low %v476_v55, %v480_v56  ;;  %v16681_v3 = vcombine.high %v483_v61, %v487_v62  ;;  %v16793_v4 = vcombine.high %v484_v63, %v488_v0  ;;  %v539_v56 = vld [vmem:[#allocation5 + $0x950] sm:$0xff] }
 0x249   :  { %12744 = vmatpush1.bf16.msra.mxu0 %v16666_v8  ;;  %12968 = vmatpush1.bf16.msra.mxu1 %v16778_v9  ;;  %v496_v8 = vld [vmem:[#allocation5 + $0x7f8] sm:$0xff]  ;;  %v16682_v9 = vcombine.low %v483_v61, %v487_v62 }
 0x24a   :  { %12746 = vmatprep.subr.bf16.mxu0 %v16667_v10  ;;  %12970 = vmatprep.subr.bf16.mxu1 %v16779_v11  ;;  %v16794_v10 = vcombine.low %v484_v63, %v488_v0  ;;  %v16683_v11 = vcombine.high %v491_v5, %v495_v6  ;;  %v16795_v12 = vcombine.high %v492_v7, %v496_v8  ;;  %v547_v0 = vld [vmem:[#allocation5 + $0x990] sm:$0xff] }
 0x24d   :  { %12748 = vmatpush1.bf16.msra.mxu0 %v16668_v16  ;;  %12972 = vmatpush1.bf16.msra.mxu1 %v16780_v17  ;;  %v504_v16 = vld [vmem:[#allocation5 + $0x838] sm:$0xff]  ;;  %v16684_v17 = vcombine.low %v491_v5, %v495_v6 }
 0x24e   :  { %12750 = vmatprep.subr.bf16.mxu0 %v16669_v18  ;;  %12974 = vmatprep.subr.bf16.mxu1 %v16781_v19  ;;  %v16796_v18 = vcombine.low %v492_v7, %v496_v8  ;;  %v16685_v19 = vcombine.high %v499_v13, %v503_v14  ;;  %v16797_v20 = vcombine.high %v500_v15, %v504_v16  ;;  %v555_v8 = vld [vmem:[#allocation5 + $0x9d0] sm:$0xff] }
 0x251   :  { %12752 = vmatpush1.bf16.msra.mxu0 %v16670_v24  ;;  %12976 = vmatpush1.bf16.msra.mxu1 %v16782_v25  ;;  %v512_v24 = vld [vmem:[#allocation5 + $0x878] sm:$0xff]  ;;  %v16686_v25 = vcombine.low %v499_v13, %v503_v14 }
 0x252   :  { %12754 = vmatprep.subr.bf16.mxu0 %v16671_v26  ;;  %12978 = vmatprep.subr.bf16.mxu1 %v16783_v27  ;;  %v16798_v26 = vcombine.low %v500_v15, %v504_v16  ;;  %v16687_v27 = vcombine.high %v507_v21, %v511_v22  ;;  %v16799_v28 = vcombine.high %v508_v23, %v512_v24  ;;  %v563_v16 = vld [vmem:[#allocation5 + $0xa10] sm:$0xff] }
 0x255   :  { %12756 = vmatpush1.bf16.msra.mxu0 %v16672_v33  ;;  %12980 = vmatpush1.bf16.msra.mxu1 %v16784_v34  ;;  %v516_v33 = vld [vmem:[#allocation5 + $0x898] sm:$0xff] }
 0x256   :  { %12758 = vmatprep.subr.bf16.mxu0 %v16673_v35  ;;  %12982 = vmatprep.subr.bf16.mxu1 %v16785_v36  ;;  %v520_v34 = vld [vmem:[#allocation5 + $0x8b8] sm:$0xff]  ;;  %v16688_v35 = vcombine.low %v507_v21, %v511_v22  ;;  %v16800_v36 = vcombine.low %v508_v23, %v512_v24  ;;  %v571_v24 = vld [vmem:[#allocation5 + $0xa50] sm:$0xff] }
 0x257   :  { %v16801_v38 = vcombine.high %v516_v33, %v520_v34  ;;  %v16802_v45 = vcombine.low %v516_v33, %v520_v34  ;;  %v579_v33 = vld [vmem:[#allocation5 + $0xa90] sm:$0xff] }
 0x258   :  { %v583_v34 = vld [vmem:[#allocation5 + $0xab0] sm:$0xff] }
 0x259   :  { %12760 = vmatpush1.bf16.msra.mxu0 %v16674_v41  ;;  %12984 = vmatpush1.bf16.msra.mxu1 %v16786_v42  ;;  %v18410_v41 = vld [vmem:[#allocation2 + $0x28] sm:$0xff]  ;;  %v524_v42 = vld [vmem:[#allocation5 + $0x8d8] sm:$0xff] }
 0x25a   :  { %12762 = vmatprep.subr.bf16.mxu0 %v16675_v43  ;;  %12986 = vmatprep.subr.bf16.mxu1 %v16787_v44  ;;  %v528_v43 = vld [vmem:[#allocation5 + $0x8f8] sm:$0xff]  ;;  %v16690_v44 = vcombine.low %v515_v29, %v519_v31 }
 0x25b   :  { %v16803_v47 = vcombine.high %v524_v42, %v528_v43  ;;  %v16804_v53 = vcombine.low %v524_v42, %v528_v43  ;;  %v591_v42 = vld [vmem:[#allocation5 + $0xaf0] sm:$0xff]  ;;  %v588_v43 = vld [vmem:[#allocation5 + $0xad8] sm:$0xff] }
 0x25d   :  { %12764 = vmatpush1.bf16.msra.mxu0 %v16676_v49  ;;  %12988 = vmatpush1.bf16.msra.mxu1 %v16788_v50  ;;  %v535_v49 = vld [vmem:[#allocation5 + $0x930] sm:$0xff]  ;;  %v532_v50 = vld [vmem:[#allocation5 + $0x918] sm:$0xff] }
 0x25e   :  { %12766 = vmatprep.subr.bf16.mxu0 %v16677_v51  ;;  %12990 = vmatprep.subr.bf16.mxu1 %v16789_v52  ;;  %v536_v51 = vld [vmem:[#allocation5 + $0x938] sm:$0xff]  ;;  %v16692_v52 = vcombine.low %v523_v39, %v527_v40  ;;  %v16693_v54 = vcombine.high %v531_v48, %v535_v49  ;;  %v16705_v39 = vcombine.high %v579_v33, %v583_v34 }
 0x25f   :  { %v16805_v55 = vcombine.high %v532_v50, %v536_v51  ;;  %v16806_v61 = vcombine.low %v532_v50, %v536_v51  ;;  %v599_v50 = vld [vmem:[#allocation5 + $0xb30] sm:$0xff]  ;;  %v596_v51 = vld [vmem:[#allocation5 + $0xb18] sm:$0xff] }
 0x261   :  { %12768 = vmatpush1.bf16.msra.mxu0 %v16678_v57  ;;  %12992 = vmatpush1.bf16.msra.mxu1 %v16790_v58  ;;  %v543_v57 = vld [vmem:[#allocation5 + $0x970] sm:$0xff]  ;;  %v540_v58 = vld [vmem:[#allocation5 + $0x958] sm:$0xff] }
 0x262   :  { %12770 = vmatprep.subr.bf16.mxu0 %v16679_v59  ;;  %12994 = vmatprep.subr.bf16.mxu1 %v16791_v60  ;;  %v544_v59 = vld [vmem:[#allocation5 + $0x978] sm:$0xff]  ;;  %v16694_v60 = vcombine.low %v531_v48, %v535_v49  ;;  %v16695_v62 = vcombine.high %v539_v56, %v543_v57  ;;  %v595_v49 = vld [vmem:[#allocation5 + $0xb10] sm:$0xff] }
 0x263   :  { %v16807_v63 = vcombine.high %v540_v58, %v544_v59  ;;  %v16808_v5 = vcombine.low %v540_v58, %v544_v59  ;;  %v607_v58 = vld [vmem:[#allocation5 + $0xb70] sm:$0xff]  ;;  %v604_v59 = vld [vmem:[#allocation5 + $0xb58] sm:$0xff] }
 0x265   :  { %12772 = vmatpush1.bf16.msra.mxu0 %v16680_v1  ;;  %12996 = vmatpush1.bf16.msra.mxu1 %v16792_v2  ;;  %v551_v1 = vld [vmem:[#allocation5 + $0x9b0] sm:$0xff]  ;;  %v548_v2 = vld [vmem:[#allocation5 + $0x998] sm:$0xff] }
 0x266   :  { %12774 = vmatprep.subr.bf16.mxu0 %v16681_v3  ;;  %12998 = vmatprep.subr.bf16.mxu1 %v16793_v4  ;;  %v552_v3 = vld [vmem:[#allocation5 + $0x9b8] sm:$0xff]  ;;  %v16696_v4 = vcombine.low %v539_v56, %v543_v57  ;;  %v16697_v6 = vcombine.high %v547_v0, %v551_v1  ;;  %v603_v57 = vld [vmem:[#allocation5 + $0xb50] sm:$0xff] }
 0x267   :  { %v16809_v7 = vcombine.high %v548_v2, %v552_v3  ;;  %v16810_v13 = vcombine.low %v548_v2, %v552_v3  ;;  %v615_v2 = vld [vmem:[#allocation5 + $0xbb0] sm:$0xff]  ;;  %v612_v3 = vld [vmem:[#allocation5 + $0xb98] sm:$0xff] }
 0x269   :  { %12776 = vmatpush1.bf16.msra.mxu0 %v16682_v9  ;;  %13000 = vmatpush1.bf16.msra.mxu1 %v16794_v10  ;;  %v559_v9 = vld [vmem:[#allocation5 + $0x9f0] sm:$0xff]  ;;  %v556_v10 = vld [vmem:[#allocation5 + $0x9d8] sm:$0xff] }
 0x26a   :  { %12778 = vmatprep.subr.bf16.mxu0 %v16683_v11  ;;  %13002 = vmatprep.subr.bf16.mxu1 %v16795_v12  ;;  %v560_v11 = vld [vmem:[#allocation5 + $0x9f8] sm:$0xff]  ;;  %v16698_v12 = vcombine.low %v547_v0, %v551_v1  ;;  %v16699_v14 = vcombine.high %v555_v8, %v559_v9  ;;  %v611_v1 = vld [vmem:[#allocation5 + $0xb90] sm:$0xff] }
 0x26b   :  { %v16811_v15 = vcombine.high %v556_v10, %v560_v11  ;;  %v16812_v21 = vcombine.low %v556_v10, %v560_v11  ;;  %v623_v10 = vld [vmem:[#allocation5 + $0xbf0] sm:$0xff]  ;;  %v620_v11 = vld [vmem:[#allocation5 + $0xbd8] sm:$0xff] }
 0x26d   :  { %12780 = vmatpush1.bf16.msra.mxu0 %v16684_v17  ;;  %13004 = vmatpush1.bf16.msra.mxu1 %v16796_v18  ;;  %v567_v17 = vld [vmem:[#allocation5 + $0xa30] sm:$0xff]  ;;  %v564_v18 = vld [vmem:[#allocation5 + $0xa18] sm:$0xff] }
 0x26e   :  { %12782 = vmatprep.subr.bf16.mxu0 %v16685_v19  ;;  %13006 = vmatprep.subr.bf16.mxu1 %v16797_v20  ;;  %v568_v19 = vld [vmem:[#allocation5 + $0xa38] sm:$0xff]  ;;  %v16700_v20 = vcombine.low %v555_v8, %v559_v9  ;;  %v16701_v22 = vcombine.high %v563_v16, %v567_v17  ;;  %v619_v9 = vld [vmem:[#allocation5 + $0xbd0] sm:$0xff] }
 0x26f   :  { %v16813_v23 = vcombine.high %v564_v18, %v568_v19  ;;  %v16814_v29 = vcombine.low %v564_v18, %v568_v19  ;;  %v631_v18 = vld [vmem:[#allocation5 + $0xc30] sm:$0xff]  ;;  %v628_v19 = vld [vmem:[#allocation5 + $0xc18] sm:$0xff] }
 0x270   :  { %2289 = vmatmul.mubr.f32.vlgmr.msra.gmra.mrb[2].mxu0 %v18409_v32  ;;  %2573 = vmatmul.mubr.f32.vlgmr.msra.gmra.mrb[2].mxu1 %v18409_v32 }
 0x271   :  { %12784 = vmatpush1.bf16.msra.mxu0 %v16686_v25  ;;  %13008 = vmatpush1.bf16.msra.mxu1 %v16798_v26  ;;  %v575_v25 = vld [vmem:[#allocation5 + $0xa70] sm:$0xff]  ;;  %v572_v26 = vld [vmem:[#allocation5 + $0xa58] sm:$0xff] }
 0x272   :  { %12786 = vmatprep.subr.bf16.mxu0 %v16687_v27  ;;  %13010 = vmatprep.subr.bf16.mxu1 %v16799_v28  ;;  %v576_v27 = vld [vmem:[#allocation5 + $0xa78] sm:$0xff]  ;;  %v16702_v28 = vcombine.low %v563_v16, %v567_v17  ;;  %v16703_v31 = vcombine.high %v571_v24, %v575_v25  ;;  %v627_v17 = vld [vmem:[#allocation5 + $0xc10] sm:$0xff] }
 0x273   :  { %2359 = vmatprep.mubr.f32.mxu0 %v18410_v41  ;;  %2643 = vmatprep.mubr.f32.mxu1 %v18410_v41  ;;  %v16815_v32 = vcombine.high %v572_v26, %v576_v27  ;;  %v587_v41 = vld [vmem:[#allocation5 + $0xad0] sm:$0xff] }
 0x275   :  { %12788 = vmatpush1.bf16.msra.mxu0 %v16688_v35  ;;  %13012 = vmatpush1.bf16.msra.mxu1 %v16800_v36  ;;  %v580_v35 = vld [vmem:[#allocation5 + $0xa98] sm:$0xff] }
 0x276   :  { %12790 = vmatprep.subr.bf16.mxu0 %v16689_v37  ;;  %13014 = vmatprep.subr.bf16.mxu1 %v16801_v38  ;;  %v584_v36 = vld [vmem:[#allocation5 + $0xab8] sm:$0xff]  ;;  %v16704_v37 = vcombine.low %v571_v24, %v575_v25  ;;  %v16816_v38 = vcombine.low %v572_v26, %v576_v27  ;;  %v635_v25 = vld [vmem:[#allocation5 + $0xc50] sm:$0xff] }
 0x277   :  { %v16817_v40 = vcombine.high %v580_v35, %v584_v36  ;;  %v639_v26 = vld [vmem:[#allocation5 + $0xc70] sm:$0xff]  ;;  %v636_v27 = vld [vmem:[#allocation5 + $0xc58] sm:$0xff] }
 0x279   :  { %12792 = vmatpush1.bf16.msra.mxu0 %v16690_v44  ;;  %13016 = vmatpush1.bf16.msra.mxu1 %v16802_v45  ;;  %v592_v44 = vld [vmem:[#allocation5 + $0xaf8] sm:$0xff]  ;;  %v16706_v45 = vcombine.low %v579_v33, %v583_v34  ;;  %v643_v34 = vld [vmem:[#allocation5 + $0xc90] sm:$0xff] }
 0x27a   :  { %12794 = vmatprep.subr.bf16.mxu0 %v16691_v46  ;;  %13018 = vmatprep.subr.bf16.mxu1 %v16803_v47  ;;  %v16818_v46 = vcombine.low %v580_v35, %v584_v36  ;;  %v16707_v47 = vcombine.high %v587_v41, %v591_v42  ;;  %v16819_v48 = vcombine.high %v588_v43, %v592_v44  ;;  %v647_v35 = vld [vmem:[#allocation5 + $0xcb0] sm:$0xff]  ;;  %v18411_v36 = vld [vmem:[#allocation2 + $0x20] sm:$0xff] }
 0x27d   :  { %12796 = vmatpush1.bf16.msra.mxu0 %v16692_v52  ;;  %13020 = vmatpush1.bf16.msra.mxu1 %v16804_v53  ;;  %v600_v52 = vld [vmem:[#allocation5 + $0xb38] sm:$0xff]  ;;  %v16708_v53 = vcombine.low %v587_v41, %v591_v42  ;;  %v16721_v41 = vcombine.high %v643_v34, %v647_v35 }
 0x27e   :  { %12798 = vmatprep.subr.bf16.mxu0 %v16693_v54  ;;  %13022 = vmatprep.subr.bf16.mxu1 %v16805_v55  ;;  %v16820_v54 = vcombine.low %v588_v43, %v592_v44  ;;  %v16709_v55 = vcombine.high %v595_v49, %v599_v50  ;;  %v16821_v56 = vcombine.high %v596_v51, %v600_v52  ;;  %v651_v43 = vld [vmem:[#allocation5 + $0xcd0] sm:$0xff] }
 0x27f   :  { %v655_v44 = vld [vmem:[#allocation5 + $0xcf0] sm:$0xff] }
 0x281   :  { %12800 = vmatpush1.bf16.msra.mxu0 %v16694_v60  ;;  %13024 = vmatpush1.bf16.msra.mxu1 %v16806_v61  ;;  %v608_v60 = vld [vmem:[#allocation5 + $0xb78] sm:$0xff]  ;;  %v16710_v61 = vcombine.low %v595_v49, %v599_v50  ;;  %v16723_v49 = vcombine.high %v651_v43, %v655_v44 }
 0x282   :  { %12802 = vmatprep.subr.bf16.mxu0 %v16695_v62  ;;  %13026 = vmatprep.subr.bf16.mxu1 %v16807_v63  ;;  %v16822_v62 = vcombine.low %v596_v51, %v600_v52  ;;  %v16711_v63 = vcombine.high %v603_v57, %v607_v58  ;;  %v16823_v0 = vcombine.high %v604_v59, %v608_v60  ;;  %v659_v51 = vld [vmem:[#allocation5 + $0xd10] sm:$0xff] }
 0x283   :  { %v663_v52 = vld [vmem:[#allocation5 + $0xd30] sm:$0xff] }
 0x285   :  { %12804 = vmatpush1.bf16.msra.mxu0 %v16696_v4  ;;  %13028 = vmatpush1.bf16.msra.mxu1 %v16808_v5  ;;  %v616_v4 = vld [vmem:[#allocation5 + $0xbb8] sm:$0xff]  ;;  %v16712_v5 = vcombine.low %v603_v57, %v607_v58  ;;  %v16725_v58 = vcombine.high %v659_v51, %v663_v52 }
 0x286   :  { %12806 = vmatprep.subr.bf16.mxu0 %v16697_v6  ;;  %13030 = vmatprep.subr.bf16.mxu1 %v16809_v7  ;;  %v16824_v6 = vcombine.low %v604_v59, %v608_v60  ;;  %v16713_v7 = vcombine.high %v611_v1, %v615_v2  ;;  %v16825_v8 = vcombine.high %v612_v3, %v616_v4  ;;  %v667_v59 = vld [vmem:[#allocation5 + $0xd50] sm:$0xff] }
 0x287   :  { %v671_v60 = vld [vmem:[#allocation5 + $0xd70] sm:$0xff] }
 0x289   :  { %12808 = vmatpush1.bf16.msra.mxu0 %v16698_v12  ;;  %13032 = vmatpush1.bf16.msra.mxu1 %v16810_v13  ;;  %v624_v12 = vld [vmem:[#allocation5 + $0xbf8] sm:$0xff]  ;;  %v16714_v13 = vcombine.low %v611_v1, %v615_v2  ;;  %v16727_v2 = vcombine.high %v667_v59, %v671_v60 }
 0x28a   :  { %12810 = vmatprep.subr.bf16.mxu0 %v16699_v14  ;;  %13034 = vmatprep.subr.bf16.mxu1 %v16811_v15  ;;  %v16826_v14 = vcombine.low %v612_v3, %v616_v4  ;;  %v16715_v15 = vcombine.high %v619_v9, %v623_v10  ;;  %v16827_v16 = vcombine.high %v620_v11, %v624_v12  ;;  %v675_v4 = vld [vmem:[#allocation5 + $0xd90] sm:$0xff] }
 0x28d   :  { %12812 = vmatpush1.bf16.msra.mxu0 %v16700_v20  ;;  %13036 = vmatpush1.bf16.msra.mxu1 %v16812_v21  ;;  %v632_v20 = vld [vmem:[#allocation5 + $0xc38] sm:$0xff]  ;;  %v16716_v21 = vcombine.low %v619_v9, %v623_v10  ;;  %v19091_v9 = vld [vmem:[#allocation7] sm:$0xff]  ;;  %v16728_v10 = vcombine.low %v667_v59, %v671_v60 }
 0x28e   :  { %12814 = vmatprep.subr.bf16.mxu0 %v16701_v22  ;;  %13038 = vmatprep.subr.bf16.mxu1 %v16813_v23  ;;  %v16828_v22 = vcombine.low %v620_v11, %v624_v12  ;;  %v16717_v23 = vcombine.high %v627_v17, %v631_v18  ;;  %v16829_v24 = vcombine.high %v628_v19, %v632_v20  ;;  %v2854_v59 = vld [vmem:[#allocation10 + $0xc8] sm:$0xff] }
 0x28f   :  { %v2858_v60 = vld [vmem:[#allocation10 + $0xe8] sm:$0xff] }
 0x291   :  { %12816 = vmatpush1.bf16.msra.mxu0 %v16702_v28  ;;  %13040 = vmatpush1.bf16.msra.mxu1 %v16814_v29  ;;  %v640_v28 = vld [vmem:[#allocation5 + $0xc78] sm:$0xff]  ;;  %v16718_v29 = vcombine.low %v627_v17, %v631_v18 }
 0x292   :  { %12818 = vmatprep.subr.bf16.mxu0 %v16703_v31  ;;  %13042 = vmatprep.subr.bf16.mxu1 %v16815_v32  ;;  %v16830_v31 = vcombine.low %v628_v19, %v632_v20  ;;  %v16719_v32 = vcombine.high %v635_v25, %v639_v26  ;;  %v16831_v33 = vcombine.high %v636_v27, %v640_v28  ;;  %v684_v20 = vld [vmem:[#allocation5 + $0xdd8] sm:$0xff] }
 0x295   :  { %12820 = vmatpush1.bf16.msra.mxu0 %v16704_v37  ;;  %13044 = vmatpush1.bf16.msra.mxu1 %v16816_v38  ;;  %v644_v37 = vld [vmem:[#allocation5 + $0xc98] sm:$0xff] }
 0x296   :  { %12822 = vmatprep.subr.bf16.mxu0 %v16705_v39  ;;  %13046 = vmatprep.subr.bf16.mxu1 %v16817_v40  ;;  %v648_v38 = vld [vmem:[#allocation5 + $0xcb8] sm:$0xff]  ;;  %v16720_v39 = vcombine.low %v635_v25, %v639_v26  ;;  %v16832_v40 = vcombine.low %v636_v27, %v640_v28  ;;  %v2829_v28 = vld [vmem:[#allocation10] sm:$0xff] }
 0x297   :  { %v16833_v42 = vcombine.high %v644_v37, %v648_v38 }
 0x299   :  { %12824 = vmatpush1.bf16.msra.mxu0 %v16706_v45  ;;  %13048 = vmatpush1.bf16.msra.mxu1 %v16818_v46  ;;  %v652_v45 = vld [vmem:[#allocation5 + $0xcd8] sm:$0xff] }
 0x29a   :  { %12826 = vmatprep.subr.bf16.mxu0 %v16707_v47  ;;  %13050 = vmatprep.subr.bf16.mxu1 %v16819_v48  ;;  %v656_v46 = vld [vmem:[#allocation5 + $0xcf8] sm:$0xff]  ;;  %v16722_v47 = vcombine.low %v643_v34, %v647_v35  ;;  %v16834_v48 = vcombine.low %v644_v37, %v648_v38 }
 0x29b   :  { %v16835_v50 = vcombine.high %v652_v45, %v656_v46  ;;  %v16836_v57 = vcombine.low %v652_v45, %v656_v46  ;;  %v2834_v34 = vld [vmem:[#allocation10 + $0x28] sm:$0xff] }
 0x29d   :  { %12828 = vmatpush1.bf16.msra.mxu0 %v16708_v53  ;;  %13052 = vmatpush1.bf16.msra.mxu1 %v16820_v54  ;;  %v660_v53 = vld [vmem:[#allocation5 + $0xd18] sm:$0xff] }
 0x29e   :  { %12830 = vmatprep.subr.bf16.mxu0 %v16709_v55  ;;  %13054 = vmatprep.subr.bf16.mxu1 %v16821_v56  ;;  %v664_v54 = vld [vmem:[#allocation5 + $0xd38] sm:$0xff]  ;;  %v2723_v55 = vlaneseq  ;;  %v16724_v56 = vcombine.low %v651_v43, %v655_v44 }
 0x29f   :  { %v16838_v1 = vcombine.low %v660_v53, %v664_v54  ;;  %v2838_v43 = vld [vmem:[#allocation10 + $0x48] sm:$0xff] }
 0x2a0   :  { %v2842_v44 = vld [vmem:[#allocation10 + $0x68] sm:$0xff] }
 0x2a1   :  { %12832 = vmatpush1.bf16.msra.mxu0 %v16710_v61  ;;  %13056 = vmatpush1.bf16.msra.mxu1 %v16822_v62  ;;  %v19086_v61 = vshrl.u32 %v2723_v55, 7  ;;  %v668_v62 = vld [vmem:[#allocation5 + $0xd58] sm:$0xff]  ;;  %v16976_v55 = vcombine.low %v2838_v43, %v2842_v44 }
 0x2a2   :  { %12834 = vmatprep.subr.bf16.mxu0 %v16711_v63  ;;  %13058 = vmatprep.subr.bf16.mxu1 %v16823_v0  ;;  %v672_v63 = vld [vmem:[#allocation5 + $0xd78] sm:$0xff]  ;;  %v16726_v0 = vcombine.low %v659_v51, %v663_v52  ;;  %v16975_v51 = vcombine.high %v2838_v43, %v2842_v44 }
 0x2a3   :  { %v16839_v3 = vcombine.high %v668_v62, %v672_v63  ;;  %v16840_v11 = vcombine.low %v668_v62, %v672_v63  ;;  %v2846_v52 = vld [vmem:[#allocation10 + $0x88] sm:$0xff] }
 0x2a4   :  { %v2894_v43 = vld [vmem:[#allocation10 + $0x208] sm:$0xff] }
 0x2a5   :  { %12836 = vmatpush1.bf16.msra.mxu0 %v16712_v5  ;;  %13060 = vmatpush1.bf16.msra.mxu1 %v16824_v6  ;;  %v679_v5 = vld [vmem:[#allocation5 + $0xdb0] sm:$0xff]  ;;  %v19089_v6 = vsub.s32 1, %v19086_v61  ;;  %v2898_v44 = vld [vmem:[#allocation10 + $0x228] sm:$0xff] }
 0x2a6   :  { %12838 = vmatprep.subr.bf16.mxu0 %v16713_v7  ;;  %13062 = vmatprep.subr.bf16.mxu1 %v16825_v8  ;;  %v676_v7 = vld [vmem:[#allocation5 + $0xd98] sm:$0xff]  ;;  %v16729_v12 = vcombine.high %v675_v4, %v679_v5 }
 0x2a7   :  { %v680_v8 = vld [vmem:[#allocation5 + $0xdb8] sm:$0xff]  ;;  %v2730_v19 = vrot.slane %v19091_v9, %v19089_v6 }
 0x2a8   :  { %v16842_v25 = vcombine.low %v676_v7, %v680_v8 }
 0x2a9   :  { %12840 = vmatpush1.bf16.msra.mxu0 %v16714_v13  ;;  %13064 = vmatpush1.bf16.msra.mxu1 %v16826_v14  ;;  %v16841_v14 = vcombine.high %v676_v7, %v680_v8  ;;  %v16980_v8 = vcombine.low %v2854_v59, %v2858_v60 }
 0x2aa   :  { %12842 = vmatprep.subr.bf16.mxu0 %v16715_v15  ;;  %13066 = vmatprep.subr.bf16.mxu1 %v16827_v16  ;;  %v683_v15 = vld [vmem:[#allocation5 + $0xdd0] sm:$0xff] }
 0x2ab   :  { %v687_v16 = vld [vmem:[#allocation5 + $0xdf0] sm:$0xff] }
 0x2ac   :  { %v16731_v26 = vcombine.high %v683_v15, %v687_v16  ;;  %v16732_v35 = vcombine.low %v683_v15, %v687_v16  ;;  %v2870_v15 = vld [vmem:[#allocation10 + $0x148] sm:$0xff] }
 0x2ad   :  { %12844 = vmatpush1.bf16.msra.mxu0 %v16716_v21  ;;  %13068 = vmatpush1.bf16.msra.mxu1 %v16828_v22  ;;  %v688_v21 = vld [vmem:[#allocation5 + $0xdf8] sm:$0xff]  ;;  %v19099_v22 = vld [vmem:[#allocation8] sm:$0xff] }
 0x2ae   :  { %12846 = vmatprep.subr.bf16.mxu0 %v16717_v23  ;;  %13070 = vmatprep.subr.bf16.mxu1 %v16829_v24  ;;  %v16730_v24 = vcombine.low %v675_v4, %v679_v5  ;;  %v16843_v27 = vcombine.high %v684_v20, %v688_v21  ;;  %v2862_v4 = vld [vmem:[#allocation10 + $0x108] sm:$0xff] }
 0x2af   :  { %v2866_v5 = vld [vmem:[#allocation10 + $0x128] sm:$0xff] }
 0x2b0   :  { %2360 = vmatmul.mubr.f32.vlgmr.msra.gmra.mrb[2].mxu0 %v18411_v36  ;;  %2644 = vmatmul.mubr.f32.vlgmr.msra.gmra.mrb[2].mxu1 %v18411_v36  ;;  %v16844_v36 = vcombine.low %v684_v20, %v688_v21  ;;  %v2874_v16 = vld [vmem:[#allocation10 + $0x168] sm:$0xff] }
 0x2b1   :  { %12848 = vmatpush1.bf16.msra.mxu0 %v16718_v29  ;;  %13072 = vmatpush1.bf16.msra.mxu1 %v16830_v31  ;;  %v2833_v29 = vld [vmem:[#allocation10 + $0x20] sm:$0xff]  ;;  %v16983_v21 = vcombine.high %v2870_v15, %v2874_v16 }
 0x2b2   :  { %12850 = vmatprep.subr.bf16.mxu0 %v16719_v32  ;;  %13074 = vmatprep.subr.bf16.mxu1 %v16831_v33  ;;  %v2780_v32 = vrot.slane %v19099_v22, %v19089_v6  ;;  %v2830_v33 = vld [vmem:[#allocation10 + $0x8] sm:$0xff]  ;;  %v16845_v37 = vcombine.high %v2829_v28, %v2833_v29 }
 0x2b3   :  { %2430 = vmatprep.mubr.f32.mxu0 %v18808_v30  ;;  %2714 = vmatprep.mubr.f32.mxu1 %v18808_v30  ;;  %v16837_v30 = vcombine.high %v660_v53, %v664_v54  ;;  %v16973_v38 = vcombine.high %v2830_v33, %v2834_v34  ;;  %v16974_v45 = vcombine.low %v2830_v33, %v2834_v34  ;;  %v2850_v53 = vld [vmem:[#allocation10 + $0xa8] sm:$0xff]  ;;  %v2885_v33 = vld [vmem:[#allocation10 + $0x1c0] sm:$0xff] }
 0x2b4   :  { %v16978_v63 = vcombine.low %v2846_v52, %v2850_v53  ;;  %v2889_v34 = vld [vmem:[#allocation10 + $0x1e0] sm:$0xff] }
 0x2b5   :  { %12852 = vmatpush1.bf16.msra.mxu0 %v16720_v39  ;;  %13076 = vmatpush1.bf16.msra.mxu1 %v16832_v40  ;;  %v2837_v40 = vld [vmem:[#allocation10 + $0x40] sm:$0xff] }
 0x2b6   :  { %12854 = vmatprep.subr.bf16.mxu0 %v16721_v41  ;;  %13078 = vmatprep.subr.bf16.mxu1 %v16833_v42  ;;  %v2841_v41 = vld [vmem:[#allocation10 + $0x60] sm:$0xff]  ;;  %v16846_v42 = vcombine.low %v2829_v28, %v2833_v29  ;;  %v16984_v29 = vcombine.low %v2870_v15, %v2874_v16  ;;  %v2926_v15 = vld [vmem:[#allocation10 + $0x308] sm:$0xff] }
 0x2b7   :  { %v16847_v46 = vcombine.high %v2837_v40, %v2841_v41  ;;  %v16848_v54 = vcombine.low %v2837_v40, %v2841_v41  ;;  %v2893_v41 = vld [vmem:[#allocation10 + $0x200] sm:$0xff]  ;;  %v2930_v16 = vld [vmem:[#allocation10 + $0x328] sm:$0xff] }
 0x2b9   :  { %12856 = vmatpush1.bf16.msra.mxu0 %v16722_v47  ;;  %13080 = vmatpush1.bf16.msra.mxu1 %v16834_v48  ;;  %v2845_v47 = vld [vmem:[#allocation10 + $0x80] sm:$0xff] }
 0x2ba   :  { %12858 = vmatprep.subr.bf16.mxu0 %v16723_v49  ;;  %13082 = vmatprep.subr.bf16.mxu1 %v16835_v50  ;;  %v2849_v48 = vld [vmem:[#allocation10 + $0xa0] sm:$0xff]  ;;  %v18412_v50 = vld [vmem:[#allocation2 + $0x30] sm:$0xff] }
 0x2bb   :  { %v16850_v62 = vcombine.low %v2845_v47, %v2849_v48 }
 0x2bd   :  { %12860 = vmatpush1.bf16.msra.mxu0 %v16724_v56  ;;  %13084 = vmatpush1.bf16.msra.mxu1 %v16836_v57  ;;  %v16849_v56 = vcombine.high %v2845_v47, %v2849_v48  ;;  %v16977_v57 = vcombine.high %v2846_v52, %v2850_v53  ;;  %v16989_v48 = vcombine.high %v2894_v43, %v2898_v44  ;;  %v2902_v52 = vld [vmem:[#allocation10 + $0x248] sm:$0xff] }
 0x2be   :  { %12862 = vmatprep.subr.bf16.mxu0 %v16725_v58  ;;  %13086 = vmatprep.subr.bf16.mxu1 %v16837_v30  ;;  %v2853_v58 = vld [vmem:[#allocation10 + $0xc0] sm:$0xff]  ;;  %v2906_v53 = vld [vmem:[#allocation10 + $0x268] sm:$0xff] }
 0x2bf   :  { %v2857_v30 = vld [vmem:[#allocation10 + $0xe0] sm:$0xff] }
 0x2c0   :  { %v16852_v7 = vcombine.low %v2853_v58, %v2857_v30 }
 0x2c1   :  { %12864 = vmatpush1.bf16.msra.mxu0 %v16726_v0  ;;  %13088 = vmatpush1.bf16.msra.mxu1 %v16838_v1  ;;  %v16851_v0 = vcombine.high %v2853_v58, %v2857_v30  ;;  %v16979_v1 = vcombine.high %v2854_v59, %v2858_v60  ;;  %v2909_v58 = vld [vmem:[#allocation10 + $0x280] sm:$0xff]  ;;  %v2910_v59 = vld [vmem:[#allocation10 + $0x288] sm:$0xff] }
 0x2c2   :  { %12866 = vmatprep.subr.bf16.mxu0 %v16727_v2  ;;  %13090 = vmatprep.subr.bf16.mxu1 %v16839_v3  ;;  %v2861_v2 = vld [vmem:[#allocation10 + $0x100] sm:$0xff]  ;;  %v2914_v60 = vld [vmem:[#allocation10 + $0x2a8] sm:$0xff] }
 0x2c3   :  { %v19093_v13 = vpop.f32.mrb[0].mxu0  ;;  %v19095_v17 = vpop.f32.mrb[0].mxu1  ;;  %v2865_v3 = vld [vmem:[#allocation10 + $0x120] sm:$0xff] }
 0x2c4   :  { %v1866_v18 = vpop.f32.mrb[1].mxu0  ;;  %v19101_v23 = vpop.f32.mrb[1].mxu1  ;;  %v2913_v30 = vld [vmem:[#allocation10 + $0x2a0] sm:$0xff] }
 0x2c5   :  { %12868 = vmatpush1.bf16.msra.mxu0 %v16728_v10  ;;  %13092 = vmatpush1.bf16.msra.mxu1 %v16840_v11  ;;  %v2764_v31 = vmul.f32 %v2730_v19, %v1866_v18  ;;  %v16853_v10 = vcombine.high %v2861_v2, %v2865_v3  ;;  %v16981_v11 = vcombine.high %v2862_v4, %v2866_v5 }
 0x2c6   :  { %12870 = vmatprep.subr.bf16.mxu0 %v16729_v12  ;;  %13094 = vmatprep.subr.bf16.mxu1 %v16841_v14  ;;  %v2869_v12 = vld [vmem:[#allocation10 + $0x140] sm:$0xff]  ;;  %v16854_v18 = vcombine.low %v2861_v2, %v2865_v3  ;;  %v16982_v19 = vcombine.low %v2862_v4, %v2866_v5  ;;  %v2918_v4 = vld [vmem:[#allocation10 + $0x2c8] sm:$0xff] }
 0x2c7   :  { %v2814_v39 = vadd.f32 %v2780_v32, %v2764_v31  ;;  %v2873_v14 = vld [vmem:[#allocation10 + $0x160] sm:$0xff]  ;;  %v2922_v5 = vld [vmem:[#allocation10 + $0x2e8] sm:$0xff] }
 0x2c8   :  { %v16855_v20 = vcombine.high %v2869_v12, %v2873_v14  ;;  %v16856_v28 = vcombine.low %v2869_v12, %v2873_v14  ;;  %v2917_v2 = vld [vmem:[#allocation10 + $0x2c0] sm:$0xff] }
 0x2c9   :  { %12872 = vmatpush1.bf16.msra.mxu0 %v16730_v24  ;;  %13096 = vmatpush1.bf16.msra.mxu1 %v16842_v25  ;;  %v19105_v49 = vmax.f32 %v2814_v39, 0.0  ;;  %v2877_v24 = vld [vmem:[#allocation10 + $0x180] sm:$0xff]  ;;  %v16859_v39 = vcombine.high %v2885_v33, %v2889_v34 }
 0x2ca   :  { %12874 = vmatprep.subr.bf16.mxu0 %v16731_v26  ;;  %13098 = vmatprep.subr.bf16.mxu1 %v16843_v27  ;;  %v2881_v25 = vld [vmem:[#allocation10 + $0x1a0] sm:$0xff]  ;;  %v2878_v26 = vld [vmem:[#allocation10 + $0x188] sm:$0xff] }
 0x2cb   :  { %v2882_v27 = vld [vmem:[#allocation10 + $0x1a8] sm:$0xff]  ;;  %v16857_v31 = vcombine.high %v2877_v24, %v2881_v25  ;;  %v2921_v3 = vld [vmem:[#allocation10 + $0x2e0] sm:$0xff] }
 0x2cc   :  { %v16985_v32 = vcombine.high %v2878_v26, %v2882_v27  ;;  %v2925_v12 = vld [vmem:[#allocation10 + $0x300] sm:$0xff] }
 0x2cd   :  { %12876 = vmatpush1.bf16.msra.mxu0 %v16732_v35  ;;  %13100 = vmatpush1.bf16.msra.mxu1 %v16844_v36  ;;  %v2886_v35 = vld [vmem:[#allocation10 + $0x1c8] sm:$0xff]  ;;  %v2929_v14 = vld [vmem:[#allocation10 + $0x320] sm:$0xff] }
 0x2ce   :  { %13102 = vmatprep.subr.bf16.mxu0 %v16845_v37  ;;  %13358 = vmatprep.subr.bf16.mxu1 %v16973_v38  ;;  %v2890_v36 = vld [vmem:[#allocation10 + $0x1e8] sm:$0xff]  ;;  %v16858_v37 = vcombine.low %v2877_v24, %v2881_v25  ;;  %v16986_v38 = vcombine.low %v2878_v26, %v2882_v27  ;;  %v2933_v24 = vld [vmem:[#allocation10 + $0x340] sm:$0xff] }
 0x2cf   :  { %v16987_v40 = vcombine.high %v2886_v35, %v2890_v36  ;;  %v2937_v25 = vld [vmem:[#allocation10 + $0x360] sm:$0xff]  ;;  %v2934_v26 = vld [vmem:[#allocation10 + $0x348] sm:$0xff] }
 0x2d0   :  { %2431 = vmatmul.mubr.f32.vlgmr.msra.gmra.mrb[2].mxu0 %v18412_v50  ;;  %2715 = vmatmul.mubr.f32.vlgmr.msra.gmra.mrb[2].mxu1 %v18412_v50  ;;  %v2901_v50 = vld [vmem:[#allocation10 + $0x240] sm:$0xff]  ;;  %v2938_v27 = vld [vmem:[#allocation10 + $0x368] sm:$0xff] }
 0x2d1   :  { %13104 = vmatpush1.bf16.msra.mxu0 %v16846_v42  ;;  %4429 = vmatprep.mubr.f32.mxu0 %v19105_v49  ;;  %v2897_v42 = vld [vmem:[#allocation10 + $0x220] sm:$0xff] }
 0x2d2   :  { %13360 = vmatpush1.bf16.msra.mxu1 %v16974_v45  ;;  %4713 = vmatprep.mubr.f32.mxu1 %v19105_v49  ;;  %v16860_v45 = vcombine.low %v2885_v33, %v2889_v34  ;;  %v16861_v47 = vcombine.high %v2893_v41, %v2897_v42  ;;  %v16999_v33 = vcombine.high %v2934_v26, %v2938_v27  ;;  %v2941_v34 = vld [vmem:[#allocation10 + $0x380] sm:$0xff] }
 0x2d3   :  { %13106 = vmatprep.subr.bf16.mxu0 %v16847_v46  ;;  %13362 = vmatprep.subr.bf16.mxu1 %v16975_v51  ;;  %v16988_v46 = vcombine.low %v2886_v35, %v2890_v36  ;;  %v2905_v51 = vld [vmem:[#allocation10 + $0x260] sm:$0xff]  ;;  %v19113_v36 = vsub.s32 3, %v19086_v61 }
 0x2d4   :  { %v2945_v35 = vld [vmem:[#allocation10 + $0x3a0] sm:$0xff] }
 0x2d5   :  { %13108 = vmatpush1.bf16.msra.mxu0 %v16848_v54  ;;  %v16862_v54 = vcombine.low %v2893_v41, %v2897_v42  ;;  %v17000_v41 = vcombine.low %v2934_v26, %v2938_v27  ;;  %v16873_v42 = vcombine.high %v2941_v34, %v2945_v35  ;;  %v2981_v26 = vld [vmem:[#allocation10 + $0x4c0] sm:$0xff] }
 0x2d6   :  { %13364 = vmatpush1.bf16.msra.mxu1 %v16976_v55  ;;  %13110 = vmatprep.subr.bf16.mxu0 %v16849_v56  ;;  %v16990_v55 = vcombine.low %v2894_v43, %v2898_v44  ;;  %v16863_v56 = vcombine.high %v2901_v50, %v2905_v51  ;;  %v2949_v44 = vld [vmem:[#allocation10 + $0x3c0] sm:$0xff] }
 0x2d7   :  { %13366 = vmatprep.subr.bf16.mxu1 %v16977_v57  ;;  %v16991_v57 = vcombine.high %v2902_v52, %v2906_v53  ;;  %v2985_v27 = vld [vmem:[#allocation10 + $0x4e0] sm:$0xff] }
 0x2d9   :  { %13112 = vmatpush1.bf16.msra.mxu0 %v16850_v62  ;;  %v16864_v62 = vcombine.low %v2901_v50, %v2905_v51  ;;  %v16874_v51 = vcombine.low %v2941_v34, %v2945_v35  ;;  %v16883_v34 = vcombine.high %v2981_v26, %v2985_v27 }
 0x2da   :  { %13368 = vmatpush1.bf16.msra.mxu1 %v16978_v63  ;;  %13114 = vmatprep.subr.bf16.mxu0 %v16851_v0  ;;  %v16992_v63 = vcombine.low %v2902_v52, %v2906_v53  ;;  %v16865_v0 = vcombine.high %v2909_v58, %v2913_v30 }
 0x2db   :  { %13370 = vmatprep.subr.bf16.mxu1 %v16979_v1  ;;  %v16993_v1 = vcombine.high %v2910_v59, %v2914_v60 }
 0x2dd   :  { %13116 = vmatpush1.bf16.msra.mxu0 %v16852_v7  ;;  %v16866_v7 = vcombine.low %v2909_v58, %v2913_v30  ;;  %v2788_v30 = vrot.slane %v19099_v22, %v19113_v36 }
 0x2de   :  { %13372 = vmatpush1.bf16.msra.mxu1 %v16980_v8  ;;  %13118 = vmatprep.subr.bf16.mxu0 %v16853_v10  ;;  %v16994_v8 = vcombine.low %v2910_v59, %v2914_v60  ;;  %v16867_v10 = vcombine.high %v2917_v2, %v2921_v3  ;;  %v2958_v59 = vld [vmem:[#allocation10 + $0x408] sm:$0xff] }
 0x2df   :  { %13374 = vmatprep.subr.bf16.mxu1 %v16981_v11  ;;  %v16995_v11 = vcombine.high %v2918_v4, %v2922_v5  ;;  %v2962_v60 = vld [vmem:[#allocation10 + $0x428] sm:$0xff] }
 0x2e1   :  { %13120 = vmatpush1.bf16.msra.mxu0 %v16854_v18  ;;  %v16868_v18 = vcombine.low %v2917_v2, %v2921_v3  ;;  %v2965_v3 = vld [vmem:[#allocation10 + $0x440] sm:$0xff] }
 0x2e2   :  { %13376 = vmatpush1.bf16.msra.mxu1 %v16982_v19  ;;  %13122 = vmatprep.subr.bf16.mxu0 %v16855_v20  ;;  %v16996_v19 = vcombine.low %v2918_v4, %v2922_v5  ;;  %v16869_v20 = vcombine.high %v2925_v12, %v2929_v14  ;;  %v2969_v4 = vld [vmem:[#allocation10 + $0x460] sm:$0xff] }
 0x2e3   :  { %13378 = vmatprep.subr.bf16.mxu1 %v16983_v21  ;;  %v16997_v21 = vcombine.high %v2926_v15, %v2930_v16 }
 0x2e5   :  { %13124 = vmatpush1.bf16.msra.mxu0 %v16856_v28  ;;  %v16870_v28 = vcombine.low %v2925_v12, %v2929_v14  ;;  %v2973_v12 = vld [vmem:[#allocation10 + $0x480] sm:$0xff] }
 0x2e6   :  { %13380 = vmatpush1.bf16.msra.mxu1 %v16984_v29  ;;  %13126 = vmatprep.subr.bf16.mxu0 %v16857_v31  ;;  %v19110_v29 = vsub.s32 0, %v19086_v61  ;;  %v16998_v31 = vcombine.low %v2926_v15, %v2930_v16  ;;  %v2977_v14 = vld [vmem:[#allocation10 + $0x4a0] sm:$0xff] }
 0x2e7   :  { %13382 = vmatprep.subr.bf16.mxu1 %v16985_v32  ;;  %v16871_v32 = vcombine.high %v2933_v24, %v2937_v25 }
 0x2e8   :  { %v2776_v50 = vrot.slane %v19099_v22, %v19110_v29 }
 0x2e9   :  { %13128 = vmatpush1.bf16.msra.mxu0 %v16858_v37  ;;  %v2942_v37 = vld [vmem:[#allocation10 + $0x388] sm:$0xff] }
 0x2ea   :  { %13384 = vmatpush1.bf16.msra.mxu1 %v16986_v38  ;;  %13130 = vmatprep.subr.bf16.mxu0 %v16859_v39  ;;  %v2946_v38 = vld [vmem:[#allocation10 + $0x3a8] sm:$0xff]  ;;  %v16872_v39 = vcombine.low %v2933_v24, %v2937_v25  ;;  %v16881_v24 = vcombine.high %v2973_v12, %v2977_v14 }
 0x2eb   :  { %13386 = vmatprep.subr.bf16.mxu1 %v16987_v40  ;;  %v2726_v40 = vrot.slane %v19091_v9, %v19110_v29  ;;  %v17001_v43 = vcombine.high %v2942_v37, %v2946_v38  ;;  %v17002_v53 = vcombine.low %v2942_v37, %v2946_v38  ;;  %v2989_v37 = vld [vmem:[#allocation10 + $0x500] sm:$0xff] }
 0x2ec   :  { %v2993_v38 = vld [vmem:[#allocation10 + $0x520] sm:$0xff] }
 0x2ed   :  { %13132 = vmatpush1.bf16.msra.mxu0 %v16860_v45  ;;  %v2953_v45 = vld [vmem:[#allocation10 + $0x3e0] sm:$0xff]  ;;  %v2763_v52 = vmul.f32 %v2726_v40, %v19093_v13  ;;  %v2994_v40 = vld [vmem:[#allocation10 + $0x528] sm:$0xff] }
 0x2ee   :  { %13388 = vmatpush1.bf16.msra.mxu1 %v16988_v46  ;;  %13134 = vmatprep.subr.bf16.mxu0 %v16861_v47  ;;  %v2738_v46 = vrot.slane %v19091_v9, %v19113_v36  ;;  %v2950_v47 = vld [vmem:[#allocation10 + $0x3c8] sm:$0xff] }
 0x2ef   :  { %13390 = vmatprep.subr.bf16.mxu1 %v16989_v48  ;;  %v2954_v48 = vld [vmem:[#allocation10 + $0x3e8] sm:$0xff] }
 0x2f0   :  { %v2766_v58 = vmul.f32 %v2738_v46, %v19101_v23  ;;  %v17004_v13 = vcombine.low %v2950_v47, %v2954_v48  ;;  %v2966_v23 = vld [vmem:[#allocation10 + $0x448] sm:$0xff]  ;;  %v3001_v46 = vld [vmem:[#allocation10 + $0x560] sm:$0xff] }
 0x2f1   :  { %13136 = vmatpush1.bf16.msra.mxu0 %v16862_v54  ;;  %v16875_v54 = vcombine.high %v2949_v44, %v2953_v45 }
 0x2f2   :  { %13392 = vmatpush1.bf16.msra.mxu1 %v16990_v55  ;;  %13138 = vmatprep.subr.bf16.mxu0 %v16863_v56  ;;  %v17003_v55 = vcombine.high %v2950_v47, %v2954_v48  ;;  %v2957_v56 = vld [vmem:[#allocation10 + $0x400] sm:$0xff]  ;;  %v2816_v2 = vadd.f32 %v2788_v30, %v2766_v58  ;;  %v2998_v47 = vld [vmem:[#allocation10 + $0x548] sm:$0xff] }
 0x2f3   :  { %13394 = vmatprep.subr.bf16.mxu1 %v16991_v57  ;;  %v2961_v57 = vld [vmem:[#allocation10 + $0x420] sm:$0xff]  ;;  %v3002_v48 = vld [vmem:[#allocation10 + $0x568] sm:$0xff] }
 0x2f4   :  { %v16878_v5 = vcombine.low %v2957_v56, %v2961_v57  ;;  %v19127_v15 = vmax.f32 %v2816_v2, 0.0  ;;  %v17016_v30 = vcombine.low %v2998_v47, %v3002_v48 }
 0x2f5   :  { %13140 = vmatpush1.bf16.msra.mxu0 %v16864_v62  ;;  %v16876_v62 = vcombine.low %v2949_v44, %v2953_v45  ;;  %v2997_v45 = vld [vmem:[#allocation10 + $0x540] sm:$0xff] }
 0x2f6   :  { %13396 = vmatpush1.bf16.msra.mxu1 %v16992_v63  ;;  %13142 = vmatprep.subr.bf16.mxu0 %v16865_v0  ;;  %v2813_v63 = vadd.f32 %v2776_v50, %v2763_v52  ;;  %v16877_v0 = vcombine.high %v2957_v56, %v2961_v57  ;;  %v16886_v50 = vcombine.low %v2989_v37, %v2993_v38  ;;  %v3006_v56 = vld [vmem:[#allocation10 + $0x588] sm:$0xff] }
 0x2f7   :  { %13398 = vmatprep.subr.bf16.mxu1 %v16993_v1  ;;  %v17005_v1 = vcombine.high %v2958_v59, %v2962_v60  ;;  %v16887_v52 = vcombine.high %v2997_v45, %v3001_v46  ;;  %v3010_v57 = vld [vmem:[#allocation10 + $0x5a8] sm:$0xff]  ;;  %v16888_v58 = vcombine.low %v2997_v45, %v3001_v46 }
 0x2f8   :  { %v17018_v2 = vcombine.low %v3006_v56, %v3010_v57 }
 0x2f9   :  { %13144 = vmatpush1.bf16.msra.mxu0 %v16866_v7  ;;  %v2970_v7 = vld [vmem:[#allocation10 + $0x468] sm:$0xff] }
 0x2fa   :  { %13400 = vmatpush1.bf16.msra.mxu1 %v16994_v8  ;;  %13146 = vmatprep.subr.bf16.mxu0 %v16867_v10  ;;  %v19125_v8 = vmax.f32 %v2813_v63, 0.0  ;;  %v17006_v10 = vcombine.low %v2958_v59, %v2962_v60  ;;  %v17007_v16 = vcombine.high %v2966_v23, %v2970_v7  ;;  %v17017_v60 = vcombine.high %v3006_v56, %v3010_v57  ;;  %v3017_v63 = vld [vmem:[#allocation10 + $0x5e0] sm:$0xff] }
 0x2fb   :  { %13402 = vmatprep.subr.bf16.mxu1 %v16995_v11  ;;  %v16879_v11 = vcombine.high %v2965_v3, %v2969_v4  ;;  %v3061_v56 = vld [vmem:[#allocation10 + $0x740] sm:$0xff] }
 0x2fc   :  { %v3065_v57 = vld [vmem:[#allocation10 + $0x760] sm:$0xff] }
 0x2fd   :  { %13148 = vmatpush1.bf16.msra.mxu0 %v16868_v18  ;;  %v2974_v18 = vld [vmem:[#allocation10 + $0x488] sm:$0xff] }
 0x2fe   :  { %13404 = vmatpush1.bf16.msra.mxu1 %v16996_v19  ;;  %13150 = vmatprep.subr.bf16.mxu0 %v16869_v20  ;;  %v2978_v19 = vld [vmem:[#allocation10 + $0x4a8] sm:$0xff]  ;;  %v16880_v20 = vcombine.low %v2965_v3, %v2969_v4 }
 0x2ff   :  { %13406 = vmatprep.subr.bf16.mxu1 %v16997_v21  ;;  %v17008_v21 = vcombine.low %v2966_v23, %v2970_v7  ;;  %v17009_v25 = vcombine.high %v2974_v18, %v2978_v19  ;;  %v3025_v23 = vld [vmem:[#allocation10 + $0x620] sm:$0xff]  ;;  %v3022_v7 = vld [vmem:[#allocation10 + $0x608] sm:$0xff] }
 0x301   :  { %13152 = vmatpush1.bf16.msra.mxu0 %v16870_v28  ;;  %v2982_v28 = vld [vmem:[#allocation10 + $0x4c8] sm:$0xff] }
 0x302   :  { %13408 = vmatpush1.bf16.msra.mxu1 %v16998_v31  ;;  %13154 = vmatprep.subr.bf16.mxu0 %v16871_v32  ;;  %v2986_v31 = vld [vmem:[#allocation10 + $0x4e8] sm:$0xff]  ;;  %v16882_v32 = vcombine.low %v2973_v12, %v2977_v14 }
 0x303   :  { %13410 = vmatprep.subr.bf16.mxu1 %v16999_v33  ;;  %v17010_v33 = vcombine.low %v2974_v18, %v2978_v19  ;;  %v17011_v35 = vcombine.high %v2982_v28, %v2986_v31  ;;  %v3029_v18 = vld [vmem:[#allocation10 + $0x640] sm:$0xff] }
 0x304   :  { %v3033_v19 = vld [vmem:[#allocation10 + $0x660] sm:$0xff] }
 0x305   :  { %13156 = vmatpush1.bf16.msra.mxu0 %v16872_v39  ;;  %v2990_v39 = vld [vmem:[#allocation10 + $0x508] sm:$0xff] }
 0x306   :  { %13412 = vmatpush1.bf16.msra.mxu1 %v17000_v41  ;;  %13158 = vmatprep.subr.bf16.mxu0 %v16873_v42  ;;  %v16884_v41 = vcombine.low %v2981_v26, %v2985_v27  ;;  %v17012_v42 = vcombine.low %v2982_v28, %v2986_v31  ;;  %v17013_v44 = vcombine.high %v2990_v39, %v2994_v40  ;;  %v3037_v28 = vld [vmem:[#allocation10 + $0x680] sm:$0xff] }
 0x307   :  { %13414 = vmatprep.subr.bf16.mxu1 %v17001_v43  ;;  %v16885_v43 = vcombine.high %v2989_v37, %v2993_v38  ;;  %v16895_v26 = vcombine.high %v3029_v18, %v3033_v19  ;;  %v3041_v31 = vld [vmem:[#allocation10 + $0x6a0] sm:$0xff] }
 0x308   :  { %v16897_v37 = vcombine.high %v3037_v28, %v3041_v31 }
 0x309   :  { %13160 = vmatpush1.bf16.msra.mxu0 %v16874_v51  ;;  %v17014_v51 = vcombine.low %v2990_v39, %v2994_v40  ;;  %v3045_v39 = vld [vmem:[#allocation10 + $0x6c0] sm:$0xff] }
 0x30a   :  { %13416 = vmatpush1.bf16.msra.mxu1 %v17002_v53  ;;  %13162 = vmatprep.subr.bf16.mxu0 %v16875_v54  ;;  %v17015_v53 = vcombine.high %v2998_v47, %v3002_v48  ;;  %v3005_v54 = vld [vmem:[#allocation10 + $0x580] sm:$0xff] }
 0x30b   :  { %13418 = vmatprep.subr.bf16.mxu1 %v17003_v55  ;;  %v3009_v55 = vld [vmem:[#allocation10 + $0x5a0] sm:$0xff] }
 0x30c   :  { %v16889_v59 = vcombine.high %v3005_v54, %v3009_v55  ;;  %v3049_v40 = vld [vmem:[#allocation10 + $0x6e0] sm:$0xff] }
 0x30d   :  { %13164 = vmatpush1.bf16.msra.mxu0 %v16876_v62  ;;  %v3013_v62 = vld [vmem:[#allocation10 + $0x5c0] sm:$0xff]  ;;  %v16899_v45 = vcombine.high %v3045_v39, %v3049_v40 }
 0x30e   :  { %13420 = vmatpush1.bf16.msra.mxu1 %v17004_v13  ;;  %13166 = vmatprep.subr.bf16.mxu0 %v16877_v0  ;;  %v3014_v13 = vld [vmem:[#allocation10 + $0x5c8] sm:$0xff]  ;;  %v16891_v3 = vcombine.high %v3013_v62, %v3017_v63  ;;  %v3053_v47 = vld [vmem:[#allocation10 + $0x700] sm:$0xff] }
 0x30f   :  { %13422 = vmatprep.subr.bf16.mxu1 %v17005_v1  ;;  %v3018_v0 = vld [vmem:[#allocation10 + $0x5e8] sm:$0xff]  ;;  %v16890_v1 = vcombine.low %v3005_v54, %v3009_v55  ;;  %v3057_v48 = vld [vmem:[#allocation10 + $0x720] sm:$0xff] }
 0x310   :  { %4430 = vmatmul.mubr.f32.vlgmr.msra.gmra.mrb[4].mxu0 %v19125_v8  ;;  %v17019_v4 = vcombine.high %v3014_v13, %v3018_v0  ;;  %v17020_v12 = vcombine.low %v3014_v13, %v3018_v0  ;;  %v16901_v54 = vcombine.high %v3053_v47, %v3057_v48  ;;  %v3069_v0 = vld [vmem:[#allocation10 + $0x780] sm:$0xff] }
 0x311   :  { %4714 = vmatmul.mubr.f32.vlgmr.msra.gmra.mrb[4].mxu1 %v19125_v8  ;;  %13168 = vmatpush1.bf16.msra.mxu0 %v16878_v5  ;;  %v3021_v5 = vld [vmem:[#allocation10 + $0x600] sm:$0xff] }
 0x312   :  { %4500 = vmatprep.mubr.f32.mxu0 %v19127_v15  ;;  %13424 = vmatpush1.bf16.msra.mxu1 %v17006_v10  ;;  %v3026_v10 = vld [vmem:[#allocation10 + $0x628] sm:$0xff]  ;;  %v16893_v14 = vcombine.high %v3021_v5, %v3025_v23 }
 0x313   :  { %4784 = vmatprep.mubr.f32.mxu1 %v19127_v15  ;;  %13170 = vmatprep.subr.bf16.mxu0 %v16879_v11  ;;  %v16892_v11 = vcombine.low %v3013_v62, %v3017_v63  ;;  %v16903_v63 = vcombine.high %v3061_v56, %v3065_v57 }
 0x314   :  { %13426 = vmatprep.subr.bf16.mxu1 %v17007_v16  ;;  %v17021_v16 = vcombine.high %v3022_v7, %v3026_v10 }
 0x315   :  { %13172 = vmatpush1.bf16.msra.mxu0 %v16880_v20  ;;  %v3030_v20 = vld [vmem:[#allocation10 + $0x648] sm:$0xff] }
 0x316   :  { %13428 = vmatpush1.bf16.msra.mxu1 %v17008_v21  ;;  %13174 = vmatprep.subr.bf16.mxu0 %v16881_v24  ;;  %v3034_v21 = vld [vmem:[#allocation10 + $0x668] sm:$0xff]  ;;  %v16894_v24 = vcombine.low %v3021_v5, %v3025_v23 }
 0x317   :  { %13430 = vmatprep.subr.bf16.mxu1 %v17009_v25  ;;  %v17022_v25 = vcombine.low %v3022_v7, %v3026_v10  ;;  %v17023_v27 = vcombine.high %v3030_v20, %v3034_v21 }
 0x319   :  { %13176 = vmatpush1.bf16.msra.mxu0 %v16882_v32  ;;  %v3038_v32 = vld [vmem:[#allocation10 + $0x688] sm:$0xff] }
 0x31a   :  { %13432 = vmatpush1.bf16.msra.mxu1 %v17010_v33  ;;  %13178 = vmatprep.subr.bf16.mxu0 %v16883_v34  ;;  %v3042_v33 = vld [vmem:[#allocation10 + $0x6a8] sm:$0xff]  ;;  %v16896_v34 = vcombine.low %v3029_v18, %v3033_v19 }
 0x31b   :  { %13434 = vmatprep.subr.bf16.mxu1 %v17011_v35  ;;  %v17024_v35 = vcombine.low %v3030_v20, %v3034_v21  ;;  %v17025_v38 = vcombine.high %v3038_v32, %v3042_v33 }
 0x31d   :  { %13180 = vmatpush1.bf16.msra.mxu0 %v16884_v41  ;;  %v3046_v41 = vld [vmem:[#allocation10 + $0x6c8] sm:$0xff] }
 0x31e   :  { %13436 = vmatpush1.bf16.msra.mxu1 %v17012_v42  ;;  %13182 = vmatprep.subr.bf16.mxu0 %v16885_v43  ;;  %v3050_v42 = vld [vmem:[#allocation10 + $0x6e8] sm:$0xff]  ;;  %v16898_v43 = vcombine.low %v3037_v28, %v3041_v31 }
 0x31f   :  { %13438 = vmatprep.subr.bf16.mxu1 %v17013_v44  ;;  %v17026_v44 = vcombine.low %v3038_v32, %v3042_v33  ;;  %v17027_v46 = vcombine.high %v3046_v41, %v3050_v42  ;;  %v3090_v28 = vld [vmem:[#allocation10 + $0x828] sm:$0xff] }
 0x321   :  { %13184 = vmatpush1.bf16.msra.mxu0 %v16886_v50  ;;  %v3054_v50 = vld [vmem:[#allocation10 + $0x708] sm:$0xff] }
 0x322   :  { %13440 = vmatpush1.bf16.msra.mxu1 %v17014_v51  ;;  %13186 = vmatprep.subr.bf16.mxu0 %v16887_v52  ;;  %v3058_v51 = vld [vmem:[#allocation10 + $0x728] sm:$0xff]  ;;  %v16900_v52 = vcombine.low %v3045_v39, %v3049_v40 }
 0x323   :  { %13442 = vmatprep.subr.bf16.mxu1 %v17015_v53  ;;  %v17028_v53 = vcombine.low %v3046_v41, %v3050_v42  ;;  %v17029_v55 = vcombine.high %v3054_v50, %v3058_v51  ;;  %v17030_v62 = vcombine.low %v3054_v50, %v3058_v51 }
 0x325   :  { %13188 = vmatpush1.bf16.msra.mxu0 %v16888_v58  ;;  %v3062_v58 = vld [vmem:[#allocation10 + $0x748] sm:$0xff] }
 0x326   :  { %13444 = vmatpush1.bf16.msra.mxu1 %v17016_v30  ;;  %13190 = vmatprep.subr.bf16.mxu0 %v16889_v59  ;;  %v3066_v30 = vld [vmem:[#allocation10 + $0x768] sm:$0xff]  ;;  %v16902_v59 = vcombine.low %v3053_v47, %v3057_v48 }
 0x327   :  { %13446 = vmatprep.subr.bf16.mxu1 %v17017_v60  ;;  %v19134_v60 = vsub.s32 2, %v19086_v61  ;;  %v17031_v13 = vcombine.high %v3062_v58, %v3066_v30  ;;  %v17032_v23 = vcombine.low %v3062_v58, %v3066_v30  ;;  %v3106_v47 = vld [vmem:[#allocation10 + $0x8a8] sm:$0xff] }
 0x329   :  { %13192 = vmatpush1.bf16.msra.mxu0 %v16890_v1  ;;  %v3073_v1 = vld [vmem:[#allocation10 + $0x7a0] sm:$0xff]  ;;  %v2734_v5 = vrot.slane %v19091_v9, %v19134_v60  ;;  %v2784_v18 = vrot.slane %v19099_v22, %v19134_v60 }
 0x32a   :  { %13448 = vmatpush1.bf16.msra.mxu1 %v17018_v2  ;;  %13194 = vmatprep.subr.bf16.mxu0 %v16891_v3  ;;  %v3070_v2 = vld [vmem:[#allocation10 + $0x788] sm:$0xff]  ;;  %v16905_v7 = vcombine.high %v3069_v0, %v3073_v1  ;;  %v16906_v19 = vcombine.low %v3069_v0, %v3073_v1 }
 0x32b   :  { %13450 = vmatprep.subr.bf16.mxu1 %v17019_v4  ;;  %v3074_v3 = vld [vmem:[#allocation10 + $0x7a8] sm:$0xff]  ;;  %v16904_v4 = vcombine.low %v3061_v56, %v3065_v57  ;;  %v2765_v20 = vmul.f32 %v2734_v5, %v19095_v17  ;;  %v3093_v17 = vld [vmem:[#allocation10 + $0x840] sm:$0xff] }
 0x32c   :  { %v17033_v10 = vcombine.high %v3070_v2, %v3074_v3  ;;  %v17034_v9 = vcombine.low %v3070_v2, %v3074_v3  ;;  %v3114_v56 = vld [vmem:[#allocation10 + $0x8e8] sm:$0xff]  ;;  %v3125_v5 = vld [vmem:[#allocation10 + $0x940] sm:$0xff] }
 0x32d   :  { %13196 = vmatpush1.bf16.msra.mxu0 %v16892_v11  ;;  %v3077_v11 = vld [vmem:[#allocation10 + $0x7c0] sm:$0xff]  ;;  %v2815_v32 = vadd.f32 %v2784_v18, %v2765_v20  ;;  %v3122_v0 = vld [vmem:[#allocation10 + $0x928] sm:$0xff] }
 0x32e   :  { %13452 = vmatpush1.bf16.msra.mxu1 %v17020_v12  ;;  %13198 = vmatprep.subr.bf16.mxu0 %v16893_v14  ;;  %v3081_v12 = vld [vmem:[#allocation10 + $0x7e0] sm:$0xff]  ;;  %v3078_v14 = vld [vmem:[#allocation10 + $0x7c8] sm:$0xff] }
 0x32f   :  { %13454 = vmatprep.subr.bf16.mxu1 %v17021_v16  ;;  %v3082_v16 = vld [vmem:[#allocation10 + $0x7e8] sm:$0xff]  ;;  %v16907_v21 = vcombine.high %v3077_v11, %v3081_v12  ;;  %v16908_v31 = vcombine.low %v3077_v11, %v3081_v12  ;;  %v19141_v40 = vmax.f32 %v2815_v32, 0.0  ;;  %v3133_v18 = vld [vmem:[#allocation10 + $0x980] sm:$0xff] }
 0x330   :  { %v17036_v22 = vcombine.low %v3078_v14, %v3082_v16  ;;  %v3134_v20 = vld [vmem:[#allocation10 + $0x988] sm:$0xff] }
 0x331   :  { %13200 = vmatpush1.bf16.msra.mxu0 %v16894_v24  ;;  %v17035_v24 = vcombine.high %v3078_v14, %v3082_v16  ;;  %v3146_v32 = vld [vmem:[#allocation10 + $0x9e8] sm:$0xff] }
 0x332   :  { %13456 = vmatpush1.bf16.msra.mxu1 %v17022_v25  ;;  %13202 = vmatprep.subr.bf16.mxu0 %v16895_v26  ;;  %v3085_v25 = vld [vmem:[#allocation10 + $0x800] sm:$0xff] }
 0x333   :  { %13458 = vmatprep.subr.bf16.mxu1 %v17023_v27  ;;  %v3089_v26 = vld [vmem:[#allocation10 + $0x820] sm:$0xff]  ;;  %v3086_v27 = vld [vmem:[#allocation10 + $0x808] sm:$0xff] }
 0x334   :  { %v16909_v33 = vcombine.high %v3085_v25, %v3089_v26  ;;  %v16910_v39 = vcombine.low %v3085_v25, %v3089_v26  ;;  %v17038_v41 = vcombine.low %v3086_v27, %v3090_v28 }
 0x335   :  { %13204 = vmatpush1.bf16.msra.mxu0 %v16896_v34  ;;  %v17037_v34 = vcombine.high %v3086_v27, %v3090_v28  ;;  %v3141_v27 = vld [vmem:[#allocation10 + $0x9c0] sm:$0xff] }
 0x336   :  { %13460 = vmatpush1.bf16.msra.mxu1 %v17024_v35  ;;  %13206 = vmatprep.subr.bf16.mxu0 %v16897_v37  ;;  %v3097_v35 = vld [vmem:[#allocation10 + $0x860] sm:$0xff]  ;;  %v3094_v37 = vld [vmem:[#allocation10 + $0x848] sm:$0xff] }
 0x337   :  { %13462 = vmatprep.subr.bf16.mxu1 %v17025_v38  ;;  %v3098_v38 = vld [vmem:[#allocation10 + $0x868] sm:$0xff]  ;;  %v16911_v42 = vcombine.high %v3093_v17, %v3097_v35  ;;  %v16912_v48 = vcombine.low %v3093_v17, %v3097_v35  ;;  %v3145_v28 = vld [vmem:[#allocation10 + $0x9e0] sm:$0xff] }
 0x338   :  { %v17040_v50 = vcombine.low %v3094_v37, %v3098_v38  ;;  %v3149_v35 = vld [vmem:[#allocation10 + $0xa00] sm:$0xff] }
 0x339   :  { %13208 = vmatpush1.bf16.msra.mxu0 %v16898_v43  ;;  %v17039_v43 = vcombine.high %v3094_v37, %v3098_v38  ;;  %v3153_v37 = vld [vmem:[#allocation10 + $0xa20] sm:$0xff]  ;;  %v3150_v38 = vld [vmem:[#allocation10 + $0xa08] sm:$0xff] }
 0x33a   :  { %13464 = vmatpush1.bf16.msra.mxu1 %v17026_v44  ;;  %13210 = vmatprep.subr.bf16.mxu0 %v16899_v45  ;;  %v3101_v44 = vld [vmem:[#allocation10 + $0x880] sm:$0xff] }
 0x33b   :  { %13466 = vmatprep.subr.bf16.mxu1 %v17027_v46  ;;  %v3105_v45 = vld [vmem:[#allocation10 + $0x8a0] sm:$0xff]  ;;  %v3102_v46 = vld [vmem:[#allocation10 + $0x888] sm:$0xff] }
 0x33c   :  { %v16913_v51 = vcombine.high %v3101_v44, %v3105_v45  ;;  %v16914_v57 = vcombine.low %v3101_v44, %v3105_v45  ;;  %v17042_v58 = vcombine.low %v3102_v46, %v3106_v47  ;;  %v3157_v45 = vld [vmem:[#allocation10 + $0xa40] sm:$0xff] }
 0x33d   :  { %13212 = vmatpush1.bf16.msra.mxu0 %v16900_v52  ;;  %v17041_v52 = vcombine.high %v3102_v46, %v3106_v47  ;;  %v3161_v46 = vld [vmem:[#allocation10 + $0xa60] sm:$0xff]  ;;  %v3158_v47 = vld [vmem:[#allocation10 + $0xa48] sm:$0xff] }
 0x33e   :  { %13468 = vmatpush1.bf16.msra.mxu1 %v17028_v53  ;;  %13214 = vmatprep.subr.bf16.mxu0 %v16901_v54  ;;  %v3109_v53 = vld [vmem:[#allocation10 + $0x8c0] sm:$0xff] }
 0x33f   :  { %13470 = vmatprep.subr.bf16.mxu1 %v17029_v55  ;;  %v3113_v54 = vld [vmem:[#allocation10 + $0x8e0] sm:$0xff]  ;;  %v3110_v55 = vld [vmem:[#allocation10 + $0x8c8] sm:$0xff] }
 0x340   :  { %v16915_v30 = vcombine.high %v3109_v53, %v3113_v54  ;;  %v16916_v1 = vcombine.low %v3109_v53, %v3113_v54  ;;  %v17044_v2 = vcombine.low %v3110_v55, %v3114_v56  ;;  %v3165_v54 = vld [vmem:[#allocation10 + $0xa80] sm:$0xff] }
 0x341   :  { %13216 = vmatpush1.bf16.msra.mxu0 %v16902_v59  ;;  %v17043_v59 = vcombine.high %v3110_v55, %v3114_v56  ;;  %v3169_v55 = vld [vmem:[#allocation10 + $0xaa0] sm:$0xff]  ;;  %v3166_v56 = vld [vmem:[#allocation10 + $0xa88] sm:$0xff] }
 0x342   :  { %13472 = vmatpush1.bf16.msra.mxu1 %v17030_v62  ;;  %13218 = vmatprep.subr.bf16.mxu0 %v16903_v63  ;;  %v3117_v62 = vld [vmem:[#allocation10 + $0x900] sm:$0xff] }
 0x343   :  { %13474 = vmatprep.subr.bf16.mxu1 %v17031_v13  ;;  %v3121_v63 = vld [vmem:[#allocation10 + $0x920] sm:$0xff]  ;;  %v3118_v13 = vld [vmem:[#allocation10 + $0x908] sm:$0xff] }
 0x344   :  { %v16917_v3 = vcombine.high %v3117_v62, %v3121_v63  ;;  %v16918_v11 = vcombine.low %v3117_v62, %v3121_v63  ;;  %v17046_v12 = vcombine.low %v3118_v13, %v3122_v0  ;;  %v3173_v63 = vld [vmem:[#allocation10 + $0xac0] sm:$0xff] }
 0x345   :  { %13220 = vmatpush1.bf16.msra.mxu0 %v16904_v4  ;;  %v17045_v4 = vcombine.high %v3118_v13, %v3122_v0  ;;  %v3177_v13 = vld [vmem:[#allocation10 + $0xae0] sm:$0xff]  ;;  %v3174_v0 = vld [vmem:[#allocation10 + $0xac8] sm:$0xff] }
 0x346   :  { %13476 = vmatpush1.bf16.msra.mxu1 %v17032_v23  ;;  %13222 = vmatprep.subr.bf16.mxu0 %v16905_v7  ;;  %v3129_v23 = vld [vmem:[#allocation10 + $0x960] sm:$0xff]  ;;  %v3126_v7 = vld [vmem:[#allocation10 + $0x948] sm:$0xff] }
 0x347   :  { %13478 = vmatprep.subr.bf16.mxu1 %v17033_v10  ;;  %v3130_v10 = vld [vmem:[#allocation10 + $0x968] sm:$0xff]  ;;  %v16919_v14 = vcombine.high %v3125_v5, %v3129_v23 }
 0x348   :  { %v17047_v16 = vcombine.high %v3126_v7, %v3130_v10 }
 0x349   :  { %13224 = vmatpush1.bf16.msra.mxu0 %v16906_v19  ;;  %v3137_v19 = vld [vmem:[#allocation10 + $0x9a0] sm:$0xff] }
 0x34a   :  { %13480 = vmatpush1.bf16.msra.mxu1 %v17034_v9  ;;  %13226 = vmatprep.subr.bf16.mxu0 %v16907_v21  ;;  %v3138_v9 = vld [vmem:[#allocation10 + $0x9a8] sm:$0xff]  ;;  %v16920_v21 = vcombine.low %v3125_v5, %v3129_v23  ;;  %v16921_v25 = vcombine.high %v3133_v18, %v3137_v19  ;;  %v3181_v23 = vld [vmem:[#allocation10 + $0xb00] sm:$0xff] }
 0x34b   :  { %13482 = vmatprep.subr.bf16.mxu1 %v17035_v24  ;;  %v17048_v24 = vcombine.low %v3126_v7, %v3130_v10  ;;  %v17049_v26 = vcombine.high %v3134_v20, %v3138_v9  ;;  %v3185_v7 = vld [vmem:[#allocation10 + $0xb20] sm:$0xff]  ;;  %v3182_v10 = vld [vmem:[#allocation10 + $0xb08] sm:$0xff] }
 0x34d   :  { %13228 = vmatpush1.bf16.msra.mxu0 %v16908_v31  ;;  %v3142_v31 = vld [vmem:[#allocation10 + $0x9c8] sm:$0xff] }
 0x34e   :  { %13484 = vmatpush1.bf16.msra.mxu1 %v17036_v22  ;;  %13230 = vmatprep.subr.bf16.mxu0 %v16909_v33  ;;  %v16922_v22 = vcombine.low %v3133_v18, %v3137_v19  ;;  %v17050_v33 = vcombine.low %v3134_v20, %v3138_v9  ;;  %v17051_v17 = vcombine.high %v3142_v31, %v3146_v32  ;;  %v3189_v19 = vld [vmem:[#allocation10 + $0xb40] sm:$0xff]  ;;  %v3190_v9 = vld [vmem:[#allocation10 + $0xb48] sm:$0xff] }
 0x34f   :  { %13486 = vmatprep.subr.bf16.mxu1 %v17037_v34  ;;  %v16923_v34 = vcombine.high %v3141_v27, %v3145_v28  ;;  %v3193_v20 = vld [vmem:[#allocation10 + $0xb60] sm:$0xff] }
 0x350   :  { %4501 = vmatmul.mubr.f32.vlgmr.msra.gmra.mrb[4].mxu0 %v19141_v40 }
 0x351   :  { %4785 = vmatmul.mubr.f32.vlgmr.msra.gmra.mrb[4].mxu1 %v19141_v40  ;;  %13232 = vmatpush1.bf16.msra.mxu0 %v16910_v39  ;;  %v3154_v39 = vld [vmem:[#allocation10 + $0xa28] sm:$0xff] }
 0x352   :  { %13488 = vmatpush1.bf16.msra.mxu1 %v17038_v41  ;;  %13234 = vmatprep.subr.bf16.mxu0 %v16911_v42  ;;  %v16924_v41 = vcombine.low %v3141_v27, %v3145_v28  ;;  %v17052_v42 = vcombine.low %v3142_v31, %v3146_v32  ;;  %v17053_v44 = vcombine.high %v3150_v38, %v3154_v39  ;;  %v3197_v28 = vld [vmem:[#allocation10 + $0xb80] sm:$0xff]  ;;  %v3198_v32 = vld [vmem:[#allocation10 + $0xb88] sm:$0xff] }
 0x353   :  { %13490 = vmatprep.subr.bf16.mxu1 %v17039_v43  ;;  %v16925_v43 = vcombine.high %v3149_v35, %v3153_v37  ;;  %v3201_v31 = vld [vmem:[#allocation10 + $0xba0] sm:$0xff] }
 0x355   :  { %13236 = vmatpush1.bf16.msra.mxu0 %v16912_v48  ;;  %v3162_v48 = vld [vmem:[#allocation10 + $0xa68] sm:$0xff] }
 0x356   :  { %13492 = vmatpush1.bf16.msra.mxu1 %v17040_v50  ;;  %13238 = vmatprep.subr.bf16.mxu0 %v16913_v51  ;;  %v16926_v50 = vcombine.low %v3149_v35, %v3153_v37  ;;  %v17054_v51 = vcombine.low %v3150_v38, %v3154_v39  ;;  %v17055_v53 = vcombine.high %v3158_v47, %v3162_v48  ;;  %v3205_v37 = vld [vmem:[#allocation10 + $0xbc0] sm:$0xff]  ;;  %v3206_v39 = vld [vmem:[#allocation10 + $0xbc8] sm:$0xff] }
 0x357   :  { %13494 = vmatprep.subr.bf16.mxu1 %v17041_v52  ;;  %v16927_v52 = vcombine.high %v3157_v45, %v3161_v46  ;;  %v3209_v38 = vld [vmem:[#allocation10 + $0xbe0] sm:$0xff] }
 0x359   :  { %13240 = vmatpush1.bf16.msra.mxu0 %v16914_v57  ;;  %v3170_v57 = vld [vmem:[#allocation10 + $0xaa8] sm:$0xff] }
 0x35a   :  { %13496 = vmatpush1.bf16.msra.mxu1 %v17042_v58  ;;  %13242 = vmatprep.subr.bf16.mxu0 %v16915_v30  ;;  %v16928_v58 = vcombine.low %v3157_v45, %v3161_v46  ;;  %v17056_v30 = vcombine.low %v3158_v47, %v3162_v48  ;;  %v17057_v62 = vcombine.high %v3166_v56, %v3170_v57  ;;  %v3213_v46 = vld [vmem:[#allocation10 + $0xc00] sm:$0xff]  ;;  %v3214_v48 = vld [vmem:[#allocation10 + $0xc08] sm:$0xff] }
 0x35b   :  { %13498 = vmatprep.subr.bf16.mxu1 %v17043_v59  ;;  %v16929_v59 = vcombine.high %v3165_v54, %v3169_v55  ;;  %v3217_v47 = vld [vmem:[#allocation10 + $0xc20] sm:$0xff] }
 0x35d   :  { %13244 = vmatpush1.bf16.msra.mxu0 %v16916_v1  ;;  %v3178_v1 = vld [vmem:[#allocation10 + $0xae8] sm:$0xff] }
 0x35e   :  { %13500 = vmatpush1.bf16.msra.mxu1 %v17044_v2  ;;  %13246 = vmatprep.subr.bf16.mxu0 %v16917_v3  ;;  %v16930_v2 = vcombine.low %v3165_v54, %v3169_v55  ;;  %v17058_v3 = vcombine.low %v3166_v56, %v3170_v57  ;;  %v17059_v5 = vcombine.high %v3174_v0, %v3178_v1  ;;  %v19146_v55 = vsub.s32 4, %v19086_v61 }
 0x35f   :  { %13502 = vmatprep.subr.bf16.mxu1 %v17045_v4  ;;  %v16931_v4 = vcombine.high %v3173_v63, %v3177_v13  ;;  %v19149_v56 = vsub.s32 5, %v19086_v61  ;;  %v19152_v57 = vsub.s32 7, %v19086_v61 }
 0x361   :  { %13248 = vmatpush1.bf16.msra.mxu0 %v16918_v11  ;;  %v3186_v11 = vld [vmem:[#allocation10 + $0xb28] sm:$0xff] }
 0x362   :  { %13504 = vmatpush1.bf16.msra.mxu1 %v17046_v12  ;;  %13250 = vmatprep.subr.bf16.mxu0 %v16919_v14  ;;  %v16932_v12 = vcombine.low %v3173_v63, %v3177_v13  ;;  %v17060_v14 = vcombine.low %v3174_v0, %v3178_v1  ;;  %v17061_v18 = vcombine.high %v3182_v10, %v3186_v11 }
 0x363   :  { %13506 = vmatprep.subr.bf16.mxu1 %v17047_v16  ;;  %v16933_v16 = vcombine.high %v3181_v23, %v3185_v7 }
 0x365   :  { %13252 = vmatpush1.bf16.msra.mxu0 %v16920_v21  ;;  %v3194_v21 = vld [vmem:[#allocation10 + $0xb68] sm:$0xff] }
 0x366   :  { %13508 = vmatpush1.bf16.msra.mxu1 %v17048_v24  ;;  %13254 = vmatprep.subr.bf16.mxu0 %v16921_v25  ;;  %v16934_v24 = vcombine.low %v3181_v23, %v3185_v7  ;;  %v17062_v25 = vcombine.low %v3182_v10, %v3186_v11  ;;  %v17063_v27 = vcombine.high %v3190_v9, %v3194_v21 }
 0x367   :  { %13510 = vmatprep.subr.bf16.mxu1 %v17049_v26  ;;  %v16935_v26 = vcombine.high %v3189_v19, %v3193_v20 }
 0x369   :  { %13256 = vmatpush1.bf16.msra.mxu0 %v16922_v22  ;;  %v3202_v22 = vld [vmem:[#allocation10 + $0xba8] sm:$0xff] }
 0x36a   :  { %13512 = vmatpush1.bf16.msra.mxu1 %v17050_v33  ;;  %13258 = vmatprep.subr.bf16.mxu0 %v16923_v34  ;;  %v16936_v33 = vcombine.low %v3189_v19, %v3193_v20  ;;  %v17064_v34 = vcombine.low %v3190_v9, %v3194_v21  ;;  %v17065_v35 = vcombine.high %v3198_v32, %v3202_v22  ;;  %v3222_v19 = vld [vmem:[#allocation10 + $0xc48] sm:$0xff] }
 0x36b   :  { %13514 = vmatprep.subr.bf16.mxu1 %v17051_v17  ;;  %v16937_v17 = vcombine.high %v3197_v28, %v3201_v31  ;;  %v3226_v20 = vld [vmem:[#allocation10 + $0xc68] sm:$0xff]  ;;  %v16942_v21 = vcombine.low %v3213_v46, %v3217_v47 }
 0x36d   :  { %13260 = vmatpush1.bf16.msra.mxu0 %v16924_v41  ;;  %v3210_v41 = vld [vmem:[#allocation10 + $0xbe8] sm:$0xff] }
 0x36e   :  { %13516 = vmatpush1.bf16.msra.mxu1 %v17052_v42  ;;  %13262 = vmatprep.subr.bf16.mxu0 %v16925_v43  ;;  %v16938_v42 = vcombine.low %v3197_v28, %v3201_v31  ;;  %v17066_v43 = vcombine.low %v3198_v32, %v3202_v22  ;;  %v17067_v45 = vcombine.high %v3206_v39, %v3210_v41  ;;  %v3233_v31 = vld [vmem:[#allocation10 + $0xca0] sm:$0xff]  ;;  %v3230_v32 = vld [vmem:[#allocation10 + $0xc88] sm:$0xff] }
 0x36f   :  { %13518 = vmatprep.subr.bf16.mxu1 %v17053_v44  ;;  %v16939_v44 = vcombine.high %v3205_v37, %v3209_v38  ;;  %v17071_v28 = vcombine.high %v3222_v19, %v3226_v20  ;;  %v3234_v22 = vld [vmem:[#allocation10 + $0xca8] sm:$0xff] }
 0x371   :  { %13264 = vmatpush1.bf16.msra.mxu0 %v16926_v50  ;;  %v3218_v50 = vld [vmem:[#allocation10 + $0xc28] sm:$0xff] }
 0x372   :  { %13520 = vmatpush1.bf16.msra.mxu1 %v17054_v51  ;;  %13266 = vmatprep.subr.bf16.mxu0 %v16927_v52  ;;  %v16940_v51 = vcombine.low %v3205_v37, %v3209_v38  ;;  %v17068_v52 = vcombine.low %v3206_v39, %v3210_v41  ;;  %v17069_v54 = vcombine.high %v3214_v48, %v3218_v50  ;;  %v3237_v38 = vld [vmem:[#allocation10 + $0xcc0] sm:$0xff]  ;;  %v3238_v41 = vld [vmem:[#allocation10 + $0xcc8] sm:$0xff] }
 0x373   :  { %13522 = vmatprep.subr.bf16.mxu1 %v17055_v53  ;;  %v16941_v53 = vcombine.high %v3213_v46, %v3217_v47  ;;  %v17073_v37 = vcombine.high %v3230_v32, %v3234_v22  ;;  %v3241_v39 = vld [vmem:[#allocation10 + $0xce0] sm:$0xff] }
 0x374   :  { %v3245_v47 = vld [vmem:[#allocation10 + $0xd00] sm:$0xff] }
 0x375   :  { %13268 = vmatpush1.bf16.msra.mxu0 %v16928_v58  ;;  %v19154_v58 = vld [vmem:[#allocation7] sm:$0xff] }
 0x376   :  { %13524 = vmatpush1.bf16.msra.mxu1 %v17056_v30  ;;  %13270 = vmatprep.subr.bf16.mxu0 %v16929_v59  ;;  %v2742_v30 = vrot.slane %v19154_v58, %v19146_v55  ;;  %v2746_v59 = vrot.slane %v19154_v58, %v19149_v56  ;;  %v2754_v13 = vrot.slane %v19154_v58, %v19152_v57 }
 0x377   :  { %13526 = vmatprep.subr.bf16.mxu1 %v17057_v62  ;;  %v19160_v62 = vld [vmem:[#allocation8] sm:$0xff] }
 0x378   :  { %v2792_v63 = vrot.slane %v19160_v62, %v19146_v55  ;;  %v2796_v1 = vrot.slane %v19160_v62, %v19149_v56 }
 0x379   :  { %13272 = vmatpush1.bf16.msra.mxu0 %v16930_v2 }
 0x37a   :  { %13528 = vmatpush1.bf16.msra.mxu1 %v17058_v3  ;;  %13274 = vmatprep.subr.bf16.mxu0 %v16931_v4 }
 0x37b   :  { %13530 = vmatprep.subr.bf16.mxu1 %v17059_v5  ;;  %v2804_v5 = vrot.slane %v19160_v62, %v19152_v57 }
 0x37d   :  { %13276 = vmatpush1.bf16.msra.mxu0 %v16932_v12 }
 0x37e   :  { %13532 = vmatpush1.bf16.msra.mxu1 %v17060_v14  ;;  %13278 = vmatprep.subr.bf16.mxu0 %v16933_v16  ;;  %v3221_v14 = vld [vmem:[#allocation10 + $0xc40] sm:$0xff] }
 0x37f   :  { %13534 = vmatprep.subr.bf16.mxu1 %v17061_v18  ;;  %v3225_v18 = vld [vmem:[#allocation10 + $0xc60] sm:$0xff] }
 0x381   :  { %13280 = vmatpush1.bf16.msra.mxu0 %v16934_v24  ;;  %v17070_v24 = vcombine.low %v3214_v48, %v3218_v50  ;;  %v3249_v48 = vld [vmem:[#allocation10 + $0xd20] sm:$0xff]  ;;  %v3246_v50 = vld [vmem:[#allocation10 + $0xd08] sm:$0xff] }
 0x382   :  { %13536 = vmatpush1.bf16.msra.mxu1 %v17062_v25  ;;  %13282 = vmatprep.subr.bf16.mxu0 %v16935_v26  ;;  %v3229_v26 = vld [vmem:[#allocation10 + $0xc80] sm:$0xff] }
 0x383   :  { %13538 = vmatprep.subr.bf16.mxu1 %v17063_v27  ;;  %v16943_v27 = vcombine.high %v3221_v14, %v3225_v18 }
 0x385   :  { %13284 = vmatpush1.bf16.msra.mxu0 %v16936_v33 }
 0x386   :  { %13540 = vmatpush1.bf16.msra.mxu1 %v17064_v34  ;;  %13286 = vmatprep.subr.bf16.mxu0 %v16937_v17  ;;  %v16944_v34 = vcombine.low %v3221_v14, %v3225_v18  ;;  %v17072_v17 = vcombine.low %v3222_v19, %v3226_v20  ;;  %v3269_v19 = vld [vmem:[#allocation10 + $0xdc0] sm:$0xff] }
 0x387   :  { %13542 = vmatprep.subr.bf16.mxu1 %v17065_v35  ;;  %v16945_v35 = vcombine.high %v3229_v26, %v3233_v31  ;;  %v3273_v20 = vld [vmem:[#allocation10 + $0xde0] sm:$0xff] }
 0x389   :  { %13288 = vmatpush1.bf16.msra.mxu0 %v16938_v42  ;;  %v3242_v42 = vld [vmem:[#allocation10 + $0xce8] sm:$0xff] }
 0x38a   :  { %13544 = vmatpush1.bf16.msra.mxu1 %v17066_v43  ;;  %13290 = vmatprep.subr.bf16.mxu0 %v16939_v44  ;;  %v16946_v43 = vcombine.low %v3229_v26, %v3233_v31  ;;  %v17074_v44 = vcombine.low %v3230_v32, %v3234_v22  ;;  %v17075_v46 = vcombine.high %v3238_v41, %v3242_v42  ;;  %v3277_v32 = vld [vmem:[#allocation10 + $0xe00] sm:$0xff] }
 0x38b   :  { %13546 = vmatprep.subr.bf16.mxu1 %v17067_v45  ;;  %v16947_v45 = vcombine.high %v3237_v38, %v3241_v39  ;;  %v3281_v22 = vld [vmem:[#allocation10 + $0xe20] sm:$0xff] }
 0x38d   :  { %13292 = vmatpush1.bf16.msra.mxu0 %v16940_v51  ;;  %v3250_v51 = vld [vmem:[#allocation10 + $0xd28] sm:$0xff] }
 0x38e   :  { %13548 = vmatpush1.bf16.msra.mxu1 %v17068_v52  ;;  %13294 = vmatprep.subr.bf16.mxu0 %v16941_v53  ;;  %v16948_v52 = vcombine.low %v3237_v38, %v3241_v39  ;;  %v17076_v53 = vcombine.low %v3238_v41, %v3242_v42  ;;  %v16957_v38 = vcombine.high %v3277_v32, %v3281_v22  ;;  %v3285_v41 = vld [vmem:[#allocation10 + $0xe40] sm:$0xff] }
 0x38f   :  { %13550 = vmatprep.subr.bf16.mxu1 %v17069_v54  ;;  %v16949_v54 = vcombine.high %v3245_v47, %v3249_v48  ;;  %v3289_v42 = vld [vmem:[#allocation10 + $0xe60] sm:$0xff] }
 0x3a3   :  { %v2432_v0 = vpop.f32.mrb[2].mxu0  ;;  %v19168_v3 = vpop.f32.mrb[2].mxu1 }
 0x3a4   :  { %v2767_v2 = vmul.f32 %v2742_v30, %v2432_v0  ;;  %v2434_v4 = vpop.f32.mrb[3].mxu0  ;;  %v2718_v7 = vpop.f32.mrb[3].mxu1  ;;  %v17077_v30 = vcombine.high %v3246_v50, %v3250_v51  ;;  %v3258_v0 = vld [vmem:[#allocation10 + $0xd68] sm:$0xff] }
 0x3a5   :  { %v2768_v23 = vmul.f32 %v2746_v59, %v2434_v4  ;;  %v2770_v11 = vmul.f32 %v2754_v13, %v2718_v7  ;;  %v3253_v59 = vld [vmem:[#allocation10 + $0xd40] sm:$0xff]  ;;  %v3254_v13 = vld [vmem:[#allocation10 + $0xd48] sm:$0xff] }
 0x3a6   :  { %v2817_v10 = vadd.f32 %v2792_v63, %v2767_v2  ;;  %v3257_v63 = vld [vmem:[#allocation10 + $0xd60] sm:$0xff]  ;;  %v17078_v2 = vcombine.low %v3246_v50, %v3250_v51  ;;  %v17080_v14 = vcombine.low %v3254_v13, %v3258_v0 }
 0x3a7   :  { %v2818_v12 = vadd.f32 %v2796_v1, %v2768_v23  ;;  %v2820_v16 = vadd.f32 %v2804_v5, %v2770_v11  ;;  %v16950_v1 = vcombine.low %v3245_v47, %v3249_v48  ;;  %v16951_v4 = vcombine.high %v3253_v59, %v3257_v63  ;;  %v3261_v23 = vld [vmem:[#allocation10 + $0xd80] sm:$0xff]  ;;  %v3266_v11 = vld [vmem:[#allocation10 + $0xda8] sm:$0xff] }
 0x3a8   :  { %v19174_v25 = vmax.f32 %v2817_v10, 0.0  ;;  %v17079_v5 = vcombine.high %v3254_v13, %v3258_v0  ;;  %v3265_v7 = vld [vmem:[#allocation10 + $0xda0] sm:$0xff]  ;;  %v3262_v10 = vld [vmem:[#allocation10 + $0xd88] sm:$0xff]  ;;  %v16959_v47 = vcombine.high %v3285_v41, %v3289_v42 }
 0x3a9   :  { %v19172_v9 = vmax.f32 %v2818_v12, 0.0  ;;  %v19178_v33 = vmax.f32 %v2820_v16, 0.0  ;;  %v16952_v12 = vcombine.low %v3253_v59, %v3257_v63  ;;  %v16953_v16 = vcombine.high %v3261_v23, %v3265_v7  ;;  %v3293_v50 = vld [vmem:[#allocation10 + $0xe80] sm:$0xff] }
 0x3aa   :  { %v17081_v18 = vcombine.high %v3262_v10, %v3266_v11  ;;  %v16954_v26 = vcombine.low %v3261_v23, %v3265_v7  ;;  %v3297_v51 = vld [vmem:[#allocation10 + $0xea0] sm:$0xff] }
 0x3ab   :  { %4571 = vmatprep.mubr.f32.mxu0 %v19172_v9  ;;  %4855 = vmatprep.mubr.f32.mxu1 %v19172_v9  ;;  %v16961_v59 = vcombine.high %v3293_v50, %v3297_v51  ;;  %v3301_v13 = vld [vmem:[#allocation10 + $0xec0] sm:$0xff] }
 0x3ac   :  { %4572 = vmatmul.mubr.f32.vlgmr.msra.gmra.mrb[4].mxu0 %v19174_v25  ;;  %4856 = vmatmul.mubr.f32.vlgmr.msra.gmra.mrb[4].mxu1 %v19174_v25  ;;  %v3305_v0 = vld [vmem:[#allocation10 + $0xee0] sm:$0xff] }
 0x3ad   :  { %13296 = vmatpush1.bf16.msra.mxu0 %v16942_v21  ;;  %13552 = vmatpush1.bf16.msra.mxu1 %v17070_v24  ;;  %v3270_v21 = vld [vmem:[#allocation10 + $0xdc8] sm:$0xff]  ;;  %v16963_v23 = vcombine.high %v3301_v13, %v3305_v0 }
 0x3ae   :  { %4642 = vmatprep.mubr.f32.mxu0 %v19178_v33  ;;  %4926 = vmatprep.mubr.f32.mxu1 %v19178_v33  ;;  %v3274_v24 = vld [vmem:[#allocation10 + $0xde8] sm:$0xff] }
 0x3af   :  { %13298 = vmatprep.subr.bf16.mxu0 %v16943_v27  ;;  %13554 = vmatprep.subr.bf16.mxu1 %v17071_v28  ;;  %v17082_v27 = vcombine.low %v3262_v10, %v3266_v11  ;;  %v16955_v28 = vcombine.high %v3269_v19, %v3273_v20  ;;  %v17083_v31 = vcombine.high %v3270_v21, %v3274_v24  ;;  %v3309_v10 = vld [vmem:[#allocation10 + $0xf00] sm:$0xff] }
 0x3b0   :  { %v3313_v11 = vld [vmem:[#allocation10 + $0xf20] sm:$0xff] }
 0x3b1   :  { %13300 = vmatpush1.bf16.msra.mxu0 %v16944_v34  ;;  %13556 = vmatpush1.bf16.msra.mxu1 %v17072_v17  ;;  %v3278_v34 = vld [vmem:[#allocation10 + $0xe08] sm:$0xff] }
 0x3b2   :  { %13302 = vmatprep.subr.bf16.mxu0 %v16945_v35  ;;  %13558 = vmatprep.subr.bf16.mxu1 %v17073_v37  ;;  %v3282_v17 = vld [vmem:[#allocation10 + $0xe28] sm:$0xff]  ;;  %v16956_v35 = vcombine.low %v3269_v19, %v3273_v20  ;;  %v17084_v37 = vcombine.low %v3270_v21, %v3274_v24  ;;  %v16965_v19 = vcombine.high %v3309_v10, %v3313_v11  ;;  %v3317_v21 = vld [vmem:[#allocation10 + $0xf40] sm:$0xff] }
 0x3b3   :  { %v17085_v39 = vcombine.high %v3278_v34, %v3282_v17  ;;  %v3321_v24 = vld [vmem:[#allocation10 + $0xf60] sm:$0xff] }
 0x3b5   :  { %13304 = vmatpush1.bf16.msra.mxu0 %v16946_v43  ;;  %13560 = vmatpush1.bf16.msra.mxu1 %v17074_v44  ;;  %v3286_v43 = vld [vmem:[#allocation10 + $0xe48] sm:$0xff] }
 0x3b6   :  { %13306 = vmatprep.subr.bf16.mxu0 %v16947_v45  ;;  %13562 = vmatprep.subr.bf16.mxu1 %v17075_v46  ;;  %v3290_v44 = vld [vmem:[#allocation10 + $0xe68] sm:$0xff]  ;;  %v16958_v45 = vcombine.low %v3277_v32, %v3281_v22  ;;  %v17086_v46 = vcombine.low %v3278_v34, %v3282_v17  ;;  %v19185_v32 = vsub.s32 6, %v19086_v61  ;;  %v16967_v22 = vcombine.high %v3317_v21, %v3321_v24  ;;  %v3325_v17 = vld [vmem:[#allocation10 + $0xf80] sm:$0xff] }
 0x3b7   :  { %v17087_v48 = vcombine.high %v3286_v43, %v3290_v44 }
 0x3b9   :  { %13308 = vmatpush1.bf16.msra.mxu0 %v16948_v52  ;;  %13564 = vmatpush1.bf16.msra.mxu1 %v17076_v53  ;;  %v3294_v52 = vld [vmem:[#allocation10 + $0xe88] sm:$0xff] }
 0x3ba   :  { %13310 = vmatprep.subr.bf16.mxu0 %v16949_v54  ;;  %13566 = vmatprep.subr.bf16.mxu1 %v17077_v30  ;;  %v3298_v53 = vld [vmem:[#allocation10 + $0xea8] sm:$0xff]  ;;  %v16960_v54 = vcombine.low %v3285_v41, %v3289_v42  ;;  %v17088_v30 = vcombine.low %v3286_v43, %v3290_v44  ;;  %v2750_v42 = vrot.slane %v19154_v58, %v19185_v32  ;;  %v3333_v44 = vld [vmem:[#allocation10 + $0xfc0] sm:$0xff] }
 0x3bb   :  { %v17089_v63 = vcombine.high %v3294_v52, %v3298_v53 }
 0x3bd   :  { %13312 = vmatpush1.bf16.msra.mxu0 %v16950_v1  ;;  %13568 = vmatpush1.bf16.msra.mxu1 %v17078_v2  ;;  %v3302_v1 = vld [vmem:[#allocation10 + $0xec8] sm:$0xff] }
 0x3be   :  { %13314 = vmatprep.subr.bf16.mxu0 %v16951_v4  ;;  %13570 = vmatprep.subr.bf16.mxu1 %v17079_v5  ;;  %v3306_v2 = vld [vmem:[#allocation10 + $0xee8] sm:$0xff]  ;;  %v16962_v4 = vcombine.low %v3293_v50, %v3297_v51  ;;  %v17090_v5 = vcombine.low %v3294_v52, %v3298_v53  ;;  %v2769_v52 = vmul.f32 %v2750_v42, %v19168_v3  ;;  %v2840_v3 = vld [vmem:[#allocation10 + $0x58] sm:$0xff] }
 0x3bf   :  { %v17091_v7 = vcombine.high %v3302_v1, %v3306_v2  ;;  %v2868_v42 = vld [vmem:[#allocation10 + $0x138] sm:$0xff] }
 0x3c1   :  { %13316 = vmatpush1.bf16.msra.mxu0 %v16952_v12  ;;  %13572 = vmatpush1.bf16.msra.mxu1 %v17080_v14  ;;  %v3310_v12 = vld [vmem:[#allocation10 + $0xf08] sm:$0xff] }
 0x3c2   :  { %13318 = vmatprep.subr.bf16.mxu0 %v16953_v16  ;;  %13574 = vmatprep.subr.bf16.mxu1 %v17081_v18  ;;  %v3314_v14 = vld [vmem:[#allocation10 + $0xf28] sm:$0xff]  ;;  %v16964_v16 = vcombine.low %v3301_v13, %v3305_v0  ;;  %v17092_v18 = vcombine.low %v3302_v1, %v3306_v2 }
 0x3c3   :  { %v17093_v20 = vcombine.high %v3310_v12, %v3314_v14 }
 0x3c5   :  { %13320 = vmatpush1.bf16.msra.mxu0 %v16954_v26  ;;  %13576 = vmatpush1.bf16.msra.mxu1 %v17082_v27  ;;  %v3318_v26 = vld [vmem:[#allocation10 + $0xf48] sm:$0xff] }
 0x3c6   :  { %13322 = vmatprep.subr.bf16.mxu0 %v16955_v28  ;;  %13578 = vmatprep.subr.bf16.mxu1 %v17083_v31  ;;  %v3322_v27 = vld [vmem:[#allocation10 + $0xf68] sm:$0xff]  ;;  %v16966_v28 = vcombine.low %v3309_v10, %v3313_v11  ;;  %v17094_v31 = vcombine.low %v3310_v12, %v3314_v14 }
 0x3c7   :  { %v17095_v34 = vcombine.high %v3318_v26, %v3322_v27  ;;  %v17096_v41 = vcombine.low %v3318_v26, %v3322_v27 }
 0x3c9   :  { %13324 = vmatpush1.bf16.msra.mxu0 %v16956_v35  ;;  %13580 = vmatpush1.bf16.msra.mxu1 %v17084_v37  ;;  %v3329_v35 = vld [vmem:[#allocation10 + $0xfa0] sm:$0xff]  ;;  %v3326_v37 = vld [vmem:[#allocation10 + $0xf88] sm:$0xff] }
 0x3ca   :  { %13326 = vmatprep.subr.bf16.mxu0 %v16957_v38  ;;  %13582 = vmatprep.subr.bf16.mxu1 %v17085_v39  ;;  %v3330_v38 = vld [vmem:[#allocation10 + $0xfa8] sm:$0xff]  ;;  %v16968_v39 = vcombine.low %v3317_v21, %v3321_v24  ;;  %v16969_v43 = vcombine.high %v3325_v17, %v3329_v35  ;;  %v16970_v50 = vcombine.low %v3325_v17, %v3329_v35 }
 0x3cb   :  { %v17097_v61 = vcombine.high %v3326_v37, %v3330_v38  ;;  %v17098_v51 = vcombine.low %v3326_v37, %v3330_v38 }
 0x3cd   :  { %13328 = vmatpush1.bf16.msra.mxu0 %v16958_v45  ;;  %13584 = vmatpush1.bf16.msra.mxu1 %v17086_v46  ;;  %v3337_v45 = vld [vmem:[#allocation10 + $0xfe0] sm:$0xff]  ;;  %v3334_v46 = vld [vmem:[#allocation10 + $0xfc8] sm:$0xff] }
 0x3ce   :  { %13330 = vmatprep.subr.bf16.mxu0 %v16959_v47  ;;  %13586 = vmatprep.subr.bf16.mxu1 %v17087_v48  ;;  %v3338_v47 = vld [vmem:[#allocation10 + $0xfe8] sm:$0xff]  ;;  %v2800_v48 = vrot.slane %v19160_v62, %v19185_v32  ;;  %v16971_v58 = vcombine.high %v3333_v44, %v3337_v45  ;;  %v16972_v13 = vcombine.low %v3333_v44, %v3337_v45 }
 0x3cf   :  { %v17099_v53 = vcombine.high %v3334_v46, %v3338_v47  ;;  %v17100_v0 = vcombine.low %v3334_v46, %v3338_v47  ;;  %v2871_v46 = vld [vmem:[#allocation10 + $0x150] sm:$0xff] }
 0x3d0   :  { %v2819_v1 = vadd.f32 %v2800_v48, %v2769_v52  ;;  %v2875_v47 = vld [vmem:[#allocation10 + $0x170] sm:$0xff]  ;;  %v2872_v48 = vld [vmem:[#allocation10 + $0x158] sm:$0xff] }
 0x3d1   :  { %13332 = vmatpush1.bf16.msra.mxu0 %v16960_v54  ;;  %13588 = vmatpush1.bf16.msra.mxu1 %v17088_v30  ;;  %v2831_v54 = vld [vmem:[#allocation10 + $0x10] sm:$0xff] }
 0x3d2   :  { %13334 = vmatprep.subr.bf16.mxu0 %v16961_v59  ;;  %13590 = vmatprep.subr.bf16.mxu1 %v17089_v63  ;;  %v2835_v30 = vld [vmem:[#allocation10 + $0x30] sm:$0xff]  ;;  %v2832_v59 = vld [vmem:[#allocation10 + $0x18] sm:$0xff]  ;;  %v19192_v10 = vmax.f32 %v2819_v1, 0.0 }
 0x3d3   :  { %v2836_v63 = vld [vmem:[#allocation10 + $0x38] sm:$0xff]  ;;  %v17101_v62 = vcombine.high %v2831_v54, %v2835_v30 }
 0x3d4   :  { %v17229_v2 = vcombine.high %v2832_v59, %v2836_v63  ;;  %v17230_v11 = vcombine.low %v2832_v59, %v2836_v63  ;;  %v2880_v59 = vld [vmem:[#allocation10 + $0x198] sm:$0xff] }
 0x3d5   :  { %13336 = vmatpush1.bf16.msra.mxu0 %v16962_v4  ;;  %13592 = vmatpush1.bf16.msra.mxu1 %v17090_v5  ;;  %v2839_v4 = vld [vmem:[#allocation10 + $0x50] sm:$0xff]  ;;  %v2884_v63 = vld [vmem:[#allocation10 + $0x1b8] sm:$0xff] }
 0x3d6   :  { %13338 = vmatprep.subr.bf16.mxu0 %v16963_v23  ;;  %13594 = vmatprep.subr.bf16.mxu1 %v17091_v7  ;;  %v2843_v5 = vld [vmem:[#allocation10 + $0x70] sm:$0xff]  ;;  %v2844_v23 = vld [vmem:[#allocation10 + $0x78] sm:$0xff]  ;;  %v17102_v7 = vcombine.low %v2831_v54, %v2835_v30 }
 0x3d7   :  { %v17103_v12 = vcombine.high %v2839_v4, %v2843_v5  ;;  %v17231_v14 = vcombine.high %v2840_v3, %v2844_v23  ;;  %v17104_v21 = vcombine.low %v2839_v4, %v2843_v5  ;;  %v17232_v24 = vcombine.low %v2840_v3, %v2844_v23  ;;  %v2879_v54 = vld [vmem:[#allocation10 + $0x190] sm:$0xff]  ;;  %v2888_v5 = vld [vmem:[#allocation10 + $0x1d8] sm:$0xff] }
 0x3d8   :  { %v2883_v30 = vld [vmem:[#allocation10 + $0x1b0] sm:$0xff]  ;;  %v2892_v3 = vld [vmem:[#allocation10 + $0x1f8] sm:$0xff] }
 0x3d9   :  { %13340 = vmatpush1.bf16.msra.mxu0 %v16964_v16  ;;  %13596 = vmatpush1.bf16.msra.mxu1 %v17092_v18  ;;  %v2847_v16 = vld [vmem:[#allocation10 + $0x90] sm:$0xff]  ;;  %v17113_v1 = vcombine.high %v2879_v54, %v2883_v30  ;;  %v17114_v23 = vcombine.low %v2879_v54, %v2883_v30  ;;  %v2928_v30 = vld [vmem:[#allocation10 + $0x318] sm:$0xff] }
 0x3da   :  { %13342 = vmatprep.subr.bf16.mxu0 %v16965_v19  ;;  %13598 = vmatprep.subr.bf16.mxu1 %v17093_v20  ;;  %v2851_v18 = vld [vmem:[#allocation10 + $0xb0] sm:$0xff]  ;;  %v2848_v19 = vld [vmem:[#allocation10 + $0x98] sm:$0xff] }
 0x3db   :  { %v2852_v20 = vld [vmem:[#allocation10 + $0xb8] sm:$0xff]  ;;  %v17105_v26 = vcombine.high %v2847_v16, %v2851_v18  ;;  %v17106_v17 = vcombine.low %v2847_v16, %v2851_v18  ;;  %v2891_v4 = vld [vmem:[#allocation10 + $0x1f0] sm:$0xff] }
 0x3dc   :  { %v17233_v27 = vcombine.high %v2848_v19, %v2852_v20  ;;  %v17234_v35 = vcombine.low %v2848_v19, %v2852_v20  ;;  %v2899_v16 = vld [vmem:[#allocation10 + $0x230] sm:$0xff]  ;;  %v2896_v18 = vld [vmem:[#allocation10 + $0x218] sm:$0xff] }
 0x3dd   :  { %13344 = vmatpush1.bf16.msra.mxu0 %v16966_v28  ;;  %13600 = vmatpush1.bf16.msra.mxu1 %v17094_v31  ;;  %v2855_v28 = vld [vmem:[#allocation10 + $0xd0] sm:$0xff]  ;;  %v2900_v19 = vld [vmem:[#allocation10 + $0x238] sm:$0xff] }
 0x3de   :  { %13346 = vmatprep.subr.bf16.mxu0 %v16967_v22  ;;  %13602 = vmatprep.subr.bf16.mxu1 %v17095_v34  ;;  %v2859_v31 = vld [vmem:[#allocation10 + $0xf0] sm:$0xff]  ;;  %v2856_v22 = vld [vmem:[#allocation10 + $0xd8] sm:$0xff] }
 0x3df   :  { %v2860_v34 = vld [vmem:[#allocation10 + $0xf8] sm:$0xff]  ;;  %v17107_v37 = vcombine.high %v2855_v28, %v2859_v31  ;;  %v2931_v54 = vld [vmem:[#allocation10 + $0x330] sm:$0xff] }
 0x3e0   :  { %v17235_v38 = vcombine.high %v2856_v22, %v2860_v34 }
 0x3e1   :  { %13348 = vmatpush1.bf16.msra.mxu0 %v16968_v39  ;;  %13604 = vmatpush1.bf16.msra.mxu1 %v17096_v41  ;;  %v2863_v39 = vld [vmem:[#allocation10 + $0x110] sm:$0xff] }
 0x3e2   :  { %13350 = vmatprep.subr.bf16.mxu0 %v16969_v43  ;;  %13606 = vmatprep.subr.bf16.mxu1 %v17097_v61  ;;  %v2867_v41 = vld [vmem:[#allocation10 + $0x130] sm:$0xff]  ;;  %v17108_v43 = vcombine.low %v2855_v28, %v2859_v31  ;;  %v17236_v61 = vcombine.low %v2856_v22, %v2860_v34  ;;  %v2904_v31 = vld [vmem:[#allocation10 + $0x258] sm:$0xff] }
 0x3e3   :  { %v17109_v44 = vcombine.high %v2863_v39, %v2867_v41  ;;  %v2907_v28 = vld [vmem:[#allocation10 + $0x270] sm:$0xff]  ;;  %v2908_v22 = vld [vmem:[#allocation10 + $0x278] sm:$0xff] }
 0x3e5   :  { %13352 = vmatpush1.bf16.msra.mxu0 %v16970_v50  ;;  %13608 = vmatpush1.bf16.msra.mxu1 %v17098_v51  ;;  %v2876_v50 = vld [vmem:[#allocation10 + $0x178] sm:$0xff]  ;;  %v17110_v51 = vcombine.low %v2863_v39, %v2867_v41  ;;  %v2915_v39 = vld [vmem:[#allocation10 + $0x2b0] sm:$0xff] }
 0x3e6   :  { %13354 = vmatprep.subr.bf16.mxu0 %v16971_v58  ;;  %13610 = vmatprep.subr.bf16.mxu1 %v17099_v53  ;;  %v17111_v58 = vcombine.high %v2871_v46, %v2875_v47  ;;  %v17239_v53 = vcombine.high %v2872_v48, %v2876_v50  ;;  %v2912_v41 = vld [vmem:[#allocation10 + $0x298] sm:$0xff] }
 0x3e9   :  { %13356 = vmatpush1.bf16.msra.mxu0 %v16972_v13  ;;  %13612 = vmatpush1.bf16.msra.mxu1 %v17100_v0  ;;  %v17112_v13 = vcombine.low %v2871_v46, %v2875_v47  ;;  %v17240_v0 = vcombine.low %v2872_v48, %v2876_v50  ;;  %v2923_v46 = vld [vmem:[#allocation10 + $0x2f0] sm:$0xff]  ;;  %v2920_v47 = vld [vmem:[#allocation10 + $0x2d8] sm:$0xff] }
 0x3ea   :  { %13614 = vmatprep.subr.bf16.mxu0 %v17101_v62  ;;  %13870 = vmatprep.subr.bf16.mxu1 %v17229_v2  ;;  %v17241_v62 = vcombine.high %v2880_v59, %v2884_v63  ;;  %v2887_v2 = vld [vmem:[#allocation10 + $0x1d0] sm:$0xff]  ;;  %v2924_v48 = vld [vmem:[#allocation10 + $0x2f8] sm:$0xff] }
 0x3eb   :  { %v17116_v20 = vcombine.low %v2887_v2, %v2891_v4 }
 0x3ec   :  { %4643 = vmatmul.mubr.f32.vlgmr.msra.gmra.mrb[4].mxu0 %v19192_v10  ;;  %4927 = vmatmul.mubr.f32.vlgmr.msra.gmra.mrb[4].mxu1 %v19192_v10 }
 0x3ed   :  { %13616 = vmatpush1.bf16.msra.mxu0 %v17102_v7  ;;  %4997 = vmatprep.mubr.f32.mxu0 %v19105_v49  ;;  %v17242_v7 = vcombine.low %v2880_v59, %v2884_v63  ;;  %v2932_v59 = vld [vmem:[#allocation10 + $0x338] sm:$0xff] }
 0x3ee   :  { %13872 = vmatpush1.bf16.msra.mxu1 %v17230_v11  ;;  %5281 = vmatprep.mubr.f32.mxu1 %v19105_v49  ;;  %v2864_v49 = vld [vmem:[#allocation10 + $0x118] sm:$0xff]  ;;  %v17115_v11 = vcombine.high %v2887_v2, %v2891_v4  ;;  %v2939_v2 = vld [vmem:[#allocation10 + $0x370] sm:$0xff] }
 0x3ef   :  { %13618 = vmatprep.subr.bf16.mxu0 %v17103_v12  ;;  %13874 = vmatprep.subr.bf16.mxu1 %v17231_v14  ;;  %v17237_v45 = vcombine.high %v2864_v49, %v2868_v42  ;;  %v17238_v52 = vcombine.low %v2864_v49, %v2868_v42  ;;  %v17243_v12 = vcombine.high %v2888_v5, %v2892_v3  ;;  %v2895_v14 = vld [vmem:[#allocation10 + $0x210] sm:$0xff]  ;;  %v2916_v49 = vld [vmem:[#allocation10 + $0x2b8] sm:$0xff] }
 0x3f0   :  { %v17118_v34 = vcombine.low %v2895_v14, %v2899_v16  ;;  %v2936_v4 = vld [vmem:[#allocation10 + $0x358] sm:$0xff] }
 0x3f1   :  { %13620 = vmatpush1.bf16.msra.mxu0 %v17104_v21  ;;  %v17244_v21 = vcombine.low %v2888_v5, %v2892_v3  ;;  %v2940_v5 = vld [vmem:[#allocation10 + $0x378] sm:$0xff] }
 0x3f2   :  { %13876 = vmatpush1.bf16.msra.mxu1 %v17232_v24  ;;  %13622 = vmatprep.subr.bf16.mxu0 %v17105_v26  ;;  %v17117_v24 = vcombine.high %v2895_v14, %v2899_v16  ;;  %v17245_v26 = vcombine.high %v2896_v18, %v2900_v19  ;;  %v2947_v14 = vld [vmem:[#allocation10 + $0x3b0] sm:$0xff]  ;;  %v2944_v16 = vld [vmem:[#allocation10 + $0x398] sm:$0xff] }
 0x3f3   :  { %13878 = vmatprep.subr.bf16.mxu1 %v17233_v27  ;;  %v2903_v27 = vld [vmem:[#allocation10 + $0x250] sm:$0xff] }
 0x3f4   :  { %v17120_v42 = vcombine.low %v2903_v27, %v2907_v28 }
 0x3f5   :  { %13624 = vmatpush1.bf16.msra.mxu0 %v17106_v17  ;;  %v17246_v17 = vcombine.low %v2896_v18, %v2900_v19  ;;  %v2948_v18 = vld [vmem:[#allocation10 + $0x3b8] sm:$0xff] }
 0x3f6   :  { %13880 = vmatpush1.bf16.msra.mxu1 %v17234_v35  ;;  %13626 = vmatprep.subr.bf16.mxu0 %v17107_v37  ;;  %v17119_v35 = vcombine.high %v2903_v27, %v2907_v28  ;;  %v17247_v37 = vcombine.high %v2904_v31, %v2908_v22  ;;  %v2955_v27 = vld [vmem:[#allocation10 + $0x3f0] sm:$0xff]  ;;  %v2952_v28 = vld [vmem:[#allocation10 + $0x3d8] sm:$0xff] }
 0x3f7   :  { %13882 = vmatprep.subr.bf16.mxu1 %v17235_v38  ;;  %v2911_v38 = vld [vmem:[#allocation10 + $0x290] sm:$0xff] }
 0x3f8   :  { %v17122_v50 = vcombine.low %v2911_v38, %v2915_v39 }
 0x3f9   :  { %13628 = vmatpush1.bf16.msra.mxu0 %v17108_v43  ;;  %v17248_v43 = vcombine.low %v2904_v31, %v2908_v22  ;;  %v2956_v31 = vld [vmem:[#allocation10 + $0x3f8] sm:$0xff] }
 0x3fa   :  { %13884 = vmatpush1.bf16.msra.mxu1 %v17236_v61  ;;  %13630 = vmatprep.subr.bf16.mxu0 %v17109_v44  ;;  %v17121_v61 = vcombine.high %v2911_v38, %v2915_v39  ;;  %v17249_v44 = vcombine.high %v2912_v41, %v2916_v49  ;;  %v2963_v38 = vld [vmem:[#allocation10 + $0x430] sm:$0xff]  ;;  %v2960_v39 = vld [vmem:[#allocation10 + $0x418] sm:$0xff] }
 0x3fb   :  { %13886 = vmatprep.subr.bf16.mxu1 %v17237_v45  ;;  %v2919_v45 = vld [vmem:[#allocation10 + $0x2d0] sm:$0xff] }
 0x3fc   :  { %v17124_v63 = vcombine.low %v2919_v45, %v2923_v46 }
 0x3fd   :  { %13632 = vmatpush1.bf16.msra.mxu0 %v17110_v51  ;;  %v17250_v51 = vcombine.low %v2912_v41, %v2916_v49  ;;  %v2964_v41 = vld [vmem:[#allocation10 + $0x438] sm:$0xff] }
 0x3fe   :  { %13888 = vmatpush1.bf16.msra.mxu1 %v17238_v52  ;;  %13634 = vmatprep.subr.bf16.mxu0 %v17111_v58  ;;  %v17123_v52 = vcombine.high %v2919_v45, %v2923_v46  ;;  %v17251_v58 = vcombine.high %v2920_v47, %v2924_v48  ;;  %v2971_v45 = vld [vmem:[#allocation10 + $0x470] sm:$0xff] }
 0x3ff   :  { %13890 = vmatprep.subr.bf16.mxu1 %v17239_v53  ;;  %v2927_v53 = vld [vmem:[#allocation10 + $0x310] sm:$0xff] }
 0x400   :  { %v17126_v3 = vcombine.low %v2927_v53, %v2931_v54 }
 0x401   :  { %13636 = vmatpush1.bf16.msra.mxu0 %v17112_v13  ;;  %v17252_v13 = vcombine.low %v2920_v47, %v2924_v48  ;;  %v2968_v47 = vld [vmem:[#allocation10 + $0x458] sm:$0xff] }
 0x402   :  { %13892 = vmatpush1.bf16.msra.mxu1 %v17240_v0  ;;  %13638 = vmatprep.subr.bf16.mxu0 %v17113_v1  ;;  %v17125_v0 = vcombine.high %v2927_v53, %v2931_v54  ;;  %v17253_v1 = vcombine.high %v2928_v30, %v2932_v59  ;;  %v2972_v48 = vld [vmem:[#allocation10 + $0x478] sm:$0xff] }
 0x403   :  { %13894 = vmatprep.subr.bf16.mxu1 %v17241_v62  ;;  %v2935_v62 = vld [vmem:[#allocation10 + $0x350] sm:$0xff]  ;;  %v17263_v53 = vcombine.high %v2968_v47, %v2972_v48  ;;  %v2976_v54 = vld [vmem:[#allocation10 + $0x498] sm:$0xff] }
 0x404   :  { %v17128_v19 = vcombine.low %v2935_v62, %v2939_v2 }
 0x405   :  { %13640 = vmatpush1.bf16.msra.mxu0 %v17114_v23  ;;  %v17254_v23 = vcombine.low %v2928_v30, %v2932_v59  ;;  %v2980_v30 = vld [vmem:[#allocation10 + $0x4b8] sm:$0xff] }
 0x406   :  { %13896 = vmatpush1.bf16.msra.mxu1 %v17242_v7  ;;  %13642 = vmatprep.subr.bf16.mxu0 %v17115_v11  ;;  %v17127_v7 = vcombine.high %v2935_v62, %v2939_v2  ;;  %v17255_v11 = vcombine.high %v2936_v4, %v2940_v5  ;;  %v2987_v62 = vld [vmem:[#allocation10 + $0x4f0] sm:$0xff]  ;;  %v2984_v2 = vld [vmem:[#allocation10 + $0x4d8] sm:$0xff] }
 0x407   :  { %13898 = vmatprep.subr.bf16.mxu1 %v17243_v12  ;;  %v2943_v12 = vld [vmem:[#allocation10 + $0x390] sm:$0xff] }
 0x408   :  { %v17130_v22 = vcombine.low %v2943_v12, %v2947_v14 }
 0x409   :  { %13644 = vmatpush1.bf16.msra.mxu0 %v17116_v20  ;;  %v17256_v20 = vcombine.low %v2936_v4, %v2940_v5  ;;  %v2988_v4 = vld [vmem:[#allocation10 + $0x4f8] sm:$0xff] }
 0x40a   :  { %13900 = vmatpush1.bf16.msra.mxu1 %v17244_v21  ;;  %13646 = vmatprep.subr.bf16.mxu0 %v17117_v24  ;;  %v17129_v21 = vcombine.high %v2943_v12, %v2947_v14  ;;  %v17257_v24 = vcombine.high %v2944_v16, %v2948_v18  ;;  %v2992_v12 = vld [vmem:[#allocation10 + $0x518] sm:$0xff] }
 0x40b   :  { %13902 = vmatprep.subr.bf16.mxu1 %v17245_v26  ;;  %v2951_v26 = vld [vmem:[#allocation10 + $0x3d0] sm:$0xff]  ;;  %v2996_v14 = vld [vmem:[#allocation10 + $0x538] sm:$0xff] }
 0x40c   :  { %v17132_v49 = vcombine.low %v2951_v26, %v2955_v27 }
 0x40d   :  { %13648 = vmatpush1.bf16.msra.mxu0 %v17118_v34  ;;  %v17258_v34 = vcombine.low %v2944_v16, %v2948_v18  ;;  %v17268_v16 = vcombine.low %v2984_v2, %v2988_v4 }
 0x40e   :  { %13904 = vmatpush1.bf16.msra.mxu1 %v17246_v17  ;;  %13650 = vmatprep.subr.bf16.mxu0 %v17119_v35  ;;  %v17131_v17 = vcombine.high %v2951_v26, %v2955_v27  ;;  %v17259_v35 = vcombine.high %v2952_v28, %v2956_v31  ;;  %v3004_v26 = vld [vmem:[#allocation10 + $0x578] sm:$0xff] }
 0x40f   :  { %13906 = vmatprep.subr.bf16.mxu1 %v17247_v37  ;;  %v2959_v37 = vld [vmem:[#allocation10 + $0x410] sm:$0xff] }
 0x410   :  { %v17134_v46 = vcombine.low %v2959_v37, %v2963_v38 }
 0x411   :  { %13652 = vmatpush1.bf16.msra.mxu0 %v17120_v42  ;;  %v17260_v42 = vcombine.low %v2952_v28, %v2956_v31  ;;  %v17270_v28 = vcombine.low %v2992_v12, %v2996_v14 }
 0x412   :  { %13908 = vmatpush1.bf16.msra.mxu1 %v17248_v43  ;;  %13654 = vmatprep.subr.bf16.mxu0 %v17121_v61  ;;  %v17133_v43 = vcombine.high %v2959_v37, %v2963_v38  ;;  %v17261_v61 = vcombine.high %v2960_v39, %v2964_v41  ;;  %v3012_v37 = vld [vmem:[#allocation10 + $0x5b8] sm:$0xff] }
 0x413   :  { %13910 = vmatprep.subr.bf16.mxu1 %v17249_v44  ;;  %v2967_v44 = vld [vmem:[#allocation10 + $0x450] sm:$0xff] }
 0x414   :  { %v17136_v59 = vcombine.low %v2967_v44, %v2971_v45 }
 0x415   :  { %13656 = vmatpush1.bf16.msra.mxu0 %v17122_v50  ;;  %v17262_v50 = vcombine.low %v2960_v39, %v2964_v41 }
 0x416   :  { %13912 = vmatpush1.bf16.msra.mxu1 %v17250_v51  ;;  %13658 = vmatprep.subr.bf16.mxu0 %v17123_v52  ;;  %v17135_v51 = vcombine.high %v2967_v44, %v2971_v45  ;;  %v2975_v52 = vld [vmem:[#allocation10 + $0x490] sm:$0xff]  ;;  %v3020_v44 = vld [vmem:[#allocation10 + $0x5f8] sm:$0xff] }
 0x417   :  { %13914 = vmatprep.subr.bf16.mxu1 %v17251_v58  ;;  %v2979_v58 = vld [vmem:[#allocation10 + $0x4b0] sm:$0xff] }
 0x418   :  { %v17138_v5 = vcombine.low %v2975_v52, %v2979_v58 }
 0x419   :  { %13660 = vmatpush1.bf16.msra.mxu0 %v17124_v63  ;;  %v17264_v63 = vcombine.low %v2968_v47, %v2972_v48 }
 0x41a   :  { %13916 = vmatpush1.bf16.msra.mxu1 %v17252_v13  ;;  %13662 = vmatprep.subr.bf16.mxu0 %v17125_v0  ;;  %v17137_v13 = vcombine.high %v2975_v52, %v2979_v58  ;;  %v17265_v0 = vcombine.high %v2976_v54, %v2980_v30  ;;  %v3024_v52 = vld [vmem:[#allocation10 + $0x618] sm:$0xff] }
 0x41b   :  { %13918 = vmatprep.subr.bf16.mxu1 %v17253_v1  ;;  %v2983_v1 = vld [vmem:[#allocation10 + $0x4d0] sm:$0xff]  ;;  %v3028_v58 = vld [vmem:[#allocation10 + $0x638] sm:$0xff] }
 0x41d   :  { %13664 = vmatpush1.bf16.msra.mxu0 %v17126_v3  ;;  %v17139_v3 = vcombine.high %v2983_v1, %v2987_v62 }
 0x41e   :  { %13920 = vmatpush1.bf16.msra.mxu1 %v17254_v23  ;;  %13666 = vmatprep.subr.bf16.mxu0 %v17127_v7  ;;  %v17267_v23 = vcombine.high %v2984_v2, %v2988_v4  ;;  %v2991_v7 = vld [vmem:[#allocation10 + $0x510] sm:$0xff]  ;;  %v17278_v2 = vcombine.low %v3024_v52, %v3028_v58 }
 0x41f   :  { %13922 = vmatprep.subr.bf16.mxu1 %v17255_v11  ;;  %v2995_v11 = vld [vmem:[#allocation10 + $0x530] sm:$0xff] }
 0x420   :  { %v17141_v18 = vcombine.high %v2991_v7, %v2995_v11  ;;  %v17142_v27 = vcombine.low %v2991_v7, %v2995_v11  ;;  %v3044_v7 = vld [vmem:[#allocation10 + $0x6b8] sm:$0xff] }
 0x421   :  { %13668 = vmatpush1.bf16.msra.mxu0 %v17128_v19  ;;  %v17269_v19 = vcombine.high %v2992_v12, %v2996_v14 }
 0x422   :  { %13924 = vmatpush1.bf16.msra.mxu1 %v17256_v20  ;;  %13670 = vmatprep.subr.bf16.mxu0 %v17129_v21  ;;  %v2999_v20 = vld [vmem:[#allocation10 + $0x550] sm:$0xff] }
 0x423   :  { %13926 = vmatprep.subr.bf16.mxu1 %v17257_v24  ;;  %v3003_v21 = vld [vmem:[#allocation10 + $0x570] sm:$0xff]  ;;  %v3000_v24 = vld [vmem:[#allocation10 + $0x558] sm:$0xff] }
 0x424   :  { %v17143_v31 = vcombine.high %v2999_v20, %v3003_v21  ;;  %v17144_v38 = vcombine.low %v2999_v20, %v3003_v21  ;;  %v17272_v39 = vcombine.low %v3000_v24, %v3004_v26  ;;  %v3052_v20 = vld [vmem:[#allocation10 + $0x6f8] sm:$0xff] }
 0x425   :  { %13672 = vmatpush1.bf16.msra.mxu0 %v17130_v22  ;;  %v17271_v22 = vcombine.high %v3000_v24, %v3004_v26 }
 0x426   :  { %13928 = vmatpush1.bf16.msra.mxu1 %v17258_v34  ;;  %13674 = vmatprep.subr.bf16.mxu0 %v17131_v17  ;;  %v3007_v34 = vld [vmem:[#allocation10 + $0x590] sm:$0xff] }
 0x427   :  { %13930 = vmatprep.subr.bf16.mxu1 %v17259_v35  ;;  %v3011_v17 = vld [vmem:[#allocation10 + $0x5b0] sm:$0xff]  ;;  %v3008_v35 = vld [vmem:[#allocation10 + $0x598] sm:$0xff] }
 0x428   :  { %v17145_v41 = vcombine.high %v3007_v34, %v3011_v17  ;;  %v17146_v45 = vcombine.low %v3007_v34, %v3011_v17  ;;  %v3060_v34 = vld [vmem:[#allocation10 + $0x738] sm:$0xff] }
 0x429   :  { %13676 = vmatpush1.bf16.msra.mxu0 %v17132_v49  ;;  %v17273_v49 = vcombine.high %v3008_v35, %v3012_v37 }
 0x42a   :  { %13932 = vmatpush1.bf16.msra.mxu1 %v17260_v42  ;;  %13678 = vmatprep.subr.bf16.mxu0 %v17133_v43  ;;  %v3015_v42 = vld [vmem:[#allocation10 + $0x5d0] sm:$0xff] }
 0x42b   :  { %13934 = vmatprep.subr.bf16.mxu1 %v17261_v61  ;;  %v3019_v43 = vld [vmem:[#allocation10 + $0x5f0] sm:$0xff]  ;;  %v3016_v61 = vld [vmem:[#allocation10 + $0x5d8] sm:$0xff] }
 0x42c   :  { %4998 = vmatmul.mubr.f32.vlgmr.msra.gmra.mrb[6].mxu0 %v19125_v8  ;;  %v17147_v47 = vcombine.high %v3015_v42, %v3019_v43  ;;  %v17275_v48 = vcombine.high %v3016_v61, %v3020_v44 }
 0x42d   :  { %5282 = vmatmul.mubr.f32.vlgmr.msra.gmra.mrb[6].mxu1 %v19125_v8  ;;  %13680 = vmatpush1.bf16.msra.mxu0 %v17134_v46  ;;  %v17266_v8 = vcombine.low %v2976_v54, %v2980_v30  ;;  %v17274_v46 = vcombine.low %v3008_v35, %v3012_v37  ;;  %v17276_v54 = vcombine.low %v3016_v61, %v3020_v44 }
 0x42e   :  { %5068 = vmatprep.mubr.f32.mxu0 %v19127_v15  ;;  %13936 = vmatpush1.bf16.msra.mxu1 %v17262_v50  ;;  %v3023_v50 = vld [vmem:[#allocation10 + $0x610] sm:$0xff] }
 0x42f   :  { %5352 = vmatprep.mubr.f32.mxu1 %v19127_v15  ;;  %13682 = vmatprep.subr.bf16.mxu0 %v17135_v51  ;;  %v17140_v15 = vcombine.low %v2983_v1, %v2987_v62  ;;  %v3027_v51 = vld [vmem:[#allocation10 + $0x630] sm:$0xff]  ;;  %v3036_v1 = vld [vmem:[#allocation10 + $0x678] sm:$0xff] }
 0x430   :  { %13938 = vmatprep.subr.bf16.mxu1 %v17263_v53  ;;  %v17148_v53 = vcombine.low %v3015_v42, %v3019_v43  ;;  %v17149_v30 = vcombine.high %v3023_v50, %v3027_v51  ;;  %v17150_v62 = vcombine.low %v3023_v50, %v3027_v51  ;;  %v3068_v42 = vld [vmem:[#allocation10 + $0x778] sm:$0xff] }
 0x431   :  { %13684 = vmatpush1.bf16.msra.mxu0 %v17136_v59  ;;  %v17277_v59 = vcombine.high %v3024_v52, %v3028_v58  ;;  %v3076_v50 = vld [vmem:[#allocation10 + $0x7b8] sm:$0xff] }
 0x432   :  { %13940 = vmatpush1.bf16.msra.mxu1 %v17264_v63  ;;  %13686 = vmatprep.subr.bf16.mxu0 %v17137_v13  ;;  %v3031_v63 = vld [vmem:[#allocation10 + $0x650] sm:$0xff] }
 0x433   :  { %13942 = vmatprep.subr.bf16.mxu1 %v17265_v0  ;;  %v3035_v13 = vld [vmem:[#allocation10 + $0x670] sm:$0xff]  ;;  %v3032_v0 = vld [vmem:[#allocation10 + $0x658] sm:$0xff] }
 0x434   :  { %v17151_v4 = vcombine.high %v3031_v63, %v3035_v13  ;;  %v17152_v11 = vcombine.low %v3031_v63, %v3035_v13  ;;  %v17280_v12 = vcombine.low %v3032_v0, %v3036_v1  ;;  %v3084_v63 = vld [vmem:[#allocation10 + $0x7f8] sm:$0xff] }
 0x435   :  { %13688 = vmatpush1.bf16.msra.mxu0 %v17138_v5  ;;  %v17279_v5 = vcombine.high %v3032_v0, %v3036_v1 }
 0x436   :  { %13944 = vmatpush1.bf16.msra.mxu1 %v17266_v8  ;;  %13690 = vmatprep.subr.bf16.mxu0 %v17139_v3  ;;  %v3039_v8 = vld [vmem:[#allocation10 + $0x690] sm:$0xff] }
 0x437   :  { %13946 = vmatprep.subr.bf16.mxu1 %v17267_v23  ;;  %v3043_v3 = vld [vmem:[#allocation10 + $0x6b0] sm:$0xff]  ;;  %v3040_v23 = vld [vmem:[#allocation10 + $0x698] sm:$0xff] }
 0x438   :  { %v17153_v14 = vcombine.high %v3039_v8, %v3043_v3  ;;  %v17154_v21 = vcombine.low %v3039_v8, %v3043_v3  ;;  %v17282_v24 = vcombine.low %v3040_v23, %v3044_v7  ;;  %v3092_v8 = vld [vmem:[#allocation10 + $0x838] sm:$0xff] }
 0x439   :  { %13692 = vmatpush1.bf16.msra.mxu0 %v17140_v15  ;;  %v17281_v15 = vcombine.high %v3040_v23, %v3044_v7 }
 0x43a   :  { %13948 = vmatpush1.bf16.msra.mxu1 %v17268_v16  ;;  %13694 = vmatprep.subr.bf16.mxu0 %v17141_v18  ;;  %v3047_v16 = vld [vmem:[#allocation10 + $0x6d0] sm:$0xff] }
 0x43b   :  { %13950 = vmatprep.subr.bf16.mxu1 %v17269_v19  ;;  %v3051_v18 = vld [vmem:[#allocation10 + $0x6f0] sm:$0xff]  ;;  %v3048_v19 = vld [vmem:[#allocation10 + $0x6d8] sm:$0xff] }
 0x43c   :  { %v17155_v26 = vcombine.high %v3047_v16, %v3051_v18  ;;  %v17156_v17 = vcombine.low %v3047_v16, %v3051_v18  ;;  %v17284_v35 = vcombine.low %v3048_v19, %v3052_v20  ;;  %v3096_v16 = vld [vmem:[#allocation10 + $0x858] sm:$0xff] }
 0x43d   :  { %13696 = vmatpush1.bf16.msra.mxu0 %v17142_v27  ;;  %v17283_v27 = vcombine.high %v3048_v19, %v3052_v20  ;;  %v3100_v18 = vld [vmem:[#allocation10 + $0x878] sm:$0xff] }
 0x43e   :  { %13952 = vmatpush1.bf16.msra.mxu1 %v17270_v28  ;;  %13698 = vmatprep.subr.bf16.mxu0 %v17143_v31  ;;  %v3055_v28 = vld [vmem:[#allocation10 + $0x710] sm:$0xff] }
 0x43f   :  { %13954 = vmatprep.subr.bf16.mxu1 %v17271_v22  ;;  %v3059_v31 = vld [vmem:[#allocation10 + $0x730] sm:$0xff]  ;;  %v3056_v22 = vld [vmem:[#allocation10 + $0x718] sm:$0xff] }
 0x440   :  { %v17157_v37 = vcombine.high %v3055_v28, %v3059_v31  ;;  %v17158_v43 = vcombine.low %v3055_v28, %v3059_v31  ;;  %v17286_v61 = vcombine.low %v3056_v22, %v3060_v34  ;;  %v3108_v28 = vld [vmem:[#allocation10 + $0x8b8] sm:$0xff] }
 0x441   :  { %13700 = vmatpush1.bf16.msra.mxu0 %v17144_v38  ;;  %v17285_v38 = vcombine.high %v3056_v22, %v3060_v34  ;;  %v17296_v22 = vcombine.low %v3096_v16, %v3100_v18 }
 0x442   :  { %13956 = vmatpush1.bf16.msra.mxu1 %v17272_v39  ;;  %13702 = vmatprep.subr.bf16.mxu0 %v17145_v41  ;;  %v3063_v39 = vld [vmem:[#allocation10 + $0x750] sm:$0xff] }
 0x443   :  { %13958 = vmatprep.subr.bf16.mxu1 %v17273_v49  ;;  %v3067_v41 = vld [vmem:[#allocation10 + $0x770] sm:$0xff]  ;;  %v3064_v49 = vld [vmem:[#allocation10 + $0x758] sm:$0xff] }
 0x444   :  { %v17159_v44 = vcombine.high %v3063_v39, %v3067_v41  ;;  %v17160_v51 = vcombine.low %v3063_v39, %v3067_v41  ;;  %v17288_v52 = vcombine.low %v3064_v49, %v3068_v42  ;;  %v3116_v39 = vld [vmem:[#allocation10 + $0x8f8] sm:$0xff] }
 0x445   :  { %13704 = vmatpush1.bf16.msra.mxu0 %v17146_v45  ;;  %v17287_v45 = vcombine.high %v3064_v49, %v3068_v42 }
 0x446   :  { %13960 = vmatpush1.bf16.msra.mxu1 %v17274_v46  ;;  %13706 = vmatprep.subr.bf16.mxu0 %v17147_v47  ;;  %v3071_v46 = vld [vmem:[#allocation10 + $0x790] sm:$0xff] }
 0x447   :  { %13962 = vmatprep.subr.bf16.mxu1 %v17275_v48  ;;  %v3075_v47 = vld [vmem:[#allocation10 + $0x7b0] sm:$0xff]  ;;  %v3072_v48 = vld [vmem:[#allocation10 + $0x798] sm:$0xff] }
 0x448   :  { %v17161_v58 = vcombine.high %v3071_v46, %v3075_v47  ;;  %v17162_v13 = vcombine.low %v3071_v46, %v3075_v47  ;;  %v17290_v0 = vcombine.low %v3072_v48, %v3076_v50 }
 0x449   :  { %13708 = vmatpush1.bf16.msra.mxu0 %v17148_v53  ;;  %v17289_v53 = vcombine.high %v3072_v48, %v3076_v50  ;;  %v3127_v50 = vld [vmem:[#allocation10 + $0x950] sm:$0xff] }
 0x44a   :  { %13964 = vmatpush1.bf16.msra.mxu1 %v17276_v54  ;;  %13710 = vmatprep.subr.bf16.mxu0 %v17149_v30  ;;  %v3079_v54 = vld [vmem:[#allocation10 + $0x7d0] sm:$0xff] }
 0x44b   :  { %13966 = vmatprep.subr.bf16.mxu1 %v17277_v59  ;;  %v3083_v30 = vld [vmem:[#allocation10 + $0x7f0] sm:$0xff]  ;;  %v3080_v59 = vld [vmem:[#allocation10 + $0x7d8] sm:$0xff] }
 0x44c   :  { %v17163_v1 = vcombine.high %v3079_v54, %v3083_v30  ;;  %v17164_v3 = vcombine.low %v3079_v54, %v3083_v30  ;;  %v17292_v23 = vcombine.low %v3080_v59, %v3084_v63 }
 0x44d   :  { %13712 = vmatpush1.bf16.msra.mxu0 %v17150_v62  ;;  %v17291_v62 = vcombine.high %v3080_v59, %v3084_v63  ;;  %v3135_v63 = vld [vmem:[#allocation10 + $0x990] sm:$0xff] }
 0x44e   :  { %13968 = vmatpush1.bf16.msra.mxu1 %v17278_v2  ;;  %13714 = vmatprep.subr.bf16.mxu0 %v17151_v4  ;;  %v3087_v2 = vld [vmem:[#allocation10 + $0x810] sm:$0xff] }
 0x44f   :  { %13970 = vmatprep.subr.bf16.mxu1 %v17279_v5  ;;  %v3091_v4 = vld [vmem:[#allocation10 + $0x830] sm:$0xff]  ;;  %v3088_v5 = vld [vmem:[#allocation10 + $0x818] sm:$0xff] }
 0x450   :  { %v17165_v7 = vcombine.high %v3087_v2, %v3091_v4  ;;  %v17294_v19 = vcombine.low %v3088_v5, %v3092_v8 }
 0x451   :  { %13716 = vmatpush1.bf16.msra.mxu0 %v17152_v11  ;;  %v17293_v11 = vcombine.high %v3088_v5, %v3092_v8  ;;  %v3143_v8 = vld [vmem:[#allocation10 + $0x9d0] sm:$0xff] }
 0x452   :  { %13972 = vmatpush1.bf16.msra.mxu1 %v17280_v12  ;;  %13718 = vmatprep.subr.bf16.mxu0 %v17153_v14  ;;  %v3095_v12 = vld [vmem:[#allocation10 + $0x850] sm:$0xff] }
 0x453   :  { %13974 = vmatprep.subr.bf16.mxu1 %v17281_v15  ;;  %v3099_v14 = vld [vmem:[#allocation10 + $0x870] sm:$0xff]  ;;  %v17166_v15 = vcombine.low %v3087_v2, %v3091_v4 }
 0x454   :  { %v17167_v20 = vcombine.high %v3095_v12, %v3099_v14  ;;  %v17168_v31 = vcombine.low %v3095_v12, %v3099_v14 }
 0x455   :  { %13720 = vmatpush1.bf16.msra.mxu0 %v17154_v21  ;;  %v3103_v21 = vld [vmem:[#allocation10 + $0x890] sm:$0xff] }
 0x456   :  { %13976 = vmatpush1.bf16.msra.mxu1 %v17282_v24  ;;  %13722 = vmatprep.subr.bf16.mxu0 %v17155_v26  ;;  %v3107_v24 = vld [vmem:[#allocation10 + $0x8b0] sm:$0xff]  ;;  %v17295_v26 = vcombine.high %v3096_v16, %v3100_v18 }
 0x457   :  { %13978 = vmatprep.subr.bf16.mxu1 %v17283_v27  ;;  %v3104_v27 = vld [vmem:[#allocation10 + $0x898] sm:$0xff]  ;;  %v17169_v34 = vcombine.high %v3103_v21, %v3107_v24  ;;  %v17170_v41 = vcombine.low %v3103_v21, %v3107_v24  ;;  %v3151_v16 = vld [vmem:[#allocation10 + $0xa10] sm:$0xff] }
 0x458   :  { %v3155_v18 = vld [vmem:[#allocation10 + $0xa30] sm:$0xff] }
 0x459   :  { %13724 = vmatpush1.bf16.msra.mxu0 %v17156_v17  ;;  %v17297_v17 = vcombine.high %v3104_v27, %v3108_v28 }
 0x45a   :  { %13980 = vmatpush1.bf16.msra.mxu1 %v17284_v35  ;;  %13726 = vmatprep.subr.bf16.mxu0 %v17157_v37  ;;  %v3111_v35 = vld [vmem:[#allocation10 + $0x8d0] sm:$0xff] }
 0x45b   :  { %13982 = vmatprep.subr.bf16.mxu1 %v17285_v38  ;;  %v3115_v37 = vld [vmem:[#allocation10 + $0x8f0] sm:$0xff]  ;;  %v3112_v38 = vld [vmem:[#allocation10 + $0x8d8] sm:$0xff] }
 0x45c   :  { %v17171_v49 = vcombine.high %v3111_v35, %v3115_v37  ;;  %v17299_v42 = vcombine.high %v3112_v38, %v3116_v39  ;;  %v17300_v46 = vcombine.low %v3112_v38, %v3116_v39  ;;  %v3167_v39 = vld [vmem:[#allocation10 + $0xa90] sm:$0xff] }
 0x45d   :  { %13728 = vmatpush1.bf16.msra.mxu0 %v17158_v43  ;;  %v3119_v43 = vld [vmem:[#allocation10 + $0x910] sm:$0xff] }
 0x45e   :  { %13984 = vmatpush1.bf16.msra.mxu1 %v17286_v61  ;;  %13730 = vmatprep.subr.bf16.mxu0 %v17159_v44  ;;  %v3123_v61 = vld [vmem:[#allocation10 + $0x930] sm:$0xff]  ;;  %v3120_v44 = vld [vmem:[#allocation10 + $0x918] sm:$0xff] }
 0x45f   :  { %13986 = vmatprep.subr.bf16.mxu1 %v17287_v45  ;;  %v3124_v45 = vld [vmem:[#allocation10 + $0x938] sm:$0xff]  ;;  %v17173_v47 = vcombine.high %v3119_v43, %v3123_v61 }
 0x460   :  { %v17301_v48 = vcombine.high %v3120_v44, %v3124_v45  ;;  %v17302_v54 = vcombine.low %v3120_v44, %v3124_v45  ;;  %v3175_v45 = vld [vmem:[#allocation10 + $0xad0] sm:$0xff] }
 0x461   :  { %13732 = vmatpush1.bf16.msra.mxu0 %v17160_v51  ;;  %v3131_v51 = vld [vmem:[#allocation10 + $0x970] sm:$0xff] }
 0x462   :  { %13988 = vmatpush1.bf16.msra.mxu1 %v17288_v52  ;;  %13734 = vmatprep.subr.bf16.mxu0 %v17161_v58  ;;  %v3128_v52 = vld [vmem:[#allocation10 + $0x958] sm:$0xff]  ;;  %v17175_v30 = vcombine.high %v3127_v50, %v3131_v51 }
 0x463   :  { %13990 = vmatprep.subr.bf16.mxu1 %v17289_v53  ;;  %v3132_v58 = vld [vmem:[#allocation10 + $0x978] sm:$0xff]  ;;  %v17174_v53 = vcombine.low %v3119_v43, %v3123_v61 }
 0x464   :  { %v17303_v59 = vcombine.high %v3128_v52, %v3132_v58  ;;  %v17304_v2 = vcombine.low %v3128_v52, %v3132_v58  ;;  %v3183_v58 = vld [vmem:[#allocation10 + $0xb10] sm:$0xff] }
 0x465   :  { %13736 = vmatpush1.bf16.msra.mxu0 %v17162_v13  ;;  %v3139_v13 = vld [vmem:[#allocation10 + $0x9b0] sm:$0xff] }
 0x466   :  { %13992 = vmatpush1.bf16.msra.mxu1 %v17290_v0  ;;  %13738 = vmatprep.subr.bf16.mxu0 %v17163_v1  ;;  %v3136_v0 = vld [vmem:[#allocation10 + $0x998] sm:$0xff]  ;;  %v17177_v4 = vcombine.high %v3135_v63, %v3139_v13 }
 0x467   :  { %13994 = vmatprep.subr.bf16.mxu1 %v17291_v62  ;;  %v3140_v1 = vld [vmem:[#allocation10 + $0x9b8] sm:$0xff]  ;;  %v17176_v62 = vcombine.low %v3127_v50, %v3131_v51 }
 0x468   :  { %v17305_v5 = vcombine.high %v3136_v0, %v3140_v1  ;;  %v17306_v12 = vcombine.low %v3136_v0, %v3140_v1  ;;  %v3191_v1 = vld [vmem:[#allocation10 + $0xb50] sm:$0xff] }
 0x469   :  { %13740 = vmatpush1.bf16.msra.mxu0 %v17164_v3  ;;  %v3147_v3 = vld [vmem:[#allocation10 + $0x9f0] sm:$0xff] }
 0x46a   :  { %13996 = vmatpush1.bf16.msra.mxu1 %v17292_v23  ;;  %13742 = vmatprep.subr.bf16.mxu0 %v17165_v7  ;;  %v3144_v23 = vld [vmem:[#allocation10 + $0x9d8] sm:$0xff]  ;;  %v17179_v14 = vcombine.high %v3143_v8, %v3147_v3  ;;  %v17180_v21 = vcombine.low %v3143_v8, %v3147_v3 }
 0x46b   :  { %13998 = vmatprep.subr.bf16.mxu1 %v17293_v11  ;;  %v3148_v7 = vld [vmem:[#allocation10 + $0x9f8] sm:$0xff]  ;;  %v17178_v11 = vcombine.low %v3135_v63, %v3139_v13 }
 0x46c   :  { %5069 = vmatmul.mubr.f32.vlgmr.msra.gmra.mrb[6].mxu0 %v19141_v40  ;;  %v17308_v24 = vcombine.low %v3144_v23, %v3148_v7 }
 0x46d   :  { %5353 = vmatmul.mubr.f32.vlgmr.msra.gmra.mrb[6].mxu1 %v19141_v40  ;;  %13744 = vmatpush1.bf16.msra.mxu0 %v17166_v15  ;;  %v17298_v40 = vcombine.low %v3104_v27, %v3108_v28  ;;  %v17307_v15 = vcombine.high %v3144_v23, %v3148_v7  ;;  %v3159_v28 = vld [vmem:[#allocation10 + $0xa50] sm:$0xff] }
 0x46e   :  { %5139 = vmatprep.mubr.f32.mxu0 %v19172_v9  ;;  %14000 = vmatpush1.bf16.msra.mxu1 %v17294_v19  ;;  %v3152_v19 = vld [vmem:[#allocation10 + $0xa18] sm:$0xff]  ;;  %v3199_v7 = vld [vmem:[#allocation10 + $0xb90] sm:$0xff] }
 0x46f   :  { %5423 = vmatprep.mubr.f32.mxu1 %v19172_v9  ;;  %13746 = vmatprep.subr.bf16.mxu0 %v17167_v20  ;;  %v17172_v9 = vcombine.low %v3111_v35, %v3115_v37  ;;  %v3156_v20 = vld [vmem:[#allocation10 + $0xa38] sm:$0xff] }
 0x470   :  { %14002 = vmatprep.subr.bf16.mxu1 %v17295_v26  ;;  %v17181_v26 = vcombine.high %v3151_v16, %v3155_v18  ;;  %v17309_v27 = vcombine.high %v3152_v19, %v3156_v20  ;;  %v17310_v35 = vcombine.low %v3152_v19, %v3156_v20  ;;  %v3207_v20 = vld [vmem:[#allocation10 + $0xbd0] sm:$0xff] }
 0x471   :  { %13748 = vmatpush1.bf16.msra.mxu0 %v17168_v31  ;;  %v3163_v31 = vld [vmem:[#allocation10 + $0xa70] sm:$0xff] }
 0x472   :  { %14004 = vmatpush1.bf16.msra.mxu1 %v17296_v22  ;;  %13750 = vmatprep.subr.bf16.mxu0 %v17169_v34  ;;  %v3160_v22 = vld [vmem:[#allocation10 + $0xa58] sm:$0xff]  ;;  %v17183_v37 = vcombine.high %v3159_v28, %v3163_v31 }
 0x473   :  { %14006 = vmatprep.subr.bf16.mxu1 %v17297_v17  ;;  %v3164_v34 = vld [vmem:[#allocation10 + $0xa78] sm:$0xff]  ;;  %v17182_v17 = vcombine.low %v3151_v16, %v3155_v18 }
 0x474   :  { %v17311_v38 = vcombine.high %v3160_v22, %v3164_v34  ;;  %v17312_v43 = vcombine.low %v3160_v22, %v3164_v34  ;;  %v3215_v34 = vld [vmem:[#allocation10 + $0xc10] sm:$0xff] }
 0x475   :  { %13752 = vmatpush1.bf16.msra.mxu0 %v17170_v41  ;;  %v3171_v41 = vld [vmem:[#allocation10 + $0xab0] sm:$0xff] }
 0x476   :  { %14008 = vmatpush1.bf16.msra.mxu1 %v17298_v40  ;;  %13754 = vmatprep.subr.bf16.mxu0 %v17171_v49  ;;  %v3168_v40 = vld [vmem:[#allocation10 + $0xa98] sm:$0xff]  ;;  %v17185_v61 = vcombine.high %v3167_v39, %v3171_v41 }
 0x477   :  { %14010 = vmatprep.subr.bf16.mxu1 %v17299_v42  ;;  %v3172_v49 = vld [vmem:[#allocation10 + $0xab8] sm:$0xff]  ;;  %v17184_v42 = vcombine.low %v3159_v28, %v3163_v31 }
 0x478   :  { %v17313_v44 = vcombine.high %v3168_v40, %v3172_v49  ;;  %v17314_v50 = vcombine.low %v3168_v40, %v3172_v49  ;;  %v3223_v49 = vld [vmem:[#allocation10 + $0xc50] sm:$0xff] }
 0x479   :  { %13756 = vmatpush1.bf16.msra.mxu0 %v17172_v9  ;;  %v3179_v9 = vld [vmem:[#allocation10 + $0xaf0] sm:$0xff] }
 0x47a   :  { %14012 = vmatpush1.bf16.msra.mxu1 %v17300_v46  ;;  %13758 = vmatprep.subr.bf16.mxu0 %v17173_v47  ;;  %v3176_v46 = vld [vmem:[#allocation10 + $0xad8] sm:$0xff]  ;;  %v17187_v51 = vcombine.high %v3175_v45, %v3179_v9 }
 0x47b   :  { %14014 = vmatprep.subr.bf16.mxu1 %v17301_v48  ;;  %v3180_v47 = vld [vmem:[#allocation10 + $0xaf8] sm:$0xff]  ;;  %v17186_v48 = vcombine.low %v3167_v39, %v3171_v41 }
 0x47c   :  { %v17315_v52 = vcombine.high %v3176_v46, %v3180_v47  ;;  %v17316_v63 = vcombine.low %v3176_v46, %v3180_v47  ;;  %v3231_v46 = vld [vmem:[#allocation10 + $0xc90] sm:$0xff] }
 0x47d   :  { %13760 = vmatpush1.bf16.msra.mxu0 %v17174_v53  ;;  %v3187_v53 = vld [vmem:[#allocation10 + $0xb30] sm:$0xff] }
 0x47e   :  { %14016 = vmatpush1.bf16.msra.mxu1 %v17302_v54  ;;  %13762 = vmatprep.subr.bf16.mxu0 %v17175_v30  ;;  %v3184_v54 = vld [vmem:[#allocation10 + $0xb18] sm:$0xff]  ;;  %v17189_v13 = vcombine.high %v3183_v58, %v3187_v53  ;;  %v3235_v47 = vld [vmem:[#allocation10 + $0xcb0] sm:$0xff] }
 0x47f   :  { %14018 = vmatprep.subr.bf16.mxu1 %v17303_v59  ;;  %v3188_v30 = vld [vmem:[#allocation10 + $0xb38] sm:$0xff]  ;;  %v17188_v59 = vcombine.low %v3175_v45, %v3179_v9 }
 0x480   :  { %v17317_v0 = vcombine.high %v3184_v54, %v3188_v30  ;;  %v17318_v8 = vcombine.low %v3184_v54, %v3188_v30  ;;  %v3239_v30 = vld [vmem:[#allocation10 + $0xcd0] sm:$0xff] }
 0x481   :  { %13764 = vmatpush1.bf16.msra.mxu0 %v17176_v62  ;;  %v3195_v62 = vld [vmem:[#allocation10 + $0xb70] sm:$0xff] }
 0x482   :  { %14020 = vmatpush1.bf16.msra.mxu1 %v17304_v2  ;;  %13766 = vmatprep.subr.bf16.mxu0 %v17177_v4  ;;  %v3192_v2 = vld [vmem:[#allocation10 + $0xb58] sm:$0xff]  ;;  %v17191_v3 = vcombine.high %v3191_v1, %v3195_v62 }
 0x483   :  { %14022 = vmatprep.subr.bf16.mxu1 %v17305_v5  ;;  %v3196_v4 = vld [vmem:[#allocation10 + $0xb78] sm:$0xff]  ;;  %v17190_v5 = vcombine.low %v3183_v58, %v3187_v53  ;;  %v17201_v53 = vcombine.high %v3231_v46, %v3235_v47 }
 0x484   :  { %v17319_v23 = vcombine.high %v3192_v2, %v3196_v4  ;;  %v17320_v16 = vcombine.low %v3192_v2, %v3196_v4  ;;  %v3247_v2 = vld [vmem:[#allocation10 + $0xd10] sm:$0xff] }
 0x485   :  { %13768 = vmatpush1.bf16.msra.mxu0 %v17178_v11  ;;  %v3203_v11 = vld [vmem:[#allocation10 + $0xbb0] sm:$0xff] }
 0x486   :  { %14024 = vmatpush1.bf16.msra.mxu1 %v17306_v12  ;;  %13770 = vmatprep.subr.bf16.mxu0 %v17179_v14  ;;  %v3200_v12 = vld [vmem:[#allocation10 + $0xb98] sm:$0xff]  ;;  %v17193_v18 = vcombine.high %v3199_v7, %v3203_v11  ;;  %v3251_v4 = vld [vmem:[#allocation10 + $0xd30] sm:$0xff] }
 0x487   :  { %14026 = vmatprep.subr.bf16.mxu1 %v17307_v15  ;;  %v3204_v14 = vld [vmem:[#allocation10 + $0xbb8] sm:$0xff]  ;;  %v17192_v15 = vcombine.low %v3191_v1, %v3195_v62 }
 0x488   :  { %v17321_v19 = vcombine.high %v3200_v12, %v3204_v14  ;;  %v17322_v28 = vcombine.low %v3200_v12, %v3204_v14  ;;  %v3259_v12 = vld [vmem:[#allocation10 + $0xd70] sm:$0xff]  ;;  %v3256_v14 = vld [vmem:[#allocation10 + $0xd58] sm:$0xff] }
 0x489   :  { %13772 = vmatpush1.bf16.msra.mxu0 %v17180_v21  ;;  %v3211_v21 = vld [vmem:[#allocation10 + $0xbf0] sm:$0xff] }
 0x48a   :  { %14028 = vmatpush1.bf16.msra.mxu1 %v17308_v24  ;;  %13774 = vmatprep.subr.bf16.mxu0 %v17181_v26  ;;  %v3208_v24 = vld [vmem:[#allocation10 + $0xbd8] sm:$0xff]  ;;  %v17195_v31 = vcombine.high %v3207_v20, %v3211_v21 }
 0x48b   :  { %14030 = vmatprep.subr.bf16.mxu1 %v17309_v27  ;;  %v3212_v26 = vld [vmem:[#allocation10 + $0xbf8] sm:$0xff]  ;;  %v17194_v27 = vcombine.low %v3199_v7, %v3203_v11  ;;  %v3255_v11 = vld [vmem:[#allocation10 + $0xd50] sm:$0xff] }
 0x48c   :  { %v17323_v22 = vcombine.high %v3208_v24, %v3212_v26  ;;  %v17324_v39 = vcombine.low %v3208_v24, %v3212_v26  ;;  %v3267_v24 = vld [vmem:[#allocation10 + $0xdb0] sm:$0xff]  ;;  %v3264_v26 = vld [vmem:[#allocation10 + $0xd98] sm:$0xff] }
 0x48d   :  { %13776 = vmatpush1.bf16.msra.mxu0 %v17182_v17  ;;  %v3219_v17 = vld [vmem:[#allocation10 + $0xc30] sm:$0xff] }
 0x48e   :  { %14032 = vmatpush1.bf16.msra.mxu1 %v17310_v35  ;;  %13778 = vmatprep.subr.bf16.mxu0 %v17183_v37  ;;  %v3216_v35 = vld [vmem:[#allocation10 + $0xc18] sm:$0xff]  ;;  %v17197_v41 = vcombine.high %v3215_v34, %v3219_v17 }
 0x48f   :  { %14034 = vmatprep.subr.bf16.mxu1 %v17311_v38  ;;  %v3220_v37 = vld [vmem:[#allocation10 + $0xc38] sm:$0xff]  ;;  %v17196_v38 = vcombine.low %v3207_v20, %v3211_v21  ;;  %v3263_v21 = vld [vmem:[#allocation10 + $0xd90] sm:$0xff] }
 0x490   :  { %v17325_v40 = vcombine.high %v3216_v35, %v3220_v37  ;;  %v17326_v45 = vcombine.low %v3216_v35, %v3220_v37  ;;  %v3271_v37 = vld [vmem:[#allocation10 + $0xdd0] sm:$0xff] }
 0x491   :  { %13780 = vmatpush1.bf16.msra.mxu0 %v17184_v42  ;;  %v3227_v42 = vld [vmem:[#allocation10 + $0xc70] sm:$0xff] }
 0x492   :  { %14036 = vmatpush1.bf16.msra.mxu1 %v17312_v43  ;;  %13782 = vmatprep.subr.bf16.mxu0 %v17185_v61  ;;  %v17198_v43 = vcombine.low %v3215_v34, %v3219_v17  ;;  %v3224_v61 = vld [vmem:[#allocation10 + $0xc58] sm:$0xff]  ;;  %v17199_v9 = vcombine.high %v3223_v49, %v3227_v42 }
 0x493   :  { %14038 = vmatprep.subr.bf16.mxu1 %v17313_v44  ;;  %v3228_v44 = vld [vmem:[#allocation10 + $0xc78] sm:$0xff] }
 0x494   :  { %v17328_v58 = vcombine.low %v3224_v61, %v3228_v44 }
 0x495   :  { %13784 = vmatpush1.bf16.msra.mxu0 %v17186_v48  ;;  %v17327_v48 = vcombine.high %v3224_v61, %v3228_v44 }
 0x496   :  { %14040 = vmatpush1.bf16.msra.mxu1 %v17314_v50  ;;  %13786 = vmatprep.subr.bf16.mxu0 %v17187_v51  ;;  %v3232_v50 = vld [vmem:[#allocation10 + $0xc98] sm:$0xff] }
 0x497   :  { %14042 = vmatprep.subr.bf16.mxu1 %v17315_v52  ;;  %v3236_v51 = vld [vmem:[#allocation10 + $0xcb8] sm:$0xff]  ;;  %v17200_v52 = vcombine.low %v3223_v49, %v3227_v42  ;;  %v17210_v42 = vcombine.low %v3263_v21, %v3267_v24 }
 0x498   :  { %v17329_v54 = vcombine.high %v3232_v50, %v3236_v51  ;;  %v3276_v49 = vld [vmem:[#allocation10 + $0xdf8] sm:$0xff] }
 0x499   :  { %13788 = vmatpush1.bf16.msra.mxu0 %v17188_v59  ;;  %v3243_v59 = vld [vmem:[#allocation10 + $0xcf0] sm:$0xff] }
 0x49a   :  { %14044 = vmatpush1.bf16.msra.mxu1 %v17316_v63  ;;  %13790 = vmatprep.subr.bf16.mxu0 %v17189_v13  ;;  %v3240_v63 = vld [vmem:[#allocation10 + $0xcd8] sm:$0xff]  ;;  %v17203_v1 = vcombine.high %v3239_v30, %v3243_v59 }
 0x49b   :  { %14046 = vmatprep.subr.bf16.mxu1 %v17317_v0  ;;  %v3244_v13 = vld [vmem:[#allocation10 + $0xcf8] sm:$0xff]  ;;  %v17202_v0 = vcombine.low %v3231_v46, %v3235_v47 }
 0x49c   :  { %v17331_v62 = vcombine.high %v3240_v63, %v3244_v13  ;;  %v3280_v46 = vld [vmem:[#allocation10 + $0xe18] sm:$0xff] }
 0x49d   :  { %13792 = vmatpush1.bf16.msra.mxu0 %v17190_v5  ;;  %v3248_v5 = vld [vmem:[#allocation10 + $0xd18] sm:$0xff] }
 0x49e   :  { %14048 = vmatpush1.bf16.msra.mxu1 %v17318_v8  ;;  %13794 = vmatprep.subr.bf16.mxu0 %v17191_v3  ;;  %v3252_v8 = vld [vmem:[#allocation10 + $0xd38] sm:$0xff]  ;;  %v17332_v3 = vcombine.low %v3240_v63, %v3244_v13 }
 0x49f   :  { %14050 = vmatprep.subr.bf16.mxu1 %v17319_v23  ;;  %v17205_v23 = vcombine.high %v3247_v2, %v3251_v4  ;;  %v17333_v7 = vcombine.high %v3248_v5, %v3252_v8  ;;  %v3284_v47 = vld [vmem:[#allocation10 + $0xe38] sm:$0xff] }
 0x4a0   :  { %v17342_v63 = vcombine.low %v3280_v46, %v3284_v47 }
 0x4a1   :  { %13796 = vmatpush1.bf16.msra.mxu0 %v17192_v15  ;;  %v3260_v15 = vld [vmem:[#allocation10 + $0xd78] sm:$0xff] }
 0x4a2   :  { %14052 = vmatpush1.bf16.msra.mxu1 %v17320_v16  ;;  %13798 = vmatprep.subr.bf16.mxu0 %v17193_v18  ;;  %v17206_v16 = vcombine.low %v3247_v2, %v3251_v4  ;;  %v17334_v18 = vcombine.low %v3248_v5, %v3252_v8  ;;  %v17335_v20 = vcombine.high %v3256_v14, %v3260_v15  ;;  %v3300_v2 = vld [vmem:[#allocation10 + $0xeb8] sm:$0xff] }
 0x4a3   :  { %14054 = vmatprep.subr.bf16.mxu1 %v17321_v19  ;;  %v17207_v19 = vcombine.high %v3255_v11, %v3259_v12 }
 0x4a5   :  { %13800 = vmatpush1.bf16.msra.mxu0 %v17194_v27  ;;  %v3268_v27 = vld [vmem:[#allocation10 + $0xdb8] sm:$0xff] }
 0x4a6   :  { %14056 = vmatpush1.bf16.msra.mxu1 %v17322_v28  ;;  %13802 = vmatprep.subr.bf16.mxu0 %v17195_v31  ;;  %v17208_v28 = vcombine.low %v3255_v11, %v3259_v12  ;;  %v17336_v31 = vcombine.low %v3256_v14, %v3260_v15  ;;  %v17337_v35 = vcombine.high %v3264_v26, %v3268_v27  ;;  %v3308_v11 = vld [vmem:[#allocation10 + $0xef8] sm:$0xff] }
 0x4a7   :  { %14058 = vmatprep.subr.bf16.mxu1 %v17323_v22  ;;  %v17209_v22 = vcombine.high %v3263_v21, %v3267_v24  ;;  %v3316_v21 = vld [vmem:[#allocation10 + $0xf38] sm:$0xff] }
 0x4a9   :  { %13804 = vmatpush1.bf16.msra.mxu0 %v17196_v38  ;;  %v3275_v38 = vld [vmem:[#allocation10 + $0xdf0] sm:$0xff] }
 0x4aa   :  { %14060 = vmatpush1.bf16.msra.mxu1 %v17324_v39  ;;  %13806 = vmatprep.subr.bf16.mxu0 %v17197_v41  ;;  %v17211_v61 = vcombine.high %v3271_v37, %v3275_v38 }
 0x4ab   :  { %14062 = vmatprep.subr.bf16.mxu1 %v17325_v40  ;;  %v3272_v40 = vld [vmem:[#allocation10 + $0xdd8] sm:$0xff] }
 0x4ac   :  { %5140 = vmatmul.mubr.f32.vlgmr.msra.gmra.mrb[6].mxu0 %v19174_v25  ;;  %v17339_v44 = vcombine.high %v3272_v40, %v3276_v49 }
 0x4ad   :  { %5424 = vmatmul.mubr.f32.vlgmr.msra.gmra.mrb[6].mxu1 %v19174_v25  ;;  %13808 = vmatpush1.bf16.msra.mxu0 %v17198_v43  ;;  %v17330_v25 = vcombine.low %v3232_v50, %v3236_v51  ;;  %v17338_v43 = vcombine.low %v3264_v26, %v3268_v27  ;;  %v17340_v50 = vcombine.low %v3272_v40, %v3276_v49 }
 0x4ae   :  { %5210 = vmatprep.mubr.f32.mxu0 %v19178_v33  ;;  %14064 = vmatpush1.bf16.msra.mxu1 %v17326_v45  ;;  %v3279_v45 = vld [vmem:[#allocation10 + $0xe10] sm:$0xff] }
 0x4af   :  { %5494 = vmatprep.mubr.f32.mxu1 %v19178_v33  ;;  %13810 = vmatprep.subr.bf16.mxu0 %v17199_v9  ;;  %v17204_v33 = vcombine.low %v3239_v30, %v3243_v59  ;;  %v3283_v9 = vld [vmem:[#allocation10 + $0xe30] sm:$0xff]  ;;  %v3292_v30 = vld [vmem:[#allocation10 + $0xe78] sm:$0xff] }
 0x4b0   :  { %14066 = vmatprep.subr.bf16.mxu1 %v17327_v48  ;;  %v17212_v48 = vcombine.low %v3271_v37, %v3275_v38  ;;  %v17213_v51 = vcombine.high %v3279_v45, %v3283_v9  ;;  %v17214_v59 = vcombine.low %v3279_v45, %v3283_v9  ;;  %v3324_v37 = vld [vmem:[#allocation10 + $0xf78] sm:$0xff]  ;;  %v19218_v9 = vld [vmem:[#allocation11] sm:$0xff] }
 0x4b1   :  { %13812 = vmatpush1.bf16.msra.mxu0 %v17200_v52  ;;  %v17341_v52 = vcombine.high %v3280_v46, %v3284_v47  ;;  %v3332_v45 = vld [vmem:[#allocation10 + $0xfb8] sm:$0xff] }
 0x4b2   :  { %14068 = vmatpush1.bf16.msra.mxu1 %v17328_v58  ;;  %13814 = vmatprep.subr.bf16.mxu0 %v17201_v53  ;;  %v3287_v58 = vld [vmem:[#allocation10 + $0xe50] sm:$0xff] }
 0x4b3   :  { %14070 = vmatprep.subr.bf16.mxu1 %v17329_v54  ;;  %v3291_v53 = vld [vmem:[#allocation10 + $0xe70] sm:$0xff]  ;;  %v3288_v54 = vld [vmem:[#allocation10 + $0xe58] sm:$0xff] }
 0x4b4   :  { %v17215_v13 = vcombine.high %v3287_v58, %v3291_v53  ;;  %v17216_v4 = vcombine.low %v3287_v58, %v3291_v53  ;;  %v17344_v5 = vcombine.low %v3288_v54, %v3292_v30  ;;  %v5510_v58 = vrot.slane %v19218_v9, %v19089_v6  ;;  %v3336_v53 = vld [vmem:[#allocation10 + $0xfd8] sm:$0xff] }
 0x4b5   :  { %13816 = vmatpush1.bf16.msra.mxu0 %v17202_v0  ;;  %v17343_v0 = vcombine.high %v3288_v54, %v3292_v30  ;;  %v3340_v54 = vld [vmem:[#allocation10 + $0xff8] sm:$0xff]  ;;  %v19222_v30 = vld [vmem:[#allocation13] sm:$0xff] }
 0x4b6   :  { %14072 = vmatpush1.bf16.msra.mxu1 %v17330_v25  ;;  %13818 = vmatprep.subr.bf16.mxu0 %v17203_v1  ;;  %v3295_v25 = vld [vmem:[#allocation10 + $0xe90] sm:$0xff] }
 0x4b7   :  { %14074 = vmatprep.subr.bf16.mxu1 %v17331_v62  ;;  %v3299_v1 = vld [vmem:[#allocation10 + $0xeb0] sm:$0xff]  ;;  %v3296_v62 = vld [vmem:[#allocation10 + $0xe98] sm:$0xff] }
 0x4b8   :  { %v17217_v8 = vcombine.high %v3295_v25, %v3299_v1  ;;  %v17218_v12 = vcombine.low %v3295_v25, %v3299_v1  ;;  %v17346_v14 = vcombine.low %v3296_v62, %v3300_v2  ;;  %v5609_v25 = vld [vmem:[#allocation14] sm:$0xff] }
 0x4b9   :  { %13820 = vmatpush1.bf16.msra.mxu0 %v17204_v33  ;;  %v17345_v33 = vcombine.high %v3296_v62, %v3300_v2  ;;  %v5613_v1 = vld [vmem:[#allocation14 + $0x20] sm:$0xff]  ;;  %v5560_v2 = vrot.slane %v19222_v30, %v19089_v6 }
 0x4ba   :  { %14076 = vmatpush1.bf16.msra.mxu1 %v17332_v3  ;;  %13822 = vmatprep.subr.bf16.mxu0 %v17205_v23  ;;  %v3303_v3 = vld [vmem:[#allocation10 + $0xed0] sm:$0xff] }
 0x4bb   :  { %14078 = vmatprep.subr.bf16.mxu1 %v17333_v7  ;;  %v3307_v23 = vld [vmem:[#allocation10 + $0xef0] sm:$0xff]  ;;  %v3304_v7 = vld [vmem:[#allocation10 + $0xed8] sm:$0xff] }
 0x4bc   :  { %v17219_v15 = vcombine.high %v3303_v3, %v3307_v23  ;;  %v17220_v24 = vcombine.low %v3303_v3, %v3307_v23  ;;  %v17348_v26 = vcombine.low %v3304_v7, %v3308_v11  ;;  %v17357_v3 = vcombine.high %v5609_v25, %v5613_v1 }
 0x4bd   :  { %13824 = vmatpush1.bf16.msra.mxu0 %v17206_v16  ;;  %v17347_v16 = vcombine.high %v3304_v7, %v3308_v11  ;;  %v5617_v11 = vld [vmem:[#allocation14 + $0x40] sm:$0xff] }
 0x4be   :  { %14080 = vmatpush1.bf16.msra.mxu1 %v17334_v18  ;;  %13826 = vmatprep.subr.bf16.mxu0 %v17207_v19  ;;  %v3311_v18 = vld [vmem:[#allocation10 + $0xf10] sm:$0xff] }
 0x4bf   :  { %v19210_v34 = vpop.f32.mrb[4].mxu0  ;;  %v19212_v17 = vpop.f32.mrb[4].mxu1  ;;  %14082 = vmatprep.subr.bf16.mxu1 %v17335_v20  ;;  %v3315_v19 = vld [vmem:[#allocation10 + $0xf30] sm:$0xff]  ;;  %v3312_v20 = vld [vmem:[#allocation10 + $0xf18] sm:$0xff] }
 0x4c0   :  { %v19214_v39 = vpop.f32.mrb[5].mxu0  ;;  %v19216_v41 = vpop.f32.mrb[5].mxu1  ;;  %v17221_v27 = vcombine.high %v3311_v18, %v3315_v19  ;;  %v17222_v38 = vcombine.low %v3311_v18, %v3315_v19  ;;  %v17350_v40 = vcombine.low %v3312_v20, %v3316_v21  ;;  %v5625_v19 = vld [vmem:[#allocation14 + $0x80] sm:$0xff] }
 0x4c1   :  { %13828 = vmatpush1.bf16.msra.mxu0 %v17208_v28  ;;  %v17349_v28 = vcombine.high %v3312_v20, %v3316_v21  ;;  %v5544_v62 = vmul.f32 %v5510_v58, %v19214_v39  ;;  %v5622_v39 = vld [vmem:[#allocation14 + $0x68] sm:$0xff]  ;;  %v5629_v20 = vld [vmem:[#allocation14 + $0xa0] sm:$0xff] }
 0x4c2   :  { %14084 = vmatpush1.bf16.msra.mxu1 %v17336_v31  ;;  %13830 = vmatprep.subr.bf16.mxu0 %v17209_v22  ;;  %v3319_v31 = vld [vmem:[#allocation10 + $0xf50] sm:$0xff] }
 0x4c3   :  { %14086 = vmatprep.subr.bf16.mxu1 %v17337_v35  ;;  %v3323_v22 = vld [vmem:[#allocation10 + $0xf70] sm:$0xff]  ;;  %v3320_v35 = vld [vmem:[#allocation10 + $0xf58] sm:$0xff]  ;;  %v5594_v7 = vadd.f32 %v5560_v2, %v5544_v62 }
 0x4c4   :  { %v17223_v49 = vcombine.high %v3319_v31, %v3323_v22  ;;  %v17224_v46 = vcombine.low %v3319_v31, %v3323_v22  ;;  %v17352_v47 = vcombine.low %v3320_v35, %v3324_v37  ;;  %v17361_v22 = vcombine.high %v5625_v19, %v5629_v20  ;;  %v5649_v58 = vld [vmem:[#allocation14 + $0x140] sm:$0xff]  ;;  %v5658_v2 = vld [vmem:[#allocation14 + $0x188] sm:$0xff] }
 0x4c5   :  { %13832 = vmatpush1.bf16.msra.mxu0 %v17210_v42  ;;  %v17351_v42 = vcombine.high %v3320_v35, %v3324_v37  ;;  %v19227_v21 = vmax.f32 %v5594_v7, 0.0  ;;  %v5633_v37 = vld [vmem:[#allocation14 + $0xc0] sm:$0xff] }
 0x4c6   :  { %14088 = vmatpush1.bf16.msra.mxu1 %v17338_v43  ;;  %13834 = vmatprep.subr.bf16.mxu0 %v17211_v61  ;;  %v3327_v43 = vld [vmem:[#allocation10 + $0xf90] sm:$0xff] }
 0x4c7   :  { %14090 = vmatprep.subr.bf16.mxu1 %v17339_v44  ;;  %v3331_v61 = vld [vmem:[#allocation10 + $0xfb0] sm:$0xff]  ;;  %v3328_v44 = vld [vmem:[#allocation10 + $0xf98] sm:$0xff] }
 0x4c8   :  { %v5661_v62 = vld [vmem:[#allocation14 + $0x1a0] sm:$0xff] }
 0x4c9   :  { %13836 = vmatpush1.bf16.msra.mxu0 %v17212_v48  ;;  %v17225_v48 = vcombine.high %v3327_v43, %v3331_v61  ;;  %v5669_v7 = vld [vmem:[#allocation14 + $0x1e0] sm:$0xff] }
 0x4ca   :  { %14092 = vmatpush1.bf16.msra.mxu1 %v17340_v50  ;;  %13838 = vmatprep.subr.bf16.mxu0 %v17213_v51  ;;  %v17353_v50 = vcombine.high %v3328_v44, %v3332_v45  ;;  %v3335_v51 = vld [vmem:[#allocation10 + $0xfd0] sm:$0xff] }
 0x4cb   :  { %14094 = vmatprep.subr.bf16.mxu1 %v17341_v52  ;;  %v3339_v52 = vld [vmem:[#allocation10 + $0xff0] sm:$0xff] }
 0x4cd   :  { %13840 = vmatpush1.bf16.msra.mxu0 %v17214_v59  ;;  %v17226_v59 = vcombine.low %v3327_v43, %v3331_v61 }
 0x4ce   :  { %14096 = vmatpush1.bf16.msra.mxu1 %v17342_v63  ;;  %13842 = vmatprep.subr.bf16.mxu0 %v17215_v13  ;;  %v17354_v63 = vcombine.low %v3328_v44, %v3332_v45  ;;  %v17227_v13 = vcombine.high %v3335_v51, %v3339_v52  ;;  %v5641_v44 = vld [vmem:[#allocation14 + $0x100] sm:$0xff] }
 0x4cf   :  { %14098 = vmatprep.subr.bf16.mxu1 %v17343_v0  ;;  %v17355_v0 = vcombine.high %v3336_v53, %v3340_v54  ;;  %v5645_v45 = vld [vmem:[#allocation14 + $0x120] sm:$0xff] }
 0x4d1   :  { %13844 = vmatpush1.bf16.msra.mxu0 %v17216_v4  ;;  %v5610_v4 = vld [vmem:[#allocation14 + $0x8] sm:$0xff] }
 0x4d2   :  { %14100 = vmatpush1.bf16.msra.mxu1 %v17344_v5  ;;  %13846 = vmatprep.subr.bf16.mxu0 %v17217_v8  ;;  %v5614_v5 = vld [vmem:[#allocation14 + $0x28] sm:$0xff]  ;;  %v17228_v8 = vcombine.low %v3335_v51, %v3339_v52  ;;  %v17365_v51 = vcombine.high %v5641_v44, %v5645_v45 }
 0x4d3   :  { %14102 = vmatprep.subr.bf16.mxu1 %v17345_v33  ;;  %v17356_v33 = vcombine.low %v3336_v53, %v3340_v54  ;;  %v17485_v23 = vcombine.high %v5610_v4, %v5614_v5  ;;  %v5653_v53 = vld [vmem:[#allocation14 + $0x160] sm:$0xff]  ;;  %v5650_v54 = vld [vmem:[#allocation14 + $0x148] sm:$0xff] }
 0x4d5   :  { %13848 = vmatpush1.bf16.msra.mxu0 %v17218_v12  ;;  %v5621_v12 = vld [vmem:[#allocation14 + $0x60] sm:$0xff] }
 0x4d6   :  { %14104 = vmatpush1.bf16.msra.mxu1 %v17346_v14  ;;  %13850 = vmatprep.subr.bf16.mxu0 %v17219_v15  ;;  %v17358_v14 = vcombine.low %v5609_v25, %v5613_v1  ;;  %v5618_v15 = vld [vmem:[#allocation14 + $0x48] sm:$0xff]  ;;  %v17359_v18 = vcombine.high %v5617_v11, %v5621_v12  ;;  %v5657_v1 = vld [vmem:[#allocation14 + $0x180] sm:$0xff] }
 0x4d7   :  { %14106 = vmatprep.subr.bf16.mxu1 %v17347_v16  ;;  %v17486_v16 = vcombine.low %v5610_v4, %v5614_v5  ;;  %v17488_v31 = vcombine.low %v5618_v15, %v5622_v39  ;;  %v5662_v4 = vld [vmem:[#allocation14 + $0x1a8] sm:$0xff]  ;;  %v17368_v5 = vcombine.low %v5649_v58, %v5653_v53 }
 0x4d9   :  { %13852 = vmatpush1.bf16.msra.mxu0 %v17220_v24  ;;  %v17487_v24 = vcombine.high %v5618_v15, %v5622_v39  ;;  %v17498_v15 = vcombine.low %v5658_v2, %v5662_v4 }
 0x4da   :  { %14108 = vmatpush1.bf16.msra.mxu1 %v17348_v26  ;;  %13854 = vmatprep.subr.bf16.mxu0 %v17221_v27  ;;  %v5626_v26 = vld [vmem:[#allocation14 + $0x88] sm:$0xff] }
 0x4db   :  { %14110 = vmatprep.subr.bf16.mxu1 %v17349_v28  ;;  %v5630_v27 = vld [vmem:[#allocation14 + $0xa8] sm:$0xff]  ;;  %v17360_v28 = vcombine.low %v5617_v11, %v5621_v12 }
 0x4dc   :  { %v17489_v35 = vcombine.high %v5626_v26, %v5630_v27  ;;  %v5666_v11 = vld [vmem:[#allocation14 + $0x1c8] sm:$0xff] }
 0x4dd   :  { %13856 = vmatpush1.bf16.msra.mxu0 %v17222_v38  ;;  %v5637_v38 = vld [vmem:[#allocation14 + $0xe0] sm:$0xff]  ;;  %v5670_v12 = vld [vmem:[#allocation14 + $0x1e8] sm:$0xff] }
 0x4de   :  { %14112 = vmatpush1.bf16.msra.mxu1 %v17350_v40  ;;  %13858 = vmatprep.subr.bf16.mxu0 %v17223_v49  ;;  %v5634_v40 = vld [vmem:[#allocation14 + $0xc8] sm:$0xff]  ;;  %v17363_v43 = vcombine.high %v5633_v37, %v5637_v38 }
 0x4df   :  { %14114 = vmatprep.subr.bf16.mxu1 %v17351_v42  ;;  %v5638_v49 = vld [vmem:[#allocation14 + $0xe8] sm:$0xff]  ;;  %v17362_v42 = vcombine.low %v5625_v19, %v5629_v20  ;;  %v5677_v19 = vld [vmem:[#allocation14 + $0x220] sm:$0xff] }
 0x4e0   :  { %v17491_v61 = vcombine.high %v5634_v40, %v5638_v49  ;;  %v5674_v20 = vld [vmem:[#allocation14 + $0x208] sm:$0xff] }
 0x4e1   :  { %13860 = vmatpush1.bf16.msra.mxu0 %v17224_v46  ;;  %v5642_v46 = vld [vmem:[#allocation14 + $0x108] sm:$0xff] }
 0x4e2   :  { %14116 = vmatpush1.bf16.msra.mxu1 %v17352_v47  ;;  %13862 = vmatprep.subr.bf16.mxu0 %v17225_v48  ;;  %v5646_v47 = vld [vmem:[#allocation14 + $0x128] sm:$0xff]  ;;  %v17364_v48 = vcombine.low %v5633_v37, %v5637_v38 }
 0x4e3   :  { %14118 = vmatprep.subr.bf16.mxu1 %v17353_v50  ;;  %v17492_v50 = vcombine.low %v5634_v40, %v5638_v49  ;;  %v17493_v52 = vcombine.high %v5642_v46, %v5646_v47  ;;  %v5682_v37 = vld [vmem:[#allocation14 + $0x248] sm:$0xff] }
 0x4e4   :  { %v5686_v38 = vld [vmem:[#allocation14 + $0x268] sm:$0xff] }
 0x4e5   :  { %13864 = vmatpush1.bf16.msra.mxu0 %v17226_v59  ;;  %v5654_v59 = vld [vmem:[#allocation14 + $0x168] sm:$0xff] }
 0x4e6   :  { %14120 = vmatpush1.bf16.msra.mxu1 %v17354_v63  ;;  %13866 = vmatprep.subr.bf16.mxu0 %v17227_v13  ;;  %v17366_v63 = vcombine.low %v5641_v44, %v5645_v45  ;;  %v17494_v13 = vcombine.low %v5642_v46, %v5646_v47  ;;  %v17495_v25 = vcombine.high %v5650_v54, %v5654_v59  ;;  %v5690_v44 = vld [vmem:[#allocation14 + $0x288] sm:$0xff] }
 0x4e7   :  { %14122 = vmatprep.subr.bf16.mxu1 %v17355_v0  ;;  %v17367_v0 = vcombine.high %v5649_v58, %v5653_v53  ;;  %v5694_v45 = vld [vmem:[#allocation14 + $0x2a8] sm:$0xff]  ;;  %v17504_v47 = vcombine.low %v5682_v37, %v5686_v38 }
 0x4e8   :  { %v5698_v58 = vld [vmem:[#allocation14 + $0x2c8] sm:$0xff] }
 0x4e9   :  { %13868 = vmatpush1.bf16.msra.mxu0 %v17228_v8  ;;  %v17496_v8 = vcombine.low %v5650_v54, %v5654_v59  ;;  %v5702_v53 = vld [vmem:[#allocation14 + $0x2e8] sm:$0xff]  ;;  %v17506_v59 = vcombine.low %v5690_v44, %v5694_v45 }
 0x4ea   :  { %14124 = vmatpush1.bf16.msra.mxu1 %v17356_v33  ;;  %14126 = vmatprep.subr.bf16.mxu0 %v17357_v3  ;;  %v17369_v33 = vcombine.high %v5657_v1, %v5661_v62  ;;  %v17497_v3 = vcombine.high %v5658_v2, %v5662_v4  ;;  %v17508_v4 = vcombine.low %v5698_v58, %v5702_v53 }
 0x4eb   :  { %14382 = vmatprep.subr.bf16.mxu1 %v17485_v23  ;;  %v5665_v23 = vld [vmem:[#allocation14 + $0x1c0] sm:$0xff] }
 0x4ec   :  { %5211 = vmatmul.mubr.f32.vlgmr.msra.gmra.mrb[6].mxu0 %v19192_v10  ;;  %v17371_v39 = vcombine.high %v5665_v23, %v5669_v7 }
 0x4ed   :  { %5495 = vmatmul.mubr.f32.vlgmr.msra.gmra.mrb[6].mxu1 %v19192_v10  ;;  %14128 = vmatpush1.bf16.msra.mxu0 %v17358_v14  ;;  %v17490_v10 = vcombine.low %v5626_v26, %v5630_v27  ;;  %v17370_v14 = vcombine.low %v5657_v1, %v5661_v62  ;;  %v17372_v26 = vcombine.low %v5665_v23, %v5669_v7  ;;  %v5706_v1 = vld [vmem:[#allocation14 + $0x308] sm:$0xff] }
 0x4ee   :  { %7209 = vmatprep.mubr.f32.mxu0 %v19227_v21  ;;  %14384 = vmatpush1.bf16.msra.mxu1 %v17486_v16  ;;  %v17499_v16 = vcombine.high %v5666_v11, %v5670_v12  ;;  %v17500_v27 = vcombine.low %v5666_v11, %v5670_v12  ;;  %v5710_v62 = vld [vmem:[#allocation14 + $0x328] sm:$0xff] }
 0x4ef   :  { %7493 = vmatprep.mubr.f32.mxu1 %v19227_v21  ;;  %14130 = vmatprep.subr.bf16.mxu0 %v17359_v18  ;;  %v5673_v18 = vld [vmem:[#allocation14 + $0x200] sm:$0xff]  ;;  %v5714_v23 = vld [vmem:[#allocation14 + $0x348] sm:$0xff]  ;;  %v17510_v12 = vcombine.low %v5706_v1, %v5710_v62 }
 0x4f0   :  { %14386 = vmatprep.subr.bf16.mxu1 %v17487_v24  ;;  %v5678_v24 = vld [vmem:[#allocation14 + $0x228] sm:$0xff]  ;;  %v17374_v40 = vcombine.low %v5673_v18, %v5677_v19 }
 0x4f1   :  { %14132 = vmatpush1.bf16.msra.mxu0 %v17360_v28  ;;  %v17373_v28 = vcombine.high %v5673_v18, %v5677_v19  ;;  %v17502_v49 = vcombine.low %v5674_v20, %v5678_v24  ;;  %v5718_v7 = vld [vmem:[#allocation14 + $0x368] sm:$0xff] }
 0x4f2   :  { %14388 = vmatpush1.bf16.msra.mxu1 %v17488_v31  ;;  %14134 = vmatprep.subr.bf16.mxu0 %v17361_v22  ;;  %v17501_v31 = vcombine.high %v5674_v20, %v5678_v24  ;;  %v5681_v22 = vld [vmem:[#allocation14 + $0x240] sm:$0xff]  ;;  %v5722_v18 = vld [vmem:[#allocation14 + $0x388] sm:$0xff]  ;;  %v5506_v24 = vrot.slane %v19218_v9, %v19110_v29 }
 0x4f3   :  { %14390 = vmatprep.subr.bf16.mxu1 %v17489_v35  ;;  %v5685_v35 = vld [vmem:[#allocation14 + $0x260] sm:$0xff]  ;;  %v5726_v19 = vld [vmem:[#allocation14 + $0x3a8] sm:$0xff] }
 0x4f4   :  { %v17376_v46 = vcombine.low %v5681_v22, %v5685_v35 }
 0x4f5   :  { %14136 = vmatpush1.bf16.msra.mxu0 %v17362_v42  ;;  %v17375_v42 = vcombine.high %v5681_v22, %v5685_v35  ;;  %v5733_v22 = vld [vmem:[#allocation14 + $0x3e0] sm:$0xff]  ;;  %v5518_v35 = vrot.slane %v19218_v9, %v19113_v36 }
 0x4f6   :  { %14392 = vmatpush1.bf16.msra.mxu1 %v17490_v10  ;;  %14138 = vmatprep.subr.bf16.mxu0 %v17363_v43  ;;  %v17503_v10 = vcombine.high %v5682_v37, %v5686_v38  ;;  %v5689_v43 = vld [vmem:[#allocation14 + $0x280] sm:$0xff]  ;;  %v5730_v37 = vld [vmem:[#allocation14 + $0x3c8] sm:$0xff] }
 0x4f7   :  { %14394 = vmatprep.subr.bf16.mxu1 %v17491_v61  ;;  %v5693_v61 = vld [vmem:[#allocation14 + $0x2a0] sm:$0xff]  ;;  %v5734_v38 = vld [vmem:[#allocation14 + $0x3e8] sm:$0xff] }
 0x4f8   :  { %v17378_v54 = vcombine.low %v5689_v43, %v5693_v61 }
 0x4f9   :  { %14140 = vmatpush1.bf16.msra.mxu0 %v17364_v48  ;;  %v17377_v48 = vcombine.high %v5689_v43, %v5693_v61  ;;  %v17515_v61 = vcombine.high %v5730_v37, %v5734_v38 }
 0x4fa   :  { %14396 = vmatpush1.bf16.msra.mxu1 %v17492_v50  ;;  %14142 = vmatprep.subr.bf16.mxu0 %v17365_v51  ;;  %v17505_v50 = vcombine.high %v5690_v44, %v5694_v45  ;;  %v5697_v51 = vld [vmem:[#allocation14 + $0x2c0] sm:$0xff] }
 0x4fb   :  { %14398 = vmatprep.subr.bf16.mxu1 %v17493_v52  ;;  %v5701_v52 = vld [vmem:[#allocation14 + $0x2e0] sm:$0xff] }
 0x4fc   :  { %v17380_v2 = vcombine.low %v5697_v51, %v5701_v52  ;;  %v5737_v44 = vld [vmem:[#allocation14 + $0x400] sm:$0xff] }
 0x4fd   :  { %14144 = vmatpush1.bf16.msra.mxu0 %v17366_v63  ;;  %v17379_v63 = vcombine.high %v5697_v51, %v5701_v52  ;;  %v5741_v45 = vld [vmem:[#allocation14 + $0x420] sm:$0xff] }
 0x4fe   :  { %14400 = vmatpush1.bf16.msra.mxu1 %v17494_v13  ;;  %14146 = vmatprep.subr.bf16.mxu0 %v17367_v0  ;;  %v17507_v13 = vcombine.high %v5698_v58, %v5702_v53  ;;  %v5705_v0 = vld [vmem:[#allocation14 + $0x300] sm:$0xff]  ;;  %v17389_v58 = vcombine.high %v5737_v44, %v5741_v45 }
 0x4ff   :  { %14402 = vmatprep.subr.bf16.mxu1 %v17495_v25  ;;  %v5709_v25 = vld [vmem:[#allocation14 + $0x320] sm:$0xff] }
 0x500   :  { %v17382_v11 = vcombine.low %v5705_v0, %v5709_v25 }
 0x501   :  { %14148 = vmatpush1.bf16.msra.mxu0 %v17368_v5  ;;  %v17381_v5 = vcombine.high %v5705_v0, %v5709_v25  ;;  %v5750_v0 = vld [vmem:[#allocation14 + $0x468] sm:$0xff] }
 0x502   :  { %14404 = vmatpush1.bf16.msra.mxu1 %v17496_v8  ;;  %14150 = vmatprep.subr.bf16.mxu0 %v17369_v33  ;;  %v17509_v8 = vcombine.high %v5706_v1, %v5710_v62  ;;  %v5713_v33 = vld [vmem:[#allocation14 + $0x340] sm:$0xff] }
 0x503   :  { %14406 = vmatprep.subr.bf16.mxu1 %v17497_v3  ;;  %v5717_v3 = vld [vmem:[#allocation14 + $0x360] sm:$0xff] }
 0x504   :  { %v17384_v20 = vcombine.low %v5713_v33, %v5717_v3 }
 0x505   :  { %14152 = vmatpush1.bf16.msra.mxu0 %v17370_v14  ;;  %v17383_v14 = vcombine.high %v5713_v33, %v5717_v3  ;;  %v5754_v33 = vld [vmem:[#allocation14 + $0x488] sm:$0xff] }
 0x506   :  { %14408 = vmatpush1.bf16.msra.mxu1 %v17498_v15  ;;  %14154 = vmatprep.subr.bf16.mxu0 %v17371_v39  ;;  %v17511_v15 = vcombine.high %v5714_v23, %v5718_v7  ;;  %v5721_v39 = vld [vmem:[#allocation14 + $0x380] sm:$0xff]  ;;  %v5758_v3 = vld [vmem:[#allocation14 + $0x4a8] sm:$0xff] }
 0x507   :  { %14410 = vmatprep.subr.bf16.mxu1 %v17499_v16  ;;  %v5725_v16 = vld [vmem:[#allocation14 + $0x3a0] sm:$0xff] }
 0x509   :  { %14156 = vmatpush1.bf16.msra.mxu0 %v17372_v26  ;;  %v17512_v26 = vcombine.low %v5714_v23, %v5718_v7 }
 0x50a   :  { %14412 = vmatpush1.bf16.msra.mxu1 %v17500_v27  ;;  %14158 = vmatprep.subr.bf16.mxu0 %v17373_v28  ;;  %v17385_v27 = vcombine.high %v5721_v39, %v5725_v16  ;;  %v17513_v28 = vcombine.high %v5722_v18, %v5726_v19 }
 0x50b   :  { %14414 = vmatprep.subr.bf16.mxu1 %v17501_v31  ;;  %v5729_v31 = vld [vmem:[#allocation14 + $0x3c0] sm:$0xff] }
 0x50c   :  { %v17387_v43 = vcombine.high %v5729_v31, %v5733_v22  ;;  %v17388_v51 = vcombine.low %v5729_v31, %v5733_v22  ;;  %v5774_v31 = vld [vmem:[#allocation14 + $0x528] sm:$0xff] }
 0x50d   :  { %14160 = vmatpush1.bf16.msra.mxu0 %v17374_v40  ;;  %v5556_v40 = vrot.slane %v19222_v30, %v19110_v29 }
 0x50e   :  { %14416 = vmatpush1.bf16.msra.mxu1 %v17502_v49  ;;  %14162 = vmatprep.subr.bf16.mxu0 %v17375_v42  ;;  %v17386_v49 = vcombine.low %v5721_v39, %v5725_v16  ;;  %v5543_v42 = vmul.f32 %v5506_v24, %v19210_v34  ;;  %v17516_v34 = vcombine.low %v5730_v37, %v5734_v38  ;;  %v5762_v39 = vld [vmem:[#allocation14 + $0x4c8] sm:$0xff] }
 0x50f   :  { %14418 = vmatprep.subr.bf16.mxu1 %v17503_v10  ;;  %v17514_v10 = vcombine.low %v5722_v18, %v5726_v19  ;;  %v5766_v16 = vld [vmem:[#allocation14 + $0x4e8] sm:$0xff]  ;;  %v17522_v19 = vcombine.low %v5754_v33, %v5758_v3 }
 0x510   :  { %v5593_v52 = vadd.f32 %v5556_v40, %v5543_v42  ;;  %v17523_v24 = vcombine.high %v5762_v39, %v5766_v16  ;;  %v5777_v40 = vld [vmem:[#allocation14 + $0x540] sm:$0xff]  ;;  %v5778_v42 = vld [vmem:[#allocation14 + $0x548] sm:$0xff] }
 0x511   :  { %14164 = vmatpush1.bf16.msra.mxu0 %v17376_v46  ;;  %v5546_v46 = vmul.f32 %v5518_v35, %v19216_v41  ;;  %v5746_v41 = vld [vmem:[#allocation14 + $0x448] sm:$0xff]  ;;  %v17524_v35 = vcombine.low %v5762_v39, %v5766_v16 }
 0x512   :  { %14420 = vmatpush1.bf16.msra.mxu1 %v17504_v47  ;;  %14166 = vmatprep.subr.bf16.mxu0 %v17377_v48  ;;  %v5568_v47 = vrot.slane %v19222_v30, %v19113_v36  ;;  %v5738_v48 = vld [vmem:[#allocation14 + $0x408] sm:$0xff]  ;;  %v19243_v25 = vmax.f32 %v5593_v52, 0.0  ;;  %v17520_v7 = vcombine.low %v5746_v41, %v5750_v0 }
 0x513   :  { %14422 = vmatprep.subr.bf16.mxu1 %v17505_v50  ;;  %v5742_v50 = vld [vmem:[#allocation14 + $0x428] sm:$0xff] }
 0x514   :  { %v17517_v53 = vcombine.high %v5738_v48, %v5742_v50  ;;  %v17518_v1 = vcombine.low %v5738_v48, %v5742_v50  ;;  %v5786_v48 = vld [vmem:[#allocation14 + $0x588] sm:$0xff] }
 0x515   :  { %14168 = vmatpush1.bf16.msra.mxu0 %v17378_v54  ;;  %v5596_v54 = vadd.f32 %v5568_v47, %v5546_v46  ;;  %v5785_v46 = vld [vmem:[#allocation14 + $0x580] sm:$0xff]  ;;  %v5790_v50 = vld [vmem:[#allocation14 + $0x5a8] sm:$0xff] }
 0x516   :  { %14424 = vmatpush1.bf16.msra.mxu1 %v17506_v59  ;;  %14170 = vmatprep.subr.bf16.mxu0 %v17379_v63  ;;  %v5745_v59 = vld [vmem:[#allocation14 + $0x440] sm:$0xff] }
 0x517   :  { %14426 = vmatprep.subr.bf16.mxu1 %v17507_v13  ;;  %v5749_v63 = vld [vmem:[#allocation14 + $0x460] sm:$0xff]  ;;  %v17390_v13 = vcombine.low %v5737_v44, %v5741_v45 }
 0x518   :  { %v17391_v62 = vcombine.high %v5745_v59, %v5749_v63  ;;  %v17392_v23 = vcombine.low %v5745_v59, %v5749_v63  ;;  %v5789_v47 = vld [vmem:[#allocation14 + $0x5a0] sm:$0xff]  ;;  %v5794_v59 = vld [vmem:[#allocation14 + $0x5c8] sm:$0xff] }
 0x519   :  { %14172 = vmatpush1.bf16.msra.mxu0 %v17380_v2  ;;  %v5753_v2 = vld [vmem:[#allocation14 + $0x480] sm:$0xff]  ;;  %v5798_v63 = vld [vmem:[#allocation14 + $0x5e8] sm:$0xff] }
 0x51a   :  { %14428 = vmatpush1.bf16.msra.mxu1 %v17508_v4  ;;  %14174 = vmatprep.subr.bf16.mxu0 %v17381_v5  ;;  %v5757_v4 = vld [vmem:[#allocation14 + $0x4a0] sm:$0xff]  ;;  %v19245_v5 = vmax.f32 %v5596_v54, 0.0 }
 0x51b   :  { %14430 = vmatprep.subr.bf16.mxu1 %v17509_v8  ;;  %v17519_v8 = vcombine.high %v5746_v41, %v5750_v0  ;;  %v17394_v18 = vcombine.low %v5753_v2, %v5757_v4  ;;  %v5797_v54 = vld [vmem:[#allocation14 + $0x5e0] sm:$0xff]  ;;  %v17530_v41 = vcombine.low %v5786_v48, %v5790_v50 }
 0x51d   :  { %14176 = vmatpush1.bf16.msra.mxu0 %v17382_v11  ;;  %v17393_v11 = vcombine.high %v5753_v2, %v5757_v4  ;;  %v5805_v2 = vld [vmem:[#allocation14 + $0x620] sm:$0xff]  ;;  %v5802_v4 = vld [vmem:[#allocation14 + $0x608] sm:$0xff] }
 0x51e   :  { %14432 = vmatpush1.bf16.msra.mxu1 %v17510_v12  ;;  %14178 = vmatprep.subr.bf16.mxu0 %v17383_v14  ;;  %v17521_v12 = vcombine.high %v5754_v33, %v5758_v3  ;;  %v5761_v14 = vld [vmem:[#allocation14 + $0x4c0] sm:$0xff]  ;;  %v17532_v3 = vcombine.low %v5794_v59, %v5798_v63 }
 0x51f   :  { %14434 = vmatprep.subr.bf16.mxu1 %v17511_v15  ;;  %v5765_v15 = vld [vmem:[#allocation14 + $0x4e0] sm:$0xff] }
 0x520   :  { %v17396_v22 = vcombine.low %v5761_v14, %v5765_v15 }
 0x521   :  { %14180 = vmatpush1.bf16.msra.mxu0 %v17384_v20  ;;  %v17395_v20 = vcombine.high %v5761_v14, %v5765_v15  ;;  %v5810_v14 = vld [vmem:[#allocation14 + $0x648] sm:$0xff] }
 0x522   :  { %14436 = vmatpush1.bf16.msra.mxu1 %v17512_v26  ;;  %14182 = vmatprep.subr.bf16.mxu0 %v17385_v27  ;;  %v5769_v26 = vld [vmem:[#allocation14 + $0x500] sm:$0xff]  ;;  %v5814_v15 = vld [vmem:[#allocation14 + $0x668] sm:$0xff] }
 0x523   :  { %14438 = vmatprep.subr.bf16.mxu1 %v17513_v28  ;;  %v5773_v27 = vld [vmem:[#allocation14 + $0x520] sm:$0xff]  ;;  %v5770_v28 = vld [vmem:[#allocation14 + $0x508] sm:$0xff] }
 0x524   :  { %v17397_v37 = vcombine.high %v5769_v26, %v5773_v27  ;;  %v17525_v38 = vcombine.high %v5770_v28, %v5774_v31 }
 0x525   :  { %14184 = vmatpush1.bf16.msra.mxu0 %v17386_v49  ;;  %v5781_v49 = vld [vmem:[#allocation14 + $0x560] sm:$0xff] }
 0x526   :  { %14440 = vmatpush1.bf16.msra.mxu1 %v17514_v10  ;;  %14186 = vmatprep.subr.bf16.mxu0 %v17387_v43  ;;  %v5782_v10 = vld [vmem:[#allocation14 + $0x568] sm:$0xff]  ;;  %v17398_v43 = vcombine.low %v5769_v26, %v5773_v27  ;;  %v17399_v44 = vcombine.high %v5777_v40, %v5781_v49 }
 0x527   :  { %14442 = vmatprep.subr.bf16.mxu1 %v17515_v61  ;;  %v17526_v61 = vcombine.low %v5770_v28, %v5774_v31  ;;  %v17527_v45 = vcombine.high %v5778_v42, %v5782_v10  ;;  %v17528_v52 = vcombine.low %v5778_v42, %v5782_v10  ;;  %v5818_v26 = vld [vmem:[#allocation14 + $0x688] sm:$0xff]  ;;  %v17536_v31 = vcombine.low %v5810_v14, %v5814_v15 }
 0x528   :  { %v5822_v27 = vld [vmem:[#allocation14 + $0x6a8] sm:$0xff] }
 0x529   :  { %14188 = vmatpush1.bf16.msra.mxu0 %v17388_v51  ;;  %v17400_v51 = vcombine.low %v5777_v40, %v5781_v49  ;;  %v5826_v40 = vld [vmem:[#allocation14 + $0x6c8] sm:$0xff]  ;;  %v17538_v10 = vcombine.low %v5818_v26, %v5822_v27 }
 0x52a   :  { %14444 = vmatpush1.bf16.msra.mxu1 %v17516_v34  ;;  %14190 = vmatprep.subr.bf16.mxu0 %v17389_v58  ;;  %v17401_v34 = vcombine.high %v5785_v46, %v5789_v47  ;;  %v17529_v58 = vcombine.high %v5786_v48, %v5790_v50  ;;  %v5830_v49 = vld [vmem:[#allocation14 + $0x6e8] sm:$0xff] }
 0x52b   :  { %14446 = vmatprep.subr.bf16.mxu1 %v17517_v53  ;;  %v5793_v53 = vld [vmem:[#allocation14 + $0x5c0] sm:$0xff]  ;;  %v17540_v50 = vcombine.low %v5826_v40, %v5830_v49 }
 0x52c   :  { %7210 = vmatmul.mubr.f32.vlgmr.msra.gmra.mrb[8].mxu0 %v19243_v25  ;;  %v17403_v0 = vcombine.high %v5793_v53, %v5797_v54  ;;  %v17404_v33 = vcombine.low %v5793_v53, %v5797_v54  ;;  %v5842_v53 = vld [vmem:[#allocation14 + $0x748] sm:$0xff] }
 0x52d   :  { %7494 = vmatmul.mubr.f32.vlgmr.msra.gmra.mrb[8].mxu1 %v19243_v25  ;;  %14192 = vmatpush1.bf16.msra.mxu0 %v17390_v13  ;;  %v17402_v13 = vcombine.low %v5785_v46, %v5789_v47  ;;  %v5834_v46 = vld [vmem:[#allocation14 + $0x708] sm:$0xff] }
 0x52e   :  { %7280 = vmatprep.mubr.f32.mxu0 %v19245_v5  ;;  %14448 = vmatpush1.bf16.msra.mxu1 %v17518_v1  ;;  %v17531_v1 = vcombine.high %v5794_v59, %v5798_v63  ;;  %v5838_v47 = vld [vmem:[#allocation14 + $0x728] sm:$0xff] }
 0x52f   :  { %7564 = vmatprep.mubr.f32.mxu1 %v19245_v5  ;;  %14194 = vmatprep.subr.bf16.mxu0 %v17391_v62  ;;  %v5801_v62 = vld [vmem:[#allocation14 + $0x600] sm:$0xff]  ;;  %v5846_v54 = vld [vmem:[#allocation14 + $0x768] sm:$0xff]  ;;  %v17542_v63 = vcombine.low %v5834_v46, %v5838_v47 }
 0x530   :  { %14450 = vmatprep.subr.bf16.mxu1 %v17519_v8  ;;  %v5806_v8 = vld [vmem:[#allocation14 + $0x628] sm:$0xff]  ;;  %v17406_v39 = vcombine.low %v5801_v62, %v5805_v2 }
 0x531   :  { %14196 = vmatpush1.bf16.msra.mxu0 %v17392_v23  ;;  %v17405_v23 = vcombine.high %v5801_v62, %v5805_v2  ;;  %v17534_v16 = vcombine.low %v5802_v4, %v5806_v8  ;;  %v5850_v62 = vld [vmem:[#allocation14 + $0x788] sm:$0xff] }
 0x532   :  { %14452 = vmatpush1.bf16.msra.mxu1 %v17520_v7  ;;  %14198 = vmatprep.subr.bf16.mxu0 %v17393_v11  ;;  %v17533_v7 = vcombine.high %v5802_v4, %v5806_v8  ;;  %v5809_v11 = vld [vmem:[#allocation14 + $0x640] sm:$0xff]  ;;  %v5854_v2 = vld [vmem:[#allocation14 + $0x7a8] sm:$0xff]  ;;  %v5514_v8 = vrot.slane %v19218_v9, %v19134_v60 }
 0x533   :  { %14454 = vmatprep.subr.bf16.mxu1 %v17521_v12  ;;  %v5813_v12 = vld [vmem:[#allocation14 + $0x660] sm:$0xff]  ;;  %v17546_v9 = vcombine.low %v5850_v62, %v5854_v2 }
 0x534   :  { %v17408_v28 = vcombine.low %v5809_v11, %v5813_v12 }
 0x535   :  { %14200 = vmatpush1.bf16.msra.mxu0 %v17394_v18  ;;  %v17407_v18 = vcombine.high %v5809_v11, %v5813_v12  ;;  %v5861_v11 = vld [vmem:[#allocation14 + $0x7e0] sm:$0xff]  ;;  %v5858_v12 = vld [vmem:[#allocation14 + $0x7c8] sm:$0xff] }
 0x536   :  { %14456 = vmatpush1.bf16.msra.mxu1 %v17522_v19  ;;  %14202 = vmatprep.subr.bf16.mxu0 %v17395_v20  ;;  %v17535_v19 = vcombine.high %v5810_v14, %v5814_v15  ;;  %v5817_v20 = vld [vmem:[#allocation14 + $0x680] sm:$0xff]  ;;  %v5862_v14 = vld [vmem:[#allocation14 + $0x7e8] sm:$0xff]  ;;  %v5564_v15 = vrot.slane %v19222_v30, %v19134_v60 }
 0x537   :  { %14458 = vmatprep.subr.bf16.mxu1 %v17523_v24  ;;  %v5821_v24 = vld [vmem:[#allocation14 + $0x6a0] sm:$0xff]  ;;  %v17548_v30 = vcombine.low %v5858_v12, %v5862_v14 }
 0x538   :  { %v17410_v42 = vcombine.low %v5817_v20, %v5821_v24 }
 0x539   :  { %14204 = vmatpush1.bf16.msra.mxu0 %v17396_v22  ;;  %v17409_v22 = vcombine.high %v5817_v20, %v5821_v24  ;;  %v5865_v20 = vld [vmem:[#allocation14 + $0x800] sm:$0xff] }
 0x53a   :  { %14460 = vmatpush1.bf16.msra.mxu1 %v17524_v35  ;;  %14206 = vmatprep.subr.bf16.mxu0 %v17397_v37  ;;  %v17537_v35 = vcombine.high %v5818_v26, %v5822_v27  ;;  %v5825_v37 = vld [vmem:[#allocation14 + $0x6c0] sm:$0xff]  ;;  %v5866_v26 = vld [vmem:[#allocation14 + $0x808] sm:$0xff] }
 0x53b   :  { %14462 = vmatprep.subr.bf16.mxu1 %v17525_v38  ;;  %v5829_v38 = vld [vmem:[#allocation14 + $0x6e0] sm:$0xff]  ;;  %v5870_v27 = vld [vmem:[#allocation14 + $0x828] sm:$0xff] }
 0x53c   :  { %v17412_v48 = vcombine.low %v5825_v37, %v5829_v38  ;;  %v5869_v24 = vld [vmem:[#allocation14 + $0x820] sm:$0xff] }
 0x53d   :  { %14208 = vmatpush1.bf16.msra.mxu0 %v17398_v43  ;;  %v17411_v43 = vcombine.high %v5825_v37, %v5829_v38  ;;  %v5877_v37 = vld [vmem:[#allocation14 + $0x860] sm:$0xff]  ;;  %v5874_v38 = vld [vmem:[#allocation14 + $0x848] sm:$0xff] }
 0x53e   :  { %14464 = vmatpush1.bf16.msra.mxu1 %v17526_v61  ;;  %14210 = vmatprep.subr.bf16.mxu0 %v17399_v44  ;;  %v17539_v61 = vcombine.high %v5826_v40, %v5830_v49  ;;  %v5833_v44 = vld [vmem:[#allocation14 + $0x700] sm:$0xff]  ;;  %v5878_v40 = vld [vmem:[#allocation14 + $0x868] sm:$0xff]  ;;  %v17422_v49 = vcombine.low %v5865_v20, %v5869_v24 }
 0x53f   :  { %14466 = vmatprep.subr.bf16.mxu1 %v17527_v45  ;;  %v5837_v45 = vld [vmem:[#allocation14 + $0x720] sm:$0xff] }
 0x540   :  { %v17414_v59 = vcombine.low %v5833_v44, %v5837_v45 }
 0x541   :  { %14212 = vmatpush1.bf16.msra.mxu0 %v17400_v51  ;;  %v17413_v51 = vcombine.high %v5833_v44, %v5837_v45  ;;  %v5881_v44 = vld [vmem:[#allocation14 + $0x880] sm:$0xff] }
 0x542   :  { %14468 = vmatpush1.bf16.msra.mxu1 %v17528_v52  ;;  %14214 = vmatprep.subr.bf16.mxu0 %v17401_v34  ;;  %v17541_v52 = vcombine.high %v5834_v46, %v5838_v47  ;;  %v5841_v34 = vld [vmem:[#allocation14 + $0x740] sm:$0xff]  ;;  %v5882_v46 = vld [vmem:[#allocation14 + $0x888] sm:$0xff] }
 0x543   :  { %14470 = vmatprep.subr.bf16.mxu1 %v17529_v58  ;;  %v5845_v58 = vld [vmem:[#allocation14 + $0x760] sm:$0xff]  ;;  %v5886_v47 = vld [vmem:[#allocation14 + $0x8a8] sm:$0xff] }
 0x544   :  { %v17416_v4 = vcombine.low %v5841_v34, %v5845_v58  ;;  %v5885_v45 = vld [vmem:[#allocation14 + $0x8a0] sm:$0xff] }
 0x545   :  { %14216 = vmatpush1.bf16.msra.mxu0 %v17402_v13  ;;  %v17415_v13 = vcombine.high %v5841_v34, %v5845_v58  ;;  %v5889_v34 = vld [vmem:[#allocation14 + $0x8c0] sm:$0xff] }
 0x546   :  { %14472 = vmatpush1.bf16.msra.mxu1 %v17530_v41  ;;  %14218 = vmatprep.subr.bf16.mxu0 %v17403_v0  ;;  %v17543_v41 = vcombine.high %v5842_v53, %v5846_v54  ;;  %v5849_v0 = vld [vmem:[#allocation14 + $0x780] sm:$0xff] }
 0x547   :  { %14474 = vmatprep.subr.bf16.mxu1 %v17531_v1  ;;  %v5853_v1 = vld [vmem:[#allocation14 + $0x7a0] sm:$0xff] }
 0x548   :  { %v5893_v58 = vld [vmem:[#allocation14 + $0x8e0] sm:$0xff] }
 0x549   :  { %14220 = vmatpush1.bf16.msra.mxu0 %v17404_v33  ;;  %v17544_v33 = vcombine.low %v5842_v53, %v5846_v54  ;;  %v5890_v53 = vld [vmem:[#allocation14 + $0x8c8] sm:$0xff] }
 0x54a   :  { %14476 = vmatpush1.bf16.msra.mxu1 %v17532_v3  ;;  %14222 = vmatprep.subr.bf16.mxu0 %v17405_v23  ;;  %v17417_v3 = vcombine.high %v5849_v0, %v5853_v1  ;;  %v17545_v23 = vcombine.high %v5850_v62, %v5854_v2  ;;  %v5894_v54 = vld [vmem:[#allocation14 + $0x8e8] sm:$0xff] }
 0x54b   :  { %14478 = vmatprep.subr.bf16.mxu1 %v17533_v7  ;;  %v5857_v7 = vld [vmem:[#allocation14 + $0x7c0] sm:$0xff]  ;;  %v5898_v62 = vld [vmem:[#allocation14 + $0x908] sm:$0xff] }
 0x54c   :  { %v5902_v2 = vld [vmem:[#allocation14 + $0x928] sm:$0xff] }
 0x54d   :  { %14224 = vmatpush1.bf16.msra.mxu0 %v17406_v39  ;;  %v17418_v39 = vcombine.low %v5849_v0, %v5853_v1  ;;  %v5897_v0 = vld [vmem:[#allocation14 + $0x900] sm:$0xff] }
 0x54e   :  { %14480 = vmatpush1.bf16.msra.mxu1 %v17534_v16  ;;  %14226 = vmatprep.subr.bf16.mxu0 %v17407_v18  ;;  %v5545_v16 = vmul.f32 %v5514_v8, %v19212_v17  ;;  %v17419_v18 = vcombine.high %v5857_v7, %v5861_v11  ;;  %v5873_v17 = vld [vmem:[#allocation14 + $0x840] sm:$0xff]  ;;  %v17556_v8 = vcombine.low %v5890_v53, %v5894_v54 }
 0x54f   :  { %14482 = vmatprep.subr.bf16.mxu1 %v17535_v19  ;;  %v17547_v19 = vcombine.high %v5858_v12, %v5862_v14  ;;  %v5901_v1 = vld [vmem:[#allocation14 + $0x920] sm:$0xff]  ;;  %v5910_v12 = vld [vmem:[#allocation14 + $0x968] sm:$0xff] }
 0x550   :  { %v17430_v14 = vcombine.low %v5897_v0, %v5901_v1 }
 0x551   :  { %14228 = vmatpush1.bf16.msra.mxu0 %v17408_v28  ;;  %v17420_v28 = vcombine.low %v5857_v7, %v5861_v11  ;;  %v5909_v7 = vld [vmem:[#allocation14 + $0x960] sm:$0xff]  ;;  %v5906_v11 = vld [vmem:[#allocation14 + $0x948] sm:$0xff] }
 0x552   :  { %14484 = vmatpush1.bf16.msra.mxu1 %v17536_v31  ;;  %14230 = vmatprep.subr.bf16.mxu0 %v17409_v22  ;;  %v5595_v31 = vadd.f32 %v5564_v15, %v5545_v16  ;;  %v17421_v22 = vcombine.high %v5865_v20, %v5869_v24  ;;  %v17558_v15 = vcombine.low %v5898_v62, %v5902_v2  ;;  %v5918_v20 = vld [vmem:[#allocation14 + $0x9a8] sm:$0xff] }
 0x553   :  { %14486 = vmatprep.subr.bf16.mxu1 %v17537_v35  ;;  %v17549_v35 = vcombine.high %v5866_v26, %v5870_v27  ;;  %v17559_v16 = vcombine.high %v5906_v11, %v5910_v12 }
 0x555   :  { %14232 = vmatpush1.bf16.msra.mxu0 %v17410_v42  ;;  %v19256_v42 = vmax.f32 %v5595_v31, 0.0  ;;  %v5921_v31 = vld [vmem:[#allocation14 + $0x9c0] sm:$0xff] }
 0x556   :  { %14488 = vmatpush1.bf16.msra.mxu1 %v17538_v10  ;;  %14234 = vmatprep.subr.bf16.mxu0 %v17411_v43  ;;  %v17550_v10 = vcombine.low %v5866_v26, %v5870_v27  ;;  %v17423_v43 = vcombine.high %v5873_v17, %v5877_v37  ;;  %v17560_v26 = vcombine.low %v5906_v11, %v5910_v12 }
 0x557   :  { %14490 = vmatprep.subr.bf16.mxu1 %v17539_v61  ;;  %v17551_v61 = vcombine.high %v5874_v38, %v5878_v40 }
 0x559   :  { %14236 = vmatpush1.bf16.msra.mxu0 %v17412_v48  ;;  %v17424_v48 = vcombine.low %v5873_v17, %v5877_v37 }
 0x55a   :  { %14492 = vmatpush1.bf16.msra.mxu1 %v17540_v50  ;;  %14238 = vmatprep.subr.bf16.mxu0 %v17413_v51  ;;  %v17552_v50 = vcombine.low %v5874_v38, %v5878_v40  ;;  %v17425_v51 = vcombine.high %v5881_v44, %v5885_v45 }
 0x55b   :  { %14494 = vmatprep.subr.bf16.mxu1 %v17541_v52  ;;  %v17553_v52 = vcombine.high %v5882_v46, %v5886_v47 }
 0x55d   :  { %14240 = vmatpush1.bf16.msra.mxu0 %v17414_v59  ;;  %v17426_v59 = vcombine.low %v5881_v44, %v5885_v45 }
 0x55e   :  { %14496 = vmatpush1.bf16.msra.mxu1 %v17542_v63  ;;  %14242 = vmatprep.subr.bf16.mxu0 %v17415_v13  ;;  %v17554_v63 = vcombine.low %v5882_v46, %v5886_v47  ;;  %v17427_v13 = vcombine.high %v5889_v34, %v5893_v58 }
 0x55f   :  { %14498 = vmatprep.subr.bf16.mxu1 %v17543_v41  ;;  %v17555_v41 = vcombine.high %v5890_v53, %v5894_v54 }
 0x561   :  { %14244 = vmatpush1.bf16.msra.mxu0 %v17416_v4  ;;  %v17428_v4 = vcombine.low %v5889_v34, %v5893_v58 }
 0x562   :  { %14500 = vmatpush1.bf16.msra.mxu1 %v17544_v33  ;;  %14246 = vmatprep.subr.bf16.mxu0 %v17417_v3  ;;  %v17429_v33 = vcombine.high %v5897_v0, %v5901_v1  ;;  %v17557_v3 = vcombine.high %v5898_v62, %v5902_v2 }
 0x563   :  { %14502 = vmatprep.subr.bf16.mxu1 %v17545_v23  ;;  %v5905_v23 = vld [vmem:[#allocation14 + $0x940] sm:$0xff] }
 0x564   :  { %v17432_v24 = vcombine.low %v5905_v23, %v5909_v7 }
 0x565   :  { %14248 = vmatpush1.bf16.msra.mxu0 %v17418_v39  ;;  %v17431_v39 = vcombine.high %v5905_v23, %v5909_v7 }
 0x566   :  { %14504 = vmatpush1.bf16.msra.mxu1 %v17546_v9  ;;  %14250 = vmatprep.subr.bf16.mxu0 %v17419_v18  ;;  %v5913_v9 = vld [vmem:[#allocation14 + $0x980] sm:$0xff] }
 0x567   :  { %14506 = vmatprep.subr.bf16.mxu1 %v17547_v19  ;;  %v5917_v18 = vld [vmem:[#allocation14 + $0x9a0] sm:$0xff]  ;;  %v5914_v19 = vld [vmem:[#allocation14 + $0x988] sm:$0xff] }
 0x568   :  { %v17433_v27 = vcombine.high %v5913_v9, %v5917_v18  ;;  %v17434_v17 = vcombine.low %v5913_v9, %v5917_v18  ;;  %v17562_v37 = vcombine.low %v5914_v19, %v5918_v20 }
 0x569   :  { %14252 = vmatpush1.bf16.msra.mxu0 %v17420_v28  ;;  %v17561_v28 = vcombine.high %v5914_v19, %v5918_v20 }
 0x56a   :  { %14508 = vmatpush1.bf16.msra.mxu1 %v17548_v30  ;;  %14254 = vmatprep.subr.bf16.mxu0 %v17421_v22  ;;  %v5925_v30 = vld [vmem:[#allocation14 + $0x9e0] sm:$0xff]  ;;  %v5922_v22 = vld [vmem:[#allocation14 + $0x9c8] sm:$0xff] }
 0x56b   :  { %14510 = vmatprep.subr.bf16.mxu1 %v17549_v35  ;;  %v5926_v35 = vld [vmem:[#allocation14 + $0x9e8] sm:$0xff]  ;;  %v17435_v38 = vcombine.high %v5921_v31, %v5925_v30  ;;  %v17436_v44 = vcombine.low %v5921_v31, %v5925_v30 }
 0x56c   :  { %7281 = vmatmul.mubr.f32.vlgmr.msra.gmra.mrb[8].mxu0 %v19256_v42  ;;  %v17563_v40 = vcombine.high %v5922_v22, %v5926_v35  ;;  %v17564_v45 = vcombine.low %v5922_v22, %v5926_v35 }
 0x56d   :  { %7565 = vmatmul.mubr.f32.vlgmr.msra.gmra.mrb[8].mxu1 %v19256_v42  ;;  %14256 = vmatpush1.bf16.msra.mxu0 %v17422_v49  ;;  %v5929_v49 = vld [vmem:[#allocation14 + $0xa00] sm:$0xff] }
 0x56e   :  { %14512 = vmatpush1.bf16.msra.mxu1 %v17550_v10  ;;  %14258 = vmatprep.subr.bf16.mxu0 %v17423_v43  ;;  %v5933_v10 = vld [vmem:[#allocation14 + $0xa20] sm:$0xff]  ;;  %v5930_v43 = vld [vmem:[#allocation14 + $0xa08] sm:$0xff] }
 0x56f   :  { %14514 = vmatprep.subr.bf16.mxu1 %v17551_v61  ;;  %v5934_v61 = vld [vmem:[#allocation14 + $0xa28] sm:$0xff]  ;;  %v17437_v46 = vcombine.high %v5929_v49, %v5933_v10  ;;  %v17438_v34 = vcombine.low %v5929_v49, %v5933_v10 }
 0x570   :  { %v17565_v47 = vcombine.high %v5930_v43, %v5934_v61  ;;  %v17566_v58 = vcombine.low %v5930_v43, %v5934_v61 }
 0x571   :  { %14260 = vmatpush1.bf16.msra.mxu0 %v17424_v48  ;;  %v5937_v48 = vld [vmem:[#allocation14 + $0xa40] sm:$0xff] }
 0x572   :  { %14516 = vmatpush1.bf16.msra.mxu1 %v17552_v50  ;;  %14262 = vmatprep.subr.bf16.mxu0 %v17425_v51  ;;  %v5941_v50 = vld [vmem:[#allocation14 + $0xa60] sm:$0xff]  ;;  %v5938_v51 = vld [vmem:[#allocation14 + $0xa48] sm:$0xff] }
 0x573   :  { %14518 = vmatprep.subr.bf16.mxu1 %v17553_v52  ;;  %v5942_v52 = vld [vmem:[#allocation14 + $0xa68] sm:$0xff]  ;;  %v17439_v53 = vcombine.high %v5937_v48, %v5941_v50  ;;  %v17440_v0 = vcombine.low %v5937_v48, %v5941_v50 }
 0x574   :  { %v17567_v54 = vcombine.high %v5938_v51, %v5942_v52  ;;  %v17568_v1 = vcombine.low %v5938_v51, %v5942_v52 }
 0x575   :  { %14264 = vmatpush1.bf16.msra.mxu0 %v17426_v59  ;;  %v5945_v59 = vld [vmem:[#allocation14 + $0xa80] sm:$0xff] }
 0x576   :  { %14520 = vmatpush1.bf16.msra.mxu1 %v17554_v63  ;;  %14266 = vmatprep.subr.bf16.mxu0 %v17427_v13  ;;  %v5949_v63 = vld [vmem:[#allocation14 + $0xaa0] sm:$0xff]  ;;  %v5946_v13 = vld [vmem:[#allocation14 + $0xa88] sm:$0xff] }
 0x577   :  { %14522 = vmatprep.subr.bf16.mxu1 %v17555_v41  ;;  %v5950_v41 = vld [vmem:[#allocation14 + $0xaa8] sm:$0xff]  ;;  %v17441_v62 = vcombine.high %v5945_v59, %v5949_v63  ;;  %v17442_v23 = vcombine.low %v5945_v59, %v5949_v63 }
 0x578   :  { %v17569_v2 = vcombine.high %v5946_v13, %v5950_v41  ;;  %v17570_v7 = vcombine.low %v5946_v13, %v5950_v41 }
 0x579   :  { %14268 = vmatpush1.bf16.msra.mxu0 %v17428_v4  ;;  %v5953_v4 = vld [vmem:[#allocation14 + $0xac0] sm:$0xff] }
 0x57a   :  { %14524 = vmatpush1.bf16.msra.mxu1 %v17556_v8  ;;  %14270 = vmatprep.subr.bf16.mxu0 %v17429_v33  ;;  %v5957_v8 = vld [vmem:[#allocation14 + $0xae0] sm:$0xff]  ;;  %v5954_v33 = vld [vmem:[#allocation14 + $0xac8] sm:$0xff] }
 0x57b   :  { %14526 = vmatprep.subr.bf16.mxu1 %v17557_v3  ;;  %v5958_v3 = vld [vmem:[#allocation14 + $0xae8] sm:$0xff]  ;;  %v17443_v11 = vcombine.high %v5953_v4, %v5957_v8  ;;  %v17444_v9 = vcombine.low %v5953_v4, %v5957_v8 }
 0x57c   :  { %v17571_v12 = vcombine.high %v5954_v33, %v5958_v3  ;;  %v17572_v18 = vcombine.low %v5954_v33, %v5958_v3 }
 0x57d   :  { %14272 = vmatpush1.bf16.msra.mxu0 %v17430_v14  ;;  %v5961_v14 = vld [vmem:[#allocation14 + $0xb00] sm:$0xff] }
 0x57e   :  { %14528 = vmatpush1.bf16.msra.mxu1 %v17558_v15  ;;  %14274 = vmatprep.subr.bf16.mxu0 %v17431_v39  ;;  %v5965_v15 = vld [vmem:[#allocation14 + $0xb20] sm:$0xff]  ;;  %v5962_v39 = vld [vmem:[#allocation14 + $0xb08] sm:$0xff] }
 0x57f   :  { %14530 = vmatprep.subr.bf16.mxu1 %v17559_v16  ;;  %v5966_v16 = vld [vmem:[#allocation14 + $0xb28] sm:$0xff]  ;;  %v17445_v19 = vcombine.high %v5961_v14, %v5965_v15  ;;  %v17446_v31 = vcombine.low %v5961_v14, %v5965_v15 }
 0x580   :  { %v17573_v20 = vcombine.high %v5962_v39, %v5966_v16  ;;  %v17574_v30 = vcombine.low %v5962_v39, %v5966_v16 }
 0x581   :  { %14276 = vmatpush1.bf16.msra.mxu0 %v17432_v24  ;;  %v5969_v24 = vld [vmem:[#allocation14 + $0xb40] sm:$0xff] }
 0x582   :  { %14532 = vmatpush1.bf16.msra.mxu1 %v17560_v26  ;;  %14278 = vmatprep.subr.bf16.mxu0 %v17433_v27  ;;  %v5973_v26 = vld [vmem:[#allocation14 + $0xb60] sm:$0xff]  ;;  %v5970_v27 = vld [vmem:[#allocation14 + $0xb48] sm:$0xff] }
 0x583   :  { %14534 = vmatprep.subr.bf16.mxu1 %v17561_v28  ;;  %v5974_v28 = vld [vmem:[#allocation14 + $0xb68] sm:$0xff]  ;;  %v17447_v22 = vcombine.high %v5969_v24, %v5973_v26  ;;  %v17448_v49 = vcombine.low %v5969_v24, %v5973_v26 }
 0x584   :  { %v17575_v35 = vcombine.high %v5970_v27, %v5974_v28  ;;  %v17576_v10 = vcombine.low %v5970_v27, %v5974_v28  ;;  %v6002_v24 = vld [vmem:[#allocation14 + $0xc48] sm:$0xff] }
 0x585   :  { %14280 = vmatpush1.bf16.msra.mxu0 %v17434_v17  ;;  %v5977_v17 = vld [vmem:[#allocation14 + $0xb80] sm:$0xff]  ;;  %v6006_v26 = vld [vmem:[#allocation14 + $0xc68] sm:$0xff] }
 0x586   :  { %14536 = vmatpush1.bf16.msra.mxu1 %v17562_v37  ;;  %14282 = vmatprep.subr.bf16.mxu0 %v17435_v38  ;;  %v5981_v37 = vld [vmem:[#allocation14 + $0xba0] sm:$0xff]  ;;  %v5978_v38 = vld [vmem:[#allocation14 + $0xb88] sm:$0xff] }
 0x587   :  { %14538 = vmatprep.subr.bf16.mxu1 %v17563_v40  ;;  %v5982_v40 = vld [vmem:[#allocation14 + $0xba8] sm:$0xff]  ;;  %v17449_v43 = vcombine.high %v5977_v17, %v5981_v37  ;;  %v17450_v48 = vcombine.low %v5977_v17, %v5981_v37  ;;  %v17583_v17 = vcombine.high %v6002_v24, %v6006_v26  ;;  %v6013_v37 = vld [vmem:[#allocation14 + $0xca0] sm:$0xff] }
 0x588   :  { %v17577_v61 = vcombine.high %v5978_v38, %v5982_v40  ;;  %v17578_v50 = vcombine.low %v5978_v38, %v5982_v40  ;;  %v6010_v38 = vld [vmem:[#allocation14 + $0xc88] sm:$0xff] }
 0x589   :  { %14284 = vmatpush1.bf16.msra.mxu0 %v17436_v44  ;;  %v5985_v44 = vld [vmem:[#allocation14 + $0xbc0] sm:$0xff]  ;;  %v6014_v40 = vld [vmem:[#allocation14 + $0xca8] sm:$0xff] }
 0x58a   :  { %14540 = vmatpush1.bf16.msra.mxu1 %v17564_v45  ;;  %14286 = vmatprep.subr.bf16.mxu0 %v17437_v46  ;;  %v5989_v45 = vld [vmem:[#allocation14 + $0xbe0] sm:$0xff]  ;;  %v5986_v46 = vld [vmem:[#allocation14 + $0xbc8] sm:$0xff] }
 0x58b   :  { %14542 = vmatprep.subr.bf16.mxu1 %v17565_v47  ;;  %v5990_v47 = vld [vmem:[#allocation14 + $0xbe8] sm:$0xff]  ;;  %v17451_v51 = vcombine.high %v5985_v44, %v5989_v45  ;;  %v17452_v59 = vcombine.low %v5985_v44, %v5989_v45  ;;  %v17585_v44 = vcombine.high %v6010_v38, %v6014_v40  ;;  %v6017_v45 = vld [vmem:[#allocation14 + $0xcc0] sm:$0xff] }
 0x58c   :  { %v17579_v52 = vcombine.high %v5986_v46, %v5990_v47  ;;  %v17580_v63 = vcombine.low %v5986_v46, %v5990_v47  ;;  %v6021_v46 = vld [vmem:[#allocation14 + $0xce0] sm:$0xff]  ;;  %v6018_v47 = vld [vmem:[#allocation14 + $0xcc8] sm:$0xff] }
 0x58d   :  { %14288 = vmatpush1.bf16.msra.mxu0 %v17438_v34  ;;  %v5993_v34 = vld [vmem:[#allocation14 + $0xc00] sm:$0xff] }
 0x58e   :  { %14544 = vmatpush1.bf16.msra.mxu1 %v17566_v58  ;;  %14290 = vmatprep.subr.bf16.mxu0 %v17439_v53  ;;  %v5997_v58 = vld [vmem:[#allocation14 + $0xc20] sm:$0xff]  ;;  %v5994_v53 = vld [vmem:[#allocation14 + $0xc08] sm:$0xff] }
 0x58f   :  { %14546 = vmatprep.subr.bf16.mxu1 %v17567_v54  ;;  %v5998_v54 = vld [vmem:[#allocation14 + $0xc28] sm:$0xff]  ;;  %v17453_v13 = vcombine.high %v5993_v34, %v5997_v58  ;;  %v17454_v28 = vcombine.low %v5993_v34, %v5997_v58  ;;  %v6025_v58 = vld [vmem:[#allocation14 + $0xd00] sm:$0xff] }
 0x590   :  { %v17581_v41 = vcombine.high %v5994_v53, %v5998_v54 }
 0x591   :  { %14292 = vmatpush1.bf16.msra.mxu0 %v17440_v0  ;;  %v19260_v0 = vld [vmem:[#allocation11] sm:$0xff] }
 0x592   :  { %14548 = vmatpush1.bf16.msra.mxu1 %v17568_v1  ;;  %14294 = vmatprep.subr.bf16.mxu0 %v17441_v62  ;;  %v5522_v1 = vrot.slane %v19260_v0, %v19146_v55  ;;  %v5526_v62 = vrot.slane %v19260_v0, %v19149_v56  ;;  %v5534_v8 = vrot.slane %v19260_v0, %v19152_v57 }
 0x593   :  { %14550 = vmatprep.subr.bf16.mxu1 %v17569_v2  ;;  %v19266_v2 = vld [vmem:[#allocation13] sm:$0xff] }
 0x594   :  { %v5572_v4 = vrot.slane %v19266_v2, %v19146_v55  ;;  %v5576_v3 = vrot.slane %v19266_v2, %v19149_v56 }
 0x595   :  { %14296 = vmatpush1.bf16.msra.mxu0 %v17442_v23 }
 0x596   :  { %14552 = vmatpush1.bf16.msra.mxu1 %v17570_v7  ;;  %14298 = vmatprep.subr.bf16.mxu0 %v17443_v11 }
 0x597   :  { %14554 = vmatprep.subr.bf16.mxu1 %v17571_v12  ;;  %v5584_v12 = vrot.slane %v19266_v2, %v19152_v57 }
 0x599   :  { %14300 = vmatpush1.bf16.msra.mxu0 %v17444_v9 }
 0x59a   :  { %14556 = vmatpush1.bf16.msra.mxu1 %v17572_v18  ;;  %14302 = vmatprep.subr.bf16.mxu0 %v17445_v19  ;;  %v6001_v18 = vld [vmem:[#allocation14 + $0xc40] sm:$0xff] }
 0x59b   :  { %14558 = vmatprep.subr.bf16.mxu1 %v17573_v20  ;;  %v6005_v20 = vld [vmem:[#allocation14 + $0xc60] sm:$0xff] }
 0x59d   :  { %14304 = vmatpush1.bf16.msra.mxu0 %v17446_v31  ;;  %v17582_v31 = vcombine.low %v5994_v53, %v5998_v54  ;;  %v6029_v53 = vld [vmem:[#allocation14 + $0xd20] sm:$0xff]  ;;  %v6026_v54 = vld [vmem:[#allocation14 + $0xd08] sm:$0xff] }
 0x59e   :  { %14560 = vmatpush1.bf16.msra.mxu1 %v17574_v30  ;;  %14306 = vmatprep.subr.bf16.mxu0 %v17447_v22  ;;  %v6009_v22 = vld [vmem:[#allocation14 + $0xc80] sm:$0xff] }
 0x59f   :  { %14562 = vmatprep.subr.bf16.mxu1 %v17575_v35  ;;  %v17455_v35 = vcombine.high %v6001_v18, %v6005_v20 }
 0x5a1   :  { %14308 = vmatpush1.bf16.msra.mxu0 %v17448_v49 }
 0x5a2   :  { %14564 = vmatpush1.bf16.msra.mxu1 %v17576_v10  ;;  %14310 = vmatprep.subr.bf16.mxu0 %v17449_v43  ;;  %v17456_v10 = vcombine.low %v6001_v18, %v6005_v20  ;;  %v17584_v43 = vcombine.low %v6002_v24, %v6006_v26  ;;  %v6049_v24 = vld [vmem:[#allocation14 + $0xdc0] sm:$0xff] }
 0x5a3   :  { %14566 = vmatprep.subr.bf16.mxu1 %v17577_v61  ;;  %v17457_v61 = vcombine.high %v6009_v22, %v6013_v37  ;;  %v6053_v26 = vld [vmem:[#allocation14 + $0xde0] sm:$0xff] }
 0x5a5   :  { %14312 = vmatpush1.bf16.msra.mxu0 %v17450_v48  ;;  %v6022_v48 = vld [vmem:[#allocation14 + $0xce8] sm:$0xff] }
 0x5a6   :  { %14568 = vmatpush1.bf16.msra.mxu1 %v17578_v50  ;;  %14314 = vmatprep.subr.bf16.mxu0 %v17451_v51  ;;  %v17458_v50 = vcombine.low %v6009_v22, %v6013_v37  ;;  %v17586_v51 = vcombine.low %v6010_v38, %v6014_v40  ;;  %v17587_v34 = vcombine.high %v6018_v47, %v6022_v48  ;;  %v6057_v38 = vld [vmem:[#allocation14 + $0xe00] sm:$0xff] }
 0x5a7   :  { %14570 = vmatprep.subr.bf16.mxu1 %v17579_v52  ;;  %v17459_v52 = vcombine.high %v6017_v45, %v6021_v46  ;;  %v6061_v40 = vld [vmem:[#allocation14 + $0xe20] sm:$0xff] }
 0x5a9   :  { %14316 = vmatpush1.bf16.msra.mxu0 %v17452_v59  ;;  %v6030_v59 = vld [vmem:[#allocation14 + $0xd28] sm:$0xff] }
 0x5aa   :  { %14572 = vmatpush1.bf16.msra.mxu1 %v17580_v63  ;;  %14318 = vmatprep.subr.bf16.mxu0 %v17453_v13  ;;  %v17460_v63 = vcombine.low %v6017_v45, %v6021_v46  ;;  %v17588_v13 = vcombine.low %v6018_v47, %v6022_v48  ;;  %v17469_v45 = vcombine.high %v6057_v38, %v6061_v40  ;;  %v6065_v47 = vld [vmem:[#allocation14 + $0xe40] sm:$0xff] }
 0x5ab   :  { %14574 = vmatprep.subr.bf16.mxu1 %v17581_v41  ;;  %v17461_v41 = vcombine.high %v6025_v58, %v6029_v53  ;;  %v6069_v48 = vld [vmem:[#allocation14 + $0xe60] sm:$0xff] }
 0x5bf   :  { %v5212_v33 = vpop.f32.mrb[6].mxu0 }
 0x5c0   :  { %v5547_v23 = vmul.f32 %v5522_v1, %v5212_v33  ;;  %v19274_v7 = vpop.f32.mrb[6].mxu1  ;;  %v5214_v11 = vpop.f32.mrb[7].mxu0  ;;  %v17589_v1 = vcombine.high %v6026_v54, %v6030_v59  ;;  %v6038_v33 = vld [vmem:[#allocation14 + $0xd68] sm:$0xff] }
 0x5c1   :  { %v5548_v14 = vmul.f32 %v5526_v62, %v5214_v11  ;;  %v5498_v15 = vpop.f32.mrb[7].mxu1  ;;  %v6033_v62 = vld [vmem:[#allocation14 + $0xd40] sm:$0xff] }
 0x5c2   :  { %v5597_v39 = vadd.f32 %v5572_v4, %v5547_v23  ;;  %v5550_v16 = vmul.f32 %v5534_v8, %v5498_v15  ;;  %v6037_v4 = vld [vmem:[#allocation14 + $0xd60] sm:$0xff]  ;;  %v6034_v8 = vld [vmem:[#allocation14 + $0xd48] sm:$0xff]  ;;  %v17590_v23 = vcombine.low %v6026_v54, %v6030_v59 }
 0x5c3   :  { %v5598_v9 = vadd.f32 %v5576_v3, %v5548_v14  ;;  %v17462_v3 = vcombine.low %v6025_v58, %v6029_v53  ;;  %v17463_v11 = vcombine.high %v6033_v62, %v6037_v4  ;;  %v6041_v14 = vld [vmem:[#allocation14 + $0xd80] sm:$0xff]  ;;  %v17592_v18 = vcombine.low %v6034_v8, %v6038_v33 }
 0x5c4   :  { %v5600_v19 = vadd.f32 %v5584_v12, %v5550_v16  ;;  %v19280_v30 = vmax.f32 %v5597_v39, 0.0  ;;  %v17591_v12 = vcombine.high %v6034_v8, %v6038_v33  ;;  %v6045_v15 = vld [vmem:[#allocation14 + $0xda0] sm:$0xff]  ;;  %v6042_v39 = vld [vmem:[#allocation14 + $0xd88] sm:$0xff]  ;;  %v17471_v58 = vcombine.high %v6065_v47, %v6069_v48 }
 0x5c5   :  { %v19278_v27 = vmax.f32 %v5598_v9, 0.0  ;;  %v6046_v16 = vld [vmem:[#allocation14 + $0xda8] sm:$0xff]  ;;  %v17464_v9 = vcombine.low %v6033_v62, %v6037_v4  ;;  %v17466_v22 = vcombine.low %v6041_v14, %v6045_v15  ;;  %v6073_v54 = vld [vmem:[#allocation14 + $0xe80] sm:$0xff] }
 0x5c6   :  { %v19284_v49 = vmax.f32 %v5600_v19, 0.0  ;;  %v17465_v19 = vcombine.high %v6041_v14, %v6045_v15  ;;  %v17593_v20 = vcombine.high %v6042_v39, %v6046_v16  ;;  %v6077_v59 = vld [vmem:[#allocation14 + $0xea0] sm:$0xff] }
 0x5c7   :  { %7351 = vmatprep.mubr.f32.mxu0 %v19278_v27  ;;  %7635 = vmatprep.mubr.f32.mxu1 %v19278_v27  ;;  %v17473_v62 = vcombine.high %v6073_v54, %v6077_v59  ;;  %v6081_v8 = vld [vmem:[#allocation14 + $0xec0] sm:$0xff] }
 0x5c8   :  { %7352 = vmatmul.mubr.f32.vlgmr.msra.gmra.mrb[8].mxu0 %v19280_v30  ;;  %7636 = vmatmul.mubr.f32.vlgmr.msra.gmra.mrb[8].mxu1 %v19280_v30  ;;  %v6085_v33 = vld [vmem:[#allocation14 + $0xee0] sm:$0xff] }
 0x5c9   :  { %14320 = vmatpush1.bf16.msra.mxu0 %v17454_v28  ;;  %14576 = vmatpush1.bf16.msra.mxu1 %v17582_v31  ;;  %v6050_v28 = vld [vmem:[#allocation14 + $0xdc8] sm:$0xff]  ;;  %v17475_v14 = vcombine.high %v6081_v8, %v6085_v33 }
 0x5ca   :  { %7422 = vmatprep.mubr.f32.mxu0 %v19284_v49  ;;  %7706 = vmatprep.mubr.f32.mxu1 %v19284_v49  ;;  %v6054_v31 = vld [vmem:[#allocation14 + $0xde8] sm:$0xff] }
 0x5cb   :  { %14322 = vmatprep.subr.bf16.mxu0 %v17455_v35  ;;  %14578 = vmatprep.subr.bf16.mxu1 %v17583_v17  ;;  %v17594_v35 = vcombine.low %v6042_v39, %v6046_v16  ;;  %v17467_v17 = vcombine.high %v6049_v24, %v6053_v26  ;;  %v17595_v37 = vcombine.high %v6050_v28, %v6054_v31  ;;  %v6089_v39 = vld [vmem:[#allocation14 + $0xf00] sm:$0xff] }
 0x5cc   :  { %v6093_v16 = vld [vmem:[#allocation14 + $0xf20] sm:$0xff] }
 0x5cd   :  { %14324 = vmatpush1.bf16.msra.mxu0 %v17456_v10  ;;  %14580 = vmatpush1.bf16.msra.mxu1 %v17584_v43  ;;  %v6058_v10 = vld [vmem:[#allocation14 + $0xe08] sm:$0xff] }
 0x5ce   :  { %14326 = vmatprep.subr.bf16.mxu0 %v17457_v61  ;;  %14582 = vmatprep.subr.bf16.mxu1 %v17585_v44  ;;  %v6062_v43 = vld [vmem:[#allocation14 + $0xe28] sm:$0xff]  ;;  %v17468_v61 = vcombine.low %v6049_v24, %v6053_v26  ;;  %v17596_v44 = vcombine.low %v6050_v28, %v6054_v31  ;;  %v17477_v24 = vcombine.high %v6089_v39, %v6093_v16  ;;  %v6097_v28 = vld [vmem:[#allocation14 + $0xf40] sm:$0xff] }
 0x5cf   :  { %v17597_v46 = vcombine.high %v6058_v10, %v6062_v43  ;;  %v6101_v31 = vld [vmem:[#allocation14 + $0xf60] sm:$0xff] }
 0x5d1   :  { %14328 = vmatpush1.bf16.msra.mxu0 %v17458_v50  ;;  %14584 = vmatpush1.bf16.msra.mxu1 %v17586_v51  ;;  %v6066_v50 = vld [vmem:[#allocation14 + $0xe48] sm:$0xff] }
 0x5d2   :  { %14330 = vmatprep.subr.bf16.mxu0 %v17459_v52  ;;  %14586 = vmatprep.subr.bf16.mxu1 %v17587_v34  ;;  %v6070_v51 = vld [vmem:[#allocation14 + $0xe68] sm:$0xff]  ;;  %v17470_v52 = vcombine.low %v6057_v38, %v6061_v40  ;;  %v17598_v34 = vcombine.low %v6058_v10, %v6062_v43  ;;  %v17479_v38 = vcombine.high %v6097_v28, %v6101_v31  ;;  %v6105_v10 = vld [vmem:[#allocation14 + $0xf80] sm:$0xff] }
 0x5d3   :  { %v17599_v53 = vcombine.high %v6066_v50, %v6070_v51  ;;  %v6109_v43 = vld [vmem:[#allocation14 + $0xfa0] sm:$0xff] }
 0x5d5   :  { %14332 = vmatpush1.bf16.msra.mxu0 %v17460_v63  ;;  %14588 = vmatpush1.bf16.msra.mxu1 %v17588_v13  ;;  %v6074_v63 = vld [vmem:[#allocation14 + $0xe88] sm:$0xff] }
 0x5d6   :  { %14334 = vmatprep.subr.bf16.mxu0 %v17461_v41  ;;  %14590 = vmatprep.subr.bf16.mxu1 %v17589_v1  ;;  %v6078_v13 = vld [vmem:[#allocation14 + $0xea8] sm:$0xff]  ;;  %v17472_v41 = vcombine.low %v6065_v47, %v6069_v48  ;;  %v17600_v1 = vcombine.low %v6066_v50, %v6070_v51  ;;  %v5530_v47 = vrot.slane %v19260_v0, %v19185_v32  ;;  %v6113_v51 = vld [vmem:[#allocation14 + $0xfc0] sm:$0xff] }
 0x5d7   :  { %v17601_v4 = vcombine.high %v6074_v63, %v6078_v13  ;;  %v17481_v48 = vcombine.high %v6105_v10, %v6109_v43 }
 0x5d9   :  { %14336 = vmatpush1.bf16.msra.mxu0 %v17462_v3  ;;  %14592 = vmatpush1.bf16.msra.mxu1 %v17590_v23  ;;  %v6082_v3 = vld [vmem:[#allocation14 + $0xec8] sm:$0xff] }
 0x5da   :  { %14338 = vmatprep.subr.bf16.mxu0 %v17463_v11  ;;  %14594 = vmatprep.subr.bf16.mxu1 %v17591_v12  ;;  %v6086_v23 = vld [vmem:[#allocation14 + $0xee8] sm:$0xff]  ;;  %v17474_v11 = vcombine.low %v6073_v54, %v6077_v59  ;;  %v17602_v12 = vcombine.low %v6074_v63, %v6078_v13  ;;  %v17482_v54 = vcombine.low %v6105_v10, %v6109_v43 }
 0x5db   :  { %v17603_v15 = vcombine.high %v6082_v3, %v6086_v23  ;;  %v5549_v63 = vmul.f32 %v5530_v47, %v19274_v7  ;;  %v5620_v7 = vld [vmem:[#allocation14 + $0x58] sm:$0xff] }
 0x5dc   :  { %v5648_v47 = vld [vmem:[#allocation14 + $0x138] sm:$0xff] }
 0x5dd   :  { %14340 = vmatpush1.bf16.msra.mxu0 %v17464_v9  ;;  %14596 = vmatpush1.bf16.msra.mxu1 %v17592_v18  ;;  %v6090_v9 = vld [vmem:[#allocation14 + $0xf08] sm:$0xff] }
 0x5de   :  { %14342 = vmatprep.subr.bf16.mxu0 %v17465_v19  ;;  %14598 = vmatprep.subr.bf16.mxu1 %v17593_v20  ;;  %v6094_v18 = vld [vmem:[#allocation14 + $0xf28] sm:$0xff]  ;;  %v17476_v19 = vcombine.low %v6081_v8, %v6085_v33  ;;  %v17604_v20 = vcombine.low %v6082_v3, %v6086_v23 }
 0x5df   :  { %v17605_v26 = vcombine.high %v6090_v9, %v6094_v18 }
 0x5e1   :  { %14344 = vmatpush1.bf16.msra.mxu0 %v17466_v22  ;;  %14600 = vmatpush1.bf16.msra.mxu1 %v17594_v35  ;;  %v6098_v22 = vld [vmem:[#allocation14 + $0xf48] sm:$0xff] }
 0x5e2   :  { %14346 = vmatprep.subr.bf16.mxu0 %v17467_v17  ;;  %14602 = vmatprep.subr.bf16.mxu1 %v17595_v37  ;;  %v6102_v35 = vld [vmem:[#allocation14 + $0xf68] sm:$0xff]  ;;  %v17478_v17 = vcombine.low %v6089_v39, %v6093_v16  ;;  %v17606_v37 = vcombine.low %v6090_v9, %v6094_v18 }
 0x5e3   :  { %v17607_v40 = vcombine.high %v6098_v22, %v6102_v35 }
 0x5e5   :  { %14348 = vmatpush1.bf16.msra.mxu0 %v17468_v61  ;;  %14604 = vmatpush1.bf16.msra.mxu1 %v17596_v44  ;;  %v6106_v61 = vld [vmem:[#allocation14 + $0xf88] sm:$0xff] }
 0x5e6   :  { %14350 = vmatprep.subr.bf16.mxu0 %v17469_v45  ;;  %14606 = vmatprep.subr.bf16.mxu1 %v17597_v46  ;;  %v6110_v44 = vld [vmem:[#allocation14 + $0xfa8] sm:$0xff]  ;;  %v17480_v45 = vcombine.low %v6097_v28, %v6101_v31  ;;  %v17608_v46 = vcombine.low %v6098_v22, %v6102_v35 }
 0x5e7   :  { %v17609_v50 = vcombine.high %v6106_v61, %v6110_v44  ;;  %v17610_v59 = vcombine.low %v6106_v61, %v6110_v44 }
 0x5e9   :  { %14352 = vmatpush1.bf16.msra.mxu0 %v17470_v52  ;;  %14608 = vmatpush1.bf16.msra.mxu1 %v17598_v34  ;;  %v6117_v52 = vld [vmem:[#allocation14 + $0xfe0] sm:$0xff]  ;;  %v6114_v34 = vld [vmem:[#allocation14 + $0xfc8] sm:$0xff] }
 0x5ea   :  { %14354 = vmatprep.subr.bf16.mxu0 %v17471_v58  ;;  %14610 = vmatprep.subr.bf16.mxu1 %v17599_v53  ;;  %v6118_v58 = vld [vmem:[#allocation14 + $0xfe8] sm:$0xff]  ;;  %v5580_v53 = vrot.slane %v19266_v2, %v19185_v32  ;;  %v17483_v0 = vcombine.high %v6113_v51, %v6117_v52  ;;  %v17484_v8 = vcombine.low %v6113_v51, %v6117_v52 }
 0x5eb   :  { %v17611_v13 = vcombine.high %v6114_v34, %v6118_v58  ;;  %v17612_v33 = vcombine.low %v6114_v34, %v6118_v58  ;;  %v5651_v34 = vld [vmem:[#allocation14 + $0x150] sm:$0xff] }
 0x5ec   :  { %v5599_v3 = vadd.f32 %v5580_v53, %v5549_v63  ;;  %v5655_v58 = vld [vmem:[#allocation14 + $0x170] sm:$0xff]  ;;  %v5652_v53 = vld [vmem:[#allocation14 + $0x158] sm:$0xff] }
 0x5ed   :  { %14356 = vmatpush1.bf16.msra.mxu0 %v17472_v41  ;;  %14612 = vmatpush1.bf16.msra.mxu1 %v17600_v1  ;;  %v5611_v41 = vld [vmem:[#allocation14 + $0x10] sm:$0xff] }
 0x5ee   :  { %14358 = vmatprep.subr.bf16.mxu0 %v17473_v62  ;;  %14614 = vmatprep.subr.bf16.mxu1 %v17601_v4  ;;  %v5615_v1 = vld [vmem:[#allocation14 + $0x30] sm:$0xff]  ;;  %v5612_v62 = vld [vmem:[#allocation14 + $0x18] sm:$0xff]  ;;  %v19295_v39 = vmax.f32 %v5599_v3, 0.0 }
 0x5ef   :  { %v5616_v4 = vld [vmem:[#allocation14 + $0x38] sm:$0xff]  ;;  %v17613_v2 = vcombine.high %v5611_v41, %v5615_v1 }
 0x5f0   :  { %v17741_v23 = vcombine.high %v5612_v62, %v5616_v4  ;;  %v17742_v16 = vcombine.low %v5612_v62, %v5616_v4  ;;  %v5660_v62 = vld [vmem:[#allocation14 + $0x198] sm:$0xff] }
 0x5f1   :  { %14360 = vmatpush1.bf16.msra.mxu0 %v17474_v11  ;;  %14616 = vmatpush1.bf16.msra.mxu1 %v17602_v12  ;;  %v5619_v11 = vld [vmem:[#allocation14 + $0x50] sm:$0xff]  ;;  %v5664_v4 = vld [vmem:[#allocation14 + $0x1b8] sm:$0xff] }
 0x5f2   :  { %14362 = vmatprep.subr.bf16.mxu0 %v17475_v14  ;;  %14618 = vmatprep.subr.bf16.mxu1 %v17603_v15  ;;  %v5623_v12 = vld [vmem:[#allocation14 + $0x70] sm:$0xff]  ;;  %v5624_v14 = vld [vmem:[#allocation14 + $0x78] sm:$0xff]  ;;  %v17614_v15 = vcombine.low %v5611_v41, %v5615_v1 }
 0x5f3   :  { %v17615_v9 = vcombine.high %v5619_v11, %v5623_v12  ;;  %v17743_v18 = vcombine.high %v5620_v7, %v5624_v14  ;;  %v17616_v28 = vcombine.low %v5619_v11, %v5623_v12  ;;  %v17744_v31 = vcombine.low %v5620_v7, %v5624_v14  ;;  %v5659_v41 = vld [vmem:[#allocation14 + $0x190] sm:$0xff]  ;;  %v5668_v12 = vld [vmem:[#allocation14 + $0x1d8] sm:$0xff] }
 0x5f4   :  { %v5663_v1 = vld [vmem:[#allocation14 + $0x1b0] sm:$0xff]  ;;  %v5672_v7 = vld [vmem:[#allocation14 + $0x1f8] sm:$0xff] }
 0x5f5   :  { %14364 = vmatpush1.bf16.msra.mxu0 %v17476_v19  ;;  %14620 = vmatpush1.bf16.msra.mxu1 %v17604_v20  ;;  %v5627_v19 = vld [vmem:[#allocation14 + $0x90] sm:$0xff]  ;;  %v17625_v3 = vcombine.high %v5659_v41, %v5663_v1  ;;  %v17626_v14 = vcombine.low %v5659_v41, %v5663_v1  ;;  %v5708_v1 = vld [vmem:[#allocation14 + $0x318] sm:$0xff] }
 0x5f6   :  { %14366 = vmatprep.subr.bf16.mxu0 %v17477_v24  ;;  %14622 = vmatprep.subr.bf16.mxu1 %v17605_v26  ;;  %v5631_v20 = vld [vmem:[#allocation14 + $0xb0] sm:$0xff]  ;;  %v5628_v24 = vld [vmem:[#allocation14 + $0x98] sm:$0xff] }
 0x5f7   :  { %v5632_v26 = vld [vmem:[#allocation14 + $0xb8] sm:$0xff]  ;;  %v17617_v22 = vcombine.high %v5627_v19, %v5631_v20  ;;  %v17618_v10 = vcombine.low %v5627_v19, %v5631_v20  ;;  %v5671_v11 = vld [vmem:[#allocation14 + $0x1f0] sm:$0xff] }
 0x5f8   :  { %v17745_v35 = vcombine.high %v5628_v24, %v5632_v26  ;;  %v17746_v43 = vcombine.low %v5628_v24, %v5632_v26  ;;  %v5679_v19 = vld [vmem:[#allocation14 + $0x230] sm:$0xff]  ;;  %v5676_v20 = vld [vmem:[#allocation14 + $0x218] sm:$0xff] }
 0x5f9   :  { %14368 = vmatpush1.bf16.msra.mxu0 %v17478_v17  ;;  %14624 = vmatpush1.bf16.msra.mxu1 %v17606_v37  ;;  %v5635_v17 = vld [vmem:[#allocation14 + $0xd0] sm:$0xff]  ;;  %v5680_v24 = vld [vmem:[#allocation14 + $0x238] sm:$0xff] }
 0x5fa   :  { %14370 = vmatprep.subr.bf16.mxu0 %v17479_v38  ;;  %14626 = vmatprep.subr.bf16.mxu1 %v17607_v40  ;;  %v5639_v37 = vld [vmem:[#allocation14 + $0xf0] sm:$0xff]  ;;  %v5636_v38 = vld [vmem:[#allocation14 + $0xd8] sm:$0xff] }
 0x5fb   :  { %v5640_v40 = vld [vmem:[#allocation14 + $0xf8] sm:$0xff]  ;;  %v17619_v61 = vcombine.high %v5635_v17, %v5639_v37  ;;  %v5711_v41 = vld [vmem:[#allocation14 + $0x330] sm:$0xff] }
 0x5fc   :  { %v17747_v44 = vcombine.high %v5636_v38, %v5640_v40 }
 0x5fd   :  { %14372 = vmatpush1.bf16.msra.mxu0 %v17480_v45  ;;  %14628 = vmatpush1.bf16.msra.mxu1 %v17608_v46  ;;  %v5643_v45 = vld [vmem:[#allocation14 + $0x110] sm:$0xff] }
 0x5fe   :  { %14374 = vmatprep.subr.bf16.mxu0 %v17481_v48  ;;  %14630 = vmatprep.subr.bf16.mxu1 %v17609_v50  ;;  %v5647_v46 = vld [vmem:[#allocation14 + $0x130] sm:$0xff]  ;;  %v17620_v48 = vcombine.low %v5635_v17, %v5639_v37  ;;  %v17748_v50 = vcombine.low %v5636_v38, %v5640_v40  ;;  %v5684_v37 = vld [vmem:[#allocation14 + $0x258] sm:$0xff] }
 0x5ff   :  { %v17621_v51 = vcombine.high %v5643_v45, %v5647_v46  ;;  %v5687_v17 = vld [vmem:[#allocation14 + $0x270] sm:$0xff]  ;;  %v5688_v38 = vld [vmem:[#allocation14 + $0x278] sm:$0xff] }
 0x601   :  { %14376 = vmatpush1.bf16.msra.mxu0 %v17482_v54  ;;  %14632 = vmatpush1.bf16.msra.mxu1 %v17610_v59  ;;  %v5656_v54 = vld [vmem:[#allocation14 + $0x178] sm:$0xff]  ;;  %v17622_v59 = vcombine.low %v5643_v45, %v5647_v46  ;;  %v5695_v45 = vld [vmem:[#allocation14 + $0x2b0] sm:$0xff] }
 0x602   :  { %14378 = vmatprep.subr.bf16.mxu0 %v17483_v0  ;;  %14634 = vmatprep.subr.bf16.mxu1 %v17611_v13  ;;  %v17623_v0 = vcombine.high %v5651_v34, %v5655_v58  ;;  %v17751_v13 = vcombine.high %v5652_v53, %v5656_v54  ;;  %v5692_v46 = vld [vmem:[#allocation14 + $0x298] sm:$0xff] }
 0x605   :  { %14380 = vmatpush1.bf16.msra.mxu0 %v17484_v8  ;;  %14636 = vmatpush1.bf16.msra.mxu1 %v17612_v33  ;;  %v17624_v8 = vcombine.low %v5651_v34, %v5655_v58  ;;  %v17752_v33 = vcombine.low %v5652_v53, %v5656_v54  ;;  %v5703_v34 = vld [vmem:[#allocation14 + $0x2f0] sm:$0xff]  ;;  %v5700_v58 = vld [vmem:[#allocation14 + $0x2d8] sm:$0xff] }
 0x606   :  { %14638 = vmatprep.subr.bf16.mxu0 %v17613_v2  ;;  %14894 = vmatprep.subr.bf16.mxu1 %v17741_v23  ;;  %v17753_v2 = vcombine.high %v5660_v62, %v5664_v4  ;;  %v5667_v23 = vld [vmem:[#allocation14 + $0x1d0] sm:$0xff]  ;;  %v5704_v53 = vld [vmem:[#allocation14 + $0x2f8] sm:$0xff] }
 0x607   :  { %v17628_v26 = vcombine.low %v5667_v23, %v5671_v11 }
 0x608   :  { %7423 = vmatmul.mubr.f32.vlgmr.msra.gmra.mrb[8].mxu0 %v19295_v39  ;;  %7707 = vmatmul.mubr.f32.vlgmr.msra.gmra.mrb[8].mxu1 %v19295_v39 }
 0x609   :  { %14640 = vmatpush1.bf16.msra.mxu0 %v17614_v15  ;;  %7777 = vmatprep.mubr.f32.mxu0 %v19227_v21  ;;  %v17754_v15 = vcombine.low %v5660_v62, %v5664_v4  ;;  %v5712_v62 = vld [vmem:[#allocation14 + $0x338] sm:$0xff] }
 0x60a   :  { %14896 = vmatpush1.bf16.msra.mxu1 %v17742_v16  ;;  %8061 = vmatprep.mubr.f32.mxu1 %v19227_v21  ;;  %v5644_v21 = vld [vmem:[#allocation14 + $0x118] sm:$0xff]  ;;  %v17627_v16 = vcombine.high %v5667_v23, %v5671_v11  ;;  %v5719_v23 = vld [vmem:[#allocation14 + $0x370] sm:$0xff] }
 0x60b   :  { %14642 = vmatprep.subr.bf16.mxu0 %v17615_v9  ;;  %14898 = vmatprep.subr.bf16.mxu1 %v17743_v18  ;;  %v17749_v52 = vcombine.high %v5644_v21, %v5648_v47  ;;  %v17750_v63 = vcombine.low %v5644_v21, %v5648_v47  ;;  %v17755_v9 = vcombine.high %v5668_v12, %v5672_v7  ;;  %v5675_v18 = vld [vmem:[#allocation14 + $0x210] sm:$0xff]  ;;  %v5696_v21 = vld [vmem:[#allocation14 + $0x2b8] sm:$0xff] }
 0x60c   :  { %v17630_v40 = vcombine.low %v5675_v18, %v5679_v19  ;;  %v5716_v11 = vld [vmem:[#allocation14 + $0x358] sm:$0xff] }
 0x60d   :  { %14644 = vmatpush1.bf16.msra.mxu0 %v17616_v28  ;;  %v17756_v28 = vcombine.low %v5668_v12, %v5672_v7  ;;  %v5720_v12 = vld [vmem:[#allocation14 + $0x378] sm:$0xff] }
 0x60e   :  { %14900 = vmatpush1.bf16.msra.mxu1 %v17744_v31  ;;  %14646 = vmatprep.subr.bf16.mxu0 %v17617_v22  ;;  %v17629_v31 = vcombine.high %v5675_v18, %v5679_v19  ;;  %v17757_v22 = vcombine.high %v5676_v20, %v5680_v24  ;;  %v5727_v18 = vld [vmem:[#allocation14 + $0x3b0] sm:$0xff]  ;;  %v5724_v19 = vld [vmem:[#allocation14 + $0x398] sm:$0xff] }
 0x60f   :  { %14902 = vmatprep.subr.bf16.mxu1 %v17745_v35  ;;  %v5683_v35 = vld [vmem:[#allocation14 + $0x250] sm:$0xff] }
 0x610   :  { %v17632_v47 = vcombine.low %v5683_v35, %v5687_v17 }
 0x611   :  { %14648 = vmatpush1.bf16.msra.mxu0 %v17618_v10  ;;  %v17758_v10 = vcombine.low %v5676_v20, %v5680_v24  ;;  %v5728_v20 = vld [vmem:[#allocation14 + $0x3b8] sm:$0xff] }
 0x612   :  { %14904 = vmatpush1.bf16.msra.mxu1 %v17746_v43  ;;  %14650 = vmatprep.subr.bf16.mxu0 %v17619_v61  ;;  %v17631_v43 = vcombine.high %v5683_v35, %v5687_v17  ;;  %v17759_v61 = vcombine.high %v5684_v37, %v5688_v38  ;;  %v5735_v35 = vld [vmem:[#allocation14 + $0x3f0] sm:$0xff]  ;;  %v5732_v17 = vld [vmem:[#allocation14 + $0x3d8] sm:$0xff] }
 0x613   :  { %14906 = vmatprep.subr.bf16.mxu1 %v17747_v44  ;;  %v5691_v44 = vld [vmem:[#allocation14 + $0x290] sm:$0xff] }
 0x614   :  { %v17634_v54 = vcombine.low %v5691_v44, %v5695_v45 }
 0x615   :  { %14652 = vmatpush1.bf16.msra.mxu0 %v17620_v48  ;;  %v17760_v48 = vcombine.low %v5684_v37, %v5688_v38  ;;  %v5736_v37 = vld [vmem:[#allocation14 + $0x3f8] sm:$0xff] }
 0x616   :  { %14908 = vmatpush1.bf16.msra.mxu1 %v17748_v50  ;;  %14654 = vmatprep.subr.bf16.mxu0 %v17621_v51  ;;  %v17633_v50 = vcombine.high %v5691_v44, %v5695_v45  ;;  %v17761_v51 = vcombine.high %v5692_v46, %v5696_v21  ;;  %v5743_v44 = vld [vmem:[#allocation14 + $0x430] sm:$0xff]  ;;  %v5740_v45 = vld [vmem:[#allocation14 + $0x418] sm:$0xff] }
 0x617   :  { %14910 = vmatprep.subr.bf16.mxu1 %v17749_v52  ;;  %v5699_v52 = vld [vmem:[#allocation14 + $0x2d0] sm:$0xff] }
 0x618   :  { %v17636_v4 = vcombine.low %v5699_v52, %v5703_v34 }
 0x619   :  { %14656 = vmatpush1.bf16.msra.mxu0 %v17622_v59  ;;  %v17762_v59 = vcombine.low %v5692_v46, %v5696_v21  ;;  %v5744_v46 = vld [vmem:[#allocation14 + $0x438] sm:$0xff] }
 0x61a   :  { %14912 = vmatpush1.bf16.msra.mxu1 %v17750_v63  ;;  %14658 = vmatprep.subr.bf16.mxu0 %v17623_v0  ;;  %v17635_v63 = vcombine.high %v5699_v52, %v5703_v34  ;;  %v17763_v0 = vcombine.high %v5700_v58, %v5704_v53  ;;  %v5751_v52 = vld [vmem:[#allocation14 + $0x470] sm:$0xff] }
 0x61b   :  { %14914 = vmatprep.subr.bf16.mxu1 %v17751_v13  ;;  %v5707_v13 = vld [vmem:[#allocation14 + $0x310] sm:$0xff] }
 0x61c   :  { %v17638_v7 = vcombine.low %v5707_v13, %v5711_v41 }
 0x61d   :  { %14660 = vmatpush1.bf16.msra.mxu0 %v17624_v8  ;;  %v17764_v8 = vcombine.low %v5700_v58, %v5704_v53  ;;  %v5748_v58 = vld [vmem:[#allocation14 + $0x458] sm:$0xff] }
 0x61e   :  { %14916 = vmatpush1.bf16.msra.mxu1 %v17752_v33  ;;  %14662 = vmatprep.subr.bf16.mxu0 %v17625_v3  ;;  %v17637_v33 = vcombine.high %v5707_v13, %v5711_v41  ;;  %v17765_v3 = vcombine.high %v5708_v1, %v5712_v62  ;;  %v5752_v53 = vld [vmem:[#allocation14 + $0x478] sm:$0xff] }
 0x61f   :  { %14918 = vmatprep.subr.bf16.mxu1 %v17753_v2  ;;  %v5715_v2 = vld [vmem:[#allocation14 + $0x350] sm:$0xff]  ;;  %v17775_v13 = vcombine.high %v5748_v58, %v5752_v53  ;;  %v5756_v41 = vld [vmem:[#allocation14 + $0x498] sm:$0xff] }
 0x620   :  { %v17640_v24 = vcombine.low %v5715_v2, %v5719_v23 }
 0x621   :  { %14664 = vmatpush1.bf16.msra.mxu0 %v17626_v14  ;;  %v17766_v14 = vcombine.low %v5708_v1, %v5712_v62  ;;  %v5760_v1 = vld [vmem:[#allocation14 + $0x4b8] sm:$0xff] }
 0x622   :  { %14920 = vmatpush1.bf16.msra.mxu1 %v17754_v15  ;;  %14666 = vmatprep.subr.bf16.mxu0 %v17627_v16  ;;  %v17639_v15 = vcombine.high %v5715_v2, %v5719_v23  ;;  %v17767_v16 = vcombine.high %v5716_v11, %v5720_v12  ;;  %v5767_v2 = vld [vmem:[#allocation14 + $0x4f0] sm:$0xff]  ;;  %v5764_v23 = vld [vmem:[#allocation14 + $0x4d8] sm:$0xff] }
 0x623   :  { %14922 = vmatprep.subr.bf16.mxu1 %v17755_v9  ;;  %v5723_v9 = vld [vmem:[#allocation14 + $0x390] sm:$0xff] }
 0x624   :  { %v17642_v38 = vcombine.low %v5723_v9, %v5727_v18 }
 0x625   :  { %14668 = vmatpush1.bf16.msra.mxu0 %v17628_v26  ;;  %v17768_v26 = vcombine.low %v5716_v11, %v5720_v12  ;;  %v5768_v11 = vld [vmem:[#allocation14 + $0x4f8] sm:$0xff] }
 0x626   :  { %14924 = vmatpush1.bf16.msra.mxu1 %v17756_v28  ;;  %14670 = vmatprep.subr.bf16.mxu0 %v17629_v31  ;;  %v17641_v28 = vcombine.high %v5723_v9, %v5727_v18  ;;  %v17769_v31 = vcombine.high %v5724_v19, %v5728_v20  ;;  %v5772_v9 = vld [vmem:[#allocation14 + $0x518] sm:$0xff] }
 0x627   :  { %14926 = vmatprep.subr.bf16.mxu1 %v17757_v22  ;;  %v5731_v22 = vld [vmem:[#allocation14 + $0x3d0] sm:$0xff]  ;;  %v5776_v18 = vld [vmem:[#allocation14 + $0x538] sm:$0xff] }
 0x628   :  { %v17644_v21 = vcombine.low %v5731_v22, %v5735_v35 }
 0x629   :  { %14672 = vmatpush1.bf16.msra.mxu0 %v17630_v40  ;;  %v17770_v40 = vcombine.low %v5724_v19, %v5728_v20  ;;  %v17780_v19 = vcombine.low %v5764_v23, %v5768_v11 }
 0x62a   :  { %14928 = vmatpush1.bf16.msra.mxu1 %v17758_v10  ;;  %14674 = vmatprep.subr.bf16.mxu0 %v17631_v43  ;;  %v17643_v10 = vcombine.high %v5731_v22, %v5735_v35  ;;  %v17771_v43 = vcombine.high %v5732_v17, %v5736_v37  ;;  %v5784_v22 = vld [vmem:[#allocation14 + $0x578] sm:$0xff] }
 0x62b   :  { %14930 = vmatprep.subr.bf16.mxu1 %v17759_v61  ;;  %v5739_v61 = vld [vmem:[#allocation14 + $0x410] sm:$0xff] }
 0x62c   :  { %v17646_v34 = vcombine.low %v5739_v61, %v5743_v44 }
 0x62d   :  { %14676 = vmatpush1.bf16.msra.mxu0 %v17632_v47  ;;  %v17772_v47 = vcombine.low %v5732_v17, %v5736_v37  ;;  %v17782_v17 = vcombine.low %v5772_v9, %v5776_v18 }
 0x62e   :  { %14932 = vmatpush1.bf16.msra.mxu1 %v17760_v48  ;;  %14678 = vmatprep.subr.bf16.mxu0 %v17633_v50  ;;  %v17645_v48 = vcombine.high %v5739_v61, %v5743_v44  ;;  %v17773_v50 = vcombine.high %v5740_v45, %v5744_v46  ;;  %v5792_v61 = vld [vmem:[#allocation14 + $0x5b8] sm:$0xff] }
 0x62f   :  { %14934 = vmatprep.subr.bf16.mxu1 %v17761_v51  ;;  %v5747_v51 = vld [vmem:[#allocation14 + $0x450] sm:$0xff] }
 0x630   :  { %v17648_v62 = vcombine.low %v5747_v51, %v5751_v52 }
 0x631   :  { %14680 = vmatpush1.bf16.msra.mxu0 %v17634_v54  ;;  %v17774_v54 = vcombine.low %v5740_v45, %v5744_v46 }
 0x632   :  { %14936 = vmatpush1.bf16.msra.mxu1 %v17762_v59  ;;  %14682 = vmatprep.subr.bf16.mxu0 %v17635_v63  ;;  %v17647_v59 = vcombine.high %v5747_v51, %v5751_v52  ;;  %v5755_v63 = vld [vmem:[#allocation14 + $0x490] sm:$0xff]  ;;  %v5800_v51 = vld [vmem:[#allocation14 + $0x5f8] sm:$0xff] }
 0x633   :  { %14938 = vmatprep.subr.bf16.mxu1 %v17763_v0  ;;  %v5759_v0 = vld [vmem:[#allocation14 + $0x4b0] sm:$0xff] }
 0x634   :  { %v17650_v12 = vcombine.low %v5755_v63, %v5759_v0 }
 0x635   :  { %14684 = vmatpush1.bf16.msra.mxu0 %v17636_v4  ;;  %v17776_v4 = vcombine.low %v5748_v58, %v5752_v53 }
 0x636   :  { %14940 = vmatpush1.bf16.msra.mxu1 %v17764_v8  ;;  %14686 = vmatprep.subr.bf16.mxu0 %v17637_v33  ;;  %v17649_v8 = vcombine.high %v5755_v63, %v5759_v0  ;;  %v17777_v33 = vcombine.high %v5756_v41, %v5760_v1  ;;  %v5804_v63 = vld [vmem:[#allocation14 + $0x618] sm:$0xff] }
 0x637   :  { %14942 = vmatprep.subr.bf16.mxu1 %v17765_v3  ;;  %v5763_v3 = vld [vmem:[#allocation14 + $0x4d0] sm:$0xff]  ;;  %v5808_v0 = vld [vmem:[#allocation14 + $0x638] sm:$0xff] }
 0x639   :  { %14688 = vmatpush1.bf16.msra.mxu0 %v17638_v7  ;;  %v17651_v7 = vcombine.high %v5763_v3, %v5767_v2 }
 0x63a   :  { %14944 = vmatpush1.bf16.msra.mxu1 %v17766_v14  ;;  %14690 = vmatprep.subr.bf16.mxu0 %v17639_v15  ;;  %v17779_v14 = vcombine.high %v5764_v23, %v5768_v11  ;;  %v5771_v15 = vld [vmem:[#allocation14 + $0x510] sm:$0xff]  ;;  %v17790_v23 = vcombine.low %v5804_v63, %v5808_v0 }
 0x63b   :  { %14946 = vmatprep.subr.bf16.mxu1 %v17767_v16  ;;  %v5775_v16 = vld [vmem:[#allocation14 + $0x530] sm:$0xff] }
 0x63c   :  { %v17653_v20 = vcombine.high %v5771_v15, %v5775_v16  ;;  %v17654_v35 = vcombine.low %v5771_v15, %v5775_v16  ;;  %v5824_v15 = vld [vmem:[#allocation14 + $0x6b8] sm:$0xff] }
 0x63d   :  { %14692 = vmatpush1.bf16.msra.mxu0 %v17640_v24  ;;  %v17781_v24 = vcombine.high %v5772_v9, %v5776_v18 }
 0x63e   :  { %14948 = vmatpush1.bf16.msra.mxu1 %v17768_v26  ;;  %14694 = vmatprep.subr.bf16.mxu0 %v17641_v28  ;;  %v5779_v26 = vld [vmem:[#allocation14 + $0x550] sm:$0xff] }
 0x63f   :  { %14950 = vmatprep.subr.bf16.mxu1 %v17769_v31  ;;  %v5783_v28 = vld [vmem:[#allocation14 + $0x570] sm:$0xff]  ;;  %v5780_v31 = vld [vmem:[#allocation14 + $0x558] sm:$0xff] }
 0x640   :  { %v17655_v37 = vcombine.high %v5779_v26, %v5783_v28  ;;  %v17656_v44 = vcombine.low %v5779_v26, %v5783_v28  ;;  %v17784_v45 = vcombine.low %v5780_v31, %v5784_v22  ;;  %v5832_v26 = vld [vmem:[#allocation14 + $0x6f8] sm:$0xff] }
 0x641   :  { %14696 = vmatpush1.bf16.msra.mxu0 %v17642_v38  ;;  %v17783_v38 = vcombine.high %v5780_v31, %v5784_v22 }
 0x642   :  { %14952 = vmatpush1.bf16.msra.mxu1 %v17770_v40  ;;  %14698 = vmatprep.subr.bf16.mxu0 %v17643_v10  ;;  %v5787_v40 = vld [vmem:[#allocation14 + $0x590] sm:$0xff] }
 0x643   :  { %14954 = vmatprep.subr.bf16.mxu1 %v17771_v43  ;;  %v5791_v10 = vld [vmem:[#allocation14 + $0x5b0] sm:$0xff]  ;;  %v5788_v43 = vld [vmem:[#allocation14 + $0x598] sm:$0xff] }
 0x644   :  { %v17657_v46 = vcombine.high %v5787_v40, %v5791_v10  ;;  %v17658_v52 = vcombine.low %v5787_v40, %v5791_v10  ;;  %v5840_v40 = vld [vmem:[#allocation14 + $0x738] sm:$0xff] }
 0x645   :  { %14700 = vmatpush1.bf16.msra.mxu0 %v17644_v21  ;;  %v17785_v21 = vcombine.high %v5788_v43, %v5792_v61 }
 0x646   :  { %14956 = vmatpush1.bf16.msra.mxu1 %v17772_v47  ;;  %14702 = vmatprep.subr.bf16.mxu0 %v17645_v48  ;;  %v5795_v47 = vld [vmem:[#allocation14 + $0x5d0] sm:$0xff] }
 0x647   :  { %14958 = vmatprep.subr.bf16.mxu1 %v17773_v50  ;;  %v5799_v48 = vld [vmem:[#allocation14 + $0x5f0] sm:$0xff]  ;;  %v5796_v50 = vld [vmem:[#allocation14 + $0x5d8] sm:$0xff] }
 0x648   :  { %7778 = vmatmul.mubr.f32.vlgmr.msra.gmra.mrb[10].mxu0 %v19243_v25  ;;  %v17659_v58 = vcombine.high %v5795_v47, %v5799_v48  ;;  %v17787_v53 = vcombine.high %v5796_v50, %v5800_v51 }
 0x649   :  { %8062 = vmatmul.mubr.f32.vlgmr.msra.gmra.mrb[10].mxu1 %v19243_v25  ;;  %14704 = vmatpush1.bf16.msra.mxu0 %v17646_v34  ;;  %v17778_v25 = vcombine.low %v5756_v41, %v5760_v1  ;;  %v17786_v34 = vcombine.low %v5788_v43, %v5792_v61  ;;  %v17788_v41 = vcombine.low %v5796_v50, %v5800_v51 }
 0x64a   :  { %7848 = vmatprep.mubr.f32.mxu0 %v19245_v5  ;;  %14960 = vmatpush1.bf16.msra.mxu1 %v17774_v54  ;;  %v5803_v54 = vld [vmem:[#allocation14 + $0x610] sm:$0xff] }
 0x64b   :  { %8132 = vmatprep.mubr.f32.mxu1 %v19245_v5  ;;  %14706 = vmatprep.subr.bf16.mxu0 %v17647_v59  ;;  %v17652_v5 = vcombine.low %v5763_v3, %v5767_v2  ;;  %v5807_v59 = vld [vmem:[#allocation14 + $0x630] sm:$0xff]  ;;  %v5816_v3 = vld [vmem:[#allocation14 + $0x678] sm:$0xff] }
 0x64c   :  { %14962 = vmatprep.subr.bf16.mxu1 %v17775_v13  ;;  %v17660_v13 = vcombine.low %v5795_v47, %v5799_v48  ;;  %v17661_v1 = vcombine.high %v5803_v54, %v5807_v59  ;;  %v17662_v2 = vcombine.low %v5803_v54, %v5807_v59  ;;  %v5848_v47 = vld [vmem:[#allocation14 + $0x778] sm:$0xff] }
 0x64d   :  { %14708 = vmatpush1.bf16.msra.mxu0 %v17648_v62  ;;  %v17789_v62 = vcombine.high %v5804_v63, %v5808_v0  ;;  %v5856_v54 = vld [vmem:[#allocation14 + $0x7b8] sm:$0xff] }
 0x64e   :  { %14964 = vmatpush1.bf16.msra.mxu1 %v17776_v4  ;;  %14710 = vmatprep.subr.bf16.mxu0 %v17649_v8  ;;  %v5811_v4 = vld [vmem:[#allocation14 + $0x650] sm:$0xff] }
 0x64f   :  { %14966 = vmatprep.subr.bf16.mxu1 %v17777_v33  ;;  %v5815_v8 = vld [vmem:[#allocation14 + $0x670] sm:$0xff]  ;;  %v5812_v33 = vld [vmem:[#allocation14 + $0x658] sm:$0xff] }
 0x650   :  { %v17663_v11 = vcombine.high %v5811_v4, %v5815_v8  ;;  %v17664_v16 = vcombine.low %v5811_v4, %v5815_v8  ;;  %v17792_v9 = vcombine.low %v5812_v33, %v5816_v3  ;;  %v5864_v4 = vld [vmem:[#allocation14 + $0x7f8] sm:$0xff] }
 0x651   :  { %14712 = vmatpush1.bf16.msra.mxu0 %v17650_v12  ;;  %v17791_v12 = vcombine.high %v5812_v33, %v5816_v3 }
 0x652   :  { %14968 = vmatpush1.bf16.msra.mxu1 %v17778_v25  ;;  %14714 = vmatprep.subr.bf16.mxu0 %v17651_v7  ;;  %v5819_v25 = vld [vmem:[#allocation14 + $0x690] sm:$0xff] }
 0x653   :  { %14970 = vmatprep.subr.bf16.mxu1 %v17779_v14  ;;  %v5823_v7 = vld [vmem:[#allocation14 + $0x6b0] sm:$0xff]  ;;  %v5820_v14 = vld [vmem:[#allocation14 + $0x698] sm:$0xff] }
 0x654   :  { %v17665_v18 = vcombine.high %v5819_v25, %v5823_v7  ;;  %v17666_v28 = vcombine.low %v5819_v25, %v5823_v7  ;;  %v17794_v31 = vcombine.low %v5820_v14, %v5824_v15  ;;  %v5872_v25 = vld [vmem:[#allocation14 + $0x838] sm:$0xff] }
 0x655   :  { %14716 = vmatpush1.bf16.msra.mxu0 %v17652_v5  ;;  %v17793_v5 = vcombine.high %v5820_v14, %v5824_v15 }
 0x656   :  { %14972 = vmatpush1.bf16.msra.mxu1 %v17780_v19  ;;  %14718 = vmatprep.subr.bf16.mxu0 %v17653_v20  ;;  %v5827_v19 = vld [vmem:[#allocation14 + $0x6d0] sm:$0xff] }
 0x657   :  { %14974 = vmatprep.subr.bf16.mxu1 %v17781_v24  ;;  %v5831_v20 = vld [vmem:[#allocation14 + $0x6f0] sm:$0xff]  ;;  %v5828_v24 = vld [vmem:[#allocation14 + $0x6d8] sm:$0xff] }
 0x658   :  { %v17667_v22 = vcombine.high %v5827_v19, %v5831_v20  ;;  %v17668_v10 = vcombine.low %v5827_v19, %v5831_v20  ;;  %v17796_v43 = vcombine.low %v5828_v24, %v5832_v26  ;;  %v5876_v19 = vld [vmem:[#allocation14 + $0x858] sm:$0xff] }
 0x659   :  { %14720 = vmatpush1.bf16.msra.mxu0 %v17654_v35  ;;  %v17795_v35 = vcombine.high %v5828_v24, %v5832_v26  ;;  %v5880_v20 = vld [vmem:[#allocation14 + $0x878] sm:$0xff] }
 0x65a   :  { %14976 = vmatpush1.bf16.msra.mxu1 %v17782_v17  ;;  %14722 = vmatprep.subr.bf16.mxu0 %v17655_v37  ;;  %v5835_v17 = vld [vmem:[#allocation14 + $0x710] sm:$0xff] }
 0x65b   :  { %14978 = vmatprep.subr.bf16.mxu1 %v17783_v38  ;;  %v5839_v37 = vld [vmem:[#allocation14 + $0x730] sm:$0xff]  ;;  %v5836_v38 = vld [vmem:[#allocation14 + $0x718] sm:$0xff] }
 0x65c   :  { %v17669_v61 = vcombine.high %v5835_v17, %v5839_v37  ;;  %v17670_v48 = vcombine.low %v5835_v17, %v5839_v37  ;;  %v17798_v50 = vcombine.low %v5836_v38, %v5840_v40  ;;  %v5888_v17 = vld [vmem:[#allocation14 + $0x8b8] sm:$0xff] }
 0x65d   :  { %14724 = vmatpush1.bf16.msra.mxu0 %v17656_v44  ;;  %v17797_v44 = vcombine.high %v5836_v38, %v5840_v40  ;;  %v17808_v38 = vcombine.low %v5876_v19, %v5880_v20 }
 0x65e   :  { %14980 = vmatpush1.bf16.msra.mxu1 %v17784_v45  ;;  %14726 = vmatprep.subr.bf16.mxu0 %v17657_v46  ;;  %v5843_v45 = vld [vmem:[#allocation14 + $0x750] sm:$0xff] }
 0x65f   :  { %14982 = vmatprep.subr.bf16.mxu1 %v17785_v21  ;;  %v5847_v46 = vld [vmem:[#allocation14 + $0x770] sm:$0xff]  ;;  %v5844_v21 = vld [vmem:[#allocation14 + $0x758] sm:$0xff] }
 0x660   :  { %v17671_v51 = vcombine.high %v5843_v45, %v5847_v46  ;;  %v17672_v59 = vcombine.low %v5843_v45, %v5847_v46  ;;  %v17800_v63 = vcombine.low %v5844_v21, %v5848_v47  ;;  %v5896_v45 = vld [vmem:[#allocation14 + $0x8f8] sm:$0xff] }
 0x661   :  { %14728 = vmatpush1.bf16.msra.mxu0 %v17658_v52  ;;  %v17799_v52 = vcombine.high %v5844_v21, %v5848_v47 }
 0x662   :  { %14984 = vmatpush1.bf16.msra.mxu1 %v17786_v34  ;;  %14730 = vmatprep.subr.bf16.mxu0 %v17659_v58  ;;  %v5851_v34 = vld [vmem:[#allocation14 + $0x790] sm:$0xff] }
 0x663   :  { %14986 = vmatprep.subr.bf16.mxu1 %v17787_v53  ;;  %v5855_v58 = vld [vmem:[#allocation14 + $0x7b0] sm:$0xff]  ;;  %v5852_v53 = vld [vmem:[#allocation14 + $0x798] sm:$0xff] }
 0x664   :  { %v17673_v0 = vcombine.high %v5851_v34, %v5855_v58  ;;  %v17674_v8 = vcombine.low %v5851_v34, %v5855_v58  ;;  %v17802_v33 = vcombine.low %v5852_v53, %v5856_v54 }
 0x665   :  { %14732 = vmatpush1.bf16.msra.mxu0 %v17660_v13  ;;  %v17801_v13 = vcombine.high %v5852_v53, %v5856_v54  ;;  %v5907_v54 = vld [vmem:[#allocation14 + $0x950] sm:$0xff] }
 0x666   :  { %14988 = vmatpush1.bf16.msra.mxu1 %v17788_v41  ;;  %14734 = vmatprep.subr.bf16.mxu0 %v17661_v1  ;;  %v5859_v41 = vld [vmem:[#allocation14 + $0x7d0] sm:$0xff] }
 0x667   :  { %14990 = vmatprep.subr.bf16.mxu1 %v17789_v62  ;;  %v5863_v1 = vld [vmem:[#allocation14 + $0x7f0] sm:$0xff]  ;;  %v5860_v62 = vld [vmem:[#allocation14 + $0x7d8] sm:$0xff] }
 0x668   :  { %v17675_v3 = vcombine.high %v5859_v41, %v5863_v1  ;;  %v17676_v7 = vcombine.low %v5859_v41, %v5863_v1  ;;  %v17804_v14 = vcombine.low %v5860_v62, %v5864_v4 }
 0x669   :  { %14736 = vmatpush1.bf16.msra.mxu0 %v17662_v2  ;;  %v17803_v2 = vcombine.high %v5860_v62, %v5864_v4  ;;  %v5915_v4 = vld [vmem:[#allocation14 + $0x990] sm:$0xff] }
 0x66a   :  { %14992 = vmatpush1.bf16.msra.mxu1 %v17790_v23  ;;  %14738 = vmatprep.subr.bf16.mxu0 %v17663_v11  ;;  %v5867_v23 = vld [vmem:[#allocation14 + $0x810] sm:$0xff] }
 0x66b   :  { %14994 = vmatprep.subr.bf16.mxu1 %v17791_v12  ;;  %v5871_v11 = vld [vmem:[#allocation14 + $0x830] sm:$0xff]  ;;  %v5868_v12 = vld [vmem:[#allocation14 + $0x818] sm:$0xff] }
 0x66c   :  { %v17677_v15 = vcombine.high %v5867_v23, %v5871_v11  ;;  %v17806_v24 = vcombine.low %v5868_v12, %v5872_v25 }
 0x66d   :  { %14740 = vmatpush1.bf16.msra.mxu0 %v17664_v16  ;;  %v17805_v16 = vcombine.high %v5868_v12, %v5872_v25  ;;  %v5923_v25 = vld [vmem:[#allocation14 + $0x9d0] sm:$0xff] }
 0x66e   :  { %14996 = vmatpush1.bf16.msra.mxu1 %v17792_v9  ;;  %14742 = vmatprep.subr.bf16.mxu0 %v17665_v18  ;;  %v5875_v9 = vld [vmem:[#allocation14 + $0x850] sm:$0xff] }
 0x66f   :  { %14998 = vmatprep.subr.bf16.mxu1 %v17793_v5  ;;  %v5879_v18 = vld [vmem:[#allocation14 + $0x870] sm:$0xff]  ;;  %v17678_v5 = vcombine.low %v5867_v23, %v5871_v11 }
 0x670   :  { %v17679_v26 = vcombine.high %v5875_v9, %v5879_v18  ;;  %v17680_v37 = vcombine.low %v5875_v9, %v5879_v18 }
 0x671   :  { %14744 = vmatpush1.bf16.msra.mxu0 %v17666_v28  ;;  %v5883_v28 = vld [vmem:[#allocation14 + $0x890] sm:$0xff] }
 0x672   :  { %15000 = vmatpush1.bf16.msra.mxu1 %v17794_v31  ;;  %14746 = vmatprep.subr.bf16.mxu0 %v17667_v22  ;;  %v5887_v31 = vld [vmem:[#allocation14 + $0x8b0] sm:$0xff]  ;;  %v17807_v22 = vcombine.high %v5876_v19, %v5880_v20 }
 0x673   :  { %15002 = vmatprep.subr.bf16.mxu1 %v17795_v35  ;;  %v5884_v35 = vld [vmem:[#allocation14 + $0x898] sm:$0xff]  ;;  %v17681_v40 = vcombine.high %v5883_v28, %v5887_v31  ;;  %v17682_v46 = vcombine.low %v5883_v28, %v5887_v31  ;;  %v5931_v19 = vld [vmem:[#allocation14 + $0xa10] sm:$0xff] }
 0x674   :  { %v5935_v20 = vld [vmem:[#allocation14 + $0xa30] sm:$0xff] }
 0x675   :  { %14748 = vmatpush1.bf16.msra.mxu0 %v17668_v10  ;;  %v17809_v10 = vcombine.high %v5884_v35, %v5888_v17 }
 0x676   :  { %15004 = vmatpush1.bf16.msra.mxu1 %v17796_v43  ;;  %14750 = vmatprep.subr.bf16.mxu0 %v17669_v61  ;;  %v5891_v43 = vld [vmem:[#allocation14 + $0x8d0] sm:$0xff] }
 0x677   :  { %15006 = vmatprep.subr.bf16.mxu1 %v17797_v44  ;;  %v5895_v61 = vld [vmem:[#allocation14 + $0x8f0] sm:$0xff]  ;;  %v5892_v44 = vld [vmem:[#allocation14 + $0x8d8] sm:$0xff] }
 0x678   :  { %v17683_v21 = vcombine.high %v5891_v43, %v5895_v61  ;;  %v17811_v47 = vcombine.high %v5892_v44, %v5896_v45  ;;  %v17812_v34 = vcombine.low %v5892_v44, %v5896_v45  ;;  %v5947_v45 = vld [vmem:[#allocation14 + $0xa90] sm:$0xff] }
 0x679   :  { %14752 = vmatpush1.bf16.msra.mxu0 %v17670_v48  ;;  %v5899_v48 = vld [vmem:[#allocation14 + $0x910] sm:$0xff] }
 0x67a   :  { %15008 = vmatpush1.bf16.msra.mxu1 %v17798_v50  ;;  %14754 = vmatprep.subr.bf16.mxu0 %v17671_v51  ;;  %v5903_v50 = vld [vmem:[#allocation14 + $0x930] sm:$0xff]  ;;  %v5900_v51 = vld [vmem:[#allocation14 + $0x918] sm:$0xff] }
 0x67b   :  { %15010 = vmatprep.subr.bf16.mxu1 %v17799_v52  ;;  %v5904_v52 = vld [vmem:[#allocation14 + $0x938] sm:$0xff]  ;;  %v17685_v58 = vcombine.high %v5899_v48, %v5903_v50 }
 0x67c   :  { %v17813_v53 = vcombine.high %v5900_v51, %v5904_v52  ;;  %v17814_v41 = vcombine.low %v5900_v51, %v5904_v52  ;;  %v5955_v52 = vld [vmem:[#allocation14 + $0xad0] sm:$0xff] }
 0x67d   :  { %14756 = vmatpush1.bf16.msra.mxu0 %v17672_v59  ;;  %v5911_v59 = vld [vmem:[#allocation14 + $0x970] sm:$0xff] }
 0x67e   :  { %15012 = vmatpush1.bf16.msra.mxu1 %v17800_v63  ;;  %14758 = vmatprep.subr.bf16.mxu0 %v17673_v0  ;;  %v5908_v63 = vld [vmem:[#allocation14 + $0x958] sm:$0xff]  ;;  %v17687_v1 = vcombine.high %v5907_v54, %v5911_v59 }
 0x67f   :  { %15014 = vmatprep.subr.bf16.mxu1 %v17801_v13  ;;  %v5912_v0 = vld [vmem:[#allocation14 + $0x978] sm:$0xff]  ;;  %v17686_v13 = vcombine.low %v5899_v48, %v5903_v50 }
 0x680   :  { %v17815_v62 = vcombine.high %v5908_v63, %v5912_v0  ;;  %v17816_v23 = vcombine.low %v5908_v63, %v5912_v0  ;;  %v5963_v0 = vld [vmem:[#allocation14 + $0xb10] sm:$0xff] }
 0x681   :  { %14760 = vmatpush1.bf16.msra.mxu0 %v17674_v8  ;;  %v5919_v8 = vld [vmem:[#allocation14 + $0x9b0] sm:$0xff] }
 0x682   :  { %15016 = vmatpush1.bf16.msra.mxu1 %v17802_v33  ;;  %14762 = vmatprep.subr.bf16.mxu0 %v17675_v3  ;;  %v5916_v33 = vld [vmem:[#allocation14 + $0x998] sm:$0xff]  ;;  %v17689_v11 = vcombine.high %v5915_v4, %v5919_v8 }
 0x683   :  { %15018 = vmatprep.subr.bf16.mxu1 %v17803_v2  ;;  %v5920_v3 = vld [vmem:[#allocation14 + $0x9b8] sm:$0xff]  ;;  %v17688_v2 = vcombine.low %v5907_v54, %v5911_v59 }
 0x684   :  { %v17817_v12 = vcombine.high %v5916_v33, %v5920_v3  ;;  %v17818_v9 = vcombine.low %v5916_v33, %v5920_v3  ;;  %v5971_v3 = vld [vmem:[#allocation14 + $0xb50] sm:$0xff] }
 0x685   :  { %14764 = vmatpush1.bf16.msra.mxu0 %v17676_v7  ;;  %v5927_v7 = vld [vmem:[#allocation14 + $0x9f0] sm:$0xff] }
 0x686   :  { %15020 = vmatpush1.bf16.msra.mxu1 %v17804_v14  ;;  %14766 = vmatprep.subr.bf16.mxu0 %v17677_v15  ;;  %v5924_v14 = vld [vmem:[#allocation14 + $0x9d8] sm:$0xff]  ;;  %v17691_v18 = vcombine.high %v5923_v25, %v5927_v7  ;;  %v17692_v28 = vcombine.low %v5923_v25, %v5927_v7 }
 0x687   :  { %15022 = vmatprep.subr.bf16.mxu1 %v17805_v16  ;;  %v5928_v15 = vld [vmem:[#allocation14 + $0x9f8] sm:$0xff]  ;;  %v17690_v16 = vcombine.low %v5915_v4, %v5919_v8 }
 0x688   :  { %7849 = vmatmul.mubr.f32.vlgmr.msra.gmra.mrb[10].mxu0 %v19256_v42  ;;  %v17820_v31 = vcombine.low %v5924_v14, %v5928_v15 }
 0x689   :  { %8133 = vmatmul.mubr.f32.vlgmr.msra.gmra.mrb[10].mxu1 %v19256_v42  ;;  %14768 = vmatpush1.bf16.msra.mxu0 %v17678_v5  ;;  %v17810_v42 = vcombine.low %v5884_v35, %v5888_v17  ;;  %v17819_v5 = vcombine.high %v5924_v14, %v5928_v15  ;;  %v5939_v17 = vld [vmem:[#allocation14 + $0xa50] sm:$0xff] }
 0x68a   :  { %7919 = vmatprep.mubr.f32.mxu0 %v19278_v27  ;;  %15024 = vmatpush1.bf16.msra.mxu1 %v17806_v24  ;;  %v5932_v24 = vld [vmem:[#allocation14 + $0xa18] sm:$0xff]  ;;  %v5979_v15 = vld [vmem:[#allocation14 + $0xb90] sm:$0xff] }
 0x68b   :  { %8203 = vmatprep.mubr.f32.mxu1 %v19278_v27  ;;  %14770 = vmatprep.subr.bf16.mxu0 %v17679_v26  ;;  %v17684_v27 = vcombine.low %v5891_v43, %v5895_v61  ;;  %v5936_v26 = vld [vmem:[#allocation14 + $0xa38] sm:$0xff] }
 0x68c   :  { %15026 = vmatprep.subr.bf16.mxu1 %v17807_v22  ;;  %v17693_v22 = vcombine.high %v5931_v19, %v5935_v20  ;;  %v17821_v35 = vcombine.high %v5932_v24, %v5936_v26  ;;  %v17822_v43 = vcombine.low %v5932_v24, %v5936_v26  ;;  %v5987_v26 = vld [vmem:[#allocation14 + $0xbd0] sm:$0xff] }
 0x68d   :  { %14772 = vmatpush1.bf16.msra.mxu0 %v17680_v37  ;;  %v5943_v37 = vld [vmem:[#allocation14 + $0xa70] sm:$0xff] }
 0x68e   :  { %15028 = vmatpush1.bf16.msra.mxu1 %v17808_v38  ;;  %14774 = vmatprep.subr.bf16.mxu0 %v17681_v40  ;;  %v5940_v38 = vld [vmem:[#allocation14 + $0xa58] sm:$0xff]  ;;  %v17695_v61 = vcombine.high %v5939_v17, %v5943_v37 }
 0x68f   :  { %15030 = vmatprep.subr.bf16.mxu1 %v17809_v10  ;;  %v5944_v40 = vld [vmem:[#allocation14 + $0xa78] sm:$0xff]  ;;  %v17694_v10 = vcombine.low %v5931_v19, %v5935_v20 }
 0x690   :  { %v17823_v44 = vcombine.high %v5940_v38, %v5944_v40  ;;  %v17824_v48 = vcombine.low %v5940_v38, %v5944_v40  ;;  %v5995_v40 = vld [vmem:[#allocation14 + $0xc10] sm:$0xff] }
 0x691   :  { %14776 = vmatpush1.bf16.msra.mxu0 %v17682_v46  ;;  %v5951_v46 = vld [vmem:[#allocation14 + $0xab0] sm:$0xff] }
 0x692   :  { %15032 = vmatpush1.bf16.msra.mxu1 %v17810_v42  ;;  %14778 = vmatprep.subr.bf16.mxu0 %v17683_v21  ;;  %v5948_v42 = vld [vmem:[#allocation14 + $0xa98] sm:$0xff]  ;;  %v17697_v50 = vcombine.high %v5947_v45, %v5951_v46 }
 0x693   :  { %15034 = vmatprep.subr.bf16.mxu1 %v17811_v47  ;;  %v5952_v21 = vld [vmem:[#allocation14 + $0xab8] sm:$0xff]  ;;  %v17696_v47 = vcombine.low %v5939_v17, %v5943_v37 }
 0x694   :  { %v17825_v51 = vcombine.high %v5948_v42, %v5952_v21  ;;  %v17826_v54 = vcombine.low %v5948_v42, %v5952_v21  ;;  %v6003_v21 = vld [vmem:[#allocation14 + $0xc50] sm:$0xff] }
 0x695   :  { %14780 = vmatpush1.bf16.msra.mxu0 %v17684_v27  ;;  %v5959_v27 = vld [vmem:[#allocation14 + $0xaf0] sm:$0xff] }
 0x696   :  { %15036 = vmatpush1.bf16.msra.mxu1 %v17812_v34  ;;  %14782 = vmatprep.subr.bf16.mxu0 %v17685_v58  ;;  %v5956_v34 = vld [vmem:[#allocation14 + $0xad8] sm:$0xff]  ;;  %v17699_v59 = vcombine.high %v5955_v52, %v5959_v27 }
 0x697   :  { %15038 = vmatprep.subr.bf16.mxu1 %v17813_v53  ;;  %v5960_v58 = vld [vmem:[#allocation14 + $0xaf8] sm:$0xff]  ;;  %v17698_v53 = vcombine.low %v5947_v45, %v5951_v46 }
 0x698   :  { %v17827_v63 = vcombine.high %v5956_v34, %v5960_v58  ;;  %v17828_v4 = vcombine.low %v5956_v34, %v5960_v58  ;;  %v6011_v34 = vld [vmem:[#allocation14 + $0xc90] sm:$0xff] }
 0x699   :  { %14784 = vmatpush1.bf16.msra.mxu0 %v17686_v13  ;;  %v5967_v13 = vld [vmem:[#allocation14 + $0xb30] sm:$0xff] }
 0x69a   :  { %15040 = vmatpush1.bf16.msra.mxu1 %v17814_v41  ;;  %14786 = vmatprep.subr.bf16.mxu0 %v17687_v1  ;;  %v5964_v41 = vld [vmem:[#allocation14 + $0xb18] sm:$0xff]  ;;  %v17701_v8 = vcombine.high %v5963_v0, %v5967_v13  ;;  %v6015_v58 = vld [vmem:[#allocation14 + $0xcb0] sm:$0xff] }
 0x69b   :  { %15042 = vmatprep.subr.bf16.mxu1 %v17815_v62  ;;  %v5968_v1 = vld [vmem:[#allocation14 + $0xb38] sm:$0xff]  ;;  %v17700_v62 = vcombine.low %v5955_v52, %v5959_v27 }
 0x69c   :  { %v17829_v33 = vcombine.high %v5964_v41, %v5968_v1  ;;  %v17830_v25 = vcombine.low %v5964_v41, %v5968_v1  ;;  %v6019_v1 = vld [vmem:[#allocation14 + $0xcd0] sm:$0xff] }
 0x69d   :  { %14788 = vmatpush1.bf16.msra.mxu0 %v17688_v2  ;;  %v5975_v2 = vld [vmem:[#allocation14 + $0xb70] sm:$0xff] }
 0x69e   :  { %15044 = vmatpush1.bf16.msra.mxu1 %v17816_v23  ;;  %14790 = vmatprep.subr.bf16.mxu0 %v17689_v11  ;;  %v5972_v23 = vld [vmem:[#allocation14 + $0xb58] sm:$0xff]  ;;  %v17703_v7 = vcombine.high %v5971_v3, %v5975_v2 }
 0x69f   :  { %15046 = vmatprep.subr.bf16.mxu1 %v17817_v12  ;;  %v5976_v11 = vld [vmem:[#allocation14 + $0xb78] sm:$0xff]  ;;  %v17702_v12 = vcombine.low %v5963_v0, %v5967_v13  ;;  %v17713_v13 = vcombine.high %v6011_v34, %v6015_v58 }
 0x6a0   :  { %v17831_v14 = vcombine.high %v5972_v23, %v5976_v11  ;;  %v17832_v19 = vcombine.low %v5972_v23, %v5976_v11  ;;  %v6027_v23 = vld [vmem:[#allocation14 + $0xd10] sm:$0xff] }
 0x6a1   :  { %14792 = vmatpush1.bf16.msra.mxu0 %v17690_v16  ;;  %v5983_v16 = vld [vmem:[#allocation14 + $0xbb0] sm:$0xff] }
 0x6a2   :  { %15048 = vmatpush1.bf16.msra.mxu1 %v17818_v9  ;;  %14794 = vmatprep.subr.bf16.mxu0 %v17691_v18  ;;  %v5980_v9 = vld [vmem:[#allocation14 + $0xb98] sm:$0xff]  ;;  %v17705_v20 = vcombine.high %v5979_v15, %v5983_v16  ;;  %v6031_v11 = vld [vmem:[#allocation14 + $0xd30] sm:$0xff] }
 0x6a3   :  { %15050 = vmatprep.subr.bf16.mxu1 %v17819_v5  ;;  %v5984_v18 = vld [vmem:[#allocation14 + $0xbb8] sm:$0xff]  ;;  %v17704_v5 = vcombine.low %v5971_v3, %v5975_v2 }
 0x6a4   :  { %v17833_v24 = vcombine.high %v5980_v9, %v5984_v18  ;;  %v17834_v17 = vcombine.low %v5980_v9, %v5984_v18  ;;  %v6039_v9 = vld [vmem:[#allocation14 + $0xd70] sm:$0xff]  ;;  %v6036_v18 = vld [vmem:[#allocation14 + $0xd58] sm:$0xff] }
 0x6a5   :  { %14796 = vmatpush1.bf16.msra.mxu0 %v17692_v28  ;;  %v5991_v28 = vld [vmem:[#allocation14 + $0xbf0] sm:$0xff] }
 0x6a6   :  { %15052 = vmatpush1.bf16.msra.mxu1 %v17820_v31  ;;  %14798 = vmatprep.subr.bf16.mxu0 %v17693_v22  ;;  %v5988_v31 = vld [vmem:[#allocation14 + $0xbd8] sm:$0xff]  ;;  %v17707_v37 = vcombine.high %v5987_v26, %v5991_v28 }
 0x6a7   :  { %15054 = vmatprep.subr.bf16.mxu1 %v17821_v35  ;;  %v5992_v22 = vld [vmem:[#allocation14 + $0xbf8] sm:$0xff]  ;;  %v17706_v35 = vcombine.low %v5979_v15, %v5983_v16  ;;  %v6035_v16 = vld [vmem:[#allocation14 + $0xd50] sm:$0xff] }
 0x6a8   :  { %v17835_v38 = vcombine.high %v5988_v31, %v5992_v22  ;;  %v17836_v45 = vcombine.low %v5988_v31, %v5992_v22  ;;  %v6047_v31 = vld [vmem:[#allocation14 + $0xdb0] sm:$0xff]  ;;  %v6044_v22 = vld [vmem:[#allocation14 + $0xd98] sm:$0xff] }
 0x6a9   :  { %14800 = vmatpush1.bf16.msra.mxu0 %v17694_v10  ;;  %v5999_v10 = vld [vmem:[#allocation14 + $0xc30] sm:$0xff] }
 0x6aa   :  { %15056 = vmatpush1.bf16.msra.mxu1 %v17822_v43  ;;  %14802 = vmatprep.subr.bf16.mxu0 %v17695_v61  ;;  %v5996_v43 = vld [vmem:[#allocation14 + $0xc18] sm:$0xff]  ;;  %v17709_v46 = vcombine.high %v5995_v40, %v5999_v10 }
 0x6ab   :  { %15058 = vmatprep.subr.bf16.mxu1 %v17823_v44  ;;  %v6000_v61 = vld [vmem:[#allocation14 + $0xc38] sm:$0xff]  ;;  %v17708_v44 = vcombine.low %v5987_v26, %v5991_v28  ;;  %v6043_v28 = vld [vmem:[#allocation14 + $0xd90] sm:$0xff] }
 0x6ac   :  { %v17837_v42 = vcombine.high %v5996_v43, %v6000_v61  ;;  %v17838_v52 = vcombine.low %v5996_v43, %v6000_v61  ;;  %v6051_v61 = vld [vmem:[#allocation14 + $0xdd0] sm:$0xff] }
 0x6ad   :  { %14804 = vmatpush1.bf16.msra.mxu0 %v17696_v47  ;;  %v6007_v47 = vld [vmem:[#allocation14 + $0xc70] sm:$0xff] }
 0x6ae   :  { %15060 = vmatpush1.bf16.msra.mxu1 %v17824_v48  ;;  %14806 = vmatprep.subr.bf16.mxu0 %v17697_v50  ;;  %v17710_v48 = vcombine.low %v5995_v40, %v5999_v10  ;;  %v6004_v50 = vld [vmem:[#allocation14 + $0xc58] sm:$0xff]  ;;  %v17711_v27 = vcombine.high %v6003_v21, %v6007_v47 }
 0x6af   :  { %15062 = vmatprep.subr.bf16.mxu1 %v17825_v51  ;;  %v6008_v51 = vld [vmem:[#allocation14 + $0xc78] sm:$0xff] }
 0x6b0   :  { %v17840_v0 = vcombine.low %v6004_v50, %v6008_v51 }
 0x6b1   :  { %14808 = vmatpush1.bf16.msra.mxu0 %v17698_v53  ;;  %v17839_v53 = vcombine.high %v6004_v50, %v6008_v51 }
 0x6b2   :  { %15064 = vmatpush1.bf16.msra.mxu1 %v17826_v54  ;;  %14810 = vmatprep.subr.bf16.mxu0 %v17699_v59  ;;  %v6012_v54 = vld [vmem:[#allocation14 + $0xc98] sm:$0xff] }
 0x6b3   :  { %15066 = vmatprep.subr.bf16.mxu1 %v17827_v63  ;;  %v6016_v59 = vld [vmem:[#allocation14 + $0xcb8] sm:$0xff]  ;;  %v17712_v63 = vcombine.low %v6003_v21, %v6007_v47  ;;  %v17722_v47 = vcombine.low %v6043_v28, %v6047_v31 }
 0x6b4   :  { %v17841_v41 = vcombine.high %v6012_v54, %v6016_v59  ;;  %v6056_v21 = vld [vmem:[#allocation14 + $0xdf8] sm:$0xff] }
 0x6b5   :  { %14812 = vmatpush1.bf16.msra.mxu0 %v17700_v62  ;;  %v6023_v62 = vld [vmem:[#allocation14 + $0xcf0] sm:$0xff] }
 0x6b6   :  { %15068 = vmatpush1.bf16.msra.mxu1 %v17828_v4  ;;  %14814 = vmatprep.subr.bf16.mxu0 %v17701_v8  ;;  %v6020_v4 = vld [vmem:[#allocation14 + $0xcd8] sm:$0xff]  ;;  %v17715_v3 = vcombine.high %v6019_v1, %v6023_v62 }
 0x6b7   :  { %15070 = vmatprep.subr.bf16.mxu1 %v17829_v33  ;;  %v6024_v8 = vld [vmem:[#allocation14 + $0xcf8] sm:$0xff]  ;;  %v17714_v33 = vcombine.low %v6011_v34, %v6015_v58 }
 0x6b8   :  { %v17843_v2 = vcombine.high %v6020_v4, %v6024_v8  ;;  %v6060_v34 = vld [vmem:[#allocation14 + $0xe18] sm:$0xff] }
 0x6b9   :  { %14816 = vmatpush1.bf16.msra.mxu0 %v17702_v12  ;;  %v6028_v12 = vld [vmem:[#allocation14 + $0xd18] sm:$0xff] }
 0x6ba   :  { %15072 = vmatpush1.bf16.msra.mxu1 %v17830_v25  ;;  %14818 = vmatprep.subr.bf16.mxu0 %v17703_v7  ;;  %v6032_v25 = vld [vmem:[#allocation14 + $0xd38] sm:$0xff]  ;;  %v17844_v7 = vcombine.low %v6020_v4, %v6024_v8 }
 0x6bb   :  { %15074 = vmatprep.subr.bf16.mxu1 %v17831_v14  ;;  %v17717_v14 = vcombine.high %v6027_v23, %v6031_v11  ;;  %v17845_v15 = vcombine.high %v6028_v12, %v6032_v25  ;;  %v6064_v58 = vld [vmem:[#allocation14 + $0xe38] sm:$0xff] }
 0x6bc   :  { %v17854_v4 = vcombine.low %v6060_v34, %v6064_v58 }
 0x6bd   :  { %14820 = vmatpush1.bf16.msra.mxu0 %v17704_v5  ;;  %v6040_v5 = vld [vmem:[#allocation14 + $0xd78] sm:$0xff] }
 0x6be   :  { %15076 = vmatpush1.bf16.msra.mxu1 %v17832_v19  ;;  %14822 = vmatprep.subr.bf16.mxu0 %v17705_v20  ;;  %v17718_v19 = vcombine.low %v6027_v23, %v6031_v11  ;;  %v17846_v20 = vcombine.low %v6028_v12, %v6032_v25  ;;  %v17847_v26 = vcombine.high %v6036_v18, %v6040_v5  ;;  %v6080_v23 = vld [vmem:[#allocation14 + $0xeb8] sm:$0xff] }
 0x6bf   :  { %15078 = vmatprep.subr.bf16.mxu1 %v17833_v24  ;;  %v17719_v24 = vcombine.high %v6035_v16, %v6039_v9 }
 0x6c1   :  { %14824 = vmatpush1.bf16.msra.mxu0 %v17706_v35  ;;  %v6048_v35 = vld [vmem:[#allocation14 + $0xdb8] sm:$0xff] }
 0x6c2   :  { %15080 = vmatpush1.bf16.msra.mxu1 %v17834_v17  ;;  %14826 = vmatprep.subr.bf16.mxu0 %v17707_v37  ;;  %v17720_v17 = vcombine.low %v6035_v16, %v6039_v9  ;;  %v17848_v37 = vcombine.low %v6036_v18, %v6040_v5  ;;  %v17849_v43 = vcombine.high %v6044_v22, %v6048_v35  ;;  %v6088_v16 = vld [vmem:[#allocation14 + $0xef8] sm:$0xff] }
 0x6c3   :  { %15082 = vmatprep.subr.bf16.mxu1 %v17835_v38  ;;  %v17721_v38 = vcombine.high %v6043_v28, %v6047_v31  ;;  %v6096_v28 = vld [vmem:[#allocation14 + $0xf38] sm:$0xff] }
 0x6c5   :  { %14828 = vmatpush1.bf16.msra.mxu0 %v17708_v44  ;;  %v6055_v44 = vld [vmem:[#allocation14 + $0xdf0] sm:$0xff] }
 0x6c6   :  { %15084 = vmatpush1.bf16.msra.mxu1 %v17836_v45  ;;  %14830 = vmatprep.subr.bf16.mxu0 %v17709_v46  ;;  %v17723_v50 = vcombine.high %v6051_v61, %v6055_v44 }
 0x6c7   :  { %15086 = vmatprep.subr.bf16.mxu1 %v17837_v42  ;;  %v6052_v42 = vld [vmem:[#allocation14 + $0xdd8] sm:$0xff] }
 0x6c8   :  { %7920 = vmatmul.mubr.f32.vlgmr.msra.gmra.mrb[10].mxu0 %v19280_v30  ;;  %v17851_v51 = vcombine.high %v6052_v42, %v6056_v21 }
 0x6c9   :  { %8204 = vmatmul.mubr.f32.vlgmr.msra.gmra.mrb[10].mxu1 %v19280_v30  ;;  %14832 = vmatpush1.bf16.msra.mxu0 %v17710_v48  ;;  %v17842_v30 = vcombine.low %v6012_v54, %v6016_v59  ;;  %v17850_v48 = vcombine.low %v6044_v22, %v6048_v35  ;;  %v17852_v54 = vcombine.low %v6052_v42, %v6056_v21 }
 0x6ca   :  { %7990 = vmatprep.mubr.f32.mxu0 %v19284_v49  ;;  %15088 = vmatpush1.bf16.msra.mxu1 %v17838_v52  ;;  %v6059_v52 = vld [vmem:[#allocation14 + $0xe10] sm:$0xff] }
 0x6cb   :  { %8274 = vmatprep.mubr.f32.mxu1 %v19284_v49  ;;  %14834 = vmatprep.subr.bf16.mxu0 %v17711_v27  ;;  %v17716_v49 = vcombine.low %v6019_v1, %v6023_v62  ;;  %v6063_v27 = vld [vmem:[#allocation14 + $0xe30] sm:$0xff]  ;;  %v6072_v1 = vld [vmem:[#allocation14 + $0xe78] sm:$0xff] }
 0x6cc   :  { %15090 = vmatprep.subr.bf16.mxu1 %v17839_v53  ;;  %v17724_v53 = vcombine.low %v6051_v61, %v6055_v44  ;;  %v17725_v59 = vcombine.high %v6059_v52, %v6063_v27  ;;  %v17726_v62 = vcombine.low %v6059_v52, %v6063_v27  ;;  %v6104_v61 = vld [vmem:[#allocation14 + $0xf78] sm:$0xff]  ;;  %v19321_v27 = vld [vmem:[#allocation16] sm:$0xff] }
 0x6cd   :  { %14836 = vmatpush1.bf16.msra.mxu0 %v17712_v63  ;;  %v17853_v63 = vcombine.high %v6060_v34, %v6064_v58  ;;  %v6112_v52 = vld [vmem:[#allocation14 + $0xfb8] sm:$0xff] }
 0x6ce   :  { %15092 = vmatpush1.bf16.msra.mxu1 %v17840_v0  ;;  %14838 = vmatprep.subr.bf16.mxu0 %v17713_v13  ;;  %v6067_v0 = vld [vmem:[#allocation14 + $0xe50] sm:$0xff] }
 0x6cf   :  { %15094 = vmatprep.subr.bf16.mxu1 %v17841_v41  ;;  %v6071_v13 = vld [vmem:[#allocation14 + $0xe70] sm:$0xff]  ;;  %v6068_v41 = vld [vmem:[#allocation14 + $0xe58] sm:$0xff] }
 0x6d0   :  { %v17727_v8 = vcombine.high %v6067_v0, %v6071_v13  ;;  %v17728_v11 = vcombine.low %v6067_v0, %v6071_v13  ;;  %v17856_v12 = vcombine.low %v6068_v41, %v6072_v1  ;;  %v8290_v0 = vrot.slane %v19321_v27, %v19089_v6  ;;  %v6116_v13 = vld [vmem:[#allocation14 + $0xfd8] sm:$0xff] }
 0x6d1   :  { %14840 = vmatpush1.bf16.msra.mxu0 %v17714_v33  ;;  %v17855_v33 = vcombine.high %v6068_v41, %v6072_v1  ;;  %v6120_v41 = vld [vmem:[#allocation14 + $0xff8] sm:$0xff]  ;;  %v19325_v1 = vld [vmem:[#allocation17] sm:$0xff] }
 0x6d2   :  { %15096 = vmatpush1.bf16.msra.mxu1 %v17842_v30  ;;  %14842 = vmatprep.subr.bf16.mxu0 %v17715_v3  ;;  %v6075_v30 = vld [vmem:[#allocation14 + $0xe90] sm:$0xff] }
 0x6d3   :  { %15098 = vmatprep.subr.bf16.mxu1 %v17843_v2  ;;  %v6079_v3 = vld [vmem:[#allocation14 + $0xeb0] sm:$0xff]  ;;  %v6076_v2 = vld [vmem:[#allocation14 + $0xe98] sm:$0xff] }
 0x6d4   :  { %v17729_v25 = vcombine.high %v6075_v30, %v6079_v3  ;;  %v17730_v9 = vcombine.low %v6075_v30, %v6079_v3  ;;  %v17858_v18 = vcombine.low %v6076_v2, %v6080_v23  ;;  %v8389_v30 = vld [vmem:[#allocation19] sm:$0xff] }
 0x6d5   :  { %14844 = vmatpush1.bf16.msra.mxu0 %v17716_v49  ;;  %v17857_v49 = vcombine.high %v6076_v2, %v6080_v23  ;;  %v8393_v3 = vld [vmem:[#allocation19 + $0x20] sm:$0xff]  ;;  %v8340_v23 = vrot.slane %v19325_v1, %v19089_v6 }
 0x6d6   :  { %15100 = vmatpush1.bf16.msra.mxu1 %v17844_v7  ;;  %14846 = vmatprep.subr.bf16.mxu0 %v17717_v14  ;;  %v6083_v7 = vld [vmem:[#allocation14 + $0xed0] sm:$0xff] }
 0x6d7   :  { %15102 = vmatprep.subr.bf16.mxu1 %v17845_v15  ;;  %v6087_v14 = vld [vmem:[#allocation14 + $0xef0] sm:$0xff]  ;;  %v6084_v15 = vld [vmem:[#allocation14 + $0xed8] sm:$0xff] }
 0x6d8   :  { %v17731_v5 = vcombine.high %v6083_v7, %v6087_v14  ;;  %v17732_v31 = vcombine.low %v6083_v7, %v6087_v14  ;;  %v17860_v22 = vcombine.low %v6084_v15, %v6088_v16  ;;  %v17869_v7 = vcombine.high %v8389_v30, %v8393_v3 }
 0x6d9   :  { %14848 = vmatpush1.bf16.msra.mxu0 %v17718_v19  ;;  %v17859_v19 = vcombine.high %v6084_v15, %v6088_v16  ;;  %v8397_v16 = vld [vmem:[#allocation19 + $0x40] sm:$0xff] }
 0x6da   :  { %15104 = vmatpush1.bf16.msra.mxu1 %v17846_v20  ;;  %14850 = vmatprep.subr.bf16.mxu0 %v17719_v24  ;;  %v6091_v20 = vld [vmem:[#allocation14 + $0xf10] sm:$0xff] }
 0x6db   :  { %v19313_v40 = vpop.f32.mrb[8].mxu0  ;;  %v19315_v10 = vpop.f32.mrb[8].mxu1  ;;  %15106 = vmatprep.subr.bf16.mxu1 %v17847_v26  ;;  %v6095_v24 = vld [vmem:[#allocation14 + $0xf30] sm:$0xff]  ;;  %v6092_v26 = vld [vmem:[#allocation14 + $0xf18] sm:$0xff] }
 0x6dc   :  { %v19317_v45 = vpop.f32.mrb[9].mxu0  ;;  %v19319_v46 = vpop.f32.mrb[9].mxu1  ;;  %v17733_v35 = vcombine.high %v6091_v20, %v6095_v24  ;;  %v17734_v44 = vcombine.low %v6091_v20, %v6095_v24  ;;  %v17862_v42 = vcombine.low %v6092_v26, %v6096_v28  ;;  %v8405_v24 = vld [vmem:[#allocation19 + $0x80] sm:$0xff] }
 0x6dd   :  { %14852 = vmatpush1.bf16.msra.mxu0 %v17720_v17  ;;  %v17861_v17 = vcombine.high %v6092_v26, %v6096_v28  ;;  %v8324_v2 = vmul.f32 %v8290_v0, %v19317_v45  ;;  %v8402_v45 = vld [vmem:[#allocation19 + $0x68] sm:$0xff]  ;;  %v8409_v26 = vld [vmem:[#allocation19 + $0xa0] sm:$0xff] }
 0x6de   :  { %15108 = vmatpush1.bf16.msra.mxu1 %v17848_v37  ;;  %14854 = vmatprep.subr.bf16.mxu0 %v17721_v38  ;;  %v6099_v37 = vld [vmem:[#allocation14 + $0xf50] sm:$0xff] }
 0x6df   :  { %15110 = vmatprep.subr.bf16.mxu1 %v17849_v43  ;;  %v6103_v38 = vld [vmem:[#allocation14 + $0xf70] sm:$0xff]  ;;  %v6100_v43 = vld [vmem:[#allocation14 + $0xf58] sm:$0xff]  ;;  %v8374_v15 = vadd.f32 %v8340_v23, %v8324_v2 }
 0x6e0   :  { %v17735_v21 = vcombine.high %v6099_v37, %v6103_v38  ;;  %v17736_v34 = vcombine.low %v6099_v37, %v6103_v38  ;;  %v17864_v58 = vcombine.low %v6100_v43, %v6104_v61  ;;  %v17873_v38 = vcombine.high %v8405_v24, %v8409_v26  ;;  %v8429_v0 = vld [vmem:[#allocation19 + $0x140] sm:$0xff]  ;;  %v8438_v23 = vld [vmem:[#allocation19 + $0x188] sm:$0xff] }
 0x6e1   :  { %14856 = vmatpush1.bf16.msra.mxu0 %v17722_v47  ;;  %v17863_v47 = vcombine.high %v6100_v43, %v6104_v61  ;;  %v19330_v28 = vmax.f32 %v8374_v15, 0.0  ;;  %v8413_v61 = vld [vmem:[#allocation19 + $0xc0] sm:$0xff] }
 0x6e2   :  { %15112 = vmatpush1.bf16.msra.mxu1 %v17850_v48  ;;  %14858 = vmatprep.subr.bf16.mxu0 %v17723_v50  ;;  %v6107_v48 = vld [vmem:[#allocation14 + $0xf90] sm:$0xff] }
 0x6e3   :  { %15114 = vmatprep.subr.bf16.mxu1 %v17851_v51  ;;  %v6111_v50 = vld [vmem:[#allocation14 + $0xfb0] sm:$0xff]  ;;  %v6108_v51 = vld [vmem:[#allocation14 + $0xf98] sm:$0xff] }
 0x6e4   :  { %v8441_v2 = vld [vmem:[#allocation19 + $0x1a0] sm:$0xff] }
 0x6e5   :  { %14860 = vmatpush1.bf16.msra.mxu0 %v17724_v53  ;;  %v17737_v53 = vcombine.high %v6107_v48, %v6111_v50  ;;  %v8449_v15 = vld [vmem:[#allocation19 + $0x1e0] sm:$0xff] }
 0x6e6   :  { %15116 = vmatpush1.bf16.msra.mxu1 %v17852_v54  ;;  %14862 = vmatprep.subr.bf16.mxu0 %v17725_v59  ;;  %v17865_v54 = vcombine.high %v6108_v51, %v6112_v52  ;;  %v6115_v59 = vld [vmem:[#allocation14 + $0xfd0] sm:$0xff] }
 0x6e7   :  { %15118 = vmatprep.subr.bf16.mxu1 %v17853_v63  ;;  %v6119_v63 = vld [vmem:[#allocation14 + $0xff0] sm:$0xff] }
 0x6e9   :  { %14864 = vmatpush1.bf16.msra.mxu0 %v17726_v62  ;;  %v17738_v62 = vcombine.low %v6107_v48, %v6111_v50 }
 0x6ea   :  { %15120 = vmatpush1.bf16.msra.mxu1 %v17854_v4  ;;  %14866 = vmatprep.subr.bf16.mxu0 %v17727_v8  ;;  %v17866_v4 = vcombine.low %v6108_v51, %v6112_v52  ;;  %v17739_v8 = vcombine.high %v6115_v59, %v6119_v63  ;;  %v8421_v51 = vld [vmem:[#allocation19 + $0x100] sm:$0xff] }
 0x6eb   :  { %15122 = vmatprep.subr.bf16.mxu1 %v17855_v33  ;;  %v17867_v33 = vcombine.high %v6116_v13, %v6120_v41  ;;  %v8425_v52 = vld [vmem:[#allocation19 + $0x120] sm:$0xff] }
 0x6ed   :  { %14868 = vmatpush1.bf16.msra.mxu0 %v17728_v11  ;;  %v8390_v11 = vld [vmem:[#allocation19 + $0x8] sm:$0xff] }
 0x6ee   :  { %15124 = vmatpush1.bf16.msra.mxu1 %v17856_v12  ;;  %14870 = vmatprep.subr.bf16.mxu0 %v17729_v25  ;;  %v8394_v12 = vld [vmem:[#allocation19 + $0x28] sm:$0xff]  ;;  %v17740_v25 = vcombine.low %v6115_v59, %v6119_v63  ;;  %v17877_v59 = vcombine.high %v8421_v51, %v8425_v52 }
 0x6ef   :  { %15126 = vmatprep.subr.bf16.mxu1 %v17857_v49  ;;  %v17868_v49 = vcombine.low %v6116_v13, %v6120_v41  ;;  %v17997_v14 = vcombine.high %v8390_v11, %v8394_v12  ;;  %v8433_v13 = vld [vmem:[#allocation19 + $0x160] sm:$0xff]  ;;  %v8430_v41 = vld [vmem:[#allocation19 + $0x148] sm:$0xff] }
 0x6f1   :  { %14872 = vmatpush1.bf16.msra.mxu0 %v17730_v9  ;;  %v8401_v9 = vld [vmem:[#allocation19 + $0x60] sm:$0xff] }
 0x6f2   :  { %15128 = vmatpush1.bf16.msra.mxu1 %v17858_v18  ;;  %14874 = vmatprep.subr.bf16.mxu0 %v17731_v5  ;;  %v17870_v18 = vcombine.low %v8389_v30, %v8393_v3  ;;  %v8398_v5 = vld [vmem:[#allocation19 + $0x48] sm:$0xff]  ;;  %v17871_v20 = vcombine.high %v8397_v16, %v8401_v9  ;;  %v8437_v3 = vld [vmem:[#allocation19 + $0x180] sm:$0xff] }
 0x6f3   :  { %15130 = vmatprep.subr.bf16.mxu1 %v17859_v19  ;;  %v17998_v19 = vcombine.low %v8390_v11, %v8394_v12  ;;  %v18000_v37 = vcombine.low %v8398_v5, %v8402_v45  ;;  %v8442_v11 = vld [vmem:[#allocation19 + $0x1a8] sm:$0xff]  ;;  %v17880_v12 = vcombine.low %v8429_v0, %v8433_v13 }
 0x6f5   :  { %14876 = vmatpush1.bf16.msra.mxu0 %v17732_v31  ;;  %v17999_v31 = vcombine.high %v8398_v5, %v8402_v45  ;;  %v18010_v5 = vcombine.low %v8438_v23, %v8442_v11 }
 0x6f6   :  { %15132 = vmatpush1.bf16.msra.mxu1 %v17860_v22  ;;  %14878 = vmatprep.subr.bf16.mxu0 %v17733_v35  ;;  %v8406_v22 = vld [vmem:[#allocation19 + $0x88] sm:$0xff] }
 0x6f7   :  { %15134 = vmatprep.subr.bf16.mxu1 %v17861_v17  ;;  %v8410_v35 = vld [vmem:[#allocation19 + $0xa8] sm:$0xff]  ;;  %v17872_v17 = vcombine.low %v8397_v16, %v8401_v9 }
 0x6f8   :  { %v18001_v43 = vcombine.high %v8406_v22, %v8410_v35  ;;  %v8446_v16 = vld [vmem:[#allocation19 + $0x1c8] sm:$0xff] }
 0x6f9   :  { %14880 = vmatpush1.bf16.msra.mxu0 %v17734_v44  ;;  %v8417_v44 = vld [vmem:[#allocation19 + $0xe0] sm:$0xff]  ;;  %v8450_v9 = vld [vmem:[#allocation19 + $0x1e8] sm:$0xff] }
 0x6fa   :  { %15136 = vmatpush1.bf16.msra.mxu1 %v17862_v42  ;;  %14882 = vmatprep.subr.bf16.mxu0 %v17735_v21  ;;  %v8414_v42 = vld [vmem:[#allocation19 + $0xc8] sm:$0xff]  ;;  %v17875_v48 = vcombine.high %v8413_v61, %v8417_v44 }
 0x6fb   :  { %15138 = vmatprep.subr.bf16.mxu1 %v17863_v47  ;;  %v8418_v21 = vld [vmem:[#allocation19 + $0xe8] sm:$0xff]  ;;  %v17874_v47 = vcombine.low %v8405_v24, %v8409_v26  ;;  %v8457_v24 = vld [vmem:[#allocation19 + $0x220] sm:$0xff] }
 0x6fc   :  { %v18003_v50 = vcombine.high %v8414_v42, %v8418_v21  ;;  %v8454_v26 = vld [vmem:[#allocation19 + $0x208] sm:$0xff] }
 0x6fd   :  { %14884 = vmatpush1.bf16.msra.mxu0 %v17736_v34  ;;  %v8422_v34 = vld [vmem:[#allocation19 + $0x108] sm:$0xff] }
 0x6fe   :  { %15140 = vmatpush1.bf16.msra.mxu1 %v17864_v58  ;;  %14886 = vmatprep.subr.bf16.mxu0 %v17737_v53  ;;  %v8426_v58 = vld [vmem:[#allocation19 + $0x128] sm:$0xff]  ;;  %v17876_v53 = vcombine.low %v8413_v61, %v8417_v44 }
 0x6ff   :  { %15142 = vmatprep.subr.bf16.mxu1 %v17865_v54  ;;  %v18004_v54 = vcombine.low %v8414_v42, %v8418_v21  ;;  %v18005_v63 = vcombine.high %v8422_v34, %v8426_v58  ;;  %v8462_v61 = vld [vmem:[#allocation19 + $0x248] sm:$0xff] }
 0x700   :  { %v8466_v44 = vld [vmem:[#allocation19 + $0x268] sm:$0xff] }
 0x701   :  { %14888 = vmatpush1.bf16.msra.mxu0 %v17738_v62  ;;  %v8434_v62 = vld [vmem:[#allocation19 + $0x168] sm:$0xff] }
 0x702   :  { %15144 = vmatpush1.bf16.msra.mxu1 %v17866_v4  ;;  %14890 = vmatprep.subr.bf16.mxu0 %v17739_v8  ;;  %v17878_v4 = vcombine.low %v8421_v51, %v8425_v52  ;;  %v18006_v8 = vcombine.low %v8422_v34, %v8426_v58  ;;  %v18007_v30 = vcombine.high %v8430_v41, %v8434_v62  ;;  %v8470_v51 = vld [vmem:[#allocation19 + $0x288] sm:$0xff] }
 0x703   :  { %15146 = vmatprep.subr.bf16.mxu1 %v17867_v33  ;;  %v17879_v33 = vcombine.high %v8429_v0, %v8433_v13  ;;  %v8474_v52 = vld [vmem:[#allocation19 + $0x2a8] sm:$0xff]  ;;  %v18016_v58 = vcombine.low %v8462_v61, %v8466_v44 }
 0x704   :  { %v8478_v0 = vld [vmem:[#allocation19 + $0x2c8] sm:$0xff] }
 0x705   :  { %14892 = vmatpush1.bf16.msra.mxu0 %v17740_v25  ;;  %v18008_v25 = vcombine.low %v8430_v41, %v8434_v62  ;;  %v8482_v13 = vld [vmem:[#allocation19 + $0x2e8] sm:$0xff]  ;;  %v18018_v62 = vcombine.low %v8470_v51, %v8474_v52 }
 0x706   :  { %15148 = vmatpush1.bf16.msra.mxu1 %v17868_v49  ;;  %15150 = vmatprep.subr.bf16.mxu0 %v17869_v7  ;;  %v17881_v49 = vcombine.high %v8437_v3, %v8441_v2  ;;  %v18009_v7 = vcombine.high %v8438_v23, %v8442_v11  ;;  %v18020_v11 = vcombine.low %v8478_v0, %v8482_v13 }
 0x707   :  { %15406 = vmatprep.subr.bf16.mxu1 %v17997_v14  ;;  %v8445_v14 = vld [vmem:[#allocation19 + $0x1c0] sm:$0xff] }
 0x708   :  { %7991 = vmatmul.mubr.f32.vlgmr.msra.gmra.mrb[10].mxu0 %v19295_v39  ;;  %v17883_v45 = vcombine.high %v8445_v14, %v8449_v15 }
 0x709   :  { %8275 = vmatmul.mubr.f32.vlgmr.msra.gmra.mrb[10].mxu1 %v19295_v39  ;;  %15152 = vmatpush1.bf16.msra.mxu0 %v17870_v18  ;;  %v18002_v39 = vcombine.low %v8406_v22, %v8410_v35  ;;  %v17882_v18 = vcombine.low %v8437_v3, %v8441_v2  ;;  %v17884_v22 = vcombine.low %v8445_v14, %v8449_v15  ;;  %v8486_v3 = vld [vmem:[#allocation19 + $0x308] sm:$0xff] }
 0x70a   :  { %9989 = vmatprep.mubr.f32.mxu0 %v19330_v28  ;;  %15408 = vmatpush1.bf16.msra.mxu1 %v17998_v19  ;;  %v18011_v19 = vcombine.high %v8446_v16, %v8450_v9  ;;  %v18012_v35 = vcombine.low %v8446_v16, %v8450_v9  ;;  %v8490_v2 = vld [vmem:[#allocation19 + $0x328] sm:$0xff] }
 0x70b   :  { %10273 = vmatprep.mubr.f32.mxu1 %v19330_v28  ;;  %15154 = vmatprep.subr.bf16.mxu0 %v17871_v20  ;;  %v8453_v20 = vld [vmem:[#allocation19 + $0x200] sm:$0xff]  ;;  %v8494_v14 = vld [vmem:[#allocation19 + $0x348] sm:$0xff]  ;;  %v18022_v9 = vcombine.low %v8486_v3, %v8490_v2 }
 0x70c   :  { %15410 = vmatprep.subr.bf16.mxu1 %v17999_v31  ;;  %v8458_v31 = vld [vmem:[#allocation19 + $0x228] sm:$0xff]  ;;  %v17886_v42 = vcombine.low %v8453_v20, %v8457_v24 }
 0x70d   :  { %15156 = vmatpush1.bf16.msra.mxu0 %v17872_v17  ;;  %v17885_v17 = vcombine.high %v8453_v20, %v8457_v24  ;;  %v18014_v21 = vcombine.low %v8454_v26, %v8458_v31  ;;  %v8498_v15 = vld [vmem:[#allocation19 + $0x368] sm:$0xff] }
 0x70e   :  { %15412 = vmatpush1.bf16.msra.mxu1 %v18000_v37  ;;  %15158 = vmatprep.subr.bf16.mxu0 %v17873_v38  ;;  %v18013_v37 = vcombine.high %v8454_v26, %v8458_v31  ;;  %v8461_v38 = vld [vmem:[#allocation19 + $0x240] sm:$0xff]  ;;  %v8502_v20 = vld [vmem:[#allocation19 + $0x388] sm:$0xff]  ;;  %v8286_v31 = vrot.slane %v19321_v27, %v19110_v29 }
 0x70f   :  { %15414 = vmatprep.subr.bf16.mxu1 %v18001_v43  ;;  %v8465_v43 = vld [vmem:[#allocation19 + $0x260] sm:$0xff]  ;;  %v8506_v24 = vld [vmem:[#allocation19 + $0x3a8] sm:$0xff] }
 0x710   :  { %v17888_v34 = vcombine.low %v8461_v38, %v8465_v43 }
 0x711   :  { %15160 = vmatpush1.bf16.msra.mxu0 %v17874_v47  ;;  %v17887_v47 = vcombine.high %v8461_v38, %v8465_v43  ;;  %v8513_v38 = vld [vmem:[#allocation19 + $0x3e0] sm:$0xff]  ;;  %v8298_v43 = vrot.slane %v19321_v27, %v19113_v36 }
 0x712   :  { %15416 = vmatpush1.bf16.msra.mxu1 %v18002_v39  ;;  %15162 = vmatprep.subr.bf16.mxu0 %v17875_v48  ;;  %v18015_v39 = vcombine.high %v8462_v61, %v8466_v44  ;;  %v8469_v48 = vld [vmem:[#allocation19 + $0x280] sm:$0xff]  ;;  %v8510_v61 = vld [vmem:[#allocation19 + $0x3c8] sm:$0xff] }
 0x713   :  { %15418 = vmatprep.subr.bf16.mxu1 %v18003_v50  ;;  %v8473_v50 = vld [vmem:[#allocation19 + $0x2a0] sm:$0xff]  ;;  %v8514_v44 = vld [vmem:[#allocation19 + $0x3e8] sm:$0xff] }
 0x714   :  { %v17890_v41 = vcombine.low %v8469_v48, %v8473_v50 }
 0x715   :  { %15164 = vmatpush1.bf16.msra.mxu0 %v17876_v53  ;;  %v17889_v53 = vcombine.high %v8469_v48, %v8473_v50  ;;  %v18027_v50 = vcombine.high %v8510_v61, %v8514_v44 }
 0x716   :  { %15420 = vmatpush1.bf16.msra.mxu1 %v18004_v54  ;;  %15166 = vmatprep.subr.bf16.mxu0 %v17877_v59  ;;  %v18017_v54 = vcombine.high %v8470_v51, %v8474_v52  ;;  %v8477_v59 = vld [vmem:[#allocation19 + $0x2c0] sm:$0xff] }
 0x717   :  { %15422 = vmatprep.subr.bf16.mxu1 %v18005_v63  ;;  %v8481_v63 = vld [vmem:[#allocation19 + $0x2e0] sm:$0xff] }
 0x718   :  { %v17892_v23 = vcombine.low %v8477_v59, %v8481_v63  ;;  %v8517_v51 = vld [vmem:[#allocation19 + $0x400] sm:$0xff] }
 0x719   :  { %15168 = vmatpush1.bf16.msra.mxu0 %v17878_v4  ;;  %v17891_v4 = vcombine.high %v8477_v59, %v8481_v63  ;;  %v8521_v52 = vld [vmem:[#allocation19 + $0x420] sm:$0xff] }
 0x71a   :  { %15424 = vmatpush1.bf16.msra.mxu1 %v18006_v8  ;;  %15170 = vmatprep.subr.bf16.mxu0 %v17879_v33  ;;  %v18019_v8 = vcombine.high %v8478_v0, %v8482_v13  ;;  %v8485_v33 = vld [vmem:[#allocation19 + $0x300] sm:$0xff]  ;;  %v17901_v0 = vcombine.high %v8517_v51, %v8521_v52 }
 0x71b   :  { %15426 = vmatprep.subr.bf16.mxu1 %v18007_v30  ;;  %v8489_v30 = vld [vmem:[#allocation19 + $0x320] sm:$0xff] }
 0x71c   :  { %v17894_v16 = vcombine.low %v8485_v33, %v8489_v30 }
 0x71d   :  { %15172 = vmatpush1.bf16.msra.mxu0 %v17880_v12  ;;  %v17893_v12 = vcombine.high %v8485_v33, %v8489_v30  ;;  %v8530_v33 = vld [vmem:[#allocation19 + $0x468] sm:$0xff] }
 0x71e   :  { %15428 = vmatpush1.bf16.msra.mxu1 %v18008_v25  ;;  %15174 = vmatprep.subr.bf16.mxu0 %v17881_v49  ;;  %v18021_v25 = vcombine.high %v8486_v3, %v8490_v2  ;;  %v8493_v49 = vld [vmem:[#allocation19 + $0x340] sm:$0xff] }
 0x71f   :  { %15430 = vmatprep.subr.bf16.mxu1 %v18009_v7  ;;  %v8497_v7 = vld [vmem:[#allocation19 + $0x360] sm:$0xff] }
 0x720   :  { %v17896_v26 = vcombine.low %v8493_v49, %v8497_v7 }
 0x721   :  { %15176 = vmatpush1.bf16.msra.mxu0 %v17882_v18  ;;  %v17895_v18 = vcombine.high %v8493_v49, %v8497_v7  ;;  %v8534_v49 = vld [vmem:[#allocation19 + $0x488] sm:$0xff] }
 0x722   :  { %15432 = vmatpush1.bf16.msra.mxu1 %v18010_v5  ;;  %15178 = vmatprep.subr.bf16.mxu0 %v17883_v45  ;;  %v18023_v5 = vcombine.high %v8494_v14, %v8498_v15  ;;  %v8501_v45 = vld [vmem:[#allocation19 + $0x380] sm:$0xff]  ;;  %v8538_v7 = vld [vmem:[#allocation19 + $0x4a8] sm:$0xff] }
 0x723   :  { %15434 = vmatprep.subr.bf16.mxu1 %v18011_v19  ;;  %v8505_v19 = vld [vmem:[#allocation19 + $0x3a0] sm:$0xff] }
 0x725   :  { %15180 = vmatpush1.bf16.msra.mxu0 %v17884_v22  ;;  %v18024_v22 = vcombine.low %v8494_v14, %v8498_v15 }
 0x726   :  { %15436 = vmatpush1.bf16.msra.mxu1 %v18012_v35  ;;  %15182 = vmatprep.subr.bf16.mxu0 %v17885_v17  ;;  %v17897_v35 = vcombine.high %v8501_v45, %v8505_v19  ;;  %v18025_v17 = vcombine.high %v8502_v20, %v8506_v24 }
 0x727   :  { %15438 = vmatprep.subr.bf16.mxu1 %v18013_v37  ;;  %v8509_v37 = vld [vmem:[#allocation19 + $0x3c0] sm:$0xff] }
 0x728   :  { %v17899_v48 = vcombine.high %v8509_v37, %v8513_v38  ;;  %v17900_v59 = vcombine.low %v8509_v37, %v8513_v38  ;;  %v8554_v37 = vld [vmem:[#allocation19 + $0x528] sm:$0xff] }
 0x729   :  { %15184 = vmatpush1.bf16.msra.mxu0 %v17886_v42  ;;  %v8336_v42 = vrot.slane %v19325_v1, %v19110_v29 }
 0x72a   :  { %15440 = vmatpush1.bf16.msra.mxu1 %v18014_v21  ;;  %15186 = vmatprep.subr.bf16.mxu0 %v17887_v47  ;;  %v17898_v21 = vcombine.low %v8501_v45, %v8505_v19  ;;  %v8323_v47 = vmul.f32 %v8286_v31, %v19313_v40  ;;  %v18028_v40 = vcombine.low %v8510_v61, %v8514_v44  ;;  %v8542_v45 = vld [vmem:[#allocation19 + $0x4c8] sm:$0xff] }
 0x72b   :  { %15442 = vmatprep.subr.bf16.mxu1 %v18015_v39  ;;  %v18026_v39 = vcombine.low %v8502_v20, %v8506_v24  ;;  %v8546_v19 = vld [vmem:[#allocation19 + $0x4e8] sm:$0xff]  ;;  %v18034_v24 = vcombine.low %v8534_v49, %v8538_v7 }
 0x72c   :  { %v8373_v63 = vadd.f32 %v8336_v42, %v8323_v47  ;;  %v18035_v31 = vcombine.high %v8542_v45, %v8546_v19  ;;  %v8557_v42 = vld [vmem:[#allocation19 + $0x540] sm:$0xff]  ;;  %v8558_v47 = vld [vmem:[#allocation19 + $0x548] sm:$0xff] }
 0x72d   :  { %15188 = vmatpush1.bf16.msra.mxu0 %v17888_v34  ;;  %v8326_v34 = vmul.f32 %v8298_v43, %v19319_v46  ;;  %v8526_v46 = vld [vmem:[#allocation19 + $0x448] sm:$0xff]  ;;  %v18036_v43 = vcombine.low %v8542_v45, %v8546_v19 }
 0x72e   :  { %15444 = vmatpush1.bf16.msra.mxu1 %v18016_v58  ;;  %15190 = vmatprep.subr.bf16.mxu0 %v17889_v53  ;;  %v8348_v58 = vrot.slane %v19325_v1, %v19113_v36  ;;  %v8518_v53 = vld [vmem:[#allocation19 + $0x408] sm:$0xff]  ;;  %v19346_v30 = vmax.f32 %v8373_v63, 0.0  ;;  %v18032_v15 = vcombine.low %v8526_v46, %v8530_v33 }
 0x72f   :  { %15446 = vmatprep.subr.bf16.mxu1 %v18017_v54  ;;  %v8522_v54 = vld [vmem:[#allocation19 + $0x428] sm:$0xff] }
 0x730   :  { %v18029_v13 = vcombine.high %v8518_v53, %v8522_v54  ;;  %v18030_v3 = vcombine.low %v8518_v53, %v8522_v54  ;;  %v8566_v53 = vld [vmem:[#allocation19 + $0x588] sm:$0xff] }
 0x731   :  { %15192 = vmatpush1.bf16.msra.mxu0 %v17890_v41  ;;  %v8376_v41 = vadd.f32 %v8348_v58, %v8326_v34  ;;  %v8565_v34 = vld [vmem:[#allocation19 + $0x580] sm:$0xff]  ;;  %v8570_v54 = vld [vmem:[#allocation19 + $0x5a8] sm:$0xff] }
 0x732   :  { %15448 = vmatpush1.bf16.msra.mxu1 %v18018_v62  ;;  %15194 = vmatprep.subr.bf16.mxu0 %v17891_v4  ;;  %v8525_v62 = vld [vmem:[#allocation19 + $0x440] sm:$0xff] }
 0x733   :  { %15450 = vmatprep.subr.bf16.mxu1 %v18019_v8  ;;  %v8529_v4 = vld [vmem:[#allocation19 + $0x460] sm:$0xff]  ;;  %v17902_v8 = vcombine.low %v8517_v51, %v8521_v52 }
 0x734   :  { %v17903_v2 = vcombine.high %v8525_v62, %v8529_v4  ;;  %v17904_v14 = vcombine.low %v8525_v62, %v8529_v4  ;;  %v8569_v58 = vld [vmem:[#allocation19 + $0x5a0] sm:$0xff]  ;;  %v8574_v62 = vld [vmem:[#allocation19 + $0x5c8] sm:$0xff] }
 0x735   :  { %15196 = vmatpush1.bf16.msra.mxu0 %v17892_v23  ;;  %v8533_v23 = vld [vmem:[#allocation19 + $0x480] sm:$0xff]  ;;  %v8578_v4 = vld [vmem:[#allocation19 + $0x5e8] sm:$0xff] }
 0x736   :  { %15452 = vmatpush1.bf16.msra.mxu1 %v18020_v11  ;;  %15198 = vmatprep.subr.bf16.mxu0 %v17893_v12  ;;  %v8537_v11 = vld [vmem:[#allocation19 + $0x4a0] sm:$0xff]  ;;  %v19348_v12 = vmax.f32 %v8376_v41, 0.0 }
 0x737   :  { %15454 = vmatprep.subr.bf16.mxu1 %v18021_v25  ;;  %v18031_v25 = vcombine.high %v8526_v46, %v8530_v33  ;;  %v17906_v20 = vcombine.low %v8533_v23, %v8537_v11  ;;  %v8577_v41 = vld [vmem:[#allocation19 + $0x5e0] sm:$0xff]  ;;  %v18042_v46 = vcombine.low %v8566_v53, %v8570_v54 }
 0x739   :  { %15200 = vmatpush1.bf16.msra.mxu0 %v17894_v16  ;;  %v17905_v16 = vcombine.high %v8533_v23, %v8537_v11  ;;  %v8585_v23 = vld [vmem:[#allocation19 + $0x620] sm:$0xff]  ;;  %v8582_v11 = vld [vmem:[#allocation19 + $0x608] sm:$0xff] }
 0x73a   :  { %15456 = vmatpush1.bf16.msra.mxu1 %v18022_v9  ;;  %15202 = vmatprep.subr.bf16.mxu0 %v17895_v18  ;;  %v18033_v9 = vcombine.high %v8534_v49, %v8538_v7  ;;  %v8541_v18 = vld [vmem:[#allocation19 + $0x4c0] sm:$0xff]  ;;  %v18044_v7 = vcombine.low %v8574_v62, %v8578_v4 }
 0x73b   :  { %15458 = vmatprep.subr.bf16.mxu1 %v18023_v5  ;;  %v8545_v5 = vld [vmem:[#allocation19 + $0x4e0] sm:$0xff] }
 0x73c   :  { %v17908_v38 = vcombine.low %v8541_v18, %v8545_v5 }
 0x73d   :  { %15204 = vmatpush1.bf16.msra.mxu0 %v17896_v26  ;;  %v17907_v26 = vcombine.high %v8541_v18, %v8545_v5  ;;  %v8590_v18 = vld [vmem:[#allocation19 + $0x648] sm:$0xff] }
 0x73e   :  { %15460 = vmatpush1.bf16.msra.mxu1 %v18024_v22  ;;  %15206 = vmatprep.subr.bf16.mxu0 %v17897_v35  ;;  %v8549_v22 = vld [vmem:[#allocation19 + $0x500] sm:$0xff]  ;;  %v8594_v5 = vld [vmem:[#allocation19 + $0x668] sm:$0xff] }
 0x73f   :  { %15462 = vmatprep.subr.bf16.mxu1 %v18025_v17  ;;  %v8553_v35 = vld [vmem:[#allocation19 + $0x520] sm:$0xff]  ;;  %v8550_v17 = vld [vmem:[#allocation19 + $0x508] sm:$0xff] }
 0x740   :  { %v17909_v61 = vcombine.high %v8549_v22, %v8553_v35  ;;  %v18037_v44 = vcombine.high %v8550_v17, %v8554_v37 }
 0x741   :  { %15208 = vmatpush1.bf16.msra.mxu0 %v17898_v21  ;;  %v8561_v21 = vld [vmem:[#allocation19 + $0x560] sm:$0xff] }
 0x742   :  { %15464 = vmatpush1.bf16.msra.mxu1 %v18026_v39  ;;  %15210 = vmatprep.subr.bf16.mxu0 %v17899_v48  ;;  %v8562_v39 = vld [vmem:[#allocation19 + $0x568] sm:$0xff]  ;;  %v17910_v48 = vcombine.low %v8549_v22, %v8553_v35  ;;  %v17911_v51 = vcombine.high %v8557_v42, %v8561_v21 }
 0x743   :  { %15466 = vmatprep.subr.bf16.mxu1 %v18027_v50  ;;  %v18038_v50 = vcombine.low %v8550_v17, %v8554_v37  ;;  %v18039_v52 = vcombine.high %v8558_v47, %v8562_v39  ;;  %v18040_v63 = vcombine.low %v8558_v47, %v8562_v39  ;;  %v8598_v22 = vld [vmem:[#allocation19 + $0x688] sm:$0xff]  ;;  %v18048_v37 = vcombine.low %v8590_v18, %v8594_v5 }
 0x744   :  { %v8602_v35 = vld [vmem:[#allocation19 + $0x6a8] sm:$0xff] }
 0x745   :  { %15212 = vmatpush1.bf16.msra.mxu0 %v17900_v59  ;;  %v17912_v59 = vcombine.low %v8557_v42, %v8561_v21  ;;  %v8606_v42 = vld [vmem:[#allocation19 + $0x6c8] sm:$0xff]  ;;  %v18050_v39 = vcombine.low %v8598_v22, %v8602_v35 }
 0x746   :  { %15468 = vmatpush1.bf16.msra.mxu1 %v18028_v40  ;;  %15214 = vmatprep.subr.bf16.mxu0 %v17901_v0  ;;  %v17913_v40 = vcombine.high %v8565_v34, %v8569_v58  ;;  %v18041_v0 = vcombine.high %v8566_v53, %v8570_v54  ;;  %v8610_v21 = vld [vmem:[#allocation19 + $0x6e8] sm:$0xff] }
 0x747   :  { %15470 = vmatprep.subr.bf16.mxu1 %v18029_v13  ;;  %v8573_v13 = vld [vmem:[#allocation19 + $0x5c0] sm:$0xff]  ;;  %v18052_v54 = vcombine.low %v8606_v42, %v8610_v21 }
 0x748   :  { %9990 = vmatmul.mubr.f32.vlgmr.msra.gmra.mrb[12].mxu0 %v19346_v30  ;;  %v17915_v33 = vcombine.high %v8573_v13, %v8577_v41  ;;  %v17916_v49 = vcombine.low %v8573_v13, %v8577_v41  ;;  %v8622_v13 = vld [vmem:[#allocation19 + $0x748] sm:$0xff] }
 0x749   :  { %10274 = vmatmul.mubr.f32.vlgmr.msra.gmra.mrb[12].mxu1 %v19346_v30  ;;  %15216 = vmatpush1.bf16.msra.mxu0 %v17902_v8  ;;  %v17914_v8 = vcombine.low %v8565_v34, %v8569_v58  ;;  %v8614_v34 = vld [vmem:[#allocation19 + $0x708] sm:$0xff] }
 0x74a   :  { %10060 = vmatprep.mubr.f32.mxu0 %v19348_v12  ;;  %15472 = vmatpush1.bf16.msra.mxu1 %v18030_v3  ;;  %v18043_v3 = vcombine.high %v8574_v62, %v8578_v4  ;;  %v8618_v58 = vld [vmem:[#allocation19 + $0x728] sm:$0xff] }
 0x74b   :  { %10344 = vmatprep.mubr.f32.mxu1 %v19348_v12  ;;  %15218 = vmatprep.subr.bf16.mxu0 %v17903_v2  ;;  %v8581_v2 = vld [vmem:[#allocation19 + $0x600] sm:$0xff]  ;;  %v8626_v41 = vld [vmem:[#allocation19 + $0x768] sm:$0xff]  ;;  %v18054_v4 = vcombine.low %v8614_v34, %v8618_v58 }
 0x74c   :  { %15474 = vmatprep.subr.bf16.mxu1 %v18031_v25  ;;  %v8586_v25 = vld [vmem:[#allocation19 + $0x628] sm:$0xff]  ;;  %v17918_v45 = vcombine.low %v8581_v2, %v8585_v23 }
 0x74d   :  { %15220 = vmatpush1.bf16.msra.mxu0 %v17904_v14  ;;  %v17917_v14 = vcombine.high %v8581_v2, %v8585_v23  ;;  %v18046_v19 = vcombine.low %v8582_v11, %v8586_v25  ;;  %v8630_v2 = vld [vmem:[#allocation19 + $0x788] sm:$0xff] }
 0x74e   :  { %15476 = vmatpush1.bf16.msra.mxu1 %v18032_v15  ;;  %15222 = vmatprep.subr.bf16.mxu0 %v17905_v16  ;;  %v18045_v15 = vcombine.high %v8582_v11, %v8586_v25  ;;  %v8589_v16 = vld [vmem:[#allocation19 + $0x640] sm:$0xff]  ;;  %v8634_v23 = vld [vmem:[#allocation19 + $0x7a8] sm:$0xff]  ;;  %v8294_v25 = vrot.slane %v19321_v27, %v19134_v60 }
 0x74f   :  { %15478 = vmatprep.subr.bf16.mxu1 %v18033_v9  ;;  %v8593_v9 = vld [vmem:[#allocation19 + $0x660] sm:$0xff]  ;;  %v18058_v27 = vcombine.low %v8630_v2, %v8634_v23 }
 0x750   :  { %v17920_v17 = vcombine.low %v8589_v16, %v8593_v9 }
 0x751   :  { %15224 = vmatpush1.bf16.msra.mxu0 %v17906_v20  ;;  %v17919_v20 = vcombine.high %v8589_v16, %v8593_v9  ;;  %v8641_v16 = vld [vmem:[#allocation19 + $0x7e0] sm:$0xff]  ;;  %v8638_v9 = vld [vmem:[#allocation19 + $0x7c8] sm:$0xff] }
 0x752   :  { %15480 = vmatpush1.bf16.msra.mxu1 %v18034_v24  ;;  %15226 = vmatprep.subr.bf16.mxu0 %v17907_v26  ;;  %v18047_v24 = vcombine.high %v8590_v18, %v8594_v5  ;;  %v8597_v26 = vld [vmem:[#allocation19 + $0x680] sm:$0xff]  ;;  %v8642_v18 = vld [vmem:[#allocation19 + $0x7e8] sm:$0xff]  ;;  %v8344_v5 = vrot.slane %v19325_v1, %v19134_v60 }
 0x753   :  { %15482 = vmatprep.subr.bf16.mxu1 %v18035_v31  ;;  %v8601_v31 = vld [vmem:[#allocation19 + $0x6a0] sm:$0xff]  ;;  %v18060_v1 = vcombine.low %v8638_v9, %v8642_v18 }
 0x754   :  { %v17922_v47 = vcombine.low %v8597_v26, %v8601_v31 }
 0x755   :  { %15228 = vmatpush1.bf16.msra.mxu0 %v17908_v38  ;;  %v17921_v38 = vcombine.high %v8597_v26, %v8601_v31  ;;  %v8645_v26 = vld [vmem:[#allocation19 + $0x800] sm:$0xff] }
 0x756   :  { %15484 = vmatpush1.bf16.msra.mxu1 %v18036_v43  ;;  %15230 = vmatprep.subr.bf16.mxu0 %v17909_v61  ;;  %v18049_v43 = vcombine.high %v8598_v22, %v8602_v35  ;;  %v8605_v61 = vld [vmem:[#allocation19 + $0x6c0] sm:$0xff]  ;;  %v8646_v22 = vld [vmem:[#allocation19 + $0x808] sm:$0xff] }
 0x757   :  { %15486 = vmatprep.subr.bf16.mxu1 %v18037_v44  ;;  %v8609_v44 = vld [vmem:[#allocation19 + $0x6e0] sm:$0xff]  ;;  %v8650_v35 = vld [vmem:[#allocation19 + $0x828] sm:$0xff] }
 0x758   :  { %v17924_v53 = vcombine.low %v8605_v61, %v8609_v44  ;;  %v8649_v31 = vld [vmem:[#allocation19 + $0x820] sm:$0xff] }
 0x759   :  { %15232 = vmatpush1.bf16.msra.mxu0 %v17910_v48  ;;  %v17923_v48 = vcombine.high %v8605_v61, %v8609_v44  ;;  %v8657_v61 = vld [vmem:[#allocation19 + $0x860] sm:$0xff]  ;;  %v8654_v44 = vld [vmem:[#allocation19 + $0x848] sm:$0xff] }
 0x75a   :  { %15488 = vmatpush1.bf16.msra.mxu1 %v18038_v50  ;;  %15234 = vmatprep.subr.bf16.mxu0 %v17911_v51  ;;  %v18051_v50 = vcombine.high %v8606_v42, %v8610_v21  ;;  %v8613_v51 = vld [vmem:[#allocation19 + $0x700] sm:$0xff]  ;;  %v8658_v42 = vld [vmem:[#allocation19 + $0x868] sm:$0xff]  ;;  %v17934_v21 = vcombine.low %v8645_v26, %v8649_v31 }
 0x75b   :  { %15490 = vmatprep.subr.bf16.mxu1 %v18039_v52  ;;  %v8617_v52 = vld [vmem:[#allocation19 + $0x720] sm:$0xff] }
 0x75c   :  { %v17926_v62 = vcombine.low %v8613_v51, %v8617_v52 }
 0x75d   :  { %15236 = vmatpush1.bf16.msra.mxu0 %v17912_v59  ;;  %v17925_v59 = vcombine.high %v8613_v51, %v8617_v52  ;;  %v8661_v51 = vld [vmem:[#allocation19 + $0x880] sm:$0xff] }
 0x75e   :  { %15492 = vmatpush1.bf16.msra.mxu1 %v18040_v63  ;;  %15238 = vmatprep.subr.bf16.mxu0 %v17913_v40  ;;  %v18053_v63 = vcombine.high %v8614_v34, %v8618_v58  ;;  %v8621_v40 = vld [vmem:[#allocation19 + $0x740] sm:$0xff]  ;;  %v8662_v34 = vld [vmem:[#allocation19 + $0x888] sm:$0xff] }
 0x75f   :  { %15494 = vmatprep.subr.bf16.mxu1 %v18041_v0  ;;  %v8625_v0 = vld [vmem:[#allocation19 + $0x760] sm:$0xff]  ;;  %v8666_v58 = vld [vmem:[#allocation19 + $0x8a8] sm:$0xff] }
 0x760   :  { %v17928_v11 = vcombine.low %v8621_v40, %v8625_v0  ;;  %v8665_v52 = vld [vmem:[#allocation19 + $0x8a0] sm:$0xff] }
 0x761   :  { %15240 = vmatpush1.bf16.msra.mxu0 %v17914_v8  ;;  %v17927_v8 = vcombine.high %v8621_v40, %v8625_v0  ;;  %v8669_v40 = vld [vmem:[#allocation19 + $0x8c0] sm:$0xff] }
 0x762   :  { %15496 = vmatpush1.bf16.msra.mxu1 %v18042_v46  ;;  %15242 = vmatprep.subr.bf16.mxu0 %v17915_v33  ;;  %v18055_v46 = vcombine.high %v8622_v13, %v8626_v41  ;;  %v8629_v33 = vld [vmem:[#allocation19 + $0x780] sm:$0xff] }
 0x763   :  { %15498 = vmatprep.subr.bf16.mxu1 %v18043_v3  ;;  %v8633_v3 = vld [vmem:[#allocation19 + $0x7a0] sm:$0xff] }
 0x764   :  { %v8673_v0 = vld [vmem:[#allocation19 + $0x8e0] sm:$0xff] }
 0x765   :  { %15244 = vmatpush1.bf16.msra.mxu0 %v17916_v49  ;;  %v18056_v49 = vcombine.low %v8622_v13, %v8626_v41  ;;  %v8670_v13 = vld [vmem:[#allocation19 + $0x8c8] sm:$0xff] }
 0x766   :  { %15500 = vmatpush1.bf16.msra.mxu1 %v18044_v7  ;;  %15246 = vmatprep.subr.bf16.mxu0 %v17917_v14  ;;  %v17929_v7 = vcombine.high %v8629_v33, %v8633_v3  ;;  %v18057_v14 = vcombine.high %v8630_v2, %v8634_v23  ;;  %v8674_v41 = vld [vmem:[#allocation19 + $0x8e8] sm:$0xff] }
 0x767   :  { %15502 = vmatprep.subr.bf16.mxu1 %v18045_v15  ;;  %v8637_v15 = vld [vmem:[#allocation19 + $0x7c0] sm:$0xff]  ;;  %v8678_v2 = vld [vmem:[#allocation19 + $0x908] sm:$0xff] }
 0x768   :  { %v8682_v23 = vld [vmem:[#allocation19 + $0x928] sm:$0xff] }
 0x769   :  { %15248 = vmatpush1.bf16.msra.mxu0 %v17918_v45  ;;  %v17930_v45 = vcombine.low %v8629_v33, %v8633_v3  ;;  %v8677_v33 = vld [vmem:[#allocation19 + $0x900] sm:$0xff] }
 0x76a   :  { %15504 = vmatpush1.bf16.msra.mxu1 %v18046_v19  ;;  %15250 = vmatprep.subr.bf16.mxu0 %v17919_v20  ;;  %v8325_v19 = vmul.f32 %v8294_v25, %v19315_v10  ;;  %v17931_v20 = vcombine.high %v8637_v15, %v8641_v16  ;;  %v8653_v10 = vld [vmem:[#allocation19 + $0x840] sm:$0xff]  ;;  %v18068_v25 = vcombine.low %v8670_v13, %v8674_v41 }
 0x76b   :  { %15506 = vmatprep.subr.bf16.mxu1 %v18047_v24  ;;  %v18059_v24 = vcombine.high %v8638_v9, %v8642_v18  ;;  %v8681_v3 = vld [vmem:[#allocation19 + $0x920] sm:$0xff]  ;;  %v8690_v9 = vld [vmem:[#allocation19 + $0x968] sm:$0xff] }
 0x76c   :  { %v17942_v18 = vcombine.low %v8677_v33, %v8681_v3 }
 0x76d   :  { %15252 = vmatpush1.bf16.msra.mxu0 %v17920_v17  ;;  %v17932_v17 = vcombine.low %v8637_v15, %v8641_v16  ;;  %v8689_v15 = vld [vmem:[#allocation19 + $0x960] sm:$0xff]  ;;  %v8686_v16 = vld [vmem:[#allocation19 + $0x948] sm:$0xff] }
 0x76e   :  { %15508 = vmatpush1.bf16.msra.mxu1 %v18048_v37  ;;  %15254 = vmatprep.subr.bf16.mxu0 %v17921_v38  ;;  %v8375_v37 = vadd.f32 %v8344_v5, %v8325_v19  ;;  %v17933_v38 = vcombine.high %v8645_v26, %v8649_v31  ;;  %v18070_v5 = vcombine.low %v8678_v2, %v8682_v23  ;;  %v8698_v26 = vld [vmem:[#allocation19 + $0x9a8] sm:$0xff] }
 0x76f   :  { %15510 = vmatprep.subr.bf16.mxu1 %v18049_v43  ;;  %v18061_v43 = vcombine.high %v8646_v22, %v8650_v35  ;;  %v18071_v19 = vcombine.high %v8686_v16, %v8690_v9 }
 0x771   :  { %15256 = vmatpush1.bf16.msra.mxu0 %v17922_v47  ;;  %v19359_v47 = vmax.f32 %v8375_v37, 0.0  ;;  %v8701_v37 = vld [vmem:[#allocation19 + $0x9c0] sm:$0xff] }
 0x772   :  { %15512 = vmatpush1.bf16.msra.mxu1 %v18050_v39  ;;  %15258 = vmatprep.subr.bf16.mxu0 %v17923_v48  ;;  %v18062_v39 = vcombine.low %v8646_v22, %v8650_v35  ;;  %v17935_v48 = vcombine.high %v8653_v10, %v8657_v61  ;;  %v18072_v22 = vcombine.low %v8686_v16, %v8690_v9 }
 0x773   :  { %15514 = vmatprep.subr.bf16.mxu1 %v18051_v50  ;;  %v18063_v50 = vcombine.high %v8654_v44, %v8658_v42 }
 0x775   :  { %15260 = vmatpush1.bf16.msra.mxu0 %v17924_v53  ;;  %v17936_v53 = vcombine.low %v8653_v10, %v8657_v61 }
 0x776   :  { %15516 = vmatpush1.bf16.msra.mxu1 %v18052_v54  ;;  %15262 = vmatprep.subr.bf16.mxu0 %v17925_v59  ;;  %v18064_v54 = vcombine.low %v8654_v44, %v8658_v42  ;;  %v17937_v59 = vcombine.high %v8661_v51, %v8665_v52 }
 0x777   :  { %15518 = vmatprep.subr.bf16.mxu1 %v18053_v63  ;;  %v18065_v63 = vcombine.high %v8662_v34, %v8666_v58 }
 0x779   :  { %15264 = vmatpush1.bf16.msra.mxu0 %v17926_v62  ;;  %v17938_v62 = vcombine.low %v8661_v51, %v8665_v52 }
 0x77a   :  { %15520 = vmatpush1.bf16.msra.mxu1 %v18054_v4  ;;  %15266 = vmatprep.subr.bf16.mxu0 %v17927_v8  ;;  %v18066_v4 = vcombine.low %v8662_v34, %v8666_v58  ;;  %v17939_v8 = vcombine.high %v8669_v40, %v8673_v0 }
 0x77b   :  { %15522 = vmatprep.subr.bf16.mxu1 %v18055_v46  ;;  %v18067_v46 = vcombine.high %v8670_v13, %v8674_v41 }
 0x77d   :  { %15268 = vmatpush1.bf16.msra.mxu0 %v17928_v11  ;;  %v17940_v11 = vcombine.low %v8669_v40, %v8673_v0 }
 0x77e   :  { %15524 = vmatpush1.bf16.msra.mxu1 %v18056_v49  ;;  %15270 = vmatprep.subr.bf16.mxu0 %v17929_v7  ;;  %v17941_v49 = vcombine.high %v8677_v33, %v8681_v3  ;;  %v18069_v7 = vcombine.high %v8678_v2, %v8682_v23 }
 0x77f   :  { %15526 = vmatprep.subr.bf16.mxu1 %v18057_v14  ;;  %v8685_v14 = vld [vmem:[#allocation19 + $0x940] sm:$0xff] }
 0x780   :  { %v17944_v31 = vcombine.low %v8685_v14, %v8689_v15 }
 0x781   :  { %15272 = vmatpush1.bf16.msra.mxu0 %v17930_v45  ;;  %v17943_v45 = vcombine.high %v8685_v14, %v8689_v15 }
 0x782   :  { %15528 = vmatpush1.bf16.msra.mxu1 %v18058_v27  ;;  %15274 = vmatprep.subr.bf16.mxu0 %v17931_v20  ;;  %v8693_v27 = vld [vmem:[#allocation19 + $0x980] sm:$0xff] }
 0x783   :  { %15530 = vmatprep.subr.bf16.mxu1 %v18059_v24  ;;  %v8697_v20 = vld [vmem:[#allocation19 + $0x9a0] sm:$0xff]  ;;  %v8694_v24 = vld [vmem:[#allocation19 + $0x988] sm:$0xff] }
 0x784   :  { %v17945_v35 = vcombine.high %v8693_v27, %v8697_v20  ;;  %v17946_v10 = vcombine.low %v8693_v27, %v8697_v20  ;;  %v18074_v61 = vcombine.low %v8694_v24, %v8698_v26 }
 0x785   :  { %15276 = vmatpush1.bf16.msra.mxu0 %v17932_v17  ;;  %v18073_v17 = vcombine.high %v8694_v24, %v8698_v26 }
 0x786   :  { %15532 = vmatpush1.bf16.msra.mxu1 %v18060_v1  ;;  %15278 = vmatprep.subr.bf16.mxu0 %v17933_v38  ;;  %v8705_v1 = vld [vmem:[#allocation19 + $0x9e0] sm:$0xff]  ;;  %v8702_v38 = vld [vmem:[#allocation19 + $0x9c8] sm:$0xff] }
 0x787   :  { %15534 = vmatprep.subr.bf16.mxu1 %v18061_v43  ;;  %v8706_v43 = vld [vmem:[#allocation19 + $0x9e8] sm:$0xff]  ;;  %v17947_v44 = vcombine.high %v8701_v37, %v8705_v1  ;;  %v17948_v51 = vcombine.low %v8701_v37, %v8705_v1 }
 0x788   :  { %10061 = vmatmul.mubr.f32.vlgmr.msra.gmra.mrb[12].mxu0 %v19359_v47  ;;  %v18075_v42 = vcombine.high %v8702_v38, %v8706_v43  ;;  %v18076_v52 = vcombine.low %v8702_v38, %v8706_v43 }
 0x789   :  { %10345 = vmatmul.mubr.f32.vlgmr.msra.gmra.mrb[12].mxu1 %v19359_v47  ;;  %15280 = vmatpush1.bf16.msra.mxu0 %v17934_v21  ;;  %v8709_v21 = vld [vmem:[#allocation19 + $0xa00] sm:$0xff] }
 0x78a   :  { %15536 = vmatpush1.bf16.msra.mxu1 %v18062_v39  ;;  %15282 = vmatprep.subr.bf16.mxu0 %v17935_v48  ;;  %v8713_v39 = vld [vmem:[#allocation19 + $0xa20] sm:$0xff]  ;;  %v8710_v48 = vld [vmem:[#allocation19 + $0xa08] sm:$0xff] }
 0x78b   :  { %15538 = vmatprep.subr.bf16.mxu1 %v18063_v50  ;;  %v8714_v50 = vld [vmem:[#allocation19 + $0xa28] sm:$0xff]  ;;  %v17949_v34 = vcombine.high %v8709_v21, %v8713_v39  ;;  %v17950_v40 = vcombine.low %v8709_v21, %v8713_v39 }
 0x78c   :  { %v18077_v58 = vcombine.high %v8710_v48, %v8714_v50  ;;  %v18078_v0 = vcombine.low %v8710_v48, %v8714_v50 }
 0x78d   :  { %15284 = vmatpush1.bf16.msra.mxu0 %v17936_v53  ;;  %v8717_v53 = vld [vmem:[#allocation19 + $0xa40] sm:$0xff] }
 0x78e   :  { %15540 = vmatpush1.bf16.msra.mxu1 %v18064_v54  ;;  %15286 = vmatprep.subr.bf16.mxu0 %v17937_v59  ;;  %v8721_v54 = vld [vmem:[#allocation19 + $0xa60] sm:$0xff]  ;;  %v8718_v59 = vld [vmem:[#allocation19 + $0xa48] sm:$0xff] }
 0x78f   :  { %15542 = vmatprep.subr.bf16.mxu1 %v18065_v63  ;;  %v8722_v63 = vld [vmem:[#allocation19 + $0xa68] sm:$0xff]  ;;  %v17951_v13 = vcombine.high %v8717_v53, %v8721_v54  ;;  %v17952_v33 = vcombine.low %v8717_v53, %v8721_v54 }
 0x790   :  { %v18079_v41 = vcombine.high %v8718_v59, %v8722_v63  ;;  %v18080_v3 = vcombine.low %v8718_v59, %v8722_v63 }
 0x791   :  { %15288 = vmatpush1.bf16.msra.mxu0 %v17938_v62  ;;  %v8725_v62 = vld [vmem:[#allocation19 + $0xa80] sm:$0xff] }
 0x792   :  { %15544 = vmatpush1.bf16.msra.mxu1 %v18066_v4  ;;  %15290 = vmatprep.subr.bf16.mxu0 %v17939_v8  ;;  %v8729_v4 = vld [vmem:[#allocation19 + $0xaa0] sm:$0xff]  ;;  %v8726_v8 = vld [vmem:[#allocation19 + $0xa88] sm:$0xff] }
 0x793   :  { %15546 = vmatprep.subr.bf16.mxu1 %v18067_v46  ;;  %v8730_v46 = vld [vmem:[#allocation19 + $0xaa8] sm:$0xff]  ;;  %v17953_v2 = vcombine.high %v8725_v62, %v8729_v4  ;;  %v17954_v14 = vcombine.low %v8725_v62, %v8729_v4 }
 0x794   :  { %v18081_v23 = vcombine.high %v8726_v8, %v8730_v46  ;;  %v18082_v15 = vcombine.low %v8726_v8, %v8730_v46 }
 0x795   :  { %15292 = vmatpush1.bf16.msra.mxu0 %v17940_v11  ;;  %v8733_v11 = vld [vmem:[#allocation19 + $0xac0] sm:$0xff] }
 0x796   :  { %15548 = vmatpush1.bf16.msra.mxu1 %v18068_v25  ;;  %15294 = vmatprep.subr.bf16.mxu0 %v17941_v49  ;;  %v8737_v25 = vld [vmem:[#allocation19 + $0xae0] sm:$0xff]  ;;  %v8734_v49 = vld [vmem:[#allocation19 + $0xac8] sm:$0xff] }
 0x797   :  { %15550 = vmatprep.subr.bf16.mxu1 %v18069_v7  ;;  %v8738_v7 = vld [vmem:[#allocation19 + $0xae8] sm:$0xff]  ;;  %v17955_v16 = vcombine.high %v8733_v11, %v8737_v25  ;;  %v17956_v27 = vcombine.low %v8733_v11, %v8737_v25 }
 0x798   :  { %v18083_v9 = vcombine.high %v8734_v49, %v8738_v7  ;;  %v18084_v20 = vcombine.low %v8734_v49, %v8738_v7 }
 0x799   :  { %15296 = vmatpush1.bf16.msra.mxu0 %v17942_v18  ;;  %v8741_v18 = vld [vmem:[#allocation19 + $0xb00] sm:$0xff] }
 0x79a   :  { %15552 = vmatpush1.bf16.msra.mxu1 %v18070_v5  ;;  %15298 = vmatprep.subr.bf16.mxu0 %v17943_v45  ;;  %v8745_v5 = vld [vmem:[#allocation19 + $0xb20] sm:$0xff]  ;;  %v8742_v45 = vld [vmem:[#allocation19 + $0xb08] sm:$0xff] }
 0x79b   :  { %15554 = vmatprep.subr.bf16.mxu1 %v18071_v19  ;;  %v8746_v19 = vld [vmem:[#allocation19 + $0xb28] sm:$0xff]  ;;  %v17957_v24 = vcombine.high %v8741_v18, %v8745_v5  ;;  %v17958_v37 = vcombine.low %v8741_v18, %v8745_v5 }
 0x79c   :  { %v18085_v26 = vcombine.high %v8742_v45, %v8746_v19  ;;  %v18086_v1 = vcombine.low %v8742_v45, %v8746_v19 }
 0x79d   :  { %15300 = vmatpush1.bf16.msra.mxu0 %v17944_v31  ;;  %v8749_v31 = vld [vmem:[#allocation19 + $0xb40] sm:$0xff] }
 0x79e   :  { %15556 = vmatpush1.bf16.msra.mxu1 %v18072_v22  ;;  %15302 = vmatprep.subr.bf16.mxu0 %v17945_v35  ;;  %v8753_v22 = vld [vmem:[#allocation19 + $0xb60] sm:$0xff]  ;;  %v8750_v35 = vld [vmem:[#allocation19 + $0xb48] sm:$0xff] }
 0x79f   :  { %15558 = vmatprep.subr.bf16.mxu1 %v18073_v17  ;;  %v8754_v17 = vld [vmem:[#allocation19 + $0xb68] sm:$0xff]  ;;  %v17959_v38 = vcombine.high %v8749_v31, %v8753_v22  ;;  %v17960_v21 = vcombine.low %v8749_v31, %v8753_v22 }
 0x7a0   :  { %v18087_v43 = vcombine.high %v8750_v35, %v8754_v17  ;;  %v18088_v39 = vcombine.low %v8750_v35, %v8754_v17  ;;  %v8782_v31 = vld [vmem:[#allocation19 + $0xc48] sm:$0xff] }
 0x7a1   :  { %15304 = vmatpush1.bf16.msra.mxu0 %v17946_v10  ;;  %v8757_v10 = vld [vmem:[#allocation19 + $0xb80] sm:$0xff]  ;;  %v8786_v22 = vld [vmem:[#allocation19 + $0xc68] sm:$0xff] }
 0x7a2   :  { %15560 = vmatpush1.bf16.msra.mxu1 %v18074_v61  ;;  %15306 = vmatprep.subr.bf16.mxu0 %v17947_v44  ;;  %v8761_v61 = vld [vmem:[#allocation19 + $0xba0] sm:$0xff]  ;;  %v8758_v44 = vld [vmem:[#allocation19 + $0xb88] sm:$0xff] }
 0x7a3   :  { %15562 = vmatprep.subr.bf16.mxu1 %v18075_v42  ;;  %v8762_v42 = vld [vmem:[#allocation19 + $0xba8] sm:$0xff]  ;;  %v17961_v48 = vcombine.high %v8757_v10, %v8761_v61  ;;  %v17962_v53 = vcombine.low %v8757_v10, %v8761_v61  ;;  %v18095_v10 = vcombine.high %v8782_v31, %v8786_v22  ;;  %v8793_v61 = vld [vmem:[#allocation19 + $0xca0] sm:$0xff] }
 0x7a4   :  { %v18089_v50 = vcombine.high %v8758_v44, %v8762_v42  ;;  %v18090_v54 = vcombine.low %v8758_v44, %v8762_v42  ;;  %v8790_v44 = vld [vmem:[#allocation19 + $0xc88] sm:$0xff] }
 0x7a5   :  { %15308 = vmatpush1.bf16.msra.mxu0 %v17948_v51  ;;  %v8765_v51 = vld [vmem:[#allocation19 + $0xbc0] sm:$0xff]  ;;  %v8794_v42 = vld [vmem:[#allocation19 + $0xca8] sm:$0xff] }
 0x7a6   :  { %15564 = vmatpush1.bf16.msra.mxu1 %v18076_v52  ;;  %15310 = vmatprep.subr.bf16.mxu0 %v17949_v34  ;;  %v8769_v52 = vld [vmem:[#allocation19 + $0xbe0] sm:$0xff]  ;;  %v8766_v34 = vld [vmem:[#allocation19 + $0xbc8] sm:$0xff] }
 0x7a7   :  { %15566 = vmatprep.subr.bf16.mxu1 %v18077_v58  ;;  %v8770_v58 = vld [vmem:[#allocation19 + $0xbe8] sm:$0xff]  ;;  %v17963_v59 = vcombine.high %v8765_v51, %v8769_v52  ;;  %v17964_v62 = vcombine.low %v8765_v51, %v8769_v52  ;;  %v18097_v51 = vcombine.high %v8790_v44, %v8794_v42  ;;  %v8797_v52 = vld [vmem:[#allocation19 + $0xcc0] sm:$0xff] }
 0x7a8   :  { %v18091_v63 = vcombine.high %v8766_v34, %v8770_v58  ;;  %v18092_v4 = vcombine.low %v8766_v34, %v8770_v58  ;;  %v8801_v34 = vld [vmem:[#allocation19 + $0xce0] sm:$0xff]  ;;  %v8798_v58 = vld [vmem:[#allocation19 + $0xcc8] sm:$0xff] }
 0x7a9   :  { %15312 = vmatpush1.bf16.msra.mxu0 %v17950_v40  ;;  %v8773_v40 = vld [vmem:[#allocation19 + $0xc00] sm:$0xff] }
 0x7aa   :  { %15568 = vmatpush1.bf16.msra.mxu1 %v18078_v0  ;;  %15314 = vmatprep.subr.bf16.mxu0 %v17951_v13  ;;  %v8777_v0 = vld [vmem:[#allocation19 + $0xc20] sm:$0xff]  ;;  %v8774_v13 = vld [vmem:[#allocation19 + $0xc08] sm:$0xff] }
 0x7ab   :  { %15570 = vmatprep.subr.bf16.mxu1 %v18079_v41  ;;  %v8778_v41 = vld [vmem:[#allocation19 + $0xc28] sm:$0xff]  ;;  %v17965_v8 = vcombine.high %v8773_v40, %v8777_v0  ;;  %v17966_v17 = vcombine.low %v8773_v40, %v8777_v0  ;;  %v8805_v0 = vld [vmem:[#allocation19 + $0xd00] sm:$0xff] }
 0x7ac   :  { %v18093_v46 = vcombine.high %v8774_v13, %v8778_v41 }
 0x7ad   :  { %15316 = vmatpush1.bf16.msra.mxu0 %v17952_v33  ;;  %v19363_v33 = vld [vmem:[#allocation16] sm:$0xff] }
 0x7ae   :  { %15572 = vmatpush1.bf16.msra.mxu1 %v18080_v3  ;;  %15318 = vmatprep.subr.bf16.mxu0 %v17953_v2  ;;  %v8302_v3 = vrot.slane %v19363_v33, %v19146_v55  ;;  %v8306_v2 = vrot.slane %v19363_v33, %v19149_v56  ;;  %v8314_v25 = vrot.slane %v19363_v33, %v19152_v57 }
 0x7af   :  { %15574 = vmatprep.subr.bf16.mxu1 %v18081_v23  ;;  %v19369_v23 = vld [vmem:[#allocation17] sm:$0xff] }
 0x7b0   :  { %v8352_v11 = vrot.slane %v19369_v23, %v19146_v55  ;;  %v8356_v7 = vrot.slane %v19369_v23, %v19149_v56 }
 0x7b1   :  { %15320 = vmatpush1.bf16.msra.mxu0 %v17954_v14 }
 0x7b2   :  { %15576 = vmatpush1.bf16.msra.mxu1 %v18082_v15  ;;  %15322 = vmatprep.subr.bf16.mxu0 %v17955_v16 }
 0x7b3   :  { %15578 = vmatprep.subr.bf16.mxu1 %v18083_v9  ;;  %v8364_v9 = vrot.slane %v19369_v23, %v19152_v57 }
 0x7b5   :  { %15324 = vmatpush1.bf16.msra.mxu0 %v17956_v27 }
 0x7b6   :  { %15580 = vmatpush1.bf16.msra.mxu1 %v18084_v20  ;;  %15326 = vmatprep.subr.bf16.mxu0 %v17957_v24  ;;  %v8781_v20 = vld [vmem:[#allocation19 + $0xc40] sm:$0xff] }
 0x7b7   :  { %15582 = vmatprep.subr.bf16.mxu1 %v18085_v26  ;;  %v8785_v26 = vld [vmem:[#allocation19 + $0xc60] sm:$0xff] }
 0x7b9   :  { %15328 = vmatpush1.bf16.msra.mxu0 %v17958_v37  ;;  %v18094_v37 = vcombine.low %v8774_v13, %v8778_v41  ;;  %v8809_v13 = vld [vmem:[#allocation19 + $0xd20] sm:$0xff]  ;;  %v8806_v41 = vld [vmem:[#allocation19 + $0xd08] sm:$0xff] }
 0x7ba   :  { %15584 = vmatpush1.bf16.msra.mxu1 %v18086_v1  ;;  %15330 = vmatprep.subr.bf16.mxu0 %v17959_v38  ;;  %v8789_v38 = vld [vmem:[#allocation19 + $0xc80] sm:$0xff] }
 0x7bb   :  { %15586 = vmatprep.subr.bf16.mxu1 %v18087_v43  ;;  %v17967_v43 = vcombine.high %v8781_v20, %v8785_v26 }
 0x7bd   :  { %15332 = vmatpush1.bf16.msra.mxu0 %v17960_v21 }
 0x7be   :  { %15588 = vmatpush1.bf16.msra.mxu1 %v18088_v39  ;;  %15334 = vmatprep.subr.bf16.mxu0 %v17961_v48  ;;  %v17968_v39 = vcombine.low %v8781_v20, %v8785_v26  ;;  %v18096_v48 = vcombine.low %v8782_v31, %v8786_v22  ;;  %v8829_v31 = vld [vmem:[#allocation19 + $0xdc0] sm:$0xff] }
 0x7bf   :  { %15590 = vmatprep.subr.bf16.mxu1 %v18089_v50  ;;  %v17969_v50 = vcombine.high %v8789_v38, %v8793_v61  ;;  %v8833_v22 = vld [vmem:[#allocation19 + $0xde0] sm:$0xff] }
 0x7c1   :  { %15336 = vmatpush1.bf16.msra.mxu0 %v17962_v53  ;;  %v8802_v53 = vld [vmem:[#allocation19 + $0xce8] sm:$0xff] }
 0x7c2   :  { %15592 = vmatpush1.bf16.msra.mxu1 %v18090_v54  ;;  %15338 = vmatprep.subr.bf16.mxu0 %v17963_v59  ;;  %v17970_v54 = vcombine.low %v8789_v38, %v8793_v61  ;;  %v18098_v59 = vcombine.low %v8790_v44, %v8794_v42  ;;  %v18099_v40 = vcombine.high %v8798_v58, %v8802_v53  ;;  %v8837_v44 = vld [vmem:[#allocation19 + $0xe00] sm:$0xff] }
 0x7c3   :  { %15594 = vmatprep.subr.bf16.mxu1 %v18091_v63  ;;  %v17971_v63 = vcombine.high %v8797_v52, %v8801_v34  ;;  %v8841_v42 = vld [vmem:[#allocation19 + $0xe20] sm:$0xff] }
 0x7c5   :  { %15340 = vmatpush1.bf16.msra.mxu0 %v17964_v62  ;;  %v8810_v62 = vld [vmem:[#allocation19 + $0xd28] sm:$0xff] }
 0x7c6   :  { %15596 = vmatpush1.bf16.msra.mxu1 %v18092_v4  ;;  %15342 = vmatprep.subr.bf16.mxu0 %v17965_v8  ;;  %v17972_v4 = vcombine.low %v8797_v52, %v8801_v34  ;;  %v18100_v8 = vcombine.low %v8798_v58, %v8802_v53  ;;  %v17981_v52 = vcombine.high %v8837_v44, %v8841_v42  ;;  %v8845_v58 = vld [vmem:[#allocation19 + $0xe40] sm:$0xff] }
 0x7c7   :  { %15598 = vmatprep.subr.bf16.mxu1 %v18093_v46  ;;  %v17973_v46 = vcombine.high %v8805_v0, %v8809_v13  ;;  %v8849_v53 = vld [vmem:[#allocation19 + $0xe60] sm:$0xff] }
 0x7db   :  { %v7992_v49 = vpop.f32.mrb[10].mxu0 }
 0x7dc   :  { %v8327_v14 = vmul.f32 %v8302_v3, %v7992_v49  ;;  %v19377_v15 = vpop.f32.mrb[10].mxu1  ;;  %v7994_v16 = vpop.f32.mrb[11].mxu0  ;;  %v18101_v3 = vcombine.high %v8806_v41, %v8810_v62  ;;  %v8818_v49 = vld [vmem:[#allocation19 + $0xd68] sm:$0xff] }
 0x7dd   :  { %v8328_v18 = vmul.f32 %v8306_v2, %v7994_v16  ;;  %v8278_v5 = vpop.f32.mrb[11].mxu1  ;;  %v8813_v2 = vld [vmem:[#allocation19 + $0xd40] sm:$0xff] }
 0x7de   :  { %v8377_v45 = vadd.f32 %v8352_v11, %v8327_v14  ;;  %v8330_v19 = vmul.f32 %v8314_v25, %v8278_v5  ;;  %v8817_v11 = vld [vmem:[#allocation19 + $0xd60] sm:$0xff]  ;;  %v8814_v25 = vld [vmem:[#allocation19 + $0xd48] sm:$0xff]  ;;  %v18102_v14 = vcombine.low %v8806_v41, %v8810_v62 }
 0x7df   :  { %v8378_v27 = vadd.f32 %v8356_v7, %v8328_v18  ;;  %v17974_v7 = vcombine.low %v8805_v0, %v8809_v13  ;;  %v17975_v16 = vcombine.high %v8813_v2, %v8817_v11  ;;  %v8821_v18 = vld [vmem:[#allocation19 + $0xd80] sm:$0xff]  ;;  %v18104_v20 = vcombine.low %v8814_v25, %v8818_v49 }
 0x7e0   :  { %v8380_v24 = vadd.f32 %v8364_v9, %v8330_v19  ;;  %v19383_v1 = vmax.f32 %v8377_v45, 0.0  ;;  %v18103_v9 = vcombine.high %v8814_v25, %v8818_v49  ;;  %v8825_v5 = vld [vmem:[#allocation19 + $0xda0] sm:$0xff]  ;;  %v8822_v45 = vld [vmem:[#allocation19 + $0xd88] sm:$0xff]  ;;  %v17983_v0 = vcombine.high %v8845_v58, %v8849_v53 }
 0x7e1   :  { %v19381_v35 = vmax.f32 %v8378_v27, 0.0  ;;  %v8826_v19 = vld [vmem:[#allocation19 + $0xda8] sm:$0xff]  ;;  %v17976_v27 = vcombine.low %v8813_v2, %v8817_v11  ;;  %v17978_v38 = vcombine.low %v8821_v18, %v8825_v5  ;;  %v8853_v41 = vld [vmem:[#allocation19 + $0xe80] sm:$0xff] }
 0x7e2   :  { %v19387_v21 = vmax.f32 %v8380_v24, 0.0  ;;  %v17977_v24 = vcombine.high %v8821_v18, %v8825_v5  ;;  %v18105_v26 = vcombine.high %v8822_v45, %v8826_v19  ;;  %v8857_v62 = vld [vmem:[#allocation19 + $0xea0] sm:$0xff] }
 0x7e3   :  { %10131 = vmatprep.mubr.f32.mxu0 %v19381_v35  ;;  %10415 = vmatprep.mubr.f32.mxu1 %v19381_v35  ;;  %v17985_v2 = vcombine.high %v8853_v41, %v8857_v62  ;;  %v8861_v25 = vld [vmem:[#allocation19 + $0xec0] sm:$0xff] }
 0x7e4   :  { %10132 = vmatmul.mubr.f32.vlgmr.msra.gmra.mrb[12].mxu0 %v19383_v1  ;;  %10416 = vmatmul.mubr.f32.vlgmr.msra.gmra.mrb[12].mxu1 %v19383_v1  ;;  %v8865_v49 = vld [vmem:[#allocation19 + $0xee0] sm:$0xff] }
 0x7e5   :  { %15344 = vmatpush1.bf16.msra.mxu0 %v17966_v17  ;;  %15600 = vmatpush1.bf16.msra.mxu1 %v18094_v37  ;;  %v8830_v17 = vld [vmem:[#allocation19 + $0xdc8] sm:$0xff]  ;;  %v17987_v18 = vcombine.high %v8861_v25, %v8865_v49 }
 0x7e6   :  { %10202 = vmatprep.mubr.f32.mxu0 %v19387_v21  ;;  %10486 = vmatprep.mubr.f32.mxu1 %v19387_v21  ;;  %v8834_v37 = vld [vmem:[#allocation19 + $0xde8] sm:$0xff] }
 0x7e7   :  { %15346 = vmatprep.subr.bf16.mxu0 %v17967_v43  ;;  %15602 = vmatprep.subr.bf16.mxu1 %v18095_v10  ;;  %v18106_v43 = vcombine.low %v8822_v45, %v8826_v19  ;;  %v17979_v10 = vcombine.high %v8829_v31, %v8833_v22  ;;  %v18107_v61 = vcombine.high %v8830_v17, %v8834_v37  ;;  %v8869_v45 = vld [vmem:[#allocation19 + $0xf00] sm:$0xff] }
 0x7e8   :  { %v8873_v19 = vld [vmem:[#allocation19 + $0xf20] sm:$0xff] }
 0x7e9   :  { %15348 = vmatpush1.bf16.msra.mxu0 %v17968_v39  ;;  %15604 = vmatpush1.bf16.msra.mxu1 %v18096_v48  ;;  %v8838_v39 = vld [vmem:[#allocation19 + $0xe08] sm:$0xff] }
 0x7ea   :  { %15350 = vmatprep.subr.bf16.mxu0 %v17969_v50  ;;  %15606 = vmatprep.subr.bf16.mxu1 %v18097_v51  ;;  %v8842_v48 = vld [vmem:[#allocation19 + $0xe28] sm:$0xff]  ;;  %v17980_v50 = vcombine.low %v8829_v31, %v8833_v22  ;;  %v18108_v51 = vcombine.low %v8830_v17, %v8834_v37  ;;  %v17989_v31 = vcombine.high %v8869_v45, %v8873_v19  ;;  %v8877_v17 = vld [vmem:[#allocation19 + $0xf40] sm:$0xff] }
 0x7eb   :  { %v18109_v34 = vcombine.high %v8838_v39, %v8842_v48  ;;  %v8881_v37 = vld [vmem:[#allocation19 + $0xf60] sm:$0xff] }
 0x7ed   :  { %15352 = vmatpush1.bf16.msra.mxu0 %v17970_v54  ;;  %15608 = vmatpush1.bf16.msra.mxu1 %v18098_v59  ;;  %v8846_v54 = vld [vmem:[#allocation19 + $0xe48] sm:$0xff] }
 0x7ee   :  { %15354 = vmatprep.subr.bf16.mxu0 %v17971_v63  ;;  %15610 = vmatprep.subr.bf16.mxu1 %v18099_v40  ;;  %v8850_v59 = vld [vmem:[#allocation19 + $0xe68] sm:$0xff]  ;;  %v17982_v63 = vcombine.low %v8837_v44, %v8841_v42  ;;  %v18110_v40 = vcombine.low %v8838_v39, %v8842_v48  ;;  %v17991_v44 = vcombine.high %v8877_v17, %v8881_v37  ;;  %v8885_v39 = vld [vmem:[#allocation19 + $0xf80] sm:$0xff] }
 0x7ef   :  { %v18111_v13 = vcombine.high %v8846_v54, %v8850_v59  ;;  %v8889_v48 = vld [vmem:[#allocation19 + $0xfa0] sm:$0xff] }
 0x7f1   :  { %15356 = vmatpush1.bf16.msra.mxu0 %v17972_v4  ;;  %15612 = vmatpush1.bf16.msra.mxu1 %v18100_v8  ;;  %v8854_v4 = vld [vmem:[#allocation19 + $0xe88] sm:$0xff] }
 0x7f2   :  { %15358 = vmatprep.subr.bf16.mxu0 %v17973_v46  ;;  %15614 = vmatprep.subr.bf16.mxu1 %v18101_v3  ;;  %v8858_v8 = vld [vmem:[#allocation19 + $0xea8] sm:$0xff]  ;;  %v17984_v46 = vcombine.low %v8845_v58, %v8849_v53  ;;  %v18112_v3 = vcombine.low %v8846_v54, %v8850_v59  ;;  %v8310_v58 = vrot.slane %v19363_v33, %v19185_v32  ;;  %v8893_v59 = vld [vmem:[#allocation19 + $0xfc0] sm:$0xff] }
 0x7f3   :  { %v18113_v11 = vcombine.high %v8854_v4, %v8858_v8  ;;  %v17993_v53 = vcombine.high %v8885_v39, %v8889_v48 }
 0x7f5   :  { %15360 = vmatpush1.bf16.msra.mxu0 %v17974_v7  ;;  %15616 = vmatpush1.bf16.msra.mxu1 %v18102_v14  ;;  %v8862_v7 = vld [vmem:[#allocation19 + $0xec8] sm:$0xff] }
 0x7f6   :  { %15362 = vmatprep.subr.bf16.mxu0 %v17975_v16  ;;  %15618 = vmatprep.subr.bf16.mxu1 %v18103_v9  ;;  %v8866_v14 = vld [vmem:[#allocation19 + $0xee8] sm:$0xff]  ;;  %v17986_v16 = vcombine.low %v8853_v41, %v8857_v62  ;;  %v18114_v9 = vcombine.low %v8854_v4, %v8858_v8  ;;  %v17994_v41 = vcombine.low %v8885_v39, %v8889_v48 }
 0x7f7   :  { %v18115_v5 = vcombine.high %v8862_v7, %v8866_v14  ;;  %v8329_v4 = vmul.f32 %v8310_v58, %v19377_v15  ;;  %v8400_v15 = vld [vmem:[#allocation19 + $0x58] sm:$0xff] }
 0x7f8   :  { %v8428_v58 = vld [vmem:[#allocation19 + $0x138] sm:$0xff] }
 0x7f9   :  { %15364 = vmatpush1.bf16.msra.mxu0 %v17976_v27  ;;  %15620 = vmatpush1.bf16.msra.mxu1 %v18104_v20  ;;  %v8870_v27 = vld [vmem:[#allocation19 + $0xf08] sm:$0xff] }
 0x7fa   :  { %15366 = vmatprep.subr.bf16.mxu0 %v17977_v24  ;;  %15622 = vmatprep.subr.bf16.mxu1 %v18105_v26  ;;  %v8874_v20 = vld [vmem:[#allocation19 + $0xf28] sm:$0xff]  ;;  %v17988_v24 = vcombine.low %v8861_v25, %v8865_v49  ;;  %v18116_v26 = vcombine.low %v8862_v7, %v8866_v14 }
 0x7fb   :  { %v18117_v22 = vcombine.high %v8870_v27, %v8874_v20 }
 0x7fd   :  { %15368 = vmatpush1.bf16.msra.mxu0 %v17978_v38  ;;  %15624 = vmatpush1.bf16.msra.mxu1 %v18106_v43  ;;  %v8878_v38 = vld [vmem:[#allocation19 + $0xf48] sm:$0xff] }
 0x7fe   :  { %15370 = vmatprep.subr.bf16.mxu0 %v17979_v10  ;;  %15626 = vmatprep.subr.bf16.mxu1 %v18107_v61  ;;  %v8882_v43 = vld [vmem:[#allocation19 + $0xf68] sm:$0xff]  ;;  %v17990_v10 = vcombine.low %v8869_v45, %v8873_v19  ;;  %v18118_v61 = vcombine.low %v8870_v27, %v8874_v20 }
 0x7ff   :  { %v18119_v42 = vcombine.high %v8878_v38, %v8882_v43 }
 0x801   :  { %15372 = vmatpush1.bf16.msra.mxu0 %v17980_v50  ;;  %15628 = vmatpush1.bf16.msra.mxu1 %v18108_v51  ;;  %v8886_v50 = vld [vmem:[#allocation19 + $0xf88] sm:$0xff] }
 0x802   :  { %15374 = vmatprep.subr.bf16.mxu0 %v17981_v52  ;;  %15630 = vmatprep.subr.bf16.mxu1 %v18109_v34  ;;  %v8890_v51 = vld [vmem:[#allocation19 + $0xfa8] sm:$0xff]  ;;  %v17992_v52 = vcombine.low %v8877_v17, %v8881_v37  ;;  %v18120_v34 = vcombine.low %v8878_v38, %v8882_v43 }
 0x803   :  { %v18121_v54 = vcombine.high %v8886_v50, %v8890_v51  ;;  %v18122_v62 = vcombine.low %v8886_v50, %v8890_v51 }
 0x805   :  { %15376 = vmatpush1.bf16.msra.mxu0 %v17982_v63  ;;  %15632 = vmatpush1.bf16.msra.mxu1 %v18110_v40  ;;  %v8897_v63 = vld [vmem:[#allocation19 + $0xfe0] sm:$0xff]  ;;  %v8894_v40 = vld [vmem:[#allocation19 + $0xfc8] sm:$0xff] }
 0x806   :  { %15378 = vmatprep.subr.bf16.mxu0 %v17983_v0  ;;  %15634 = vmatprep.subr.bf16.mxu1 %v18111_v13  ;;  %v8898_v0 = vld [vmem:[#allocation19 + $0xfe8] sm:$0xff]  ;;  %v8360_v13 = vrot.slane %v19369_v23, %v19185_v32  ;;  %v17995_v33 = vcombine.high %v8893_v59, %v8897_v63  ;;  %v17996_v25 = vcombine.low %v8893_v59, %v8897_v63 }
 0x807   :  { %v18123_v8 = vcombine.high %v8894_v40, %v8898_v0  ;;  %v18124_v49 = vcombine.low %v8894_v40, %v8898_v0  ;;  %v8431_v40 = vld [vmem:[#allocation19 + $0x150] sm:$0xff] }
 0x808   :  { %v8379_v7 = vadd.f32 %v8360_v13, %v8329_v4  ;;  %v8435_v0 = vld [vmem:[#allocation19 + $0x170] sm:$0xff]  ;;  %v8432_v13 = vld [vmem:[#allocation19 + $0x158] sm:$0xff] }
 0x809   :  { %15380 = vmatpush1.bf16.msra.mxu0 %v17984_v46  ;;  %15636 = vmatpush1.bf16.msra.mxu1 %v18112_v3  ;;  %v8391_v46 = vld [vmem:[#allocation19 + $0x10] sm:$0xff] }
 0x80a   :  { %15382 = vmatprep.subr.bf16.mxu0 %v17985_v2  ;;  %15638 = vmatprep.subr.bf16.mxu1 %v18113_v11  ;;  %v8395_v3 = vld [vmem:[#allocation19 + $0x30] sm:$0xff]  ;;  %v8392_v2 = vld [vmem:[#allocation19 + $0x18] sm:$0xff]  ;;  %v19398_v45 = vmax.f32 %v8379_v7, 0.0 }
 0x80b   :  { %v8396_v11 = vld [vmem:[#allocation19 + $0x38] sm:$0xff]  ;;  %v18125_v23 = vcombine.high %v8391_v46, %v8395_v3 }
 0x80c   :  { %v18253_v14 = vcombine.high %v8392_v2, %v8396_v11  ;;  %v18254_v19 = vcombine.low %v8392_v2, %v8396_v11  ;;  %v8440_v2 = vld [vmem:[#allocation19 + $0x198] sm:$0xff] }
 0x80d   :  { %15384 = vmatpush1.bf16.msra.mxu0 %v17986_v16  ;;  %15640 = vmatpush1.bf16.msra.mxu1 %v18114_v9  ;;  %v8399_v16 = vld [vmem:[#allocation19 + $0x50] sm:$0xff]  ;;  %v8444_v11 = vld [vmem:[#allocation19 + $0x1b8] sm:$0xff] }
 0x80e   :  { %15386 = vmatprep.subr.bf16.mxu0 %v17987_v18  ;;  %15642 = vmatprep.subr.bf16.mxu1 %v18115_v5  ;;  %v8403_v9 = vld [vmem:[#allocation19 + $0x70] sm:$0xff]  ;;  %v8404_v18 = vld [vmem:[#allocation19 + $0x78] sm:$0xff]  ;;  %v18126_v5 = vcombine.low %v8391_v46, %v8395_v3 }
 0x80f   :  { %v18127_v27 = vcombine.high %v8399_v16, %v8403_v9  ;;  %v18255_v20 = vcombine.high %v8400_v15, %v8404_v18  ;;  %v18128_v17 = vcombine.low %v8399_v16, %v8403_v9  ;;  %v18256_v37 = vcombine.low %v8400_v15, %v8404_v18  ;;  %v8439_v46 = vld [vmem:[#allocation19 + $0x190] sm:$0xff]  ;;  %v8448_v9 = vld [vmem:[#allocation19 + $0x1d8] sm:$0xff] }
 0x810   :  { %v8443_v3 = vld [vmem:[#allocation19 + $0x1b0] sm:$0xff]  ;;  %v8452_v15 = vld [vmem:[#allocation19 + $0x1f8] sm:$0xff] }
 0x811   :  { %15388 = vmatpush1.bf16.msra.mxu0 %v17988_v24  ;;  %15644 = vmatpush1.bf16.msra.mxu1 %v18116_v26  ;;  %v8407_v24 = vld [vmem:[#allocation19 + $0x90] sm:$0xff]  ;;  %v18137_v7 = vcombine.high %v8439_v46, %v8443_v3  ;;  %v18138_v18 = vcombine.low %v8439_v46, %v8443_v3  ;;  %v8488_v3 = vld [vmem:[#allocation19 + $0x318] sm:$0xff] }
 0x812   :  { %15390 = vmatprep.subr.bf16.mxu0 %v17989_v31  ;;  %15646 = vmatprep.subr.bf16.mxu1 %v18117_v22  ;;  %v8411_v26 = vld [vmem:[#allocation19 + $0xb0] sm:$0xff]  ;;  %v8408_v31 = vld [vmem:[#allocation19 + $0x98] sm:$0xff] }
 0x813   :  { %v8412_v22 = vld [vmem:[#allocation19 + $0xb8] sm:$0xff]  ;;  %v18129_v38 = vcombine.high %v8407_v24, %v8411_v26  ;;  %v18130_v39 = vcombine.low %v8407_v24, %v8411_v26  ;;  %v8451_v16 = vld [vmem:[#allocation19 + $0x1f0] sm:$0xff] }
 0x814   :  { %v18257_v43 = vcombine.high %v8408_v31, %v8412_v22  ;;  %v18258_v48 = vcombine.low %v8408_v31, %v8412_v22  ;;  %v8459_v24 = vld [vmem:[#allocation19 + $0x230] sm:$0xff]  ;;  %v8456_v26 = vld [vmem:[#allocation19 + $0x218] sm:$0xff] }
 0x815   :  { %15392 = vmatpush1.bf16.msra.mxu0 %v17990_v10  ;;  %15648 = vmatpush1.bf16.msra.mxu1 %v18118_v61  ;;  %v8415_v10 = vld [vmem:[#allocation19 + $0xd0] sm:$0xff]  ;;  %v8460_v31 = vld [vmem:[#allocation19 + $0x238] sm:$0xff] }
 0x816   :  { %15394 = vmatprep.subr.bf16.mxu0 %v17991_v44  ;;  %15650 = vmatprep.subr.bf16.mxu1 %v18119_v42  ;;  %v8419_v61 = vld [vmem:[#allocation19 + $0xf0] sm:$0xff]  ;;  %v8416_v44 = vld [vmem:[#allocation19 + $0xd8] sm:$0xff] }
 0x817   :  { %v8420_v42 = vld [vmem:[#allocation19 + $0xf8] sm:$0xff]  ;;  %v18131_v50 = vcombine.high %v8415_v10, %v8419_v61  ;;  %v8491_v46 = vld [vmem:[#allocation19 + $0x330] sm:$0xff] }
 0x818   :  { %v18259_v51 = vcombine.high %v8416_v44, %v8420_v42 }
 0x819   :  { %15396 = vmatpush1.bf16.msra.mxu0 %v17992_v52  ;;  %15652 = vmatpush1.bf16.msra.mxu1 %v18120_v34  ;;  %v8423_v52 = vld [vmem:[#allocation19 + $0x110] sm:$0xff] }
 0x81a   :  { %15398 = vmatprep.subr.bf16.mxu0 %v17993_v53  ;;  %15654 = vmatprep.subr.bf16.mxu1 %v18121_v54  ;;  %v8427_v34 = vld [vmem:[#allocation19 + $0x130] sm:$0xff]  ;;  %v18132_v53 = vcombine.low %v8415_v10, %v8419_v61  ;;  %v18260_v54 = vcombine.low %v8416_v44, %v8420_v42  ;;  %v8464_v61 = vld [vmem:[#allocation19 + $0x258] sm:$0xff] }
 0x81b   :  { %v18133_v59 = vcombine.high %v8423_v52, %v8427_v34  ;;  %v8467_v10 = vld [vmem:[#allocation19 + $0x270] sm:$0xff]  ;;  %v8468_v44 = vld [vmem:[#allocation19 + $0x278] sm:$0xff] }
 0x81d   :  { %15400 = vmatpush1.bf16.msra.mxu0 %v17994_v41  ;;  %15656 = vmatpush1.bf16.msra.mxu1 %v18122_v62  ;;  %v8436_v41 = vld [vmem:[#allocation19 + $0x178] sm:$0xff]  ;;  %v18134_v62 = vcombine.low %v8423_v52, %v8427_v34  ;;  %v8475_v52 = vld [vmem:[#allocation19 + $0x2b0] sm:$0xff] }
 0x81e   :  { %15402 = vmatprep.subr.bf16.mxu0 %v17995_v33  ;;  %15658 = vmatprep.subr.bf16.mxu1 %v18123_v8  ;;  %v18135_v33 = vcombine.high %v8431_v40, %v8435_v0  ;;  %v18263_v8 = vcombine.high %v8432_v13, %v8436_v41  ;;  %v8472_v34 = vld [vmem:[#allocation19 + $0x298] sm:$0xff] }
 0x821   :  { %15404 = vmatpush1.bf16.msra.mxu0 %v17996_v25  ;;  %15660 = vmatpush1.bf16.msra.mxu1 %v18124_v49  ;;  %v18136_v25 = vcombine.low %v8431_v40, %v8435_v0  ;;  %v18264_v49 = vcombine.low %v8432_v13, %v8436_v41  ;;  %v8483_v40 = vld [vmem:[#allocation19 + $0x2f0] sm:$0xff]  ;;  %v8480_v0 = vld [vmem:[#allocation19 + $0x2d8] sm:$0xff] }
 0x822   :  { %15662 = vmatprep.subr.bf16.mxu0 %v18125_v23  ;;  %15918 = vmatprep.subr.bf16.mxu1 %v18253_v14  ;;  %v18265_v23 = vcombine.high %v8440_v2, %v8444_v11  ;;  %v8447_v14 = vld [vmem:[#allocation19 + $0x1d0] sm:$0xff]  ;;  %v8484_v13 = vld [vmem:[#allocation19 + $0x2f8] sm:$0xff] }
 0x823   :  { %v18140_v22 = vcombine.low %v8447_v14, %v8451_v16 }
 0x824   :  { %10203 = vmatmul.mubr.f32.vlgmr.msra.gmra.mrb[12].mxu0 %v19398_v45  ;;  %10487 = vmatmul.mubr.f32.vlgmr.msra.gmra.mrb[12].mxu1 %v19398_v45 }
 0x825   :  { %15664 = vmatpush1.bf16.msra.mxu0 %v18126_v5  ;;  %10557 = vmatprep.mubr.f32.mxu0 %v19330_v28  ;;  %v18266_v5 = vcombine.low %v8440_v2, %v8444_v11  ;;  %v8492_v2 = vld [vmem:[#allocation19 + $0x338] sm:$0xff] }
 0x826   :  { %15920 = vmatpush1.bf16.msra.mxu1 %v18254_v19  ;;  %10841 = vmatprep.mubr.f32.mxu1 %v19330_v28  ;;  %v8424_v28 = vld [vmem:[#allocation19 + $0x118] sm:$0xff]  ;;  %v18139_v19 = vcombine.high %v8447_v14, %v8451_v16  ;;  %v8499_v14 = vld [vmem:[#allocation19 + $0x370] sm:$0xff] }
 0x827   :  { %15666 = vmatprep.subr.bf16.mxu0 %v18127_v27  ;;  %15922 = vmatprep.subr.bf16.mxu1 %v18255_v20  ;;  %v18261_v63 = vcombine.high %v8424_v28, %v8428_v58  ;;  %v18262_v4 = vcombine.low %v8424_v28, %v8428_v58  ;;  %v18267_v27 = vcombine.high %v8448_v9, %v8452_v15  ;;  %v8455_v20 = vld [vmem:[#allocation19 + $0x210] sm:$0xff]  ;;  %v8476_v28 = vld [vmem:[#allocation19 + $0x2b8] sm:$0xff] }
 0x828   :  { %v18142_v42 = vcombine.low %v8455_v20, %v8459_v24  ;;  %v8496_v16 = vld [vmem:[#allocation19 + $0x358] sm:$0xff] }
 0x829   :  { %15668 = vmatpush1.bf16.msra.mxu0 %v18128_v17  ;;  %v18268_v17 = vcombine.low %v8448_v9, %v8452_v15  ;;  %v8500_v9 = vld [vmem:[#allocation19 + $0x378] sm:$0xff] }
 0x82a   :  { %15924 = vmatpush1.bf16.msra.mxu1 %v18256_v37  ;;  %15670 = vmatprep.subr.bf16.mxu0 %v18129_v38  ;;  %v18141_v37 = vcombine.high %v8455_v20, %v8459_v24  ;;  %v18269_v38 = vcombine.high %v8456_v26, %v8460_v31  ;;  %v8507_v20 = vld [vmem:[#allocation19 + $0x3b0] sm:$0xff]  ;;  %v8504_v24 = vld [vmem:[#allocation19 + $0x398] sm:$0xff] }
 0x82b   :  { %15926 = vmatprep.subr.bf16.mxu1 %v18257_v43  ;;  %v8463_v43 = vld [vmem:[#allocation19 + $0x250] sm:$0xff] }
 0x82c   :  { %v18144_v58 = vcombine.low %v8463_v43, %v8467_v10 }
 0x82d   :  { %15672 = vmatpush1.bf16.msra.mxu0 %v18130_v39  ;;  %v18270_v39 = vcombine.low %v8456_v26, %v8460_v31  ;;  %v8508_v26 = vld [vmem:[#allocation19 + $0x3b8] sm:$0xff] }
 0x82e   :  { %15928 = vmatpush1.bf16.msra.mxu1 %v18258_v48  ;;  %15674 = vmatprep.subr.bf16.mxu0 %v18131_v50  ;;  %v18143_v48 = vcombine.high %v8463_v43, %v8467_v10  ;;  %v18271_v50 = vcombine.high %v8464_v61, %v8468_v44  ;;  %v8515_v43 = vld [vmem:[#allocation19 + $0x3f0] sm:$0xff]  ;;  %v8512_v10 = vld [vmem:[#allocation19 + $0x3d8] sm:$0xff] }
 0x82f   :  { %15930 = vmatprep.subr.bf16.mxu1 %v18259_v51  ;;  %v8471_v51 = vld [vmem:[#allocation19 + $0x290] sm:$0xff] }
 0x830   :  { %v18146_v41 = vcombine.low %v8471_v51, %v8475_v52 }
 0x831   :  { %15676 = vmatpush1.bf16.msra.mxu0 %v18132_v53  ;;  %v18272_v53 = vcombine.low %v8464_v61, %v8468_v44  ;;  %v8516_v61 = vld [vmem:[#allocation19 + $0x3f8] sm:$0xff] }
 0x832   :  { %15932 = vmatpush1.bf16.msra.mxu1 %v18260_v54  ;;  %15678 = vmatprep.subr.bf16.mxu0 %v18133_v59  ;;  %v18145_v54 = vcombine.high %v8471_v51, %v8475_v52  ;;  %v18273_v59 = vcombine.high %v8472_v34, %v8476_v28  ;;  %v8523_v51 = vld [vmem:[#allocation19 + $0x430] sm:$0xff]  ;;  %v8520_v52 = vld [vmem:[#allocation19 + $0x418] sm:$0xff] }
 0x833   :  { %15934 = vmatprep.subr.bf16.mxu1 %v18261_v63  ;;  %v8479_v63 = vld [vmem:[#allocation19 + $0x2d0] sm:$0xff] }
 0x834   :  { %v18148_v11 = vcombine.low %v8479_v63, %v8483_v40 }
 0x835   :  { %15680 = vmatpush1.bf16.msra.mxu0 %v18134_v62  ;;  %v18274_v62 = vcombine.low %v8472_v34, %v8476_v28  ;;  %v8524_v34 = vld [vmem:[#allocation19 + $0x438] sm:$0xff] }
 0x836   :  { %15936 = vmatpush1.bf16.msra.mxu1 %v18262_v4  ;;  %15682 = vmatprep.subr.bf16.mxu0 %v18135_v33  ;;  %v18147_v4 = vcombine.high %v8479_v63, %v8483_v40  ;;  %v18275_v33 = vcombine.high %v8480_v0, %v8484_v13  ;;  %v8531_v63 = vld [vmem:[#allocation19 + $0x470] sm:$0xff] }
 0x837   :  { %15938 = vmatprep.subr.bf16.mxu1 %v18263_v8  ;;  %v8487_v8 = vld [vmem:[#allocation19 + $0x310] sm:$0xff] }
 0x838   :  { %v18150_v15 = vcombine.low %v8487_v8, %v8491_v46 }
 0x839   :  { %15684 = vmatpush1.bf16.msra.mxu0 %v18136_v25  ;;  %v18276_v25 = vcombine.low %v8480_v0, %v8484_v13  ;;  %v8528_v0 = vld [vmem:[#allocation19 + $0x458] sm:$0xff] }
 0x83a   :  { %15940 = vmatpush1.bf16.msra.mxu1 %v18264_v49  ;;  %15686 = vmatprep.subr.bf16.mxu0 %v18137_v7  ;;  %v18149_v49 = vcombine.high %v8487_v8, %v8491_v46  ;;  %v18277_v7 = vcombine.high %v8488_v3, %v8492_v2  ;;  %v8532_v13 = vld [vmem:[#allocation19 + $0x478] sm:$0xff] }
 0x83b   :  { %15942 = vmatprep.subr.bf16.mxu1 %v18265_v23  ;;  %v8495_v23 = vld [vmem:[#allocation19 + $0x350] sm:$0xff]  ;;  %v18287_v8 = vcombine.high %v8528_v0, %v8532_v13  ;;  %v8536_v46 = vld [vmem:[#allocation19 + $0x498] sm:$0xff] }
 0x83c   :  { %v18152_v31 = vcombine.low %v8495_v23, %v8499_v14 }
 0x83d   :  { %15688 = vmatpush1.bf16.msra.mxu0 %v18138_v18  ;;  %v18278_v18 = vcombine.low %v8488_v3, %v8492_v2  ;;  %v8540_v3 = vld [vmem:[#allocation19 + $0x4b8] sm:$0xff] }
 0x83e   :  { %15944 = vmatpush1.bf16.msra.mxu1 %v18266_v5  ;;  %15690 = vmatprep.subr.bf16.mxu0 %v18139_v19  ;;  %v18151_v5 = vcombine.high %v8495_v23, %v8499_v14  ;;  %v18279_v19 = vcombine.high %v8496_v16, %v8500_v9  ;;  %v8547_v23 = vld [vmem:[#allocation19 + $0x4f0] sm:$0xff]  ;;  %v8544_v14 = vld [vmem:[#allocation19 + $0x4d8] sm:$0xff] }
 0x83f   :  { %15946 = vmatprep.subr.bf16.mxu1 %v18267_v27  ;;  %v8503_v27 = vld [vmem:[#allocation19 + $0x390] sm:$0xff] }
 0x840   :  { %v18154_v44 = vcombine.low %v8503_v27, %v8507_v20 }
 0x841   :  { %15692 = vmatpush1.bf16.msra.mxu0 %v18140_v22  ;;  %v18280_v22 = vcombine.low %v8496_v16, %v8500_v9  ;;  %v8548_v16 = vld [vmem:[#allocation19 + $0x4f8] sm:$0xff] }
 0x842   :  { %15948 = vmatpush1.bf16.msra.mxu1 %v18268_v17  ;;  %15694 = vmatprep.subr.bf16.mxu0 %v18141_v37  ;;  %v18153_v17 = vcombine.high %v8503_v27, %v8507_v20  ;;  %v18281_v37 = vcombine.high %v8504_v24, %v8508_v26  ;;  %v8552_v27 = vld [vmem:[#allocation19 + $0x518] sm:$0xff] }
 0x843   :  { %15950 = vmatprep.subr.bf16.mxu1 %v18269_v38  ;;  %v8511_v38 = vld [vmem:[#allocation19 + $0x3d0] sm:$0xff]  ;;  %v8556_v20 = vld [vmem:[#allocation19 + $0x538] sm:$0xff] }
 0x844   :  { %v18156_v28 = vcombine.low %v8511_v38, %v8515_v43 }
 0x845   :  { %15696 = vmatpush1.bf16.msra.mxu0 %v18142_v42  ;;  %v18282_v42 = vcombine.low %v8504_v24, %v8508_v26  ;;  %v18292_v24 = vcombine.low %v8544_v14, %v8548_v16 }
 0x846   :  { %15952 = vmatpush1.bf16.msra.mxu1 %v18270_v39  ;;  %15698 = vmatprep.subr.bf16.mxu0 %v18143_v48  ;;  %v18155_v39 = vcombine.high %v8511_v38, %v8515_v43  ;;  %v18283_v48 = vcombine.high %v8512_v10, %v8516_v61  ;;  %v8564_v38 = vld [vmem:[#allocation19 + $0x578] sm:$0xff] }
 0x847   :  { %15954 = vmatprep.subr.bf16.mxu1 %v18271_v50  ;;  %v8519_v50 = vld [vmem:[#allocation19 + $0x410] sm:$0xff] }
 0x848   :  { %v18158_v40 = vcombine.low %v8519_v50, %v8523_v51 }
 0x849   :  { %15700 = vmatpush1.bf16.msra.mxu0 %v18144_v58  ;;  %v18284_v58 = vcombine.low %v8512_v10, %v8516_v61  ;;  %v18294_v10 = vcombine.low %v8552_v27, %v8556_v20 }
 0x84a   :  { %15956 = vmatpush1.bf16.msra.mxu1 %v18272_v53  ;;  %15702 = vmatprep.subr.bf16.mxu0 %v18145_v54  ;;  %v18157_v53 = vcombine.high %v8519_v50, %v8523_v51  ;;  %v18285_v54 = vcombine.high %v8520_v52, %v8524_v34  ;;  %v8572_v50 = vld [vmem:[#allocation19 + $0x5b8] sm:$0xff] }
 0x84b   :  { %15958 = vmatprep.subr.bf16.mxu1 %v18273_v59  ;;  %v8527_v59 = vld [vmem:[#allocation19 + $0x450] sm:$0xff] }
 0x84c   :  { %v18160_v2 = vcombine.low %v8527_v59, %v8531_v63 }
 0x84d   :  { %15704 = vmatpush1.bf16.msra.mxu0 %v18146_v41  ;;  %v18286_v41 = vcombine.low %v8520_v52, %v8524_v34 }
 0x84e   :  { %15960 = vmatpush1.bf16.msra.mxu1 %v18274_v62  ;;  %15706 = vmatprep.subr.bf16.mxu0 %v18147_v4  ;;  %v18159_v62 = vcombine.high %v8527_v59, %v8531_v63  ;;  %v8535_v4 = vld [vmem:[#allocation19 + $0x490] sm:$0xff]  ;;  %v8580_v59 = vld [vmem:[#allocation19 + $0x5f8] sm:$0xff] }
 0x84f   :  { %15962 = vmatprep.subr.bf16.mxu1 %v18275_v33  ;;  %v8539_v33 = vld [vmem:[#allocation19 + $0x4b0] sm:$0xff] }
 0x850   :  { %v18162_v9 = vcombine.low %v8535_v4, %v8539_v33 }
 0x851   :  { %15708 = vmatpush1.bf16.msra.mxu0 %v18148_v11  ;;  %v18288_v11 = vcombine.low %v8528_v0, %v8532_v13 }
 0x852   :  { %15964 = vmatpush1.bf16.msra.mxu1 %v18276_v25  ;;  %15710 = vmatprep.subr.bf16.mxu0 %v18149_v49  ;;  %v18161_v25 = vcombine.high %v8535_v4, %v8539_v33  ;;  %v18289_v49 = vcombine.high %v8536_v46, %v8540_v3  ;;  %v8584_v4 = vld [vmem:[#allocation19 + $0x618] sm:$0xff] }
 0x853   :  { %15966 = vmatprep.subr.bf16.mxu1 %v18277_v7  ;;  %v8543_v7 = vld [vmem:[#allocation19 + $0x4d0] sm:$0xff]  ;;  %v8588_v33 = vld [vmem:[#allocation19 + $0x638] sm:$0xff] }
 0x855   :  { %15712 = vmatpush1.bf16.msra.mxu0 %v18150_v15  ;;  %v18163_v15 = vcombine.high %v8543_v7, %v8547_v23 }
 0x856   :  { %15968 = vmatpush1.bf16.msra.mxu1 %v18278_v18  ;;  %15714 = vmatprep.subr.bf16.mxu0 %v18151_v5  ;;  %v18291_v18 = vcombine.high %v8544_v14, %v8548_v16  ;;  %v8551_v5 = vld [vmem:[#allocation19 + $0x510] sm:$0xff]  ;;  %v18302_v14 = vcombine.low %v8584_v4, %v8588_v33 }
 0x857   :  { %15970 = vmatprep.subr.bf16.mxu1 %v18279_v19  ;;  %v8555_v19 = vld [vmem:[#allocation19 + $0x530] sm:$0xff] }
 0x858   :  { %v18165_v26 = vcombine.high %v8551_v5, %v8555_v19  ;;  %v18166_v43 = vcombine.low %v8551_v5, %v8555_v19  ;;  %v8604_v5 = vld [vmem:[#allocation19 + $0x6b8] sm:$0xff] }
 0x859   :  { %15716 = vmatpush1.bf16.msra.mxu0 %v18152_v31  ;;  %v18293_v31 = vcombine.high %v8552_v27, %v8556_v20 }
 0x85a   :  { %15972 = vmatpush1.bf16.msra.mxu1 %v18280_v22  ;;  %15718 = vmatprep.subr.bf16.mxu0 %v18153_v17  ;;  %v8559_v22 = vld [vmem:[#allocation19 + $0x550] sm:$0xff] }
 0x85b   :  { %15974 = vmatprep.subr.bf16.mxu1 %v18281_v37  ;;  %v8563_v17 = vld [vmem:[#allocation19 + $0x570] sm:$0xff]  ;;  %v8560_v37 = vld [vmem:[#allocation19 + $0x558] sm:$0xff] }
 0x85c   :  { %v18167_v61 = vcombine.high %v8559_v22, %v8563_v17  ;;  %v18168_v51 = vcombine.low %v8559_v22, %v8563_v17  ;;  %v18296_v52 = vcombine.low %v8560_v37, %v8564_v38  ;;  %v8612_v22 = vld [vmem:[#allocation19 + $0x6f8] sm:$0xff] }
 0x85d   :  { %15720 = vmatpush1.bf16.msra.mxu0 %v18154_v44  ;;  %v18295_v44 = vcombine.high %v8560_v37, %v8564_v38 }
 0x85e   :  { %15976 = vmatpush1.bf16.msra.mxu1 %v18282_v42  ;;  %15722 = vmatprep.subr.bf16.mxu0 %v18155_v39  ;;  %v8567_v42 = vld [vmem:[#allocation19 + $0x590] sm:$0xff] }
 0x85f   :  { %15978 = vmatprep.subr.bf16.mxu1 %v18283_v48  ;;  %v8571_v39 = vld [vmem:[#allocation19 + $0x5b0] sm:$0xff]  ;;  %v8568_v48 = vld [vmem:[#allocation19 + $0x598] sm:$0xff] }
 0x860   :  { %v18169_v34 = vcombine.high %v8567_v42, %v8571_v39  ;;  %v18170_v63 = vcombine.low %v8567_v42, %v8571_v39  ;;  %v8620_v42 = vld [vmem:[#allocation19 + $0x738] sm:$0xff] }
 0x861   :  { %15724 = vmatpush1.bf16.msra.mxu0 %v18156_v28  ;;  %v18297_v28 = vcombine.high %v8568_v48, %v8572_v50 }
 0x862   :  { %15980 = vmatpush1.bf16.msra.mxu1 %v18284_v58  ;;  %15726 = vmatprep.subr.bf16.mxu0 %v18157_v53  ;;  %v8575_v58 = vld [vmem:[#allocation19 + $0x5d0] sm:$0xff] }
 0x863   :  { %15982 = vmatprep.subr.bf16.mxu1 %v18285_v54  ;;  %v8579_v53 = vld [vmem:[#allocation19 + $0x5f0] sm:$0xff]  ;;  %v8576_v54 = vld [vmem:[#allocation19 + $0x5d8] sm:$0xff] }
 0x864   :  { %10558 = vmatmul.mubr.f32.vlgmr.msra.gmra.mrb[14].mxu0 %v19346_v30  ;;  %v18171_v0 = vcombine.high %v8575_v58, %v8579_v53  ;;  %v18299_v13 = vcombine.high %v8576_v54, %v8580_v59 }
 0x865   :  { %10842 = vmatmul.mubr.f32.vlgmr.msra.gmra.mrb[14].mxu1 %v19346_v30  ;;  %15728 = vmatpush1.bf16.msra.mxu0 %v18158_v40  ;;  %v18290_v30 = vcombine.low %v8536_v46, %v8540_v3  ;;  %v18298_v40 = vcombine.low %v8568_v48, %v8572_v50  ;;  %v18300_v46 = vcombine.low %v8576_v54, %v8580_v59 }
 0x866   :  { %10628 = vmatprep.mubr.f32.mxu0 %v19348_v12  ;;  %15984 = vmatpush1.bf16.msra.mxu1 %v18286_v41  ;;  %v8583_v41 = vld [vmem:[#allocation19 + $0x610] sm:$0xff] }
 0x867   :  { %10912 = vmatprep.mubr.f32.mxu1 %v19348_v12  ;;  %15730 = vmatprep.subr.bf16.mxu0 %v18159_v62  ;;  %v18164_v12 = vcombine.low %v8543_v7, %v8547_v23  ;;  %v8587_v62 = vld [vmem:[#allocation19 + $0x630] sm:$0xff]  ;;  %v8596_v7 = vld [vmem:[#allocation19 + $0x678] sm:$0xff] }
 0x868   :  { %15986 = vmatprep.subr.bf16.mxu1 %v18287_v8  ;;  %v18172_v8 = vcombine.low %v8575_v58, %v8579_v53  ;;  %v18173_v3 = vcombine.high %v8583_v41, %v8587_v62  ;;  %v18174_v23 = vcombine.low %v8583_v41, %v8587_v62  ;;  %v8628_v58 = vld [vmem:[#allocation19 + $0x778] sm:$0xff] }
 0x869   :  { %15732 = vmatpush1.bf16.msra.mxu0 %v18160_v2  ;;  %v18301_v2 = vcombine.high %v8584_v4, %v8588_v33  ;;  %v8636_v41 = vld [vmem:[#allocation19 + $0x7b8] sm:$0xff] }
 0x86a   :  { %15988 = vmatpush1.bf16.msra.mxu1 %v18288_v11  ;;  %15734 = vmatprep.subr.bf16.mxu0 %v18161_v25  ;;  %v8591_v11 = vld [vmem:[#allocation19 + $0x650] sm:$0xff] }
 0x86b   :  { %15990 = vmatprep.subr.bf16.mxu1 %v18289_v49  ;;  %v8595_v25 = vld [vmem:[#allocation19 + $0x670] sm:$0xff]  ;;  %v8592_v49 = vld [vmem:[#allocation19 + $0x658] sm:$0xff] }
 0x86c   :  { %v18175_v16 = vcombine.high %v8591_v11, %v8595_v25  ;;  %v18176_v19 = vcombine.low %v8591_v11, %v8595_v25  ;;  %v18304_v27 = vcombine.low %v8592_v49, %v8596_v7  ;;  %v8644_v11 = vld [vmem:[#allocation19 + $0x7f8] sm:$0xff] }
 0x86d   :  { %15736 = vmatpush1.bf16.msra.mxu0 %v18162_v9  ;;  %v18303_v9 = vcombine.high %v8592_v49, %v8596_v7 }
 0x86e   :  { %15992 = vmatpush1.bf16.msra.mxu1 %v18290_v30  ;;  %15738 = vmatprep.subr.bf16.mxu0 %v18163_v15  ;;  %v8599_v30 = vld [vmem:[#allocation19 + $0x690] sm:$0xff] }
 0x86f   :  { %15994 = vmatprep.subr.bf16.mxu1 %v18291_v18  ;;  %v8603_v15 = vld [vmem:[#allocation19 + $0x6b0] sm:$0xff]  ;;  %v8600_v18 = vld [vmem:[#allocation19 + $0x698] sm:$0xff] }
 0x870   :  { %v18177_v20 = vcombine.high %v8599_v30, %v8603_v15  ;;  %v18178_v17 = vcombine.low %v8599_v30, %v8603_v15  ;;  %v18306_v37 = vcombine.low %v8600_v18, %v8604_v5  ;;  %v8652_v30 = vld [vmem:[#allocation19 + $0x838] sm:$0xff] }
 0x871   :  { %15740 = vmatpush1.bf16.msra.mxu0 %v18164_v12  ;;  %v18305_v12 = vcombine.high %v8600_v18, %v8604_v5 }
 0x872   :  { %15996 = vmatpush1.bf16.msra.mxu1 %v18292_v24  ;;  %15742 = vmatprep.subr.bf16.mxu0 %v18165_v26  ;;  %v8607_v24 = vld [vmem:[#allocation19 + $0x6d0] sm:$0xff] }
 0x873   :  { %15998 = vmatprep.subr.bf16.mxu1 %v18293_v31  ;;  %v8611_v26 = vld [vmem:[#allocation19 + $0x6f0] sm:$0xff]  ;;  %v8608_v31 = vld [vmem:[#allocation19 + $0x6d8] sm:$0xff] }
 0x874   :  { %v18179_v38 = vcombine.high %v8607_v24, %v8611_v26  ;;  %v18180_v39 = vcombine.low %v8607_v24, %v8611_v26  ;;  %v18308_v48 = vcombine.low %v8608_v31, %v8612_v22  ;;  %v8656_v24 = vld [vmem:[#allocation19 + $0x858] sm:$0xff] }
 0x875   :  { %15744 = vmatpush1.bf16.msra.mxu0 %v18166_v43  ;;  %v18307_v43 = vcombine.high %v8608_v31, %v8612_v22  ;;  %v8660_v26 = vld [vmem:[#allocation19 + $0x878] sm:$0xff] }
 0x876   :  { %16000 = vmatpush1.bf16.msra.mxu1 %v18294_v10  ;;  %15746 = vmatprep.subr.bf16.mxu0 %v18167_v61  ;;  %v8615_v10 = vld [vmem:[#allocation19 + $0x710] sm:$0xff] }
 0x877   :  { %16002 = vmatprep.subr.bf16.mxu1 %v18295_v44  ;;  %v8619_v61 = vld [vmem:[#allocation19 + $0x730] sm:$0xff]  ;;  %v8616_v44 = vld [vmem:[#allocation19 + $0x718] sm:$0xff] }
 0x878   :  { %v18181_v50 = vcombine.high %v8615_v10, %v8619_v61  ;;  %v18182_v53 = vcombine.low %v8615_v10, %v8619_v61  ;;  %v18310_v54 = vcombine.low %v8616_v44, %v8620_v42  ;;  %v8668_v10 = vld [vmem:[#allocation19 + $0x8b8] sm:$0xff] }
 0x879   :  { %15748 = vmatpush1.bf16.msra.mxu0 %v18168_v51  ;;  %v18309_v51 = vcombine.high %v8616_v44, %v8620_v42  ;;  %v18320_v44 = vcombine.low %v8656_v24, %v8660_v26 }
 0x87a   :  { %16004 = vmatpush1.bf16.msra.mxu1 %v18296_v52  ;;  %15750 = vmatprep.subr.bf16.mxu0 %v18169_v34  ;;  %v8623_v52 = vld [vmem:[#allocation19 + $0x750] sm:$0xff] }
 0x87b   :  { %16006 = vmatprep.subr.bf16.mxu1 %v18297_v28  ;;  %v8627_v34 = vld [vmem:[#allocation19 + $0x770] sm:$0xff]  ;;  %v8624_v28 = vld [vmem:[#allocation19 + $0x758] sm:$0xff] }
 0x87c   :  { %v18183_v59 = vcombine.high %v8623_v52, %v8627_v34  ;;  %v18184_v62 = vcombine.low %v8623_v52, %v8627_v34  ;;  %v18312_v4 = vcombine.low %v8624_v28, %v8628_v58  ;;  %v8676_v52 = vld [vmem:[#allocation19 + $0x8f8] sm:$0xff] }
 0x87d   :  { %15752 = vmatpush1.bf16.msra.mxu0 %v18170_v63  ;;  %v18311_v63 = vcombine.high %v8624_v28, %v8628_v58 }
 0x87e   :  { %16008 = vmatpush1.bf16.msra.mxu1 %v18298_v40  ;;  %15754 = vmatprep.subr.bf16.mxu0 %v18171_v0  ;;  %v8631_v40 = vld [vmem:[#allocation19 + $0x790] sm:$0xff] }
 0x87f   :  { %16010 = vmatprep.subr.bf16.mxu1 %v18299_v13  ;;  %v8635_v0 = vld [vmem:[#allocation19 + $0x7b0] sm:$0xff]  ;;  %v8632_v13 = vld [vmem:[#allocation19 + $0x798] sm:$0xff] }
 0x880   :  { %v18185_v33 = vcombine.high %v8631_v40, %v8635_v0  ;;  %v18186_v25 = vcombine.low %v8631_v40, %v8635_v0  ;;  %v18314_v49 = vcombine.low %v8632_v13, %v8636_v41 }
 0x881   :  { %15756 = vmatpush1.bf16.msra.mxu0 %v18172_v8  ;;  %v18313_v8 = vcombine.high %v8632_v13, %v8636_v41  ;;  %v8687_v41 = vld [vmem:[#allocation19 + $0x950] sm:$0xff] }
 0x882   :  { %16012 = vmatpush1.bf16.msra.mxu1 %v18300_v46  ;;  %15758 = vmatprep.subr.bf16.mxu0 %v18173_v3  ;;  %v8639_v46 = vld [vmem:[#allocation19 + $0x7d0] sm:$0xff] }
 0x883   :  { %16014 = vmatprep.subr.bf16.mxu1 %v18301_v2  ;;  %v8643_v3 = vld [vmem:[#allocation19 + $0x7f0] sm:$0xff]  ;;  %v8640_v2 = vld [vmem:[#allocation19 + $0x7d8] sm:$0xff] }
 0x884   :  { %v18187_v7 = vcombine.high %v8639_v46, %v8643_v3  ;;  %v18188_v15 = vcombine.low %v8639_v46, %v8643_v3  ;;  %v18316_v18 = vcombine.low %v8640_v2, %v8644_v11 }
 0x885   :  { %15760 = vmatpush1.bf16.msra.mxu0 %v18174_v23  ;;  %v18315_v23 = vcombine.high %v8640_v2, %v8644_v11  ;;  %v8695_v11 = vld [vmem:[#allocation19 + $0x990] sm:$0xff] }
 0x886   :  { %16016 = vmatpush1.bf16.msra.mxu1 %v18302_v14  ;;  %15762 = vmatprep.subr.bf16.mxu0 %v18175_v16  ;;  %v8647_v14 = vld [vmem:[#allocation19 + $0x810] sm:$0xff] }
 0x887   :  { %16018 = vmatprep.subr.bf16.mxu1 %v18303_v9  ;;  %v8651_v16 = vld [vmem:[#allocation19 + $0x830] sm:$0xff]  ;;  %v8648_v9 = vld [vmem:[#allocation19 + $0x818] sm:$0xff] }
 0x888   :  { %v18189_v5 = vcombine.high %v8647_v14, %v8651_v16  ;;  %v18318_v31 = vcombine.low %v8648_v9, %v8652_v30 }
 0x889   :  { %15764 = vmatpush1.bf16.msra.mxu0 %v18176_v19  ;;  %v18317_v19 = vcombine.high %v8648_v9, %v8652_v30  ;;  %v8703_v30 = vld [vmem:[#allocation19 + $0x9d0] sm:$0xff] }
 0x88a   :  { %16020 = vmatpush1.bf16.msra.mxu1 %v18304_v27  ;;  %15766 = vmatprep.subr.bf16.mxu0 %v18177_v20  ;;  %v8655_v27 = vld [vmem:[#allocation19 + $0x850] sm:$0xff] }
 0x88b   :  { %16022 = vmatprep.subr.bf16.mxu1 %v18305_v12  ;;  %v8659_v20 = vld [vmem:[#allocation19 + $0x870] sm:$0xff]  ;;  %v18190_v12 = vcombine.low %v8647_v14, %v8651_v16 }
 0x88c   :  { %v18191_v22 = vcombine.high %v8655_v27, %v8659_v20  ;;  %v18192_v61 = vcombine.low %v8655_v27, %v8659_v20 }
 0x88d   :  { %15768 = vmatpush1.bf16.msra.mxu0 %v18178_v17  ;;  %v8663_v17 = vld [vmem:[#allocation19 + $0x890] sm:$0xff] }
 0x88e   :  { %16024 = vmatpush1.bf16.msra.mxu1 %v18306_v37  ;;  %15770 = vmatprep.subr.bf16.mxu0 %v18179_v38  ;;  %v8667_v37 = vld [vmem:[#allocation19 + $0x8b0] sm:$0xff]  ;;  %v18319_v38 = vcombine.high %v8656_v24, %v8660_v26 }
 0x88f   :  { %16026 = vmatprep.subr.bf16.mxu1 %v18307_v43  ;;  %v8664_v43 = vld [vmem:[#allocation19 + $0x898] sm:$0xff]  ;;  %v18193_v42 = vcombine.high %v8663_v17, %v8667_v37  ;;  %v18194_v34 = vcombine.low %v8663_v17, %v8667_v37  ;;  %v8711_v24 = vld [vmem:[#allocation19 + $0xa10] sm:$0xff] }
 0x890   :  { %v8715_v26 = vld [vmem:[#allocation19 + $0xa30] sm:$0xff] }
 0x891   :  { %15772 = vmatpush1.bf16.msra.mxu0 %v18180_v39  ;;  %v18321_v39 = vcombine.high %v8664_v43, %v8668_v10 }
 0x892   :  { %16028 = vmatpush1.bf16.msra.mxu1 %v18308_v48  ;;  %15774 = vmatprep.subr.bf16.mxu0 %v18181_v50  ;;  %v8671_v48 = vld [vmem:[#allocation19 + $0x8d0] sm:$0xff] }
 0x893   :  { %16030 = vmatprep.subr.bf16.mxu1 %v18309_v51  ;;  %v8675_v50 = vld [vmem:[#allocation19 + $0x8f0] sm:$0xff]  ;;  %v8672_v51 = vld [vmem:[#allocation19 + $0x8d8] sm:$0xff] }
 0x894   :  { %v18195_v28 = vcombine.high %v8671_v48, %v8675_v50  ;;  %v18323_v58 = vcombine.high %v8672_v51, %v8676_v52  ;;  %v18324_v40 = vcombine.low %v8672_v51, %v8676_v52  ;;  %v8727_v52 = vld [vmem:[#allocation19 + $0xa90] sm:$0xff] }
 0x895   :  { %15776 = vmatpush1.bf16.msra.mxu0 %v18182_v53  ;;  %v8679_v53 = vld [vmem:[#allocation19 + $0x910] sm:$0xff] }
 0x896   :  { %16032 = vmatpush1.bf16.msra.mxu1 %v18310_v54  ;;  %15778 = vmatprep.subr.bf16.mxu0 %v18183_v59  ;;  %v8683_v54 = vld [vmem:[#allocation19 + $0x930] sm:$0xff]  ;;  %v8680_v59 = vld [vmem:[#allocation19 + $0x918] sm:$0xff] }
 0x897   :  { %16034 = vmatprep.subr.bf16.mxu1 %v18311_v63  ;;  %v8684_v63 = vld [vmem:[#allocation19 + $0x938] sm:$0xff]  ;;  %v18197_v0 = vcombine.high %v8679_v53, %v8683_v54 }
 0x898   :  { %v18325_v13 = vcombine.high %v8680_v59, %v8684_v63  ;;  %v18326_v46 = vcombine.low %v8680_v59, %v8684_v63  ;;  %v8735_v63 = vld [vmem:[#allocation19 + $0xad0] sm:$0xff] }
 0x899   :  { %15780 = vmatpush1.bf16.msra.mxu0 %v18184_v62  ;;  %v8691_v62 = vld [vmem:[#allocation19 + $0x970] sm:$0xff] }
 0x89a   :  { %16036 = vmatpush1.bf16.msra.mxu1 %v18312_v4  ;;  %15782 = vmatprep.subr.bf16.mxu0 %v18185_v33  ;;  %v8688_v4 = vld [vmem:[#allocation19 + $0x958] sm:$0xff]  ;;  %v18199_v3 = vcombine.high %v8687_v41, %v8691_v62 }
 0x89b   :  { %16038 = vmatprep.subr.bf16.mxu1 %v18313_v8  ;;  %v8692_v33 = vld [vmem:[#allocation19 + $0x978] sm:$0xff]  ;;  %v18198_v8 = vcombine.low %v8679_v53, %v8683_v54 }
 0x89c   :  { %v18327_v2 = vcombine.high %v8688_v4, %v8692_v33  ;;  %v18328_v14 = vcombine.low %v8688_v4, %v8692_v33  ;;  %v8743_v33 = vld [vmem:[#allocation19 + $0xb10] sm:$0xff] }
 0x89d   :  { %15784 = vmatpush1.bf16.msra.mxu0 %v18186_v25  ;;  %v8699_v25 = vld [vmem:[#allocation19 + $0x9b0] sm:$0xff] }
 0x89e   :  { %16040 = vmatpush1.bf16.msra.mxu1 %v18314_v49  ;;  %15786 = vmatprep.subr.bf16.mxu0 %v18187_v7  ;;  %v8696_v49 = vld [vmem:[#allocation19 + $0x998] sm:$0xff]  ;;  %v18201_v16 = vcombine.high %v8695_v11, %v8699_v25 }
 0x89f   :  { %16042 = vmatprep.subr.bf16.mxu1 %v18315_v23  ;;  %v8700_v7 = vld [vmem:[#allocation19 + $0x9b8] sm:$0xff]  ;;  %v18200_v23 = vcombine.low %v8687_v41, %v8691_v62 }
 0x8a0   :  { %v18329_v9 = vcombine.high %v8696_v49, %v8700_v7  ;;  %v18330_v27 = vcombine.low %v8696_v49, %v8700_v7  ;;  %v8751_v7 = vld [vmem:[#allocation19 + $0xb50] sm:$0xff] }
 0x8a1   :  { %15788 = vmatpush1.bf16.msra.mxu0 %v18188_v15  ;;  %v8707_v15 = vld [vmem:[#allocation19 + $0x9f0] sm:$0xff] }
 0x8a2   :  { %16044 = vmatpush1.bf16.msra.mxu1 %v18316_v18  ;;  %15790 = vmatprep.subr.bf16.mxu0 %v18189_v5  ;;  %v8704_v18 = vld [vmem:[#allocation19 + $0x9d8] sm:$0xff]  ;;  %v18203_v20 = vcombine.high %v8703_v30, %v8707_v15  ;;  %v18204_v17 = vcombine.low %v8703_v30, %v8707_v15 }
 0x8a3   :  { %16046 = vmatprep.subr.bf16.mxu1 %v18317_v19  ;;  %v8708_v5 = vld [vmem:[#allocation19 + $0x9f8] sm:$0xff]  ;;  %v18202_v19 = vcombine.low %v8695_v11, %v8699_v25 }
 0x8a4   :  { %10629 = vmatmul.mubr.f32.vlgmr.msra.gmra.mrb[14].mxu0 %v19359_v47  ;;  %v18332_v37 = vcombine.low %v8704_v18, %v8708_v5 }
 0x8a5   :  { %10913 = vmatmul.mubr.f32.vlgmr.msra.gmra.mrb[14].mxu1 %v19359_v47  ;;  %15792 = vmatpush1.bf16.msra.mxu0 %v18190_v12  ;;  %v18322_v47 = vcombine.low %v8664_v43, %v8668_v10  ;;  %v18331_v12 = vcombine.high %v8704_v18, %v8708_v5  ;;  %v8719_v10 = vld [vmem:[#allocation19 + $0xa50] sm:$0xff] }
 0x8a6   :  { %10699 = vmatprep.mubr.f32.mxu0 %v19381_v35  ;;  %16048 = vmatpush1.bf16.msra.mxu1 %v18318_v31  ;;  %v8712_v31 = vld [vmem:[#allocation19 + $0xa18] sm:$0xff]  ;;  %v8759_v5 = vld [vmem:[#allocation19 + $0xb90] sm:$0xff] }
 0x8a7   :  { %10983 = vmatprep.mubr.f32.mxu1 %v19381_v35  ;;  %15794 = vmatprep.subr.bf16.mxu0 %v18191_v22  ;;  %v18196_v35 = vcombine.low %v8671_v48, %v8675_v50  ;;  %v8716_v22 = vld [vmem:[#allocation19 + $0xa38] sm:$0xff] }
 0x8a8   :  { %16050 = vmatprep.subr.bf16.mxu1 %v18319_v38  ;;  %v18205_v38 = vcombine.high %v8711_v24, %v8715_v26  ;;  %v18333_v43 = vcombine.high %v8712_v31, %v8716_v22  ;;  %v18334_v48 = vcombine.low %v8712_v31, %v8716_v22  ;;  %v8767_v22 = vld [vmem:[#allocation19 + $0xbd0] sm:$0xff] }
 0x8a9   :  { %15796 = vmatpush1.bf16.msra.mxu0 %v18192_v61  ;;  %v8723_v61 = vld [vmem:[#allocation19 + $0xa70] sm:$0xff] }
 0x8aa   :  { %16052 = vmatpush1.bf16.msra.mxu1 %v18320_v44  ;;  %15798 = vmatprep.subr.bf16.mxu0 %v18193_v42  ;;  %v8720_v44 = vld [vmem:[#allocation19 + $0xa58] sm:$0xff]  ;;  %v18207_v50 = vcombine.high %v8719_v10, %v8723_v61 }
 0x8ab   :  { %16054 = vmatprep.subr.bf16.mxu1 %v18321_v39  ;;  %v8724_v42 = vld [vmem:[#allocation19 + $0xa78] sm:$0xff]  ;;  %v18206_v39 = vcombine.low %v8711_v24, %v8715_v26 }
 0x8ac   :  { %v18335_v51 = vcombine.high %v8720_v44, %v8724_v42  ;;  %v18336_v53 = vcombine.low %v8720_v44, %v8724_v42  ;;  %v8775_v42 = vld [vmem:[#allocation19 + $0xc10] sm:$0xff] }
 0x8ad   :  { %15800 = vmatpush1.bf16.msra.mxu0 %v18194_v34  ;;  %v8731_v34 = vld [vmem:[#allocation19 + $0xab0] sm:$0xff] }
 0x8ae   :  { %16056 = vmatpush1.bf16.msra.mxu1 %v18322_v47  ;;  %15802 = vmatprep.subr.bf16.mxu0 %v18195_v28  ;;  %v8728_v47 = vld [vmem:[#allocation19 + $0xa98] sm:$0xff]  ;;  %v18209_v54 = vcombine.high %v8727_v52, %v8731_v34 }
 0x8af   :  { %16058 = vmatprep.subr.bf16.mxu1 %v18323_v58  ;;  %v8732_v28 = vld [vmem:[#allocation19 + $0xab8] sm:$0xff]  ;;  %v18208_v58 = vcombine.low %v8719_v10, %v8723_v61 }
 0x8b0   :  { %v18337_v59 = vcombine.high %v8728_v47, %v8732_v28  ;;  %v18338_v41 = vcombine.low %v8728_v47, %v8732_v28  ;;  %v8783_v28 = vld [vmem:[#allocation19 + $0xc50] sm:$0xff] }
 0x8b1   :  { %15804 = vmatpush1.bf16.msra.mxu0 %v18196_v35  ;;  %v8739_v35 = vld [vmem:[#allocation19 + $0xaf0] sm:$0xff] }
 0x8b2   :  { %16060 = vmatpush1.bf16.msra.mxu1 %v18324_v40  ;;  %15806 = vmatprep.subr.bf16.mxu0 %v18197_v0  ;;  %v8736_v40 = vld [vmem:[#allocation19 + $0xad8] sm:$0xff]  ;;  %v18211_v62 = vcombine.high %v8735_v63, %v8739_v35 }
 0x8b3   :  { %16062 = vmatprep.subr.bf16.mxu1 %v18325_v13  ;;  %v8740_v0 = vld [vmem:[#allocation19 + $0xaf8] sm:$0xff]  ;;  %v18210_v13 = vcombine.low %v8727_v52, %v8731_v34 }
 0x8b4   :  { %v18339_v4 = vcombine.high %v8736_v40, %v8740_v0  ;;  %v18340_v11 = vcombine.low %v8736_v40, %v8740_v0  ;;  %v8791_v40 = vld [vmem:[#allocation19 + $0xc90] sm:$0xff] }
 0x8b5   :  { %15808 = vmatpush1.bf16.msra.mxu0 %v18198_v8  ;;  %v8747_v8 = vld [vmem:[#allocation19 + $0xb30] sm:$0xff] }
 0x8b6   :  { %16064 = vmatpush1.bf16.msra.mxu1 %v18326_v46  ;;  %15810 = vmatprep.subr.bf16.mxu0 %v18199_v3  ;;  %v8744_v46 = vld [vmem:[#allocation19 + $0xb18] sm:$0xff]  ;;  %v18213_v25 = vcombine.high %v8743_v33, %v8747_v8  ;;  %v8795_v0 = vld [vmem:[#allocation19 + $0xcb0] sm:$0xff] }
 0x8b7   :  { %16066 = vmatprep.subr.bf16.mxu1 %v18327_v2  ;;  %v8748_v3 = vld [vmem:[#allocation19 + $0xb38] sm:$0xff]  ;;  %v18212_v2 = vcombine.low %v8735_v63, %v8739_v35 }
 0x8b8   :  { %v18341_v49 = vcombine.high %v8744_v46, %v8748_v3  ;;  %v18342_v30 = vcombine.low %v8744_v46, %v8748_v3  ;;  %v8799_v3 = vld [vmem:[#allocation19 + $0xcd0] sm:$0xff] }
 0x8b9   :  { %15812 = vmatpush1.bf16.msra.mxu0 %v18200_v23  ;;  %v8755_v23 = vld [vmem:[#allocation19 + $0xb70] sm:$0xff] }
 0x8ba   :  { %16068 = vmatpush1.bf16.msra.mxu1 %v18328_v14  ;;  %15814 = vmatprep.subr.bf16.mxu0 %v18201_v16  ;;  %v8752_v14 = vld [vmem:[#allocation19 + $0xb58] sm:$0xff]  ;;  %v18215_v15 = vcombine.high %v8751_v7, %v8755_v23 }
 0x8bb   :  { %16070 = vmatprep.subr.bf16.mxu1 %v18329_v9  ;;  %v8756_v16 = vld [vmem:[#allocation19 + $0xb78] sm:$0xff]  ;;  %v18214_v9 = vcombine.low %v8743_v33, %v8747_v8  ;;  %v18225_v8 = vcombine.high %v8791_v40, %v8795_v0 }
 0x8bc   :  { %v18343_v18 = vcombine.high %v8752_v14, %v8756_v16  ;;  %v18344_v24 = vcombine.low %v8752_v14, %v8756_v16  ;;  %v8807_v14 = vld [vmem:[#allocation19 + $0xd10] sm:$0xff] }
 0x8bd   :  { %15816 = vmatpush1.bf16.msra.mxu0 %v18202_v19  ;;  %v8763_v19 = vld [vmem:[#allocation19 + $0xbb0] sm:$0xff] }
 0x8be   :  { %16072 = vmatpush1.bf16.msra.mxu1 %v18330_v27  ;;  %15818 = vmatprep.subr.bf16.mxu0 %v18203_v20  ;;  %v8760_v27 = vld [vmem:[#allocation19 + $0xb98] sm:$0xff]  ;;  %v18217_v26 = vcombine.high %v8759_v5, %v8763_v19  ;;  %v8811_v16 = vld [vmem:[#allocation19 + $0xd30] sm:$0xff] }
 0x8bf   :  { %16074 = vmatprep.subr.bf16.mxu1 %v18331_v12  ;;  %v8764_v20 = vld [vmem:[#allocation19 + $0xbb8] sm:$0xff]  ;;  %v18216_v12 = vcombine.low %v8751_v7, %v8755_v23 }
 0x8c0   :  { %v18345_v31 = vcombine.high %v8760_v27, %v8764_v20  ;;  %v18346_v10 = vcombine.low %v8760_v27, %v8764_v20  ;;  %v8819_v27 = vld [vmem:[#allocation19 + $0xd70] sm:$0xff]  ;;  %v8816_v20 = vld [vmem:[#allocation19 + $0xd58] sm:$0xff] }
 0x8c1   :  { %15820 = vmatpush1.bf16.msra.mxu0 %v18204_v17  ;;  %v8771_v17 = vld [vmem:[#allocation19 + $0xbf0] sm:$0xff] }
 0x8c2   :  { %16076 = vmatpush1.bf16.msra.mxu1 %v18332_v37  ;;  %15822 = vmatprep.subr.bf16.mxu0 %v18205_v38  ;;  %v8768_v37 = vld [vmem:[#allocation19 + $0xbd8] sm:$0xff]  ;;  %v18219_v61 = vcombine.high %v8767_v22, %v8771_v17 }
 0x8c3   :  { %16078 = vmatprep.subr.bf16.mxu1 %v18333_v43  ;;  %v8772_v38 = vld [vmem:[#allocation19 + $0xbf8] sm:$0xff]  ;;  %v18218_v43 = vcombine.low %v8759_v5, %v8763_v19  ;;  %v8815_v19 = vld [vmem:[#allocation19 + $0xd50] sm:$0xff] }
 0x8c4   :  { %v18347_v44 = vcombine.high %v8768_v37, %v8772_v38  ;;  %v18348_v52 = vcombine.low %v8768_v37, %v8772_v38  ;;  %v8827_v37 = vld [vmem:[#allocation19 + $0xdb0] sm:$0xff]  ;;  %v8824_v38 = vld [vmem:[#allocation19 + $0xd98] sm:$0xff] }
 0x8c5   :  { %15824 = vmatpush1.bf16.msra.mxu0 %v18206_v39  ;;  %v8779_v39 = vld [vmem:[#allocation19 + $0xc30] sm:$0xff] }
 0x8c6   :  { %16080 = vmatpush1.bf16.msra.mxu1 %v18334_v48  ;;  %15826 = vmatprep.subr.bf16.mxu0 %v18207_v50  ;;  %v8776_v48 = vld [vmem:[#allocation19 + $0xc18] sm:$0xff]  ;;  %v18221_v34 = vcombine.high %v8775_v42, %v8779_v39 }
 0x8c7   :  { %16082 = vmatprep.subr.bf16.mxu1 %v18335_v51  ;;  %v8780_v50 = vld [vmem:[#allocation19 + $0xc38] sm:$0xff]  ;;  %v18220_v51 = vcombine.low %v8767_v22, %v8771_v17  ;;  %v8823_v17 = vld [vmem:[#allocation19 + $0xd90] sm:$0xff] }
 0x8c8   :  { %v18349_v47 = vcombine.high %v8776_v48, %v8780_v50  ;;  %v18350_v63 = vcombine.low %v8776_v48, %v8780_v50  ;;  %v8831_v50 = vld [vmem:[#allocation19 + $0xdd0] sm:$0xff] }
 0x8c9   :  { %15828 = vmatpush1.bf16.msra.mxu0 %v18208_v58  ;;  %v8787_v58 = vld [vmem:[#allocation19 + $0xc70] sm:$0xff] }
 0x8ca   :  { %16084 = vmatpush1.bf16.msra.mxu1 %v18336_v53  ;;  %15830 = vmatprep.subr.bf16.mxu0 %v18209_v54  ;;  %v18222_v53 = vcombine.low %v8775_v42, %v8779_v39  ;;  %v8784_v54 = vld [vmem:[#allocation19 + $0xc58] sm:$0xff]  ;;  %v18223_v35 = vcombine.high %v8783_v28, %v8787_v58 }
 0x8cb   :  { %16086 = vmatprep.subr.bf16.mxu1 %v18337_v59  ;;  %v8788_v59 = vld [vmem:[#allocation19 + $0xc78] sm:$0xff] }
 0x8cc   :  { %v18352_v33 = vcombine.low %v8784_v54, %v8788_v59 }
 0x8cd   :  { %15832 = vmatpush1.bf16.msra.mxu0 %v18210_v13  ;;  %v18351_v13 = vcombine.high %v8784_v54, %v8788_v59 }
 0x8ce   :  { %16088 = vmatpush1.bf16.msra.mxu1 %v18338_v41  ;;  %15834 = vmatprep.subr.bf16.mxu0 %v18211_v62  ;;  %v8792_v41 = vld [vmem:[#allocation19 + $0xc98] sm:$0xff] }
 0x8cf   :  { %16090 = vmatprep.subr.bf16.mxu1 %v18339_v4  ;;  %v8796_v62 = vld [vmem:[#allocation19 + $0xcb8] sm:$0xff]  ;;  %v18224_v4 = vcombine.low %v8783_v28, %v8787_v58  ;;  %v18234_v58 = vcombine.low %v8823_v17, %v8827_v37 }
 0x8d0   :  { %v18353_v46 = vcombine.high %v8792_v41, %v8796_v62  ;;  %v8836_v28 = vld [vmem:[#allocation19 + $0xdf8] sm:$0xff] }
 0x8d1   :  { %15836 = vmatpush1.bf16.msra.mxu0 %v18212_v2  ;;  %v8803_v2 = vld [vmem:[#allocation19 + $0xcf0] sm:$0xff] }
 0x8d2   :  { %16092 = vmatpush1.bf16.msra.mxu1 %v18340_v11  ;;  %15838 = vmatprep.subr.bf16.mxu0 %v18213_v25  ;;  %v8800_v11 = vld [vmem:[#allocation19 + $0xcd8] sm:$0xff]  ;;  %v18227_v7 = vcombine.high %v8799_v3, %v8803_v2 }
 0x8d3   :  { %16094 = vmatprep.subr.bf16.mxu1 %v18341_v49  ;;  %v8804_v25 = vld [vmem:[#allocation19 + $0xcf8] sm:$0xff]  ;;  %v18226_v49 = vcombine.low %v8791_v40, %v8795_v0 }
 0x8d4   :  { %v18355_v23 = vcombine.high %v8800_v11, %v8804_v25  ;;  %v8840_v40 = vld [vmem:[#allocation19 + $0xe18] sm:$0xff] }
 0x8d5   :  { %15840 = vmatpush1.bf16.msra.mxu0 %v18214_v9  ;;  %v8808_v9 = vld [vmem:[#allocation19 + $0xd18] sm:$0xff] }
 0x8d6   :  { %16096 = vmatpush1.bf16.msra.mxu1 %v18342_v30  ;;  %15842 = vmatprep.subr.bf16.mxu0 %v18215_v15  ;;  %v8812_v30 = vld [vmem:[#allocation19 + $0xd38] sm:$0xff]  ;;  %v18356_v15 = vcombine.low %v8800_v11, %v8804_v25 }
 0x8d7   :  { %16098 = vmatprep.subr.bf16.mxu1 %v18343_v18  ;;  %v18229_v18 = vcombine.high %v8807_v14, %v8811_v16  ;;  %v18357_v5 = vcombine.high %v8808_v9, %v8812_v30  ;;  %v8844_v0 = vld [vmem:[#allocation19 + $0xe38] sm:$0xff] }
 0x8d8   :  { %v18366_v11 = vcombine.low %v8840_v40, %v8844_v0 }
 0x8d9   :  { %15844 = vmatpush1.bf16.msra.mxu0 %v18216_v12  ;;  %v8820_v12 = vld [vmem:[#allocation19 + $0xd78] sm:$0xff] }
 0x8da   :  { %16100 = vmatpush1.bf16.msra.mxu1 %v18344_v24  ;;  %15846 = vmatprep.subr.bf16.mxu0 %v18217_v26  ;;  %v18230_v24 = vcombine.low %v8807_v14, %v8811_v16  ;;  %v18358_v26 = vcombine.low %v8808_v9, %v8812_v30  ;;  %v18359_v22 = vcombine.high %v8816_v20, %v8820_v12  ;;  %v8860_v14 = vld [vmem:[#allocation19 + $0xeb8] sm:$0xff] }
 0x8db   :  { %16102 = vmatprep.subr.bf16.mxu1 %v18345_v31  ;;  %v18231_v31 = vcombine.high %v8815_v19, %v8819_v27 }
 0x8dd   :  { %15848 = vmatpush1.bf16.msra.mxu0 %v18218_v43  ;;  %v8828_v43 = vld [vmem:[#allocation19 + $0xdb8] sm:$0xff] }
 0x8de   :  { %16104 = vmatpush1.bf16.msra.mxu1 %v18346_v10  ;;  %15850 = vmatprep.subr.bf16.mxu0 %v18219_v61  ;;  %v18232_v10 = vcombine.low %v8815_v19, %v8819_v27  ;;  %v18360_v61 = vcombine.low %v8816_v20, %v8820_v12  ;;  %v18361_v48 = vcombine.high %v8824_v38, %v8828_v43  ;;  %v8868_v19 = vld [vmem:[#allocation19 + $0xef8] sm:$0xff] }
 0x8df   :  { %16106 = vmatprep.subr.bf16.mxu1 %v18347_v44  ;;  %v18233_v44 = vcombine.high %v8823_v17, %v8827_v37  ;;  %v8876_v17 = vld [vmem:[#allocation19 + $0xf38] sm:$0xff] }
 0x8e1   :  { %15852 = vmatpush1.bf16.msra.mxu0 %v18220_v51  ;;  %v8835_v51 = vld [vmem:[#allocation19 + $0xdf0] sm:$0xff] }
 0x8e2   :  { %16108 = vmatpush1.bf16.msra.mxu1 %v18348_v52  ;;  %15854 = vmatprep.subr.bf16.mxu0 %v18221_v34  ;;  %v18235_v54 = vcombine.high %v8831_v50, %v8835_v51 }
 0x8e3   :  { %16110 = vmatprep.subr.bf16.mxu1 %v18349_v47  ;;  %v8832_v47 = vld [vmem:[#allocation19 + $0xdd8] sm:$0xff] }
 0x8e4   :  { %10700 = vmatmul.mubr.f32.vlgmr.msra.gmra.mrb[14].mxu0 %v19383_v1  ;;  %v18363_v59 = vcombine.high %v8832_v47, %v8836_v28 }
 0x8e5   :  { %10984 = vmatmul.mubr.f32.vlgmr.msra.gmra.mrb[14].mxu1 %v19383_v1  ;;  %15856 = vmatpush1.bf16.msra.mxu0 %v18222_v53  ;;  %v18354_v1 = vcombine.low %v8792_v41, %v8796_v62  ;;  %v18362_v53 = vcombine.low %v8824_v38, %v8828_v43  ;;  %v18364_v41 = vcombine.low %v8832_v47, %v8836_v28 }
 0x8e6   :  { %10770 = vmatprep.mubr.f32.mxu0 %v19387_v21  ;;  %16112 = vmatpush1.bf16.msra.mxu1 %v18350_v63  ;;  %v8839_v63 = vld [vmem:[#allocation19 + $0xe10] sm:$0xff] }
 0x8e7   :  { %11054 = vmatprep.mubr.f32.mxu1 %v19387_v21  ;;  %15858 = vmatprep.subr.bf16.mxu0 %v18223_v35  ;;  %v18228_v21 = vcombine.low %v8799_v3, %v8803_v2  ;;  %v8843_v35 = vld [vmem:[#allocation19 + $0xe30] sm:$0xff]  ;;  %v8852_v3 = vld [vmem:[#allocation19 + $0xe78] sm:$0xff] }
 0x8e8   :  { %16114 = vmatprep.subr.bf16.mxu1 %v18351_v13  ;;  %v18236_v13 = vcombine.low %v8831_v50, %v8835_v51  ;;  %v18237_v62 = vcombine.high %v8839_v63, %v8843_v35  ;;  %v18238_v2 = vcombine.low %v8839_v63, %v8843_v35  ;;  %v8884_v50 = vld [vmem:[#allocation19 + $0xf78] sm:$0xff]  ;;  %v19424_v35 = vld [vmem:[#allocation20] sm:$0xff] }
 0x8e9   :  { %15860 = vmatpush1.bf16.msra.mxu0 %v18224_v4  ;;  %v18365_v4 = vcombine.high %v8840_v40, %v8844_v0  ;;  %v8892_v63 = vld [vmem:[#allocation19 + $0xfb8] sm:$0xff] }
 0x8ea   :  { %16116 = vmatpush1.bf16.msra.mxu1 %v18352_v33  ;;  %15862 = vmatprep.subr.bf16.mxu0 %v18225_v8  ;;  %v8847_v33 = vld [vmem:[#allocation19 + $0xe50] sm:$0xff] }
 0x8eb   :  { %16118 = vmatprep.subr.bf16.mxu1 %v18353_v46  ;;  %v8851_v8 = vld [vmem:[#allocation19 + $0xe70] sm:$0xff]  ;;  %v8848_v46 = vld [vmem:[#allocation19 + $0xe58] sm:$0xff] }
 0x8ec   :  { %v18239_v25 = vcombine.high %v8847_v33, %v8851_v8  ;;  %v18240_v16 = vcombine.low %v8847_v33, %v8851_v8  ;;  %v18368_v9 = vcombine.low %v8848_v46, %v8852_v3  ;;  %v11070_v33 = vrot.slane %v19424_v35, %v19089_v6  ;;  %v8896_v8 = vld [vmem:[#allocation19 + $0xfd8] sm:$0xff] }
 0x8ed   :  { %15864 = vmatpush1.bf16.msra.mxu0 %v18226_v49  ;;  %v18367_v49 = vcombine.high %v8848_v46, %v8852_v3  ;;  %v8900_v46 = vld [vmem:[#allocation19 + $0xff8] sm:$0xff]  ;;  %v19428_v3 = vld [vmem:[#allocation22] sm:$0xff] }
 0x8ee   :  { %16120 = vmatpush1.bf16.msra.mxu1 %v18354_v1  ;;  %15866 = vmatprep.subr.bf16.mxu0 %v18227_v7  ;;  %v8855_v1 = vld [vmem:[#allocation19 + $0xe90] sm:$0xff] }
 0x8ef   :  { %16122 = vmatprep.subr.bf16.mxu1 %v18355_v23  ;;  %v8859_v7 = vld [vmem:[#allocation19 + $0xeb0] sm:$0xff]  ;;  %v8856_v23 = vld [vmem:[#allocation19 + $0xe98] sm:$0xff] }
 0x8f0   :  { %v18241_v30 = vcombine.high %v8855_v1, %v8859_v7  ;;  %v18242_v27 = vcombine.low %v8855_v1, %v8859_v7  ;;  %v18370_v20 = vcombine.low %v8856_v23, %v8860_v14  ;;  %v18379_v1 = vcombine.high %v8896_v8, %v8900_v46 }
 0x8f1   :  { %15868 = vmatpush1.bf16.msra.mxu0 %v18228_v21  ;;  %v18369_v21 = vcombine.high %v8856_v23, %v8860_v14  ;;  %v11120_v23 = vrot.slane %v19428_v3, %v19089_v6  ;;  %v12017_v6 = vld [vmem:[#allocation23 + $0x80] sm:$0xff]  }
 0x8f2   :  { %16124 = vmatpush1.bf16.msra.mxu1 %v18356_v15  ;;  %15870 = vmatprep.subr.bf16.mxu0 %v18229_v18  ;;  %v8863_v15 = vld [vmem:[#allocation19 + $0xed0] sm:$0xff] }
 0x8f3   :  { %16126 = vmatprep.subr.bf16.mxu1 %v18357_v5  ;;  %v8867_v18 = vld [vmem:[#allocation19 + $0xef0] sm:$0xff]  ;;  %v8864_v5 = vld [vmem:[#allocation19 + $0xed8] sm:$0xff] }
 0x8f4   :  { %v18243_v12 = vcombine.high %v8863_v15, %v8867_v18  ;;  %v18244_v37 = vcombine.low %v8863_v15, %v8867_v18  ;;  %v18372_v38 = vcombine.low %v8864_v5, %v8868_v19  ;;  %v12025_v18 = vld [vmem:[#allocation23 + $0xc0] sm:$0xff]  }
 0x8f5   :  { %15872 = vmatpush1.bf16.msra.mxu0 %v18230_v24  ;;  %v18371_v24 = vcombine.high %v8864_v5, %v8868_v19 }
 0x8f6   :  { %16128 = vmatpush1.bf16.msra.mxu1 %v18358_v26  ;;  %15874 = vmatprep.subr.bf16.mxu0 %v18231_v31  ;;  %v8871_v26 = vld [vmem:[#allocation19 + $0xf10] sm:$0xff] }
 0x8f7   :  { %v19416_v42 = vpop.f32.mrb[12].mxu0  ;;  %v19418_v39 = vpop.f32.mrb[12].mxu1  ;;  %16130 = vmatprep.subr.bf16.mxu1 %v18359_v22  ;;  %v8875_v31 = vld [vmem:[#allocation19 + $0xf30] sm:$0xff]  ;;  %v8872_v22 = vld [vmem:[#allocation19 + $0xf18] sm:$0xff] }
 0x8f8   :  { %v19420_v52 = vpop.f32.mrb[13].mxu0  ;;  %v19422_v34 = vpop.f32.mrb[13].mxu1  ;;  %v18245_v43 = vcombine.high %v8871_v26, %v8875_v31  ;;  %v18246_v51 = vcombine.low %v8871_v26, %v8875_v31  ;;  %v18374_v47 = vcombine.low %v8872_v22, %v8876_v17  ;;  %v12027_v26 = vld [vmem:[#allocation23 + $0xd0] sm:$0xff]  }
 0x8f9   :  { %15876 = vmatpush1.bf16.msra.mxu0 %v18232_v10  ;;  %v18373_v10 = vcombine.high %v8872_v22, %v8876_v17  ;;  %v11104_v7 = vmul.f32 %v11070_v33, %v19420_v52  ;;  %v11747_v52 = vld [vmem:[#allocation23] sm:$0xff]   ;;  %v12003_v31 = vld [vmem:[#allocation23 + $0x10] sm:$0xff]   ;;  %v12012_v17 = vld [vmem:[#allocation23 + $0x58] sm:$0xff]  }
 0x8fa   :  { %16132 = vmatpush1.bf16.msra.mxu1 %v18360_v61  ;;  %15878 = vmatprep.subr.bf16.mxu0 %v18233_v44  ;;  %v8879_v61 = vld [vmem:[#allocation19 + $0xf50] sm:$0xff]  ;;  %v12019_v22 = vld [vmem:[#allocation23 + $0x90] sm:$0xff]  }
 0x8fb   :  { %16134 = vmatprep.subr.bf16.mxu1 %v18361_v48  ;;  %v8883_v44 = vld [vmem:[#allocation19 + $0xf70] sm:$0xff]  ;;  %v8880_v48 = vld [vmem:[#allocation19 + $0xf58] sm:$0xff]  ;;  %v11154_v15 = vadd.f32 %v11120_v23, %v11104_v7 }
 0x8fc   :  { %v18247_v28 = vcombine.high %v8879_v61, %v8883_v44  ;;  %v18248_v40 = vcombine.low %v8879_v61, %v8883_v44  ;;  %v18376_v0 = vcombine.low %v8880_v48, %v8884_v50  ;;  %v12005_v61 = vld [vmem:[#allocation23 + $0x20] sm:$0xff]   ;;  %v12034_v7 = vld [vmem:[#allocation23 + $0x108] sm:$0xff]  }
 0x8fd   :  { %15880 = vmatpush1.bf16.msra.mxu0 %v18234_v58  ;;  %v18375_v58 = vcombine.high %v8880_v48, %v8884_v50  ;;  %v12021_v44 = vld [vmem:[#allocation23 + $0xa0] sm:$0xff]   ;;  %v12014_v48 = vld [vmem:[#allocation23 + $0x68] sm:$0xff]  }
 0x8fe   :  { %16136 = vmatpush1.bf16.msra.mxu1 %v18362_v53  ;;  %15882 = vmatprep.subr.bf16.mxu0 %v18235_v54  ;;  %v8887_v53 = vld [vmem:[#allocation19 + $0xf90] sm:$0xff]  ;;  %v12030_v50 = vld [vmem:[#allocation23 + $0xe8] sm:$0xff]  }
 0x8ff   :  { %16138 = vmatprep.subr.bf16.mxu1 %v18363_v59  ;;  %v8891_v54 = vld [vmem:[#allocation19 + $0xfb0] sm:$0xff]  ;;  %v8888_v59 = vld [vmem:[#allocation19 + $0xf98] sm:$0xff] }
 0x900   :  { %v12050_v23 = vld [vmem:[#allocation23 + $0x188] sm:$0xff]  }
 0x901   :  { %15884 = vmatpush1.bf16.msra.mxu0 %v18236_v13  ;;  %v18249_v13 = vcombine.high %v8887_v53, %v8891_v54 }
 0x902   :  { %16140 = vmatpush1.bf16.msra.mxu1 %v18364_v41  ;;  %15886 = vmatprep.subr.bf16.mxu0 %v18237_v62  ;;  %v18377_v41 = vcombine.high %v8888_v59, %v8892_v63  ;;  %v8895_v62 = vld [vmem:[#allocation19 + $0xfd0] sm:$0xff] }
 0x903   :  { %16142 = vmatprep.subr.bf16.mxu1 %v18365_v4  ;;  %v8899_v4 = vld [vmem:[#allocation19 + $0xff0] sm:$0xff] }
 0x905   :  { %15888 = vmatpush1.bf16.msra.mxu0 %v18238_v2  ;;  %v11078_v2 = vrot.slane %v19424_v35, %v19113_v36 }
 0x906   :  { %16144 = vmatpush1.bf16.msra.mxu1 %v18366_v11  ;;  %15890 = vmatprep.subr.bf16.mxu0 %v18239_v25  ;;  %v18250_v11 = vcombine.low %v8887_v53, %v8891_v54  ;;  %v18378_v25 = vcombine.low %v8888_v59, %v8892_v63  ;;  %v12015_v53 = vld [vmem:[#allocation23 + $0x70] sm:$0xff]   ;;  %v11116_v63 = vrot.slane %v19428_v3, %v19110_v29 }
 0x907   :  { %16146 = vmatprep.subr.bf16.mxu1 %v18367_v49  ;;  %v18251_v49 = vcombine.high %v8895_v62, %v8899_v4  ;;  %v11106_v14 = vmul.f32 %v11078_v2, %v19422_v34  ;;  %v11162_v34 = vmax.f32 %v11154_v15, 0.0  ;;  %v12031_v54 = vld [vmem:[#allocation23 + $0xf0] sm:$0xff]   ;;  %v12057_v2 = vld [vmem:[#allocation23 + $0x1c0] sm:$0xff]   ;;  %v12060_v15 = vld [vmem:[#allocation23 + $0x1d8] sm:$0xff]  }
 0x909   :  { %15892 = vmatpush1.bf16.msra.mxu0 %v18240_v16  ;;  %v11128_v16 = vrot.slane %v19428_v3, %v19113_v36  ;;  %v12010_v36 = vld [vmem:[#allocation23 + $0x48] sm:$0xff]  }
 0x90a   :  { %16148 = vmatpush1.bf16.msra.mxu1 %v18368_v9  ;;  %15894 = vmatprep.subr.bf16.mxu0 %v18241_v30  ;;  %v18252_v9 = vcombine.low %v8895_v62, %v8899_v4  ;;  %v18380_v30 = vcombine.low %v8896_v8, %v8900_v46  ;;  %v12016_v62 = vld [vmem:[#allocation23 + $0x78] sm:$0xff]   ;;  %v12041_v46 = vld [vmem:[#allocation23 + $0x140] sm:$0xff]  }
 0x90b   :  { %16150 = vmatprep.subr.bf16.mxu1 %v18369_v21  ;;  %v12009_v21 = vld [vmem:[#allocation23 + $0x40] sm:$0xff]   ;;  %v11156_v5 = vadd.f32 %v11128_v16, %v11106_v14  ;;  %v12032_v4 = vld [vmem:[#allocation23 + $0xf8] sm:$0xff]   ;;  %v12043_v14 = vld [vmem:[#allocation23 + $0x150] sm:$0xff]  }
 0x90c   :  { %v12059_v16 = vld [vmem:[#allocation23 + $0x1d0] sm:$0xff]  }
 0x90d   :  { %15896 = vmatpush1.bf16.msra.mxu0 %v18242_v27  ;;  %v11164_v19 = vmax.f32 %v11156_v5, 0.0  ;;  %v12026_v27 = vld [vmem:[#allocation23 + $0xc8] sm:$0xff]   ;;  %v12052_v5 = vld [vmem:[#allocation23 + $0x198] sm:$0xff]  }
 0x90e   :  { %16152 = vmatpush1.bf16.msra.mxu1 %v18370_v20  ;;  %15898 = vmatprep.subr.bf16.mxu0 %v18243_v12  ;;  %v12002_v20 = vld [vmem:[#allocation23 + $0x8] sm:$0xff]  }
 0x90f   :  { %16154 = vmatprep.subr.bf16.mxu1 %v18371_v24  ;;  %v12018_v12 = vld [vmem:[#allocation23 + $0x88] sm:$0xff]   ;;  %v12011_v24 = vld [vmem:[#allocation23 + $0x50] sm:$0xff]  }
 0x911   :  { %15900 = vmatpush1.bf16.msra.mxu0 %v18244_v37  ;;  %v12028_v37 = vld [vmem:[#allocation23 + $0xd8] sm:$0xff]  }
 0x912   :  { %16156 = vmatpush1.bf16.msra.mxu1 %v18372_v38  ;;  %15902 = vmatprep.subr.bf16.mxu0 %v18245_v43  ;;  %v12020_v38 = vld [vmem:[#allocation23 + $0x98] sm:$0xff]   ;;  %v12013_v43 = vld [vmem:[#allocation23 + $0x60] sm:$0xff]  }
 0x913   :  { %16158 = vmatprep.subr.bf16.mxu1 %v18373_v10  ;;  %v12029_v10 = vld [vmem:[#allocation23 + $0xe0] sm:$0xff]  }
 0x915   :  { %15904 = vmatpush1.bf16.msra.mxu0 %v18246_v51  ;;  %v11066_v51 = vrot.slane %v19424_v35, %v19110_v29  ;;  %v12024_v29 = vld [vmem:[#allocation23 + $0xb8] sm:$0xff]  }
 0x916   :  { %16160 = vmatpush1.bf16.msra.mxu1 %v18374_v47  ;;  %15906 = vmatprep.subr.bf16.mxu0 %v18247_v28  ;;  %v12006_v47 = vld [vmem:[#allocation23 + $0x28] sm:$0xff]   ;;  %v11074_v28 = vrot.slane %v19424_v35, %v19134_v60 }
 0x917   :  { %16162 = vmatprep.subr.bf16.mxu1 %v18375_v58  ;;  %v12022_v58 = vld [vmem:[#allocation23 + $0xa8] sm:$0xff]   ;;  %v11103_v59 = vmul.f32 %v11066_v51, %v19416_v42  ;;  %v12008_v42 = vld [vmem:[#allocation23 + $0x38] sm:$0xff]   ;;  %v11140_v51 = vrot.slane %v19428_v3, %v19185_v32 }
 0x919   :  { %15908 = vmatpush1.bf16.msra.mxu0 %v18248_v40  ;;  %v12007_v40 = vld [vmem:[#allocation23 + $0x30] sm:$0xff]   ;;  %v11153_v33 = vadd.f32 %v11116_v63, %v11103_v59 }
 0x91a   :  { %16164 = vmatpush1.bf16.msra.mxu1 %v18376_v0  ;;  %15910 = vmatprep.subr.bf16.mxu0 %v18249_v13  ;;  %v11105_v0 = vmul.f32 %v11074_v28, %v19418_v39  ;;  %v11124_v13 = vrot.slane %v19428_v3, %v19134_v60  ;;  %v12033_v39 = vld [vmem:[#allocation23 + $0x100] sm:$0xff]  }
 0x91b   :  { %16166 = vmatprep.subr.bf16.mxu1 %v18377_v41  ;;  %v12023_v41 = vld [vmem:[#allocation23 + $0xb0] sm:$0xff]  }
 0x91c   :  { %v11155_v8 = vadd.f32 %v11124_v13, %v11105_v0 }
 0x91d   :  { %15912 = vmatpush1.bf16.msra.mxu0 %v18250_v11  ;;  %v11161_v11 = vmax.f32 %v11153_v33, 0.0 }
 0x91e   :  { %16168 = vmatpush1.bf16.msra.mxu1 %v18378_v25  ;;  %15914 = vmatprep.subr.bf16.mxu0 %v18251_v49  ;;  %v11163_v60 = vmax.f32 %v11155_v8, 0.0  ;;  %v12049_v25 = vld [vmem:[#allocation23 + $0x180] sm:$0xff]   ;;  %v12042_v49 = vld [vmem:[#allocation23 + $0x148] sm:$0xff]  }
 0x91f   :  { %16170 = vmatprep.subr.bf16.mxu1 %v18379_v1  ;;  %v12058_v1 = vld [vmem:[#allocation23 + $0x1c8] sm:$0xff]   ;;  %v11745_v8 = vld [vmem:[#allocation25] ss:$0 sm:$0xff] }
 0x921   :  { %15916 = vmatpush1.bf16.msra.mxu0 %v18252_v9  ;;  %v12035_v9 = vld [vmem:[#allocation23 + $0x110] sm:$0xff]  }
 0x922   :  { %16172 = vmatpush1.bf16.msra.mxu1 %v18380_v30  ;;  %16174 = vmatprep.subr.bf16.mxu0 %v12009_v21  ;;  %v12051_v30 = vld [vmem:[#allocation23 + $0x190] sm:$0xff]   ;;  %v12044_v21 = vld [vmem:[#allocation23 + $0x158] sm:$0xff]  }
 0x923   :  { %16206 = vmatprep.subr.bf16.mxu1 %v12025_v18  ;;  %v12036_v18 = vld [vmem:[#allocation23 + $0x118] sm:$0xff]  }
 0x924   :  { %10771 = vmatmul.mubr.f32.vlgmr.msra.gmra.mrb[14].mxu0 %v19398_v45 }
 0x925   :  { %11055 = vmatmul.mubr.f32.vlgmr.msra.gmra.mrb[14].mxu1 %v19398_v45  ;;  %16176 = vmatpush3.bf16.msra.mxu0 %v11747_v52  ;;  %v12004_v45 = vld [vmem:[#allocation23 + $0x18] sm:$0xff]   ;;  %v12045_v52 = vld [vmem:[#allocation23 + $0x160] sm:$0xff]  }
 0x926   :  { %11496 = vmatprep.mubr.f32.mxu0 %v11162_v34  ;;  %16208 = vmatpush3.bf16.msra.mxu1 %v12017_v6  ;;  %v12061_v6 = vld [vmem:[#allocation23 + $0x1e0] sm:$0xff]  }
 0x927   :  { %11566 = vmatprep.mubr.f32.mxu1 %v11164_v19  ;;  %16178 = vmatprep.subr.bf16.mxu0 %v12010_v36  ;;  %v12037_v34 = vld [vmem:[#allocation23 + $0x120] sm:$0xff]   ;;  %v12046_v19 = vld [vmem:[#allocation23 + $0x168] sm:$0xff]  }
 0x928   :  { %16210 = vmatprep.subr.bf16.mxu1 %v12026_v27  ;;  %v12053_v36 = vld [vmem:[#allocation23 + $0x1a0] sm:$0xff]   ;;  %v12062_v27 = vld [vmem:[#allocation23 + $0x1e8] sm:$0xff]  }
 0x929   :  { %16180 = vmatpush3.bf16.msra.mxu0 %v12002_v20  ;;  %v12038_v20 = vld [vmem:[#allocation23 + $0x128] sm:$0xff]  }
 0x92a   :  { %16212 = vmatpush3.bf16.msra.mxu1 %v12018_v12  ;;  %16182 = vmatprep.subr.bf16.mxu0 %v12011_v24  ;;  %v12054_v12 = vld [vmem:[#allocation23 + $0x1a8] sm:$0xff]   ;;  %v12047_v24 = vld [vmem:[#allocation23 + $0x170] sm:$0xff]  }
 0x92b   :  { %16214 = vmatprep.subr.bf16.mxu1 %v12027_v26  ;;  %v12063_v26 = vld [vmem:[#allocation23 + $0x1f0] sm:$0xff]  }
 0x92d   :  { %16184 = vmatpush3.bf16.msra.mxu0 %v12003_v31  ;;  %v12039_v31 = vld [vmem:[#allocation23 + $0x130] sm:$0xff]  }
 0x92e   :  { %16216 = vmatpush3.bf16.msra.mxu1 %v12019_v22  ;;  %16186 = vmatprep.subr.bf16.mxu0 %v12012_v17  ;;  %v12055_v22 = vld [vmem:[#allocation23 + $0x1b0] sm:$0xff]   ;;  %v12048_v17 = vld [vmem:[#allocation23 + $0x178] sm:$0xff]  }
 0x92f   :  { %16218 = vmatprep.subr.bf16.mxu1 %v12028_v37  ;;  %v12064_v37 = vld [vmem:[#allocation23 + $0x1f8] sm:$0xff]  }
 0x931   :  { %16188 = vmatpush3.bf16.msra.mxu0 %v12004_v45  ;;  %v12040_v45 = vld [vmem:[#allocation23 + $0x138] sm:$0xff]  }
 0x932   :  { %16220 = vmatpush3.bf16.msra.mxu1 %v12020_v38  ;;  %16190 = vmatprep.subr.bf16.mxu0 %v12013_v43  ;;  %v12056_v38 = vld [vmem:[#allocation23 + $0x1b8] sm:$0xff]   ;;  %v11082_v43 = vrot.slane %v19424_v35, %v19146_v55 }
 0x933   :  { %16222 = vmatprep.subr.bf16.mxu1 %v12029_v10  ;;  %v11090_v10 = vrot.slane %v19424_v35, %v19185_v32 }
 0x935   :  { %16192 = vmatpush3.bf16.msra.mxu0 %v12005_v61  ;;  %v11086_v61 = vrot.slane %v19424_v35, %v19149_v56 }
 0x936   :  { %16224 = vmatpush3.bf16.msra.mxu1 %v12021_v44  ;;  %16194 = vmatprep.subr.bf16.mxu0 %v12014_v48  ;;  %v11132_v44 = vrot.slane %v19428_v3, %v19146_v55  ;;  %v11094_v48 = vrot.slane %v19424_v35, %v19152_v57 }
 0x937   :  { %16226 = vmatprep.subr.bf16.mxu1 %v12030_v50 }
 0x939   :  { %16196 = vmatpush3.bf16.msra.mxu0 %v12006_v47  ;;  %v11136_v47 = vrot.slane %v19428_v3, %v19149_v56 }
 0x93a   :  { %16228 = vmatpush3.bf16.msra.mxu1 %v12022_v58  ;;  %16198 = vmatprep.subr.bf16.mxu0 %v12015_v53 }
 0x93b   :  { %16230 = vmatprep.subr.bf16.mxu1 %v12031_v54  ;;  %v11144_v54 = vrot.slane %v19428_v3, %v19152_v57 }
 0x93d   :  { %16200 = vmatpush3.bf16.msra.mxu0 %v12007_v40 }
 0x93e   :  { %16232 = vmatpush3.bf16.msra.mxu1 %v12023_v41  ;;  %16202 = vmatprep.subr.bf16.mxu0 %v12016_v62 }
 0x93f   :  { %16234 = vmatprep.subr.bf16.mxu1 %v12032_v4 }
 0x941   :  { %16204 = vmatpush3.bf16.msra.mxu0 %v12008_v42 }
 0x942   :  { %16236 = vmatpush3.bf16.msra.mxu1 %v12024_v29  ;;  %16238 = vmatprep.subr.bf16.mxu0 %v12041_v46 }
 0x943   :  { %16270 = vmatprep.subr.bf16.mxu1 %v12057_v2 }
 0x944   :  { %11497 = vmatmul.mubr.f32.vlgmr.msra.gmra.mrb[16].mxu0 %v11161_v11 }
 0x945   :  { %11567 = vmatmul.mubr.f32.vlgmr.msra.gmra.mrb[16].mxu1 %v11163_v60  ;;  %16240 = vmatpush3.bf16.msra.mxu0 %v12033_v39 }
 0x946   :  { %16272 = vmatpush3.bf16.msra.mxu1 %v12049_v25  ;;  %16242 = vmatprep.subr.bf16.mxu0 %v12042_v49 }
 0x947   :  { %16274 = vmatprep.subr.bf16.mxu1 %v12058_v1 }
 0x949   :  { %16244 = vmatpush3.bf16.msra.mxu0 %v12034_v7 }
 0x94a   :  { %16276 = vmatpush3.bf16.msra.mxu1 %v12050_v23  ;;  %16246 = vmatprep.subr.bf16.mxu0 %v12043_v14 }
 0x94b   :  { %16278 = vmatprep.subr.bf16.mxu1 %v12059_v16 }
 0x94d   :  { %16248 = vmatpush3.bf16.msra.mxu0 %v12035_v9 }
 0x94e   :  { %16280 = vmatpush3.bf16.msra.mxu1 %v12051_v30  ;;  %16250 = vmatprep.subr.bf16.mxu0 %v12044_v21 }
 0x94f   :  { %16282 = vmatprep.subr.bf16.mxu1 %v12060_v15 }
 0x951   :  { %16252 = vmatpush3.bf16.msra.mxu0 %v12036_v18 }
 0x952   :  { %16284 = vmatpush3.bf16.msra.mxu1 %v12052_v5  ;;  %16254 = vmatprep.subr.bf16.mxu0 %v12045_v52 }
 0x953   :  { %16286 = vmatprep.subr.bf16.mxu1 %v12061_v6 }
 0x955   :  { %16256 = vmatpush3.bf16.msra.mxu0 %v12037_v34 }
 0x956   :  { %16288 = vmatpush3.bf16.msra.mxu1 %v12053_v36  ;;  %16258 = vmatprep.subr.bf16.mxu0 %v12046_v19 }
 0x957   :  { %16290 = vmatprep.subr.bf16.mxu1 %v12062_v27 }
 0x959   :  { %16260 = vmatpush3.bf16.msra.mxu0 %v12038_v20 }
 0x95a   :  { %16292 = vmatpush3.bf16.msra.mxu1 %v12054_v12  ;;  %16262 = vmatprep.subr.bf16.mxu0 %v12047_v24 }
 0x95b   :  { %16294 = vmatprep.subr.bf16.mxu1 %v12063_v26 }
 0x95d   :  { %16264 = vmatpush3.bf16.msra.mxu0 %v12039_v31 }
 0x95e   :  { %16296 = vmatpush3.bf16.msra.mxu1 %v12055_v22  ;;  %16266 = vmatprep.subr.bf16.mxu0 %v12048_v17 }
 0x95f   :  { %16298 = vmatprep.subr.bf16.mxu1 %v12064_v37 }
 0x961   :  { %16268 = vmatpush3.bf16.msra.mxu0 %v12040_v45 }
 0x962   :  { %16300 = vmatpush3.bf16.msra.mxu1 %v12056_v38 }
 0x9f7   :  { %v10772_v50 = vpop.f32.mrb[14].mxu0 }
 0x9f8   :  { %v11107_v28 = vmul.f32 %v11082_v43, %v10772_v50  ;;  %v11056_v58 = vpop.f32.mrb[14].mxu1  ;;  %v10774_v53 = vpop.f32.mrb[15].mxu0 }
 0x9f9   :  { %v11109_v59 = vmul.f32 %v11090_v10, %v11056_v58  ;;  %v11108_v63 = vmul.f32 %v11086_v61, %v10774_v53  ;;  %v11058_v40 = vpop.f32.mrb[15].mxu1 }
 0x9fa   :  { %v11157_v55 = vadd.f32 %v11132_v44, %v11107_v28  ;;  %v11110_v0 = vmul.f32 %v11094_v48, %v11058_v40 }
 0x9fb   :  { %v11159_v13 = vadd.f32 %v11140_v51, %v11109_v59  ;;  %v11158_v35 = vadd.f32 %v11136_v47, %v11108_v63 }
 0x9fc   :  { %v11160_v41 = vadd.f32 %v11144_v54, %v11110_v0  ;;  %v11165_v4 = vmax.f32 %v11157_v55, 0.0 }
 0x9fd   :  { %v11166_v62 = vmax.f32 %v11158_v35, 0.0  ;;  %v11167_v33 = vmax.f32 %v11159_v13, 0.0 }
 0x9fe   :  { %v11168_v32 = vmax.f32 %v11160_v41, 0.0 }
 0x9ff   :  { %11636 = vmatprep.mubr.f32.mxu0 %v11166_v62 }
 0xa00   :  { %11706 = vmatprep.mubr.f32.mxu1 %v11168_v32  ;;  %11637 = vmatmul.mubr.f32.vlgmr.msra.gmra.mrb[18].mxu0 %v11165_v4 }
 0xa01   :  { %11707 = vmatmul.mubr.f32.vlgmr.msra.gmra.mrb[18].mxu1 %v11167_v33 }
 0xa17   :  { %v12097_v56 = vpop.f32.mrb[16].mxu0 }
 0xa18   :  { %v12132_v42 = vpop.f32.mrb[16].mxu1  ;;  %v12098_v57 = vpop.f32.mrb[17].mxu0 }
 0xa19   :  { %v12099_v3 = vadd.f32 %v12098_v57, %v12097_v56  ;;  %v12133_v29 = vpop.f32.mrb[17].mxu1 }
 0xa1a   :  { %v12134_v46 = vadd.f32 %v12133_v29, %v12132_v42 }
 0xa1b   :  { %v11499_v2 = vadd.f32 %v12099_v3, %v11745_v8 }
 0xa1d   :  { %v11569_v11 = vadd.f32 %v12134_v46, %v11499_v2 }
 0xad3   :  { %v12167_v39 = vpop.f32.mrb[18].mxu0 }
 0xad4   :  { %v12202_v60 = vpop.f32.mrb[18].mxu1  ;;  %v12168_v25 = vpop.f32.mrb[19].mxu0 }
 0xad5   :  { %v12169_v49 = vadd.f32 %v12168_v25, %v12167_v39  ;;  %v12203_v1 = vpop.f32.mrb[19].mxu1 }
 0xad6   :  { %v12204_v7 = vadd.f32 %v12203_v1, %v12202_v60 }
 0xad7   :  { %v11639_v23 = vadd.f32 %v12169_v49, %v11569_v11 }
 0xad9   :  { %v11709_v14 = vadd.f32 %v12204_v7, %v11639_v23 }
 0xadb   :  { %11712 = vmax.xlane.f32.xlu0 %v11709_v14 }
 0xb68   :  { %v11713_v16 = vpop.xlane.xlu0 %11712 }
 0xb69   :  { %v11714_v9 = vsub.f32 %v11709_v14, %v11713_v16 }
 0xb6b   :  { %v11715_v30 = vmul.f32 1.442695, %v11714_v9 }
 0xb6d   :  { %18402 = vpow2.f32 %v11715_v30 }
 0xb77   :  { %v18403_v21 = vpop.eup %18402 }
 0xb78   :  { %11717 = vadd.xlane.f32.xlu0 %v18403_v21 }
 0xc05   :  { %v11718_v15 = vpop.xlane.xlu0 %11717 }
 0xc06   :  { %18404 = vlog2.f32 %v11718_v15 }
 0xc10   :  { %v18405_v18 = vpop.eup %18404 }
 0xc11   :  { %v11720_v5 = vmul.f32 0.6931472, %v18405_v18 }
 0xc13   :  { %v11721_v52 = vsub.f32 %v11714_v9, %v11720_v5 }
 0xc15   :  { %11722 = vst [vmem:[#allocation26] sm:$0xff] %v11721_v52 }
 0xc16   :  { %18760 = shalt.err (!%p18757_p12)
}
 0xc17   :  { %s19496_s0 = sld [smem:[#allocation36_spill]] }
 0xc1d   :  { %s18761_s4 = scalar_lea.hbm %s19496_s0, 128 }
 0xc1e   :  { %p18762_p13 = scmp.ne.s32.totalorder %s19496_s0, %s18761_s4  ;;  %p18765_p0 = scmp.lt.u32.totalorder %s18761_s4, %s19496_s0 }
 0xc20   :  { %p18767_p1 = pnand %p18765_p0, %p18762_p13 }
 0xc22   :  { %18770 = shalt.err (!%p18767_p1)
}
 0xc23   :  { %11732 = dma.vmem_to_hbm [thread:$0]  %s11730_s21, 128, %s19496_s0, [#allocation4]  }
 0xc24   :  { %18787 = dma.done.wait [#allocation4], 128  }
 0xc25   :  { %18788 = vsyncadd [#allocation4], 4294967168 }
 0xc26   :  { %11736 = vsyncpa [#allocation3], 1 }
 0xc27   :  { %11737 = vsyncpa [#allocation6], 1 }
 0xc28   :  { %11738 = vsyncpa [#allocation9], 1 }
 0xc29   :  { %11739 = vsyncpa [#allocation12], 1 }
 0xc2a   :  { %11740 = vsyncpa [#allocation15], 1 }
 0xc2b   :  { %11741 = vsyncpa [#allocation18], 1 }
 0xc2c   :  { %11742 = vsyncpa [#allocation21], 1 }
 0xc2d   :  { %11743 = vsyncpa [#allocation24], 1 }
 0xc2e   :  { %11744 = vsyncpa [#allocation4], 1 }

</bundles_post_ra>
